<compile_context>
chip_gen: v7x
topology: tpu7x:2x2x1
jax: 0.10.0
libtpu: 0.0.40
codegen_flags: <defaults>
</compile_context>

<pallas_src>
import math
from functools import partial

import jax
import jax.numpy as jnp
from jax.experimental import pallas as pl
from jax.experimental.pallas import tpu as pltpu

# ---------------- configuration (small, consistent with the module) ----------------
B        = 2
C_IN     = 32            # in_channels; GroupNorm(num_groups=32) -> 1 channel / group here
H_SP = W_SP = 8
N_TOK    = H_SP * W_SP   # 64 spatial tokens
N_HEADS  = 4
D_HEAD   = 16
D        = N_HEADS * D_HEAD      # inner_dim = 64
CTX_DIM  = 48
S_CTX    = 8
D_FF     = 4 * D                 # FeedForward inner dim (mult=4) = 256
GN_EPS   = 1e-6
LN_EPS   = 1e-5
LANE     = 128                   # TPU lane width; kernel I/O channel dims padded to this
ATTN_SCALE = D_HEAD ** (-0.5)

# --- packed-slab layouts (see pack_params) ---
# wcols (D, 832): column groups, every slice starts on a 128-lane boundary.
_C_FF1A0, _C_FF1A1 = 0, D_FF              # GEGLU 'a' half of w_ff1
_C_FF1G0, _C_FF1G1 = D_FF, 2 * D_FF       # GEGLU 'gate' half of w_ff1
_C_WOUT0, _C_WOUT1 = 512, 512 + LANE      # proj_out (columns zero-padded to 128)
_C_QKV0,  _C_QKV1  = 640, 640 + 3 * D     # fused self-attn q|k|v
# wrows (448, D): row groups (8-sublane aligned starts).
_R_WQ20, _R_WQ21 = 0, D                   # cross-attn to_q
_R_WO10, _R_WO11 = D, 2 * D               # self-attn to_out
_R_WO20, _R_WO21 = 2 * D, 3 * D           # cross-attn to_out
_R_FF20, _R_FF21 = 3 * D, 3 * D + D_FF    # w_ff2
# w128 (LANE, 192)
_C_KV0, _C_KV1 = 0, 2 * D                 # fused cross-attn k|v (rows ctx-padded to 128)
_C_IN0, _C_IN1 = 2 * D, 3 * D             # proj_in (rows channel-padded to 128)
# vec (14, 512): one gain/bias vector per row, zero padded to 512 lanes.
(_B_IN, _LN1_G, _LN1_B, _BO1, _LN2_G, _LN2_B, _BO2,
 _LN3_G, _LN3_B, _B_FF2, _GN_G, _GN_B, _B_OUT, _B_FF1) = range(14)


# ------------------------------- kernel helpers ------------------------------------
def _layernorm(z, g, b):
    m = jnp.mean(z, axis=-1, keepdims=True)
    v = jnp.mean((z - m) ** 2, axis=-1, keepdims=True)
    return (z - m) * jax.lax.rsqrt(v + LN_EPS) * g + b


def _split_heads(t2d, nb, seq, nsets):
    """(nb*seq, nsets*H*Dh) with lanes ordered (set, head, d) -> `nsets` stacked arrays
    of shape (nb*H, seq, Dh); group index = b*H + h (must match _head_merge_proj)."""
    t3 = t2d.reshape(nb, seq, nsets * N_HEADS * D_HEAD)
    outs = []
    for s in range(nsets):
        parts = []
        for b in range(nb):
            for h in range(N_HEADS):
                c0 = (s * N_HEADS + h) * D_HEAD
                parts.append(t3[b, :, c0:c0 + D_HEAD])
        outs.append(jnp.stack(parts, axis=0))
    return tuple(outs)


def _attention(q, k, v, use_bf16):
    """Head-batched attention core. q: (G, nq, Dh), k/v: (G, nk, Dh), G = nb*H.
    Similarities stay fp32 (ATTN_PRECISION='fp32'); exact softmax normalization."""
    f32 = jnp.float32
    sim = jnp.einsum('gid,gjd->gij', q, k, preferred_element_type=f32) * ATTN_SCALE
    sim = sim - jnp.max(sim, axis=-1, keepdims=True)      # numerically stable softmax
    p = jnp.exp(sim)
    p = p * pl.reciprocal(jnp.sum(p, axis=-1, keepdims=True), approx=False)
    if use_bf16:
        p = p.astype(jnp.bfloat16)
        v = v.astype(jnp.bfloat16)
    return jnp.einsum('gij,gjd->gid', p, v, preferred_element_type=f32)   # (G, nq, Dh)


def _head_merge_proj(o, wo, nb, use_bf16):
    """o: (nb*H, nq, Dh); wo: (D, D). Per-head to_out projection summed over heads
    (== concat-heads @ wo); batches re-joined along rows -> (nb*nq, D)."""
    f32 = jnp.float32
    if use_bf16:
        o = o.astype(jnp.bfloat16)
        wo = wo.astype(jnp.bfloat16)
    rows = []
    for b in range(nb):
        acc = None
        for h in range(N_HEADS):
            part = jnp.dot(o[b * N_HEADS + h], wo[h * D_HEAD:(h + 1) * D_HEAD, :],
                           preferred_element_type=f32)
            acc = part if acc is None else acc + part
        rows.append(acc)
    return rows[0] if nb == 1 else jnp.concatenate(rows, axis=0)


# ----------------------------------- kernel ----------------------------------------
def spatial_transformer_kernel(x_ref, ctx_ref, wcols_ref, wrows_ref, w128_ref, vec_ref,
                               o_ref, *, use_bf16):
    f32 = jnp.float32
    nb, n_tok = x_ref.shape[0], x_ref.shape[1]
    m = nb * n_tok

    def mm(a, w):                       # MXU matmul; bf16 operands under the fast path
        if use_bf16:
            a = a.astype(jnp.bfloat16)
            w = w.astype(jnp.bfloat16)
        return jnp.dot(a, w, preferred_element_type=f32)

    def mm32(a, w):                     # fp32 matmul (attention-precision q/k/v path)
        return jnp.dot(a, w, preferred_element_type=f32)

    def vrow(r, c0, c1):                # (1, c1-c0) slice of the packed gain/bias table
        return vec_ref[r:r + 1, c0:c1]

    # --- GroupNorm(32, C_IN): num_groups == num_channels -> per-channel stats over the
    #     spatial (token) axis, per batch element. Padded channels stay zero. ---
    xin = x_ref[...].astype(f32)                               # (nb, n_tok, LANE)
    mu = jnp.mean(xin, axis=1, keepdims=True)
    var = jnp.mean((xin - mu) ** 2, axis=1, keepdims=True)
    hgn = ((xin - mu) * jax.lax.rsqrt(var + GN_EPS)).reshape(m, LANE)
    hgn = hgn * vrow(_GN_G, 0, LANE) + vrow(_GN_B, 0, LANE)
    del xin, mu, var                   # input tile is re-read for the final residual

    # --- proj_in: 1x1 conv == per-token linear (rows channel-padded to LANE) ---
    x = mm(hgn, w128_ref[:, _C_IN0:_C_IN1]) + vrow(_B_IN, 0, D)          # (m, D)

    # --- BasicTransformerBlock: self-attention (one fused lane-dense QKV matmul) ---
    z = _layernorm(x, vrow(_LN1_G, 0, D), vrow(_LN1_B, 0, D))
    qkv = mm32(z, wcols_ref[:, _C_QKV0:_C_QKV1])                         # (m, 3*D)
    q, k, v = _split_heads(qkv, nb, n_tok, 3)
    o = _attention(q, k, v, use_bf16)
    x = x + _head_merge_proj(o, wrows_ref[_R_WO10:_R_WO11, :], nb, use_bf16) \
          + vrow(_BO1, 0, D)

    # --- cross-attention (context): lane-dense q and fused k|v projections ---
    z = _layernorm(x, vrow(_LN2_G, 0, D), vrow(_LN2_B, 0, D))
    q2 = mm32(z, wrows_ref[_R_WQ20:_R_WQ21, :])                          # (m, D)
    ctx = ctx_ref[...].astype(f32).reshape(nb * S_CTX, LANE)
    kv = mm32(ctx, w128_ref[:, _C_KV0:_C_KV1])                           # (nb*S, 2*D)
    (q,) = _split_heads(q2, nb, n_tok, 1)
    k, v = _split_heads(kv, nb, S_CTX, 2)
    o = _attention(q, k, v, use_bf16)
    x = x + _head_merge_proj(o, wrows_ref[_R_WO20:_R_WO21, :], nb, use_bf16) \
          + vrow(_BO2, 0, D)

    # --- GEGLU feed-forward: gate half first + row chunks -> low peak vreg pressure;
    #     exact erf GELU to match F.gelu. ---
    z = _layernorm(x, vrow(_LN3_G, 0, D), vrow(_LN3_B, 0, D))
    ffs = []
    for r0 in range(0, m, n_tok):                                        # static chunks
        zc = z[r0:r0 + n_tok]
        gate = mm(zc, wcols_ref[:, _C_FF1G0:_C_FF1G1]) + vrow(_B_FF1, D_FF, 2 * D_FF)
        gate = 0.5 * gate * (1.0 + jax.lax.erf(gate * (1.0 / math.sqrt(2.0))))
        a = mm(zc, wcols_ref[:, _C_FF1A0:_C_FF1A1]) + vrow(_B_FF1, 0, D_FF)
        ffs.append(mm(a * gate, wrows_ref[_R_FF20:_R_FF21, :]))
    ff = ffs[0] if len(ffs) == 1 else jnp.concatenate(ffs, axis=0)
    x = x + ff + vrow(_B_FF2, 0, D)

    # --- proj_out (columns padded to LANE -> lane-dense store) + residual.
    #     The input tile is re-read here instead of being kept live across the kernel. ---
    out = mm(x, wcols_ref[:, _C_WOUT0:_C_WOUT1]) + vrow(_B_OUT, 0, LANE)
    o_ref[...] = (out.reshape(nb, n_tok, LANE) + x_ref[...].astype(f32)).astype(o_ref.dtype)


# ------------------------------- host-side packing ----------------------------------
def pack_params(p):
    """Pack raw module params into 4 fused weight slabs + 1 gain/bias table (few large
    prologue DMAs instead of 14 small ones); all in-kernel slices are tile-aligned."""
    pad_c = LANE - C_IN

    # (D, 832) column slab: [ff1_a | ff1_gate | proj_out(col-padded) | fused q|k|v]
    w_out = jnp.pad(p['w_out'], ((0, 0), (0, pad_c)))                    # (D, LANE)
    wqkv1 = jnp.concatenate([p['wq1'], p['wk1'], p['wv1']], axis=1)      # (D, 3*D)
    wcols = jnp.concatenate([p['w_ff1'][:, :D_FF], p['w_ff1'][:, D_FF:],
                             w_out, wqkv1], axis=1)                      # (D, 832)

    # (448, D) row slab: [wq2 | wo1 | wo2 | w_ff2]
    wrows = jnp.concatenate([p['wq2'], p['wo1'], p['wo2'], p['w_ff2']], axis=0)

    # (LANE, 192) slab: [fused k|v (ctx rows padded) | proj_in (channel rows padded)]
    wkv2 = jnp.pad(jnp.concatenate([p['wk2'], p['wv2']], axis=1),
                   ((0, LANE - CTX_DIM), (0, 0)))                        # (LANE, 2*D)
    w_in = jnp.pad(p['w_in'], ((0, pad_c), (0, 0)))                      # (LANE, D)
    w128 = jnp.concatenate([wkv2, w_in], axis=1)                         # (LANE, 3*D)

    # (14, 512) gain/bias table (row order must match the _* row constants).
    def row(a):
        return jnp.pad(a, ((0, 0), (0, 512 - a.shape[1])))
    vec = jnp.concatenate(
        [row(p['b_in']), row(p['ln1_g']), row(p['ln1_b']), row(p['bo1']),
         row(p['ln2_g']), row(p['ln2_b']), row(p['bo2']),
         row(p['ln3_g']), row(p['ln3_b']), row(p['b_ff2']),
         row(p['gn_g']), row(p['gn_b']), row(p['b_out']), p['b_ff1']], axis=0)

    return [wcols, wrows, w128, vec]


def _default_fold_batch():
    """Fold the batch into one grid step on single-TensorCore chips (v5e/v6e); keep the
    parallel batch grid on v7x so its two TensorCores each take a batch element."""
    try:
        kind = jax.devices()[0].device_kind.lower()
    except Exception:
        return True
    return not ("v7" in kind or "7x" in kind)


# ---------------------------------- wrapper -----------------------------------------
@partial(jax.jit, static_argnames=("fold_batch", "use_bf16"))
def _spatial_transformer_jit(x_nchw, ctx, params, fold_batch, use_bf16):
    b, c, h, w = x_nchw.shape
    n_tok = h * w
    nb = b if fold_batch else 1

    # NCHW -> tokens-major, channel dims padded to one full lane tile (lane-dense I/O).
    x_seq = jnp.transpose(x_nchw, (0, 2, 3, 1)).reshape(b, n_tok, c)
    x_pad = jnp.pad(x_seq, ((0, 0), (0, 0), (0, LANE - c)))
    ctx_pad = jnp.pad(ctx, ((0, 0), (0, 0), (0, LANE - ctx.shape[-1])))

    packed = pack_params(params)
    w_specs = [pl.BlockSpec(wt.shape, (lambda i, nd=wt.ndim: (0,) * nd)) for wt in packed]

    out = pl.pallas_call(
        partial(spatial_transformer_kernel, use_bf16=use_bf16),
        out_shape=jax.ShapeDtypeStruct((b, n_tok, LANE), x_nchw.dtype),
        grid=(b // nb,),
        in_specs=[pl.BlockSpec((nb, n_tok, LANE), lambda i: (i, 0, 0)),
                  pl.BlockSpec((nb, S_CTX, LANE), lambda i: (i, 0, 0))] + w_specs,
        out_specs=pl.BlockSpec((nb, n_tok, LANE), lambda i: (i, 0, 0)),
        # TODO(synk): on v7x, confirm with a profile that grid=(B,) "parallel" really
        # shards across the two TensorCores; if it serializes, switch to
        # pltpu.CORE_PARALLEL / pl.core_map over a 2-core mesh.
        compiler_params=pltpu.CompilerParams(dimension_semantics=("parallel",)),
    )(x_pad, ctx_pad, *packed)

    out = out[:, :, :c]                                              # drop lane padding
    return jnp.transpose(out.reshape(b, h, w, c), (0, 3, 1, 2))      # back to NCHW


def spatial_transformer(x_nchw, ctx, params, fold_batch=None, use_bf16=False):
    if fold_batch is None:
        fold_batch = _default_fold_batch()
    return _spatial_transformer_jit(x_nchw, ctx, params, bool(fold_batch), bool(use_bf16))


# ----------------------------- pure-JAX reference ------------------------------------
def reference_forward(x_nchw, ctx, p):
    b, c, h, w = x_nchw.shape
    x_seq = jnp.transpose(x_nchw, (0, 2, 3, 1)).reshape(b, h * w, c).astype(jnp.float32)

    def ln(z, g, bb):
        m = z.mean(-1, keepdims=True)
        v = ((z - m) ** 2).mean(-1, keepdims=True)
        return (z - m) / jnp.sqrt(v + LN_EPS) * g + bb

    def attn(q_in, kv_in, wq, wk, wv, wo, bo):
        q = (q_in @ wq).reshape(-1, N_HEADS, D_HEAD)
        k = (kv_in @ wk).reshape(-1, N_HEADS, D_HEAD)
        v = (kv_in @ wv).reshape(-1, N_HEADS, D_HEAD)
        sim = jnp.einsum('ihd,jhd->hij', q, k) * (D_HEAD ** -0.5)
        pm = jax.nn.softmax(sim, axis=-1)
        o = jnp.einsum('hij,jhd->ihd', pm, v).reshape(-1, N_HEADS * D_HEAD)
        return o @ wo + bo

    def one(xs, cs):
        mean = xs.mean(axis=0, keepdims=True)
        var = ((xs - mean) ** 2).mean(axis=0, keepdims=True)
        xn = (xs - mean) / jnp.sqrt(var + GN_EPS) * p['gn_g'] + p['gn_b']
        x = xn @ p['w_in'] + p['b_in']
        z = ln(x, p['ln1_g'], p['ln1_b'])
        x = x + attn(z, z, p['wq1'], p['wk1'], p['wv1'], p['wo1'], p['bo1'])
        z = ln(x, p['ln2_g'], p['ln2_b'])
        x = x + attn(z, cs, p['wq2'], p['wk2'], p['wv2'], p['wo2'], p['bo2'])
        z = ln(x, p['ln3_g'], p['ln3_b'])
        proj = z @ p['w_ff1'] + p['b_ff1']
        a, gate = proj[:, :D_FF], proj[:, D_FF:]
        gelu = 0.5 * gate * (1.0 + jax.lax.erf(gate / math.sqrt(2.0)))
        x = x + (a * gelu) @ p['w_ff2'] + p['b_ff2']
        return (x @ p['w_out'] + p['b_out']) + xs

    y = jax.vmap(one)(x_seq, ctx.astype(jnp.float32))
    return jnp.transpose(y.reshape(b, h, w, c), (0, 3, 1, 2))


# ------------------------------------- main ------------------------------------------
if __name__ == "__main__":
    key = jax.random.PRNGKey(0)
    keys = jax.random.split(key, 40)

    def rnd(k, shape, scale=0.05):
        return jax.random.normal(k, shape, jnp.float32) * scale

    # Parameter shapes follow the PyTorch __init__ (weights stored (in, out) so the
    # kernel computes x @ W).  1x1 convs are per-pixel linears.
    # NOTE: the original proj_out is zero_module()'d (output == input at init); we use
    # small random weights instead so the full kernel path is actually exercised.
    params = {
        "gn_g": 1.0 + rnd(keys[0], (1, C_IN), 0.1),
        "gn_b": rnd(keys[1], (1, C_IN), 0.1),
        "w_in": rnd(keys[2], (C_IN, D)),    "b_in": rnd(keys[3], (1, D)),
        "ln1_g": 1.0 + rnd(keys[4], (1, D), 0.1), "ln1_b": rnd(keys[5], (1, D), 0.1),
        "wq1": rnd(keys[6], (D, D)), "wk1": rnd(keys[7], (D, D)),
        "wv1": rnd(keys[8], (D, D)), "wo1": rnd(keys[9], (D, D)), "bo1": rnd(keys[10], (1, D)),
        "ln2_g": 1.0 + rnd(keys[11], (1, D), 0.1), "ln2_b": rnd(keys[12], (1, D), 0.1),
        "wq2": rnd(keys[13], (D, D)), "wk2": rnd(keys[14], (CTX_DIM, D)),
        "wv2": rnd(keys[15], (CTX_DIM, D)), "wo2": rnd(keys[16], (D, D)), "bo2": rnd(keys[17], (1, D)),
        "ln3_g": 1.0 + rnd(keys[18], (1, D), 0.1), "ln3_b": rnd(keys[19], (1, D), 0.1),
        "w_ff1": rnd(keys[20], (D, 2 * D_FF)), "b_ff1": rnd(keys[21], (1, 2 * D_FF)),
        "w_ff2": rnd(keys[22], (D_FF, D)),     "b_ff2": rnd(keys[23], (1, D)),
        "w_out": rnd(keys[24], (D, C_IN)),     "b_out": rnd(keys[25], (1, C_IN)),
    }

    x = jax.random.normal(keys[30], (B, C_IN, H_SP, W_SP), jnp.float32)    # NCHW input
    context = jax.random.normal(keys[31], (B, S_CTX, CTX_DIM), jnp.float32)

    y_ref = jax.block_until_ready(reference_forward(x, context, params))

    # 1) default (fp32, device-appropriate batch layout)
    y_kernel = jax.block_until_ready(spatial_transformer(x, context, params))
    assert y_kernel.shape == x.shape
    assert jnp.allclose(y_kernel, y_ref, atol=2e-3, rtol=2e-3), (
        "max abs diff %e" % float(jnp.max(jnp.abs(y_kernel - y_ref))))

    # 2) the other batch layout (folded vs per-batch grid), validating both the
    #    v5e/v6e and the v7x configurations.
    y_alt = jax.block_until_ready(
        spatial_transformer(x, context, params, fold_batch=not _default_fold_batch()))
    assert jnp.allclose(y_alt, y_ref, atol=2e-3, rtol=2e-3), (
        "max abs diff (alt path) %e" % float(jnp.max(jnp.abs(y_alt - y_ref))))

    # 3) bf16 MXU-operand fast path (v6e/v7x): Q.K^T stays fp32; looser tolerance.
    y_bf16 = jax.block_until_ready(
        spatial_transformer(x, context, params, use_bf16=True))
    assert jnp.allclose(y_bf16, y_ref, atol=5e-2, rtol=5e-2), (
        "max abs diff (bf16 path) %e" % float(jnp.max(jnp.abs(y_bf16 - y_ref))))

    print("KERNEL_OK")
</pallas_src>

<mosaic_0001>
module attributes {stable_mosaic.version = 11 : i64} {
  func.func @spatial_transformer_kernel(%arg0: i32, %arg1: memref<2x64x128xf32, #tpu.memory_space<vmem>>, %arg2: memref<2x8x128xf32, #tpu.memory_space<vmem>>, %arg3: memref<64x832xf32, #tpu.memory_space<vmem>>, %arg4: memref<448x64xf32, #tpu.memory_space<vmem>>, %arg5: memref<128x192xf32, #tpu.memory_space<vmem>>, %arg6: memref<14x512xf32, #tpu.memory_space<vmem>>, %arg7: memref<2x64x128xf32, #tpu.memory_space<vmem>>) attributes {dimension_semantics = [#tpu.dimension_semantics<parallel>], iteration_bounds = array<i64: 1>, scalar_prefetch = 0 : i64, scratch_operands = 0 : i64, tpu.core_type = #tpu.core_type<tc>, window_params = [{transform_indices = @transform_0, window_bounds = array<i64: 2, 64, 128>}, {transform_indices = @transform_1, window_bounds = array<i64: 2, 8, 128>}, {pipeline_mode = #tpu.pipeline_mode<synchronous>, transform_indices = @transform_2, window_bounds = array<i64: 64, 832>}, {pipeline_mode = #tpu.pipeline_mode<synchronous>, transform_indices = @transform_3, window_bounds = array<i64: 448, 64>}, {pipeline_mode = #tpu.pipeline_mode<synchronous>, transform_indices = @transform_4, window_bounds = array<i64: 128, 192>}, {pipeline_mode = #tpu.pipeline_mode<synchronous>, transform_indices = @transform_5, window_bounds = array<i64: 14, 512>}, {transform_indices = @transform_6, window_bounds = array<i64: 2, 64, 128>}]} {
    %c0 = arith.constant 0 : index
    %c0_0 = arith.constant 0 : index
    %c0_1 = arith.constant 0 : index
    %0 = vector.load %arg1[%c0, %c0_0, %c0_1] : memref<2x64x128xf32, #tpu.memory_space<vmem>>, vector<2x64x128xf32>
    %cst = arith.constant dense<0.000000e+00> : vector<2x128xf32>
    %1 = vector.multi_reduction <add>, %0, %cst [1] : vector<2x64x128xf32> to vector<2x128xf32>
    %2 = vector.shape_cast %1 : vector<2x128xf32> to vector<2x1x128xf32>
    %cst_2 = arith.constant 6.400000e+01 : f32
    %3 = vector.broadcast %cst_2 : f32 to vector<2x1x128xf32>
    %4 = arith.divf %2, %3 : vector<2x1x128xf32>
    %5 = vector.broadcast %4 : vector<2x1x128xf32> to vector<2x64x128xf32>
    %6 = arith.subf %0, %5 : vector<2x64x128xf32>
    %7 = arith.mulf %6, %6 : vector<2x64x128xf32>
    %cst_3 = arith.constant dense<0.000000e+00> : vector<2x128xf32>
    %8 = vector.multi_reduction <add>, %7, %cst_3 [1] : vector<2x64x128xf32> to vector<2x128xf32>
    %9 = vector.shape_cast %8 : vector<2x128xf32> to vector<2x1x128xf32>
    %cst_4 = arith.constant 6.400000e+01 : f32
    %10 = vector.broadcast %cst_4 : f32 to vector<2x1x128xf32>
    %11 = arith.divf %9, %10 : vector<2x1x128xf32>
    %12 = vector.broadcast %4 : vector<2x1x128xf32> to vector<2x64x128xf32>
    %13 = arith.subf %0, %12 : vector<2x64x128xf32>
    %cst_5 = arith.constant 9.99999997E-7 : f32
    %14 = vector.broadcast %cst_5 : f32 to vector<2x1x128xf32>
    %15 = arith.addf %11, %14 : vector<2x1x128xf32>
    %16 = math.rsqrt %15 : vector<2x1x128xf32>
    %17 = vector.broadcast %16 : vector<2x1x128xf32> to vector<2x64x128xf32>
    %18 = arith.mulf %13, %17 : vector<2x64x128xf32>
    %19 = vector.shape_cast %18 : vector<2x64x128xf32> to vector<128x128xf32>
    %c10 = arith.constant 10 : index
    %c0_6 = arith.constant 0 : index
    %20 = vector.load %arg6[%c10, %c0_6] : memref<14x512xf32, #tpu.memory_space<vmem>>, vector<1x128xf32>
    %21 = vector.broadcast %20 : vector<1x128xf32> to vector<128x128xf32>
    %22 = arith.mulf %19, %21 : vector<128x128xf32>
    %c11 = arith.constant 11 : index
    %c0_7 = arith.constant 0 : index
    %23 = vector.load %arg6[%c11, %c0_7] : memref<14x512xf32, #tpu.memory_space<vmem>>, vector<1x128xf32>
    %24 = vector.broadcast %23 : vector<1x128xf32> to vector<128x128xf32>
    %25 = arith.addf %22, %24 : vector<128x128xf32>
    %c0_8 = arith.constant 0 : index
    %c128 = arith.constant 128 : index
    %26 = vector.load %arg5[%c0_8, %c128] : memref<128x192xf32, #tpu.memory_space<vmem>>, vector<128x64xf32>
    %cst_9 = arith.constant dense<0.000000e+00> : vector<128x64xf32>
    %27 = tpu.matmul %25, %26, %cst_9 {dimension_numbers = #tpu.dot_dimension_numbers<[1], [0], [0], [1], [0, 0, 1, 1], [], []>} : vector<128x128xf32>, vector<128x64xf32>, vector<128x64xf32> -> vector<128x64xf32>
    %c0_10 = arith.constant 0 : index
    %c0_11 = arith.constant 0 : index
    %28 = vector.load %arg6[%c0_10, %c0_11] : memref<14x512xf32, #tpu.memory_space<vmem>>, vector<1x64xf32>
    %29 = vector.broadcast %28 : vector<1x64xf32> to vector<128x64xf32>
    %30 = arith.addf %27, %29 : vector<128x64xf32>
    %c1 = arith.constant 1 : index
    %c0_12 = arith.constant 0 : index
    %31 = vector.load %arg6[%c1, %c0_12] : memref<14x512xf32, #tpu.memory_space<vmem>>, vector<1x64xf32>
    %c2 = arith.constant 2 : index
    %c0_13 = arith.constant 0 : index
    %32 = vector.load %arg6[%c2, %c0_13] : memref<14x512xf32, #tpu.memory_space<vmem>>, vector<1x64xf32>
    %cst_14 = arith.constant dense<0.000000e+00> : vector<128xf32>
    %33 = vector.multi_reduction <add>, %30, %cst_14 [1] : vector<128x64xf32> to vector<128xf32>
    %34 = vector.shape_cast %33 : vector<128xf32> to vector<128x1xf32>
    %cst_15 = arith.constant 6.400000e+01 : f32
    %35 = vector.broadcast %cst_15 : f32 to vector<128x1xf32>
    %36 = arith.divf %34, %35 : vector<128x1xf32>
    %37 = vector.broadcast %36 : vector<128x1xf32> to vector<128x64xf32>
    %38 = arith.subf %30, %37 : vector<128x64xf32>
    %39 = arith.mulf %38, %38 : vector<128x64xf32>
    %cst_16 = arith.constant dense<0.000000e+00> : vector<128xf32>
    %40 = vector.multi_reduction <add>, %39, %cst_16 [1] : vector<128x64xf32> to vector<128xf32>
    %41 = vector.shape_cast %40 : vector<128xf32> to vector<128x1xf32>
    %cst_17 = arith.constant 6.400000e+01 : f32
    %42 = vector.broadcast %cst_17 : f32 to vector<128x1xf32>
    %43 = arith.divf %41, %42 : vector<128x1xf32>
    %44 = vector.broadcast %36 : vector<128x1xf32> to vector<128x64xf32>
    %45 = arith.subf %30, %44 : vector<128x64xf32>
    %cst_18 = arith.constant 9.99999974E-6 : f32
    %46 = vector.broadcast %cst_18 : f32 to vector<128x1xf32>
    %47 = arith.addf %43, %46 : vector<128x1xf32>
    %48 = math.rsqrt %47 : vector<128x1xf32>
    %49 = vector.broadcast %48 : vector<128x1xf32> to vector<128x64xf32>
    %50 = arith.mulf %45, %49 : vector<128x64xf32>
    %51 = vector.broadcast %31 : vector<1x64xf32> to vector<128x64xf32>
    %52 = arith.mulf %50, %51 : vector<128x64xf32>
    %53 = vector.broadcast %32 : vector<1x64xf32> to vector<128x64xf32>
    %54 = arith.addf %52, %53 : vector<128x64xf32>
    %c0_19 = arith.constant 0 : index
    %c640 = arith.constant 640 : index
    %55 = vector.load %arg3[%c0_19, %c640] : memref<64x832xf32, #tpu.memory_space<vmem>>, vector<64x192xf32>
    %cst_20 = arith.constant dense<0.000000e+00> : vector<128x192xf32>
    %56 = tpu.matmul %54, %55, %cst_20 {dimension_numbers = #tpu.dot_dimension_numbers<[1], [0], [0], [1], [0, 0, 1, 1], [], []>} : vector<128x64xf32>, vector<64x192xf32>, vector<128x192xf32> -> vector<128x192xf32>
    %57 = vector.shape_cast %56 : vector<128x192xf32> to vector<2x64x192xf32>
    %58 = vector.extract_strided_slice %57 {offsets = [0, 0, 0], sizes = [1, 64, 16], strides = [1, 1, 1]} : vector<2x64x192xf32> to vector<1x64x16xf32>
    %59 = vector.shape_cast %58 : vector<1x64x16xf32> to vector<64x16xf32>
    %60 = vector.extract_strided_slice %57 {offsets = [0, 0, 16], sizes = [1, 64, 16], strides = [1, 1, 1]} : vector<2x64x192xf32> to vector<1x64x16xf32>
    %61 = vector.shape_cast %60 : vector<1x64x16xf32> to vector<64x16xf32>
    %62 = vector.extract_strided_slice %57 {offsets = [0, 0, 32], sizes = [1, 64, 16], strides = [1, 1, 1]} : vector<2x64x192xf32> to vector<1x64x16xf32>
    %63 = vector.shape_cast %62 : vector<1x64x16xf32> to vector<64x16xf32>
    %64 = vector.extract_strided_slice %57 {offsets = [0, 0, 48], sizes = [1, 64, 16], strides = [1, 1, 1]} : vector<2x64x192xf32> to vector<1x64x16xf32>
    %65 = vector.shape_cast %64 : vector<1x64x16xf32> to vector<64x16xf32>
    %66 = vector.extract_strided_slice %57 {offsets = [1, 0, 0], sizes = [1, 64, 16], strides = [1, 1, 1]} : vector<2x64x192xf32> to vector<1x64x16xf32>
    %67 = vector.shape_cast %66 : vector<1x64x16xf32> to vector<64x16xf32>
    %68 = vector.extract_strided_slice %57 {offsets = [1, 0, 16], sizes = [1, 64, 16], strides = [1, 1, 1]} : vector<2x64x192xf32> to vector<1x64x16xf32>
    %69 = vector.shape_cast %68 : vector<1x64x16xf32> to vector<64x16xf32>
    %70 = vector.extract_strided_slice %57 {offsets = [1, 0, 32], sizes = [1, 64, 16], strides = [1, 1, 1]} : vector<2x64x192xf32> to vector<1x64x16xf32>
    %71 = vector.shape_cast %70 : vector<1x64x16xf32> to vector<64x16xf32>
    %72 = vector.extract_strided_slice %57 {offsets = [1, 0, 48], sizes = [1, 64, 16], strides = [1, 1, 1]} : vector<2x64x192xf32> to vector<1x64x16xf32>
    %73 = vector.shape_cast %72 : vector<1x64x16xf32> to vector<64x16xf32>
    %74 = vector.shape_cast %59 : vector<64x16xf32> to vector<1x64x16xf32>
    %75 = vector.shape_cast %61 : vector<64x16xf32> to vector<1x64x16xf32>
    %76 = vector.shape_cast %63 : vector<64x16xf32> to vector<1x64x16xf32>
    %77 = vector.shape_cast %65 : vector<64x16xf32> to vector<1x64x16xf32>
    %78 = vector.shape_cast %67 : vector<64x16xf32> to vector<1x64x16xf32>
    %79 = vector.shape_cast %69 : vector<64x16xf32> to vector<1x64x16xf32>
    %80 = vector.shape_cast %71 : vector<64x16xf32> to vector<1x64x16xf32>
    %81 = vector.shape_cast %73 : vector<64x16xf32> to vector<1x64x16xf32>
    %82 = tpu.concatenate %74, %75, %76, %77, %78, %79, %80, %81 in 0 : vector<1x64x16xf32>, vector<1x64x16xf32>, vector<1x64x16xf32>, vector<1x64x16xf32>, vector<1x64x16xf32>, vector<1x64x16xf32>, vector<1x64x16xf32>, vector<1x64x16xf32> -> vector<8x64x16xf32>
    %83 = vector.extract_strided_slice %57 {offsets = [0, 0, 64], sizes = [1, 64, 16], strides = [1, 1, 1]} : vector<2x64x192xf32> to vector<1x64x16xf32>
    %84 = vector.shape_cast %83 : vector<1x64x16xf32> to vector<64x16xf32>
    %85 = vector.extract_strided_slice %57 {offsets = [0, 0, 80], sizes = [1, 64, 16], strides = [1, 1, 1]} : vector<2x64x192xf32> to vector<1x64x16xf32>
    %86 = vector.shape_cast %85 : vector<1x64x16xf32> to vector<64x16xf32>
    %87 = vector.extract_strided_slice %57 {offsets = [0, 0, 96], sizes = [1, 64, 16], strides = [1, 1, 1]} : vector<2x64x192xf32> to vector<1x64x16xf32>
    %88 = vector.shape_cast %87 : vector<1x64x16xf32> to vector<64x16xf32>
    %89 = vector.extract_strided_slice %57 {offsets = [0, 0, 112], sizes = [1, 64, 16], strides = [1, 1, 1]} : vector<2x64x192xf32> to vector<1x64x16xf32>
    %90 = vector.shape_cast %89 : vector<1x64x16xf32> to vector<64x16xf32>
    %91 = vector.extract_strided_slice %57 {offsets = [1, 0, 64], sizes = [1, 64, 16], strides = [1, 1, 1]} : vector<2x64x192xf32> to vector<1x64x16xf32>
    %92 = vector.shape_cast %91 : vector<1x64x16xf32> to vector<64x16xf32>
    %93 = vector.extract_strided_slice %57 {offsets = [1, 0, 80], sizes = [1, 64, 16], strides = [1, 1, 1]} : vector<2x64x192xf32> to vector<1x64x16xf32>
    %94 = vector.shape_cast %93 : vector<1x64x16xf32> to vector<64x16xf32>
    %95 = vector.extract_strided_slice %57 {offsets = [1, 0, 96], sizes = [1, 64, 16], strides = [1, 1, 1]} : vector<2x64x192xf32> to vector<1x64x16xf32>
    %96 = vector.shape_cast %95 : vector<1x64x16xf32> to vector<64x16xf32>
    %97 = vector.extract_strided_slice %57 {offsets = [1, 0, 112], sizes = [1, 64, 16], strides = [1, 1, 1]} : vector<2x64x192xf32> to vector<1x64x16xf32>
    %98 = vector.shape_cast %97 : vector<1x64x16xf32> to vector<64x16xf32>
    %99 = vector.shape_cast %84 : vector<64x16xf32> to vector<1x64x16xf32>
    %100 = vector.shape_cast %86 : vector<64x16xf32> to vector<1x64x16xf32>
    %101 = vector.shape_cast %88 : vector<64x16xf32> to vector<1x64x16xf32>
    %102 = vector.shape_cast %90 : vector<64x16xf32> to vector<1x64x16xf32>
    %103 = vector.shape_cast %92 : vector<64x16xf32> to vector<1x64x16xf32>
    %104 = vector.shape_cast %94 : vector<64x16xf32> to vector<1x64x16xf32>
    %105 = vector.shape_cast %96 : vector<64x16xf32> to vector<1x64x16xf32>
    %106 = vector.shape_cast %98 : vector<64x16xf32> to vector<1x64x16xf32>
    %107 = tpu.concatenate %99, %100, %101, %102, %103, %104, %105, %106 in 0 : vector<1x64x16xf32>, vector<1x64x16xf32>, vector<1x64x16xf32>, vector<1x64x16xf32>, vector<1x64x16xf32>, vector<1x64x16xf32>, vector<1x64x16xf32>, vector<1x64x16xf32> -> vector<8x64x16xf32>
    %108 = vector.extract_strided_slice %57 {offsets = [0, 0, 128], sizes = [1, 64, 16], strides = [1, 1, 1]} : vector<2x64x192xf32> to vector<1x64x16xf32>
    %109 = vector.shape_cast %108 : vector<1x64x16xf32> to vector<64x16xf32>
    %110 = vector.extract_strided_slice %57 {offsets = [0, 0, 144], sizes = [1, 64, 16], strides = [1, 1, 1]} : vector<2x64x192xf32> to vector<1x64x16xf32>
    %111 = vector.shape_cast %110 : vector<1x64x16xf32> to vector<64x16xf32>
    %112 = vector.extract_strided_slice %57 {offsets = [0, 0, 160], sizes = [1, 64, 16], strides = [1, 1, 1]} : vector<2x64x192xf32> to vector<1x64x16xf32>
    %113 = vector.shape_cast %112 : vector<1x64x16xf32> to vector<64x16xf32>
    %114 = vector.extract_strided_slice %57 {offsets = [0, 0, 176], sizes = [1, 64, 16], strides = [1, 1, 1]} : vector<2x64x192xf32> to vector<1x64x16xf32>
    %115 = vector.shape_cast %114 : vector<1x64x16xf32> to vector<64x16xf32>
    %116 = vector.extract_strided_slice %57 {offsets = [1, 0, 128], sizes = [1, 64, 16], strides = [1, 1, 1]} : vector<2x64x192xf32> to vector<1x64x16xf32>
    %117 = vector.shape_cast %116 : vector<1x64x16xf32> to vector<64x16xf32>
    %118 = vector.extract_strided_slice %57 {offsets = [1, 0, 144], sizes = [1, 64, 16], strides = [1, 1, 1]} : vector<2x64x192xf32> to vector<1x64x16xf32>
    %119 = vector.shape_cast %118 : vector<1x64x16xf32> to vector<64x16xf32>
    %120 = vector.extract_strided_slice %57 {offsets = [1, 0, 160], sizes = [1, 64, 16], strides = [1, 1, 1]} : vector<2x64x192xf32> to vector<1x64x16xf32>
    %121 = vector.shape_cast %120 : vector<1x64x16xf32> to vector<64x16xf32>
    %122 = vector.extract_strided_slice %57 {offsets = [1, 0, 176], sizes = [1, 64, 16], strides = [1, 1, 1]} : vector<2x64x192xf32> to vector<1x64x16xf32>
    %123 = vector.shape_cast %122 : vector<1x64x16xf32> to vector<64x16xf32>
    %124 = vector.shape_cast %109 : vector<64x16xf32> to vector<1x64x16xf32>
    %125 = vector.shape_cast %111 : vector<64x16xf32> to vector<1x64x16xf32>
    %126 = vector.shape_cast %113 : vector<64x16xf32> to vector<1x64x16xf32>
    %127 = vector.shape_cast %115 : vector<64x16xf32> to vector<1x64x16xf32>
    %128 = vector.shape_cast %117 : vector<64x16xf32> to vector<1x64x16xf32>
    %129 = vector.shape_cast %119 : vector<64x16xf32> to vector<1x64x16xf32>
    %130 = vector.shape_cast %121 : vector<64x16xf32> to vector<1x64x16xf32>
    %131 = vector.shape_cast %123 : vector<64x16xf32> to vector<1x64x16xf32>
    %132 = tpu.concatenate %124, %125, %126, %127, %128, %129, %130, %131 in 0 : vector<1x64x16xf32>, vector<1x64x16xf32>, vector<1x64x16xf32>, vector<1x64x16xf32>, vector<1x64x16xf32>, vector<1x64x16xf32>, vector<1x64x16xf32>, vector<1x64x16xf32> -> vector<8x64x16xf32>
    "tpu.trace_start"() <{level = 10 : i32, message = "gid,gjd->gij"}> : () -> ()
    %cst_21 = arith.constant dense<0.000000e+00> : vector<8x64x64xf32>
    %133 = tpu.matmul %82, %107, %cst_21 {dimension_numbers = #tpu.dot_dimension_numbers<[2], [2], [1], [1], [0, 0, 0, 1, 1, 1], [0], [0]>} : vector<8x64x16xf32>, vector<8x64x16xf32>, vector<8x64x64xf32> -> vector<8x64x64xf32>
    "tpu.trace_stop"() : () -> ()
    %cst_22 = arith.constant 2.500000e-01 : f32
    %134 = vector.broadcast %cst_22 : f32 to vector<8x64x64xf32>
    %135 = arith.mulf %133, %134 : vector<8x64x64xf32>
    %cst_23 = arith.constant dense<0xFF800000> : vector<8x64xf32>
    %136 = vector.multi_reduction <maximumf>, %135, %cst_23 [2] : vector<8x64x64xf32> to vector<8x64xf32>
    %137 = vector.shape_cast %136 : vector<8x64xf32> to vector<8x64x1xf32>
    %138 = vector.broadcast %137 : vector<8x64x1xf32> to vector<8x64x64xf32>
    %139 = arith.subf %135, %138 : vector<8x64x64xf32>
    %140 = math.exp %139 : vector<8x64x64xf32>
    %cst_24 = arith.constant dense<0.000000e+00> : vector<8x64xf32>
    %141 = vector.multi_reduction <add>, %140, %cst_24 [2] : vector<8x64x64xf32> to vector<8x64xf32>
    %142 = vector.shape_cast %141 : vector<8x64xf32> to vector<8x64x1xf32>
    %143 = tpu.reciprocal %142 : vector<8x64x1xf32> -> vector<8x64x1xf32>
    %144 = vector.broadcast %143 : vector<8x64x1xf32> to vector<8x64x64xf32>
    %145 = arith.mulf %140, %144 : vector<8x64x64xf32>
    "tpu.trace_start"() <{level = 10 : i32, message = "gij,gjd->gid"}> : () -> ()
    %cst_25 = arith.constant dense<0.000000e+00> : vector<8x64x16xf32>
    %146 = tpu.matmul %145, %132, %cst_25 {dimension_numbers = #tpu.dot_dimension_numbers<[2], [1], [1], [2], [0, 0, 0, 1, 1, 2], [0], [0]>} : vector<8x64x64xf32>, vector<8x64x16xf32>, vector<8x64x16xf32> -> vector<8x64x16xf32>
    "tpu.trace_stop"() : () -> ()
    %c64 = arith.constant 64 : index
    %c0_26 = arith.constant 0 : index
    %147 = vector.load %arg4[%c64, %c0_26] : memref<448x64xf32, #tpu.memory_space<vmem>>, vector<64x64xf32>
    %148 = vector.extract_strided_slice %146 {offsets = [0, 0, 0], sizes = [1, 64, 16], strides = [1, 1, 1]} : vector<8x64x16xf32> to vector<1x64x16xf32>
    %149 = vector.shape_cast %148 : vector<1x64x16xf32> to vector<64x16xf32>
    %150 = vector.extract_strided_slice %147 {offsets = [0, 0], sizes = [16, 64], strides = [1, 1]} : vector<64x64xf32> to vector<16x64xf32>
    %cst_27 = arith.constant dense<0.000000e+00> : vector<64x64xf32>
    %151 = tpu.matmul %149, %150, %cst_27 {dimension_numbers = #tpu.dot_dimension_numbers<[1], [0], [0], [1], [0, 0, 1, 1], [], []>} : vector<64x16xf32>, vector<16x64xf32>, vector<64x64xf32> -> vector<64x64xf32>
    %152 = vector.extract_strided_slice %146 {offsets = [1, 0, 0], sizes = [1, 64, 16], strides = [1, 1, 1]} : vector<8x64x16xf32> to vector<1x64x16xf32>
    %153 = vector.shape_cast %152 : vector<1x64x16xf32> to vector<64x16xf32>
    %154 = vector.extract_strided_slice %147 {offsets = [16, 0], sizes = [16, 64], strides = [1, 1]} : vector<64x64xf32> to vector<16x64xf32>
    %cst_28 = arith.constant dense<0.000000e+00> : vector<64x64xf32>
    %155 = tpu.matmul %153, %154, %cst_28 {dimension_numbers = #tpu.dot_dimension_numbers<[1], [0], [0], [1], [0, 0, 1, 1], [], []>} : vector<64x16xf32>, vector<16x64xf32>, vector<64x64xf32> -> vector<64x64xf32>
    %156 = arith.addf %151, %155 : vector<64x64xf32>
    %157 = vector.extract_strided_slice %146 {offsets = [2, 0, 0], sizes = [1, 64, 16], strides = [1, 1, 1]} : vector<8x64x16xf32> to vector<1x64x16xf32>
    %158 = vector.shape_cast %157 : vector<1x64x16xf32> to vector<64x16xf32>
    %159 = vector.extract_strided_slice %147 {offsets = [32, 0], sizes = [16, 64], strides = [1, 1]} : vector<64x64xf32> to vector<16x64xf32>
    %cst_29 = arith.constant dense<0.000000e+00> : vector<64x64xf32>
    %160 = tpu.matmul %158, %159, %cst_29 {dimension_numbers = #tpu.dot_dimension_numbers<[1], [0], [0], [1], [0, 0, 1, 1], [], []>} : vector<64x16xf32>, vector<16x64xf32>, vector<64x64xf32> -> vector<64x64xf32>
    %161 = arith.addf %156, %160 : vector<64x64xf32>
    %162 = vector.extract_strided_slice %146 {offsets = [3, 0, 0], sizes = [1, 64, 16], strides = [1, 1, 1]} : vector<8x64x16xf32> to vector<1x64x16xf32>
    %163 = vector.shape_cast %162 : vector<1x64x16xf32> to vector<64x16xf32>
    %164 = vector.extract_strided_slice %147 {offsets = [48, 0], sizes = [16, 64], strides = [1, 1]} : vector<64x64xf32> to vector<16x64xf32>
    %cst_30 = arith.constant dense<0.000000e+00> : vector<64x64xf32>
    %165 = tpu.matmul %163, %164, %cst_30 {dimension_numbers = #tpu.dot_dimension_numbers<[1], [0], [0], [1], [0, 0, 1, 1], [], []>} : vector<64x16xf32>, vector<16x64xf32>, vector<64x64xf32> -> vector<64x64xf32>
    %166 = arith.addf %161, %165 : vector<64x64xf32>
    %167 = vector.extract_strided_slice %146 {offsets = [4, 0, 0], sizes = [1, 64, 16], strides = [1, 1, 1]} : vector<8x64x16xf32> to vector<1x64x16xf32>
    %168 = vector.shape_cast %167 : vector<1x64x16xf32> to vector<64x16xf32>
    %169 = vector.extract_strided_slice %147 {offsets = [0, 0], sizes = [16, 64], strides = [1, 1]} : vector<64x64xf32> to vector<16x64xf32>
    %cst_31 = arith.constant dense<0.000000e+00> : vector<64x64xf32>
    %170 = tpu.matmul %168, %169, %cst_31 {dimension_numbers = #tpu.dot_dimension_numbers<[1], [0], [0], [1], [0, 0, 1, 1], [], []>} : vector<64x16xf32>, vector<16x64xf32>, vector<64x64xf32> -> vector<64x64xf32>
    %171 = vector.extract_strided_slice %146 {offsets = [5, 0, 0], sizes = [1, 64, 16], strides = [1, 1, 1]} : vector<8x64x16xf32> to vector<1x64x16xf32>
    %172 = vector.shape_cast %171 : vector<1x64x16xf32> to vector<64x16xf32>
    %173 = vector.extract_strided_slice %147 {offsets = [16, 0], sizes = [16, 64], strides = [1, 1]} : vector<64x64xf32> to vector<16x64xf32>
    %cst_32 = arith.constant dense<0.000000e+00> : vector<64x64xf32>
    %174 = tpu.matmul %172, %173, %cst_32 {dimension_numbers = #tpu.dot_dimension_numbers<[1], [0], [0], [1], [0, 0, 1, 1], [], []>} : vector<64x16xf32>, vector<16x64xf32>, vector<64x64xf32> -> vector<64x64xf32>
    %175 = arith.addf %170, %174 : vector<64x64xf32>
    %176 = vector.extract_strided_slice %146 {offsets = [6, 0, 0], sizes = [1, 64, 16], strides = [1, 1, 1]} : vector<8x64x16xf32> to vector<1x64x16xf32>
    %177 = vector.shape_cast %176 : vector<1x64x16xf32> to vector<64x16xf32>
    %178 = vector.extract_strided_slice %147 {offsets = [32, 0], sizes = [16, 64], strides = [1, 1]} : vector<64x64xf32> to vector<16x64xf32>
    %cst_33 = arith.constant dense<0.000000e+00> : vector<64x64xf32>
    %179 = tpu.matmul %177, %178, %cst_33 {dimension_numbers = #tpu.dot_dimension_numbers<[1], [0], [0], [1], [0, 0, 1, 1], [], []>} : vector<64x16xf32>, vector<16x64xf32>, vector<64x64xf32> -> vector<64x64xf32>
    %180 = arith.addf %175, %179 : vector<64x64xf32>
    %181 = vector.extract_strided_slice %146 {offsets = [7, 0, 0], sizes = [1, 64, 16], strides = [1, 1, 1]} : vector<8x64x16xf32> to vector<1x64x16xf32>
    %182 = vector.shape_cast %181 : vector<1x64x16xf32> to vector<64x16xf32>
    %183 = vector.extract_strided_slice %147 {offsets = [48, 0], sizes = [16, 64], strides = [1, 1]} : vector<64x64xf32> to vector<16x64xf32>
    %cst_34 = arith.constant dense<0.000000e+00> : vector<64x64xf32>
    %184 = tpu.matmul %182, %183, %cst_34 {dimension_numbers = #tpu.dot_dimension_numbers<[1], [0], [0], [1], [0, 0, 1, 1], [], []>} : vector<64x16xf32>, vector<16x64xf32>, vector<64x64xf32> -> vector<64x64xf32>
    %185 = arith.addf %180, %184 : vector<64x64xf32>
    %186 = tpu.concatenate %166, %185 in 0 : vector<64x64xf32>, vector<64x64xf32> -> vector<128x64xf32>
    %187 = arith.addf %30, %186 : vector<128x64xf32>
    %c3 = arith.constant 3 : index
    %c0_35 = arith.constant 0 : index
    %188 = vector.load %arg6[%c3, %c0_35] : memref<14x512xf32, #tpu.memory_space<vmem>>, vector<1x64xf32>
    %189 = vector.broadcast %188 : vector<1x64xf32> to vector<128x64xf32>
    %190 = arith.addf %187, %189 : vector<128x64xf32>
    %c4 = arith.constant 4 : index
    %c0_36 = arith.constant 0 : index
    %191 = vector.load %arg6[%c4, %c0_36] : memref<14x512xf32, #tpu.memory_space<vmem>>, vector<1x64xf32>
    %c5 = arith.constant 5 : index
    %c0_37 = arith.constant 0 : index
    %192 = vector.load %arg6[%c5, %c0_37] : memref<14x512xf32, #tpu.memory_space<vmem>>, vector<1x64xf32>
    %cst_38 = arith.constant dense<0.000000e+00> : vector<128xf32>
    %193 = vector.multi_reduction <add>, %190, %cst_38 [1] : vector<128x64xf32> to vector<128xf32>
    %194 = vector.shape_cast %193 : vector<128xf32> to vector<128x1xf32>
    %cst_39 = arith.constant 6.400000e+01 : f32
    %195 = vector.broadcast %cst_39 : f32 to vector<128x1xf32>
    %196 = arith.divf %194, %195 : vector<128x1xf32>
    %197 = vector.broadcast %196 : vector<128x1xf32> to vector<128x64xf32>
    %198 = arith.subf %190, %197 : vector<128x64xf32>
    %199 = arith.mulf %198, %198 : vector<128x64xf32>
    %cst_40 = arith.constant dense<0.000000e+00> : vector<128xf32>
    %200 = vector.multi_reduction <add>, %199, %cst_40 [1] : vector<128x64xf32> to vector<128xf32>
    %201 = vector.shape_cast %200 : vector<128xf32> to vector<128x1xf32>
    %cst_41 = arith.constant 6.400000e+01 : f32
    %202 = vector.broadcast %cst_41 : f32 to vector<128x1xf32>
    %203 = arith.divf %201, %202 : vector<128x1xf32>
    %204 = vector.broadcast %196 : vector<128x1xf32> to vector<128x64xf32>
    %205 = arith.subf %190, %204 : vector<128x64xf32>
    %cst_42 = arith.constant 9.99999974E-6 : f32
    %206 = vector.broadcast %cst_42 : f32 to vector<128x1xf32>
    %207 = arith.addf %203, %206 : vector<128x1xf32>
    %208 = math.rsqrt %207 : vector<128x1xf32>
    %209 = vector.broadcast %208 : vector<128x1xf32> to vector<128x64xf32>
    %210 = arith.mulf %205, %209 : vector<128x64xf32>
    %211 = vector.broadcast %191 : vector<1x64xf32> to vector<128x64xf32>
    %212 = arith.mulf %210, %211 : vector<128x64xf32>
    %213 = vector.broadcast %192 : vector<1x64xf32> to vector<128x64xf32>
    %214 = arith.addf %212, %213 : vector<128x64xf32>
    %c0_43 = arith.constant 0 : index
    %c0_44 = arith.constant 0 : index
    %215 = vector.load %arg4[%c0_43, %c0_44] : memref<448x64xf32, #tpu.memory_space<vmem>>, vector<64x64xf32>
    %cst_45 = arith.constant dense<0.000000e+00> : vector<128x64xf32>
    %216 = tpu.matmul %214, %215, %cst_45 {dimension_numbers = #tpu.dot_dimension_numbers<[1], [0], [0], [1], [0, 0, 1, 1], [], []>} : vector<128x64xf32>, vector<64x64xf32>, vector<128x64xf32> -> vector<128x64xf32>
    %c0_46 = arith.constant 0 : index
    %c0_47 = arith.constant 0 : index
    %c0_48 = arith.constant 0 : index
    %217 = vector.load %arg2[%c0_46, %c0_47, %c0_48] : memref<2x8x128xf32, #tpu.memory_space<vmem>>, vector<2x8x128xf32>
    %218 = vector.shape_cast %217 : vector<2x8x128xf32> to vector<16x128xf32>
    %c0_49 = arith.constant 0 : index
    %c0_50 = arith.constant 0 : index
    %219 = vector.load %arg5[%c0_49, %c0_50] : memref<128x192xf32, #tpu.memory_space<vmem>>, vector<128x128xf32>
    %cst_51 = arith.constant dense<0.000000e+00> : vector<16x128xf32>
    %220 = tpu.matmul %218, %219, %cst_51 {dimension_numbers = #tpu.dot_dimension_numbers<[1], [0], [0], [1], [0, 0, 1, 1], [], []>} : vector<16x128xf32>, vector<128x128xf32>, vector<16x128xf32> -> vector<16x128xf32>
    %221 = vector.shape_cast %216 : vector<128x64xf32> to vector<2x64x64xf32>
    %222 = vector.extract_strided_slice %221 {offsets = [0, 0, 0], sizes = [1, 64, 16], strides = [1, 1, 1]} : vector<2x64x64xf32> to vector<1x64x16xf32>
    %223 = vector.shape_cast %222 : vector<1x64x16xf32> to vector<64x16xf32>
    %224 = vector.extract_strided_slice %221 {offsets = [0, 0, 16], sizes = [1, 64, 16], strides = [1, 1, 1]} : vector<2x64x64xf32> to vector<1x64x16xf32>
    %225 = vector.shape_cast %224 : vector<1x64x16xf32> to vector<64x16xf32>
    %226 = vector.extract_strided_slice %221 {offsets = [0, 0, 32], sizes = [1, 64, 16], strides = [1, 1, 1]} : vector<2x64x64xf32> to vector<1x64x16xf32>
    %227 = vector.shape_cast %226 : vector<1x64x16xf32> to vector<64x16xf32>
    %228 = vector.extract_strided_slice %221 {offsets = [0, 0, 48], sizes = [1, 64, 16], strides = [1, 1, 1]} : vector<2x64x64xf32> to vector<1x64x16xf32>
    %229 = vector.shape_cast %228 : vector<1x64x16xf32> to vector<64x16xf32>
    %230 = vector.extract_strided_slice %221 {offsets = [1, 0, 0], sizes = [1, 64, 16], strides = [1, 1, 1]} : vector<2x64x64xf32> to vector<1x64x16xf32>
    %231 = vector.shape_cast %230 : vector<1x64x16xf32> to vector<64x16xf32>
    %232 = vector.extract_strided_slice %221 {offsets = [1, 0, 16], sizes = [1, 64, 16], strides = [1, 1, 1]} : vector<2x64x64xf32> to vector<1x64x16xf32>
    %233 = vector.shape_cast %232 : vector<1x64x16xf32> to vector<64x16xf32>
    %234 = vector.extract_strided_slice %221 {offsets = [1, 0, 32], sizes = [1, 64, 16], strides = [1, 1, 1]} : vector<2x64x64xf32> to vector<1x64x16xf32>
    %235 = vector.shape_cast %234 : vector<1x64x16xf32> to vector<64x16xf32>
    %236 = vector.extract_strided_slice %221 {offsets = [1, 0, 48], sizes = [1, 64, 16], strides = [1, 1, 1]} : vector<2x64x64xf32> to vector<1x64x16xf32>
    %237 = vector.shape_cast %236 : vector<1x64x16xf32> to vector<64x16xf32>
    %238 = vector.shape_cast %223 : vector<64x16xf32> to vector<1x64x16xf32>
    %239 = vector.shape_cast %225 : vector<64x16xf32> to vector<1x64x16xf32>
    %240 = vector.shape_cast %227 : vector<64x16xf32> to vector<1x64x16xf32>
    %241 = vector.shape_cast %229 : vector<64x16xf32> to vector<1x64x16xf32>
    %242 = vector.shape_cast %231 : vector<64x16xf32> to vector<1x64x16xf32>
    %243 = vector.shape_cast %233 : vector<64x16xf32> to vector<1x64x16xf32>
    %244 = vector.shape_cast %235 : vector<64x16xf32> to vector<1x64x16xf32>
    %245 = vector.shape_cast %237 : vector<64x16xf32> to vector<1x64x16xf32>
    %246 = tpu.concatenate %238, %239, %240, %241, %242, %243, %244, %245 in 0 : vector<1x64x16xf32>, vector<1x64x16xf32>, vector<1x64x16xf32>, vector<1x64x16xf32>, vector<1x64x16xf32>, vector<1x64x16xf32>, vector<1x64x16xf32>, vector<1x64x16xf32> -> vector<8x64x16xf32>
    %247 = vector.shape_cast %220 : vector<16x128xf32> to vector<2x8x128xf32>
    %248 = vector.extract_strided_slice %247 {offsets = [0, 0, 0], sizes = [1, 8, 16], strides = [1, 1, 1]} : vector<2x8x128xf32> to vector<1x8x16xf32>
    %249 = vector.shape_cast %248 : vector<1x8x16xf32> to vector<8x16xf32>
    %250 = vector.extract_strided_slice %247 {offsets = [0, 0, 16], sizes = [1, 8, 16], strides = [1, 1, 1]} : vector<2x8x128xf32> to vector<1x8x16xf32>
    %251 = vector.shape_cast %250 : vector<1x8x16xf32> to vector<8x16xf32>
    %252 = vector.extract_strided_slice %247 {offsets = [0, 0, 32], sizes = [1, 8, 16], strides = [1, 1, 1]} : vector<2x8x128xf32> to vector<1x8x16xf32>
    %253 = vector.shape_cast %252 : vector<1x8x16xf32> to vector<8x16xf32>
    %254 = vector.extract_strided_slice %247 {offsets = [0, 0, 48], sizes = [1, 8, 16], strides = [1, 1, 1]} : vector<2x8x128xf32> to vector<1x8x16xf32>
    %255 = vector.shape_cast %254 : vector<1x8x16xf32> to vector<8x16xf32>
    %256 = vector.extract_strided_slice %247 {offsets = [1, 0, 0], sizes = [1, 8, 16], strides = [1, 1, 1]} : vector<2x8x128xf32> to vector<1x8x16xf32>
    %257 = vector.shape_cast %256 : vector<1x8x16xf32> to vector<8x16xf32>
    %258 = vector.extract_strided_slice %247 {offsets = [1, 0, 16], sizes = [1, 8, 16], strides = [1, 1, 1]} : vector<2x8x128xf32> to vector<1x8x16xf32>
    %259 = vector.shape_cast %258 : vector<1x8x16xf32> to vector<8x16xf32>
    %260 = vector.extract_strided_slice %247 {offsets = [1, 0, 32], sizes = [1, 8, 16], strides = [1, 1, 1]} : vector<2x8x128xf32> to vector<1x8x16xf32>
    %261 = vector.shape_cast %260 : vector<1x8x16xf32> to vector<8x16xf32>
    %262 = vector.extract_strided_slice %247 {offsets = [1, 0, 48], sizes = [1, 8, 16], strides = [1, 1, 1]} : vector<2x8x128xf32> to vector<1x8x16xf32>
    %263 = vector.shape_cast %262 : vector<1x8x16xf32> to vector<8x16xf32>
    %264 = vector.shape_cast %249 : vector<8x16xf32> to vector<1x8x16xf32>
    %265 = vector.shape_cast %251 : vector<8x16xf32> to vector<1x8x16xf32>
    %266 = vector.shape_cast %253 : vector<8x16xf32> to vector<1x8x16xf32>
    %267 = vector.shape_cast %255 : vector<8x16xf32> to vector<1x8x16xf32>
    %268 = vector.shape_cast %257 : vector<8x16xf32> to vector<1x8x16xf32>
    %269 = vector.shape_cast %259 : vector<8x16xf32> to vector<1x8x16xf32>
    %270 = vector.shape_cast %261 : vector<8x16xf32> to vector<1x8x16xf32>
    %271 = vector.shape_cast %263 : vector<8x16xf32> to vector<1x8x16xf32>
    %272 = tpu.concatenate %264, %265, %266, %267, %268, %269, %270, %271 in 0 : vector<1x8x16xf32>, vector<1x8x16xf32>, vector<1x8x16xf32>, vector<1x8x16xf32>, vector<1x8x16xf32>, vector<1x8x16xf32>, vector<1x8x16xf32>, vector<1x8x16xf32> -> vector<8x8x16xf32>
    %273 = vector.extract_strided_slice %247 {offsets = [0, 0, 64], sizes = [1, 8, 16], strides = [1, 1, 1]} : vector<2x8x128xf32> to vector<1x8x16xf32>
    %274 = vector.shape_cast %273 : vector<1x8x16xf32> to vector<8x16xf32>
    %275 = vector.extract_strided_slice %247 {offsets = [0, 0, 80], sizes = [1, 8, 16], strides = [1, 1, 1]} : vector<2x8x128xf32> to vector<1x8x16xf32>
    %276 = vector.shape_cast %275 : vector<1x8x16xf32> to vector<8x16xf32>
    %277 = vector.extract_strided_slice %247 {offsets = [0, 0, 96], sizes = [1, 8, 16], strides = [1, 1, 1]} : vector<2x8x128xf32> to vector<1x8x16xf32>
    %278 = vector.shape_cast %277 : vector<1x8x16xf32> to vector<8x16xf32>
    %279 = vector.extract_strided_slice %247 {offsets = [0, 0, 112], sizes = [1, 8, 16], strides = [1, 1, 1]} : vector<2x8x128xf32> to vector<1x8x16xf32>
    %280 = vector.shape_cast %279 : vector<1x8x16xf32> to vector<8x16xf32>
    %281 = vector.extract_strided_slice %247 {offsets = [1, 0, 64], sizes = [1, 8, 16], strides = [1, 1, 1]} : vector<2x8x128xf32> to vector<1x8x16xf32>
    %282 = vector.shape_cast %281 : vector<1x8x16xf32> to vector<8x16xf32>
    %283 = vector.extract_strided_slice %247 {offsets = [1, 0, 80], sizes = [1, 8, 16], strides = [1, 1, 1]} : vector<2x8x128xf32> to vector<1x8x16xf32>
    %284 = vector.shape_cast %283 : vector<1x8x16xf32> to vector<8x16xf32>
    %285 = vector.extract_strided_slice %247 {offsets = [1, 0, 96], sizes = [1, 8, 16], strides = [1, 1, 1]} : vector<2x8x128xf32> to vector<1x8x16xf32>
    %286 = vector.shape_cast %285 : vector<1x8x16xf32> to vector<8x16xf32>
    %287 = vector.extract_strided_slice %247 {offsets = [1, 0, 112], sizes = [1, 8, 16], strides = [1, 1, 1]} : vector<2x8x128xf32> to vector<1x8x16xf32>
    %288 = vector.shape_cast %287 : vector<1x8x16xf32> to vector<8x16xf32>
    %289 = vector.shape_cast %274 : vector<8x16xf32> to vector<1x8x16xf32>
    %290 = vector.shape_cast %276 : vector<8x16xf32> to vector<1x8x16xf32>
    %291 = vector.shape_cast %278 : vector<8x16xf32> to vector<1x8x16xf32>
    %292 = vector.shape_cast %280 : vector<8x16xf32> to vector<1x8x16xf32>
    %293 = vector.shape_cast %282 : vector<8x16xf32> to vector<1x8x16xf32>
    %294 = vector.shape_cast %284 : vector<8x16xf32> to vector<1x8x16xf32>
    %295 = vector.shape_cast %286 : vector<8x16xf32> to vector<1x8x16xf32>
    %296 = vector.shape_cast %288 : vector<8x16xf32> to vector<1x8x16xf32>
    %297 = tpu.concatenate %289, %290, %291, %292, %293, %294, %295, %296 in 0 : vector<1x8x16xf32>, vector<1x8x16xf32>, vector<1x8x16xf32>, vector<1x8x16xf32>, vector<1x8x16xf32>, vector<1x8x16xf32>, vector<1x8x16xf32>, vector<1x8x16xf32> -> vector<8x8x16xf32>
    "tpu.trace_start"() <{level = 10 : i32, message = "gid,gjd->gij"}> : () -> ()
    %cst_52 = arith.constant dense<0.000000e+00> : vector<8x64x8xf32>
    %298 = tpu.matmul %246, %272, %cst_52 {dimension_numbers = #tpu.dot_dimension_numbers<[2], [2], [1], [1], [0, 0, 0, 1, 1, 1], [0], [0]>} : vector<8x64x16xf32>, vector<8x8x16xf32>, vector<8x64x8xf32> -> vector<8x64x8xf32>
    "tpu.trace_stop"() : () -> ()
    %cst_53 = arith.constant 2.500000e-01 : f32
    %299 = vector.broadcast %cst_53 : f32 to vector<8x64x8xf32>
    %300 = arith.mulf %298, %299 : vector<8x64x8xf32>
    %cst_54 = arith.constant dense<0xFF800000> : vector<8x64xf32>
    %301 = vector.multi_reduction <maximumf>, %300, %cst_54 [2] : vector<8x64x8xf32> to vector<8x64xf32>
    %302 = vector.shape_cast %301 : vector<8x64xf32> to vector<8x64x1xf32>
    %303 = vector.broadcast %302 : vector<8x64x1xf32> to vector<8x64x8xf32>
    %304 = arith.subf %300, %303 : vector<8x64x8xf32>
    %305 = math.exp %304 : vector<8x64x8xf32>
    %cst_55 = arith.constant dense<0.000000e+00> : vector<8x64xf32>
    %306 = vector.multi_reduction <add>, %305, %cst_55 [2] : vector<8x64x8xf32> to vector<8x64xf32>
    %307 = vector.shape_cast %306 : vector<8x64xf32> to vector<8x64x1xf32>
    %308 = tpu.reciprocal %307 : vector<8x64x1xf32> -> vector<8x64x1xf32>
    %309 = vector.broadcast %308 : vector<8x64x1xf32> to vector<8x64x8xf32>
    %310 = arith.mulf %305, %309 : vector<8x64x8xf32>
    "tpu.trace_start"() <{level = 10 : i32, message = "gij,gjd->gid"}> : () -> ()
    %cst_56 = arith.constant dense<0.000000e+00> : vector<8x64x16xf32>
    %311 = tpu.matmul %310, %297, %cst_56 {dimension_numbers = #tpu.dot_dimension_numbers<[2], [1], [1], [2], [0, 0, 0, 1, 1, 2], [0], [0]>} : vector<8x64x8xf32>, vector<8x8x16xf32>, vector<8x64x16xf32> -> vector<8x64x16xf32>
    "tpu.trace_stop"() : () -> ()
    %c128_57 = arith.constant 128 : index
    %c0_58 = arith.constant 0 : index
    %312 = vector.load %arg4[%c128_57, %c0_58] : memref<448x64xf32, #tpu.memory_space<vmem>>, vector<64x64xf32>
    %313 = vector.extract_strided_slice %311 {offsets = [0, 0, 0], sizes = [1, 64, 16], strides = [1, 1, 1]} : vector<8x64x16xf32> to vector<1x64x16xf32>
    %314 = vector.shape_cast %313 : vector<1x64x16xf32> to vector<64x16xf32>
    %315 = vector.extract_strided_slice %312 {offsets = [0, 0], sizes = [16, 64], strides = [1, 1]} : vector<64x64xf32> to vector<16x64xf32>
    %cst_59 = arith.constant dense<0.000000e+00> : vector<64x64xf32>
    %316 = tpu.matmul %314, %315, %cst_59 {dimension_numbers = #tpu.dot_dimension_numbers<[1], [0], [0], [1], [0, 0, 1, 1], [], []>} : vector<64x16xf32>, vector<16x64xf32>, vector<64x64xf32> -> vector<64x64xf32>
    %317 = vector.extract_strided_slice %311 {offsets = [1, 0, 0], sizes = [1, 64, 16], strides = [1, 1, 1]} : vector<8x64x16xf32> to vector<1x64x16xf32>
    %318 = vector.shape_cast %317 : vector<1x64x16xf32> to vector<64x16xf32>
    %319 = vector.extract_strided_slice %312 {offsets = [16, 0], sizes = [16, 64], strides = [1, 1]} : vector<64x64xf32> to vector<16x64xf32>
    %cst_60 = arith.constant dense<0.000000e+00> : vector<64x64xf32>
    %320 = tpu.matmul %318, %319, %cst_60 {dimension_numbers = #tpu.dot_dimension_numbers<[1], [0], [0], [1], [0, 0, 1, 1], [], []>} : vector<64x16xf32>, vector<16x64xf32>, vector<64x64xf32> -> vector<64x64xf32>
    %321 = arith.addf %316, %320 : vector<64x64xf32>
    %322 = vector.extract_strided_slice %311 {offsets = [2, 0, 0], sizes = [1, 64, 16], strides = [1, 1, 1]} : vector<8x64x16xf32> to vector<1x64x16xf32>
    %323 = vector.shape_cast %322 : vector<1x64x16xf32> to vector<64x16xf32>
    %324 = vector.extract_strided_slice %312 {offsets = [32, 0], sizes = [16, 64], strides = [1, 1]} : vector<64x64xf32> to vector<16x64xf32>
    %cst_61 = arith.constant dense<0.000000e+00> : vector<64x64xf32>
    %325 = tpu.matmul %323, %324, %cst_61 {dimension_numbers = #tpu.dot_dimension_numbers<[1], [0], [0], [1], [0, 0, 1, 1], [], []>} : vector<64x16xf32>, vector<16x64xf32>, vector<64x64xf32> -> vector<64x64xf32>
    %326 = arith.addf %321, %325 : vector<64x64xf32>
    %327 = vector.extract_strided_slice %311 {offsets = [3, 0, 0], sizes = [1, 64, 16], strides = [1, 1, 1]} : vector<8x64x16xf32> to vector<1x64x16xf32>
    %328 = vector.shape_cast %327 : vector<1x64x16xf32> to vector<64x16xf32>
    %329 = vector.extract_strided_slice %312 {offsets = [48, 0], sizes = [16, 64], strides = [1, 1]} : vector<64x64xf32> to vector<16x64xf32>
    %cst_62 = arith.constant dense<0.000000e+00> : vector<64x64xf32>
    %330 = tpu.matmul %328, %329, %cst_62 {dimension_numbers = #tpu.dot_dimension_numbers<[1], [0], [0], [1], [0, 0, 1, 1], [], []>} : vector<64x16xf32>, vector<16x64xf32>, vector<64x64xf32> -> vector<64x64xf32>
    %331 = arith.addf %326, %330 : vector<64x64xf32>
    %332 = vector.extract_strided_slice %311 {offsets = [4, 0, 0], sizes = [1, 64, 16], strides = [1, 1, 1]} : vector<8x64x16xf32> to vector<1x64x16xf32>
    %333 = vector.shape_cast %332 : vector<1x64x16xf32> to vector<64x16xf32>
    %334 = vector.extract_strided_slice %312 {offsets = [0, 0], sizes = [16, 64], strides = [1, 1]} : vector<64x64xf32> to vector<16x64xf32>
    %cst_63 = arith.constant dense<0.000000e+00> : vector<64x64xf32>
    %335 = tpu.matmul %333, %334, %cst_63 {dimension_numbers = #tpu.dot_dimension_numbers<[1], [0], [0], [1], [0, 0, 1, 1], [], []>} : vector<64x16xf32>, vector<16x64xf32>, vector<64x64xf32> -> vector<64x64xf32>
    %336 = vector.extract_strided_slice %311 {offsets = [5, 0, 0], sizes = [1, 64, 16], strides = [1, 1, 1]} : vector<8x64x16xf32> to vector<1x64x16xf32>
    %337 = vector.shape_cast %336 : vector<1x64x16xf32> to vector<64x16xf32>
    %338 = vector.extract_strided_slice %312 {offsets = [16, 0], sizes = [16, 64], strides = [1, 1]} : vector<64x64xf32> to vector<16x64xf32>
    %cst_64 = arith.constant dense<0.000000e+00> : vector<64x64xf32>
    %339 = tpu.matmul %337, %338, %cst_64 {dimension_numbers = #tpu.dot_dimension_numbers<[1], [0], [0], [1], [0, 0, 1, 1], [], []>} : vector<64x16xf32>, vector<16x64xf32>, vector<64x64xf32> -> vector<64x64xf32>
    %340 = arith.addf %335, %339 : vector<64x64xf32>
    %341 = vector.extract_strided_slice %311 {offsets = [6, 0, 0], sizes = [1, 64, 16], strides = [1, 1, 1]} : vector<8x64x16xf32> to vector<1x64x16xf32>
    %342 = vector.shape_cast %341 : vector<1x64x16xf32> to vector<64x16xf32>
    %343 = vector.extract_strided_slice %312 {offsets = [32, 0], sizes = [16, 64], strides = [1, 1]} : vector<64x64xf32> to vector<16x64xf32>
    %cst_65 = arith.constant dense<0.000000e+00> : vector<64x64xf32>
    %344 = tpu.matmul %342, %343, %cst_65 {dimension_numbers = #tpu.dot_dimension_numbers<[1], [0], [0], [1], [0, 0, 1, 1], [], []>} : vector<64x16xf32>, vector<16x64xf32>, vector<64x64xf32> -> vector<64x64xf32>
    %345 = arith.addf %340, %344 : vector<64x64xf32>
    %346 = vector.extract_strided_slice %311 {offsets = [7, 0, 0], sizes = [1, 64, 16], strides = [1, 1, 1]} : vector<8x64x16xf32> to vector<1x64x16xf32>
    %347 = vector.shape_cast %346 : vector<1x64x16xf32> to vector<64x16xf32>
    %348 = vector.extract_strided_slice %312 {offsets = [48, 0], sizes = [16, 64], strides = [1, 1]} : vector<64x64xf32> to vector<16x64xf32>
    %cst_66 = arith.constant dense<0.000000e+00> : vector<64x64xf32>
    %349 = tpu.matmul %347, %348, %cst_66 {dimension_numbers = #tpu.dot_dimension_numbers<[1], [0], [0], [1], [0, 0, 1, 1], [], []>} : vector<64x16xf32>, vector<16x64xf32>, vector<64x64xf32> -> vector<64x64xf32>
    %350 = arith.addf %345, %349 : vector<64x64xf32>
    %351 = tpu.concatenate %331, %350 in 0 : vector<64x64xf32>, vector<64x64xf32> -> vector<128x64xf32>
    %352 = arith.addf %190, %351 : vector<128x64xf32>
    %c6 = arith.constant 6 : index
    %c0_67 = arith.constant 0 : index
    %353 = vector.load %arg6[%c6, %c0_67] : memref<14x512xf32, #tpu.memory_space<vmem>>, vector<1x64xf32>
    %354 = vector.broadcast %353 : vector<1x64xf32> to vector<128x64xf32>
    %355 = arith.addf %352, %354 : vector<128x64xf32>
    %c7 = arith.constant 7 : index
    %c0_68 = arith.constant 0 : index
    %356 = vector.load %arg6[%c7, %c0_68] : memref<14x512xf32, #tpu.memory_space<vmem>>, vector<1x64xf32>
    %c8 = arith.constant 8 : index
    %c0_69 = arith.constant 0 : index
    %357 = vector.load %arg6[%c8, %c0_69] : memref<14x512xf32, #tpu.memory_space<vmem>>, vector<1x64xf32>
    %cst_70 = arith.constant dense<0.000000e+00> : vector<128xf32>
    %358 = vector.multi_reduction <add>, %355, %cst_70 [1] : vector<128x64xf32> to vector<128xf32>
    %359 = vector.shape_cast %358 : vector<128xf32> to vector<128x1xf32>
    %cst_71 = arith.constant 6.400000e+01 : f32
    %360 = vector.broadcast %cst_71 : f32 to vector<128x1xf32>
    %361 = arith.divf %359, %360 : vector<128x1xf32>
    %362 = vector.broadcast %361 : vector<128x1xf32> to vector<128x64xf32>
    %363 = arith.subf %355, %362 : vector<128x64xf32>
    %364 = arith.mulf %363, %363 : vector<128x64xf32>
    %cst_72 = arith.constant dense<0.000000e+00> : vector<128xf32>
    %365 = vector.multi_reduction <add>, %364, %cst_72 [1] : vector<128x64xf32> to vector<128xf32>
    %366 = vector.shape_cast %365 : vector<128xf32> to vector<128x1xf32>
    %cst_73 = arith.constant 6.400000e+01 : f32
    %367 = vector.broadcast %cst_73 : f32 to vector<128x1xf32>
    %368 = arith.divf %366, %367 : vector<128x1xf32>
    %369 = vector.broadcast %361 : vector<128x1xf32> to vector<128x64xf32>
    %370 = arith.subf %355, %369 : vector<128x64xf32>
    %cst_74 = arith.constant 9.99999974E-6 : f32
    %371 = vector.broadcast %cst_74 : f32 to vector<128x1xf32>
    %372 = arith.addf %368, %371 : vector<128x1xf32>
    %373 = math.rsqrt %372 : vector<128x1xf32>
    %374 = vector.broadcast %373 : vector<128x1xf32> to vector<128x64xf32>
    %375 = arith.mulf %370, %374 : vector<128x64xf32>
    %376 = vector.broadcast %356 : vector<1x64xf32> to vector<128x64xf32>
    %377 = arith.mulf %375, %376 : vector<128x64xf32>
    %378 = vector.broadcast %357 : vector<1x64xf32> to vector<128x64xf32>
    %379 = arith.addf %377, %378 : vector<128x64xf32>
    %380 = vector.extract_strided_slice %379 {offsets = [0, 0], sizes = [64, 64], strides = [1, 1]} : vector<128x64xf32> to vector<64x64xf32>
    %c0_75 = arith.constant 0 : index
    %c256 = arith.constant 256 : index
    %381 = vector.load %arg3[%c0_75, %c256] : memref<64x832xf32, #tpu.memory_space<vmem>>, vector<64x256xf32>
    %cst_76 = arith.constant dense<0.000000e+00> : vector<64x256xf32>
    %382 = tpu.matmul %380, %381, %cst_76 {dimension_numbers = #tpu.dot_dimension_numbers<[1], [0], [0], [1], [0, 0, 1, 1], [], []>} : vector<64x64xf32>, vector<64x256xf32>, vector<64x256xf32> -> vector<64x256xf32>
    %c13 = arith.constant 13 : index
    %c256_77 = arith.constant 256 : index
    %383 = vector.load %arg6[%c13, %c256_77] : memref<14x512xf32, #tpu.memory_space<vmem>>, vector<1x256xf32>
    %384 = vector.broadcast %383 : vector<1x256xf32> to vector<64x256xf32>
    %385 = arith.addf %382, %384 : vector<64x256xf32>
    %cst_78 = arith.constant 5.000000e-01 : f32
    %386 = vector.broadcast %cst_78 : f32 to vector<64x256xf32>
    %387 = arith.mulf %386, %385 : vector<64x256xf32>
    %cst_79 = arith.constant 0.707106769 : f32
    %388 = vector.broadcast %cst_79 : f32 to vector<64x256xf32>
    %389 = arith.mulf %385, %388 : vector<64x256xf32>
    %390 = math.erf %389 : vector<64x256xf32>
    %cst_80 = arith.constant 1.000000e+00 : f32
    %391 = vector.broadcast %cst_80 : f32 to vector<64x256xf32>
    %392 = arith.addf %391, %390 : vector<64x256xf32>
    %393 = arith.mulf %387, %392 : vector<64x256xf32>
    %c0_81 = arith.constant 0 : index
    %c0_82 = arith.constant 0 : index
    %394 = vector.load %arg3[%c0_81, %c0_82] : memref<64x832xf32, #tpu.memory_space<vmem>>, vector<64x256xf32>
    %cst_83 = arith.constant dense<0.000000e+00> : vector<64x256xf32>
    %395 = tpu.matmul %380, %394, %cst_83 {dimension_numbers = #tpu.dot_dimension_numbers<[1], [0], [0], [1], [0, 0, 1, 1], [], []>} : vector<64x64xf32>, vector<64x256xf32>, vector<64x256xf32> -> vector<64x256xf32>
    %c13_84 = arith.constant 13 : index
    %c0_85 = arith.constant 0 : index
    %396 = vector.load %arg6[%c13_84, %c0_85] : memref<14x512xf32, #tpu.memory_space<vmem>>, vector<1x256xf32>
    %397 = vector.broadcast %396 : vector<1x256xf32> to vector<64x256xf32>
    %398 = arith.addf %395, %397 : vector<64x256xf32>
    %399 = arith.mulf %398, %393 : vector<64x256xf32>
    %c192 = arith.constant 192 : index
    %c0_86 = arith.constant 0 : index
    %400 = vector.load %arg4[%c192, %c0_86] : memref<448x64xf32, #tpu.memory_space<vmem>>, vector<256x64xf32>
    %cst_87 = arith.constant dense<0.000000e+00> : vector<64x64xf32>
    %401 = tpu.matmul %399, %400, %cst_87 {dimension_numbers = #tpu.dot_dimension_numbers<[1], [0], [0], [1], [0, 0, 1, 1], [], []>} : vector<64x256xf32>, vector<256x64xf32>, vector<64x64xf32> -> vector<64x64xf32>
    %402 = vector.extract_strided_slice %379 {offsets = [64, 0], sizes = [64, 64], strides = [1, 1]} : vector<128x64xf32> to vector<64x64xf32>
    %c0_88 = arith.constant 0 : index
    %c256_89 = arith.constant 256 : index
    %403 = vector.load %arg3[%c0_88, %c256_89] : memref<64x832xf32, #tpu.memory_space<vmem>>, vector<64x256xf32>
    %cst_90 = arith.constant dense<0.000000e+00> : vector<64x256xf32>
    %404 = tpu.matmul %402, %403, %cst_90 {dimension_numbers = #tpu.dot_dimension_numbers<[1], [0], [0], [1], [0, 0, 1, 1], [], []>} : vector<64x64xf32>, vector<64x256xf32>, vector<64x256xf32> -> vector<64x256xf32>
    %c13_91 = arith.constant 13 : index
    %c256_92 = arith.constant 256 : index
    %405 = vector.load %arg6[%c13_91, %c256_92] : memref<14x512xf32, #tpu.memory_space<vmem>>, vector<1x256xf32>
    %406 = vector.broadcast %405 : vector<1x256xf32> to vector<64x256xf32>
    %407 = arith.addf %404, %406 : vector<64x256xf32>
    %cst_93 = arith.constant 5.000000e-01 : f32
    %408 = vector.broadcast %cst_93 : f32 to vector<64x256xf32>
    %409 = arith.mulf %408, %407 : vector<64x256xf32>
    %cst_94 = arith.constant 0.707106769 : f32
    %410 = vector.broadcast %cst_94 : f32 to vector<64x256xf32>
    %411 = arith.mulf %407, %410 : vector<64x256xf32>
    %412 = math.erf %411 : vector<64x256xf32>
    %cst_95 = arith.constant 1.000000e+00 : f32
    %413 = vector.broadcast %cst_95 : f32 to vector<64x256xf32>
    %414 = arith.addf %413, %412 : vector<64x256xf32>
    %415 = arith.mulf %409, %414 : vector<64x256xf32>
    %c0_96 = arith.constant 0 : index
    %c0_97 = arith.constant 0 : index
    %416 = vector.load %arg3[%c0_96, %c0_97] : memref<64x832xf32, #tpu.memory_space<vmem>>, vector<64x256xf32>
    %cst_98 = arith.constant dense<0.000000e+00> : vector<64x256xf32>
    %417 = tpu.matmul %402, %416, %cst_98 {dimension_numbers = #tpu.dot_dimension_numbers<[1], [0], [0], [1], [0, 0, 1, 1], [], []>} : vector<64x64xf32>, vector<64x256xf32>, vector<64x256xf32> -> vector<64x256xf32>
    %c13_99 = arith.constant 13 : index
    %c0_100 = arith.constant 0 : index
    %418 = vector.load %arg6[%c13_99, %c0_100] : memref<14x512xf32, #tpu.memory_space<vmem>>, vector<1x256xf32>
    %419 = vector.broadcast %418 : vector<1x256xf32> to vector<64x256xf32>
    %420 = arith.addf %417, %419 : vector<64x256xf32>
    %421 = arith.mulf %420, %415 : vector<64x256xf32>
    %c192_101 = arith.constant 192 : index
    %c0_102 = arith.constant 0 : index
    %422 = vector.load %arg4[%c192_101, %c0_102] : memref<448x64xf32, #tpu.memory_space<vmem>>, vector<256x64xf32>
    %cst_103 = arith.constant dense<0.000000e+00> : vector<64x64xf32>
    %423 = tpu.matmul %421, %422, %cst_103 {dimension_numbers = #tpu.dot_dimension_numbers<[1], [0], [0], [1], [0, 0, 1, 1], [], []>} : vector<64x256xf32>, vector<256x64xf32>, vector<64x64xf32> -> vector<64x64xf32>
    %424 = tpu.concatenate %401, %423 in 0 : vector<64x64xf32>, vector<64x64xf32> -> vector<128x64xf32>
    %425 = arith.addf %355, %424 : vector<128x64xf32>
    %c9 = arith.constant 9 : index
    %c0_104 = arith.constant 0 : index
    %426 = vector.load %arg6[%c9, %c0_104] : memref<14x512xf32, #tpu.memory_space<vmem>>, vector<1x64xf32>
    %427 = vector.broadcast %426 : vector<1x64xf32> to vector<128x64xf32>
    %428 = arith.addf %425, %427 : vector<128x64xf32>
    %c0_105 = arith.constant 0 : index
    %c512 = arith.constant 512 : index
    %429 = vector.load %arg3[%c0_105, %c512] : memref<64x832xf32, #tpu.memory_space<vmem>>, vector<64x128xf32>
    %cst_106 = arith.constant dense<0.000000e+00> : vector<128x128xf32>
    %430 = tpu.matmul %428, %429, %cst_106 {dimension_numbers = #tpu.dot_dimension_numbers<[1], [0], [0], [1], [0, 0, 1, 1], [], []>} : vector<128x64xf32>, vector<64x128xf32>, vector<128x128xf32> -> vector<128x128xf32>
    %c12 = arith.constant 12 : index
    %c0_107 = arith.constant 0 : index
    %431 = vector.load %arg6[%c12, %c0_107] : memref<14x512xf32, #tpu.memory_space<vmem>>, vector<1x128xf32>
    %432 = vector.broadcast %431 : vector<1x128xf32> to vector<128x128xf32>
    %433 = arith.addf %430, %432 : vector<128x128xf32>
    %434 = vector.shape_cast %433 : vector<128x128xf32> to vector<2x64x128xf32>
    %c0_108 = arith.constant 0 : index
    %c0_109 = arith.constant 0 : index
    %c0_110 = arith.constant 0 : index
    %435 = vector.load %arg1[%c0_108, %c0_109, %c0_110] : memref<2x64x128xf32, #tpu.memory_space<vmem>>, vector<2x64x128xf32>
    %436 = arith.addf %434, %435 : vector<2x64x128xf32>
    %c0_111 = arith.constant 0 : index
    %c0_112 = arith.constant 0 : index
    %c0_113 = arith.constant 0 : index
    %437 = vector.load %arg7[%c0_111, %c0_112, %c0_113] : memref<2x64x128xf32, #tpu.memory_space<vmem>>, vector<2x64x128xf32>
    tpu.vector_store %arg7[%c0_111, %c0_112, %c0_113], %436 {strides = array<i32>} : memref<2x64x128xf32, #tpu.memory_space<vmem>>, vector<2x64x128xf32>,
    return
  }
  func.func @transform_0(%arg0: i32) -> (i32, i32, i32) {
    %c0_i32 = arith.constant 0 : i32
    %c0_i32_0 = arith.constant 0 : i32
    %c0_i32_1 = arith.constant 0 : i32
    return %arg0, %c0_i32, %c0_i32_0 : i32, i32, i32
  }
  func.func @transform_1(%arg0: i32) -> (i32, i32, i32) {
    %c0_i32 = arith.constant 0 : i32
    %c0_i32_0 = arith.constant 0 : i32
    %c0_i32_1 = arith.constant 0 : i32
    return %arg0, %c0_i32, %c0_i32_0 : i32, i32, i32
  }
  func.func @transform_2(%arg0: i32) -> (i32, i32) {
    %c0_i32 = arith.constant 0 : i32
    %c0_i32_0 = arith.constant 0 : i32
    %c0_i32_1 = arith.constant 0 : i32
    return %c0_i32, %c0_i32_0 : i32, i32
  }
  func.func @transform_3(%arg0: i32) -> (i32, i32) {
    %c0_i32 = arith.constant 0 : i32
    %c0_i32_0 = arith.constant 0 : i32
    %c0_i32_1 = arith.constant 0 : i32
    return %c0_i32, %c0_i32_0 : i32, i32
  }
  func.func @transform_4(%arg0: i32) -> (i32, i32) {
    %c0_i32 = arith.constant 0 : i32
    %c0_i32_0 = arith.constant 0 : i32
    %c0_i32_1 = arith.constant 0 : i32
    return %c0_i32, %c0_i32_0 : i32, i32
  }
  func.func @transform_5(%arg0: i32) -> (i32, i32) {
    %c0_i32 = arith.constant 0 : i32
    %c0_i32_0 = arith.constant 0 : i32
    %c0_i32_1 = arith.constant 0 : i32
    return %c0_i32, %c0_i32_0 : i32, i32
  }
  func.func @transform_6(%arg0: i32) -> (i32, i32, i32) {
    %c0_i32 = arith.constant 0 : i32
    %c0_i32_0 = arith.constant 0 : i32
    %c0_i32_1 = arith.constant 0 : i32
    return %arg0, %c0_i32, %c0_i32_0 : i32, i32, i32
  }
}

</mosaic_0001>

<bundles_post_ra>
// kernel: _spatial_transformer_jit.1
= control target key start
LH: loop header
LB: loop body
LE: loop exit
PB: predicated region body
PF: predicated region fallthrough
CT: control target
= control target key end

     0   :  { %vm346_vm0 = vcmask 523264   ;;  %vm1100_vm1 = vcmask 130048   ;;  %s15402_s7 = smov 112   ;;  %s15403_s8 = smov 96   ;;  %vm6924_vm3 = vcmask 64512   ;;  %s20530_s4 = inlined_call_operand.vmem [shape: f32[128,192], index: 4, kind: input, shape index: {}]   ;;  %s20531_s0 = inlined_call_operand.vmem [shape: f32[2,64,128], index: 0, kind: input, shape index: {}]   ;;  %s20532_s5 = inlined_call_operand.vmem [shape: f32[14,512], index: 5, kind: input, shape index: {}]   ;;  %s20533_s2 = inlined_call_operand.vmem [shape: f32[64,832], index: 2, kind: input, shape index: {}]   ;;  %s20534_s3 = inlined_call_operand.vmem [shape: f32[448,64], index: 3, kind: input, shape index: {}]   ;;  %s20535_s1 = inlined_call_operand.vmem [shape: f32[2,8,128], index: 1, kind: input, shape index: {}]   ;;  %s20536_s6 = inlined_call_operand.vmem [shape: f32[2,64,128], index: 6, kind: output, shape index: {}]  }
   0x1   :  { %v182_v0 = vld [vmem:[%s20530_s4 + $0x8] sm:$0xff]  ;;  %v183_v1 = vld [vmem:[%s20530_s4 + $0x18] sm:$0xff]  ;;  %v15462_v9 = vld [vmem:[%s20531_s0] sm:$0xff]  ;;  %s15404_s9 = smov 64   ;;  %s15405_s10 = smov 80  }
   0x2   :  { %v184_v2 = vld [vmem:[%s20530_s4 + $0x28] sm:$0xff]  ;;  %v13718_v3 = vpack.c.bf16 %v183_v1, %v182_v0  ;;  %v185_v4 = vld [vmem:[%s20530_s4 + $0x38] sm:$0xff]  ;;  %v15478_v13 = vld [vmem:[%s20531_s0 + $0x10] sm:$0xff] }
   0x3   :  { %v13722_v5 = vpack.c.bf16 %v185_v4, %v184_v2  ;;  %v186_v6 = vld [vmem:[%s20530_s4 + $0x48] sm:$0xff]  ;;  %v187_v7 = vld [vmem:[%s20530_s4 + $0x58] sm:$0xff]  ;;  %v15491_v17 = vld [vmem:[%s20531_s0 + $0x40] sm:$0xff] }
   0x4   :  { %13719 = vmatprep.subr.bf16.mxu0 %v13718_v3  ;;  %v13726_v8 = vpack.c.bf16 %v187_v7, %v186_v6  ;;  %v15467_v10 = vld [vmem:[%s20531_s0 + $0x8] sm:$0xff]  ;;  %v189_v12 = vld [vmem:[%s20530_s4 + $0x78] sm:$0xff]  ;;  %v27_v19 = vld [vmem:[%s20531_s0 + $0x20] sm:$0xff] }
   0x5   :  { %13721 = vmatpush3.bf16.msra.mxu0 %v13718_v3  ;;  %v188_v11 = vld [vmem:[%s20530_s4 + $0x68] sm:$0xff]  ;;  %v39_v14 = vadd.f32 %v15467_v10, %v15462_v9  ;;  %v15485_v15 = vld [vmem:[%s20531_s0 + $0x18] sm:$0xff]  ;;  %v15504_v21 = vld [vmem:[%s20531_s0 + $0x50] sm:$0xff] }
   0x6   :  { %13723 = vmatprep.subr.bf16.mxu0 %v13722_v5  ;;  %v13730_v18 = vpack.c.bf16 %v189_v12, %v188_v11  ;;  %v15499_v20 = vld [vmem:[%s20531_s0 + $0x48] sm:$0xff]  ;;  %v191_v23 = vld [vmem:[%s20530_s4 + $0x98] sm:$0xff]  ;;  %v29_v31 = vld [vmem:[%s20531_s0 + $0x30] sm:$0xff] }
   0x7   :  { %v40_v16 = vadd.f32 %v39_v14, %v15478_v13  ;;  %v190_v22 = vld [vmem:[%s20530_s4 + $0x88] sm:$0xff]  ;;  %v52_v25 = vadd.f32 %v15499_v20, %v15491_v17  ;;  %v15521_v27 = vld [vmem:[%s20531_s0 + $0x58] sm:$0xff]  ;;  %v15530_v32 = vld [vmem:[%s20531_s0 + $0x60] sm:$0xff] }
   0x8   :  { %v28_v26 = vld [vmem:[%s20531_s0 + $0x28] sm:$0xff]  ;;  %v13734_v30 = vpack.c.bf16 %v191_v23, %v190_v22  ;;  %v193_v34 = vld [vmem:[%s20530_s4 + $0xb8] sm:$0xff]  ;;  %v15551_v42 = vld [vmem:[%s20531_s0 + $0x70] sm:$0xff] }
   0x9   :  { %13725 = vmatpush3.bf16.msra.mxu0 %v13722_v5  ;;  %v41_v24 = vadd.f32 %v40_v16, %v15485_v15  ;;  %v53_v29 = vadd.f32 %v52_v25, %v15504_v21  ;;  %v192_v33 = vld [vmem:[%s20530_s4 + $0xa8] sm:$0xff]  ;;  %v30_v37 = vld [vmem:[%s20531_s0 + $0x38] sm:$0xff]  ;;  %vm16100_vm2 = vmpackc.low %vm1100_vm1, %vm1100_vm1 }
   0xa   :  { %13727 = vmatprep.subr.bf16.mxu0 %v13726_v8  ;;  %v15545_v38 = vld [vmem:[%s20531_s0 + $0x68] sm:$0xff]  ;;  %v13738_v41 = vpack.c.bf16 %v193_v34, %v192_v33  ;;  %v195_v44 = vld [vmem:[%s20530_s4 + $0xd8] sm:$0xff] }
   0xb   :  { %v42_v28 = vadd.f32 %v41_v24, %v27_v19  ;;  %v54_v36 = vadd.f32 %v53_v29, %v15521_v27  ;;  %v194_v43 = vld [vmem:[%s20530_s4 + $0xc8] sm:$0xff]  ;;  %v15563_v47 = vld [vmem:[%s20531_s0 + $0x78] sm:$0xff] }
   0xc   :  { %v13742_v50 = vpack.c.bf16 %v195_v44, %v194_v43  ;;  %v196_v51 = vld [vmem:[%s20530_s4 + $0xe8] sm:$0xff]  ;;  %v197_v52 = vld [vmem:[%s20530_s4 + $0xf8] sm:$0xff] }
   0xd   :  { %13729 = vmatpush3.bf16.msra.mxu0 %v13726_v8  ;;  %v43_v35 = vadd.f32 %v42_v28, %v28_v26  ;;  %v55_v40 = vadd.f32 %v54_v36, %v15530_v32  ;;  %v13746_v57 = vpack.c.bf16 %v197_v52, %v196_v51 }
   0xe   :  { %13731 = vmatprep.subr.bf16.mxu0 %v13730_v18 }
   0xf   :  { %v44_v39 = vadd.f32 %v43_v35, %v29_v31  ;;  %v56_v46 = vadd.f32 %v55_v40, %v15545_v38 }
  0x11   :  { %13733 = vmatpush3.bf16.msra.mxu0 %v13730_v18  ;;  %v45_v45 = vadd.f32 %v44_v39, %v30_v37  ;;  %v57_v49 = vadd.f32 %v56_v46, %v15551_v42 }
  0x12   :  { %13735 = vmatprep.subr.bf16.mxu0 %v13734_v30 }
  0x13   :  { %v46_v48 = vrot.slane %v45_v45, 4  ;;  %v58_v54 = vadd.f32 %v57_v49, %v15563_v47 }
  0x15   :  { %13737 = vmatpush3.bf16.msra.mxu0 %v13734_v30  ;;  %v47_v53 = vadd.f32 %v46_v48, %v45_v45  ;;  %v59_v56 = vrot.slane %v58_v54, 4 }
  0x16   :  { %13739 = vmatprep.subr.bf16.mxu0 %v13738_v41 }
  0x17   :  { %v48_v55 = vrot.slane %v47_v53, 2  ;;  %v60_v59 = vadd.f32 %v59_v56, %v58_v54 }
  0x19   :  { %13741 = vmatpush3.bf16.msra.mxu0 %v13738_v41  ;;  %v49_v58 = vadd.f32 %v48_v55, %v47_v53  ;;  %v61_v61 = vrot.slane %v60_v59, 2 }
  0x1a   :  { %13743 = vmatprep.subr.bf16.mxu0 %v13742_v50 }
  0x1b   :  { %v50_v60 = vrot.slane %v49_v58, 1  ;;  %v62_v63 = vadd.f32 %v61_v61, %v60_v59 }
  0x1d   :  { %13745 = vmatpush3.bf16.msra.mxu0 %v13742_v50  ;;  %v51_v62 = vadd.f32 %v50_v60, %v49_v58  ;;  %v63_v1 = vrot.slane %v62_v63, 1 }
  0x1e   :  { %13747 = vmatprep.subr.bf16.mxu0 %v13746_v57 }
  0x1f   :  { %v66_v0 = vmul.f32 0.015625, %v51_v62 }
  0x21   :  { %13749 = vmatpush3.bf16.msra.mxu0 %v13746_v57  ;;  %v15574_v2 = vsub.f32 %v15462_v9, %v66_v0  ;;  %v15577_v3 = vsub.f32 %v15467_v10, %v66_v0  ;;  %v15580_v4 = vsub.f32 %v15478_v13, %v66_v0  ;;  %v15583_v5 = vsub.f32 %v15485_v15, %v66_v0 }
  0x22   :  { %v15585_v6 = vsub.f32 %v27_v19, %v66_v0  ;;  %v15593_v11 = vsub.f32 %v28_v26, %v66_v0  ;;  %v64_v13 = vadd.f32 %v63_v1, %v62_v63  ;;  %v15597_v14 = vsub.f32 %v29_v31, %v66_v0 }
  0x23   :  { %v84_v7 = vmul.f32 %v15574_v2, %v15574_v2  ;;  %v85_v8 = vmul.f32 %v15577_v3, %v15577_v3  ;;  %v86_v9 = vmul.f32 %v15580_v4, %v15580_v4  ;;  %v87_v10 = vmul.f32 %v15583_v5, %v15583_v5 }
  0x24   :  { %v88_v15 = vmul.f32 %v15585_v6, %v15585_v6  ;;  %v67_v18 = vmul.f32 0.015625, %v64_v13  ;;  %v15601_v19 = vsub.f32 %v30_v37, %v66_v0  ;;  %v89_v22 = vmul.f32 %v15593_v11, %v15593_v11 }
  0x25   :  { %v100_v12 = vadd.f32 %v85_v8, %v84_v7  ;;  %v90_v28 = vmul.f32 %v15597_v14, %v15597_v14  ;;  %v148_v8 = vld [vmem:[%s20532_s5 + $0x22] ss:$0 sm:$0xff] }
  0x26   :  { %v15606_v24 = vsub.f32 %v15491_v17, %v67_v18  ;;  %v15609_v25 = vsub.f32 %v15499_v20, %v67_v18  ;;  %v15612_v26 = vsub.f32 %v15504_v21, %v67_v18  ;;  %v15617_v29 = vsub.f32 %v15521_v27, %v67_v18 }
  0x27   :  { %v101_v16 = vadd.f32 %v100_v12, %v86_v9  ;;  %v15620_v31 = vsub.f32 %v15530_v32, %v67_v18  ;;  %v91_v21 = vmul.f32 %v15601_v19, %v15601_v19  ;;  %v15631_v27 = vsub.f32 %v15545_v38, %v67_v18 }
  0x28   :  { %v92_v17 = vmul.f32 %v15606_v24, %v15606_v24  ;;  %v93_v20 = vmul.f32 %v15609_v25, %v15609_v25  ;;  %v94_v33 = vmul.f32 %v15612_v26, %v15612_v26  ;;  %v95_v32 = vmul.f32 %v15617_v29, %v15617_v29 }
  0x29   :  { %v102_v23 = vadd.f32 %v101_v16, %v87_v10  ;;  %v15636_v37 = vsub.f32 %v15551_v42, %v67_v18  ;;  %v96_v39 = vmul.f32 %v15620_v31, %v15620_v31  ;;  %v15641_v43 = vsub.f32 %v15563_v47, %v67_v18 }
  0x2a   :  { %v113_v35 = vadd.f32 %v93_v20, %v92_v17  ;;  %v97_v38 = vmul.f32 %v15631_v27, %v15631_v27 }
  0x2b   :  { %v103_v30 = vadd.f32 %v102_v23, %v88_v15  ;;  %v98_v46 = vmul.f32 %v15636_v37, %v15636_v37  ;;  %v99_v42 = vmul.f32 %v15641_v43, %v15641_v43  ;;  %v165_v15 = vld [vmem:[%s20532_s5 + $0x23] ss:$0 sm:$0xff] }
  0x2c   :  { %v114_v40 = vadd.f32 %v113_v35, %v94_v33 }
  0x2d   :  { %v104_v34 = vadd.f32 %v103_v30, %v89_v22 }
  0x2e   :  { %v115_v44 = vadd.f32 %v114_v40, %v95_v32 }
  0x2f   :  { %v105_v36 = vadd.f32 %v104_v34, %v90_v28 }
  0x30   :  { %v116_v48 = vadd.f32 %v115_v44, %v96_v39 }
  0x31   :  { %v106_v41 = vadd.f32 %v105_v36, %v91_v21 }
  0x32   :  { %v117_v50 = vadd.f32 %v116_v48, %v97_v38 }
  0x33   :  { %v107_v45 = vrot.slane %v106_v41, 4 }
  0x34   :  { %v118_v52 = vadd.f32 %v117_v50, %v98_v46 }
  0x35   :  { %v108_v49 = vadd.f32 %v107_v45, %v106_v41 }
  0x36   :  { %v119_v54 = vadd.f32 %v118_v52, %v99_v42 }
  0x37   :  { %v109_v51 = vrot.slane %v108_v49, 2 }
  0x38   :  { %v120_v55 = vrot.slane %v119_v54, 4 }
  0x39   :  { %v110_v53 = vadd.f32 %v109_v51, %v108_v49 }
  0x3a   :  { %v121_v57 = vadd.f32 %v120_v55, %v119_v54 }
  0x3b   :  { %v111_v47 = vrot.slane %v110_v53, 1 }
  0x3c   :  { %v122_v59 = vrot.slane %v121_v57, 2 }
  0x3d   :  { %v112_v56 = vadd.f32 %v111_v47, %v110_v53 }
  0x3e   :  { %v123_v61 = vadd.f32 %v122_v59, %v121_v57 }
  0x3f   :  { %v126_v58 = vmul.f32 0.015625, %v112_v56 }
  0x40   :  { %v124_v62 = vrot.slane %v123_v61, 1 }
  0x41   :  { %v128_v60 = vadd.f32 1e-06, %v126_v58 }
  0x42   :  { %v125_v63 = vadd.f32 %v124_v62, %v123_v61 }
  0x43   :  { %14723 = vrsqrt.f32 %v128_v60 }
  0x44   :  { %v127_v0 = vmul.f32 0.015625, %v125_v63 }
  0x46   :  { %v129_v1 = vadd.f32 1e-06, %v127_v0 }
  0x48   :  { %14725 = vrsqrt.f32 %v129_v1 }
  0x4d   :  { %v14724_v7 = vpop.eup %14723 }
  0x4e   :  { %v132_v9 = vmul.f32 %v14724_v7, %v15574_v2  ;;  %v133_v10 = vmul.f32 %v14724_v7, %v15577_v3  ;;  %v134_v12 = vmul.f32 %v14724_v7, %v15580_v4  ;;  %v135_v13 = vmul.f32 %v14724_v7, %v15583_v5 }
  0x4f   :  { %v136_v16 = vmul.f32 %v14724_v7, %v15585_v6  ;;  %v137_v30 = vmul.f32 %v14724_v7, %v15593_v11  ;;  %v138_v2 = vmul.f32 %v14724_v7, %v15597_v14  ;;  %v139_v34 = vmul.f32 %v14724_v7, %v15601_v19 }
  0x50   :  { %v149_v18 = vmul.f32 %v148_v8, %v132_v9  ;;  %v150_v22 = vmul.f32 %v148_v8, %v133_v10  ;;  %v151_v23 = vmul.f32 %v148_v8, %v134_v12  ;;  %v152_v28 = vmul.f32 %v148_v8, %v135_v13 }
  0x51   :  { %v153_v4 = vmul.f32 %v148_v8, %v136_v16  ;;  %v154_v33 = vmul.f32 %v148_v8, %v137_v30  ;;  %v155_v32 = vmul.f32 %v148_v8, %v138_v2  ;;  %v156_v36 = vmul.f32 %v148_v8, %v139_v34 }
  0x52   :  { %v166_v17 = vadd.f32 %v165_v15, %v149_v18  ;;  %v167_v3 = vadd.f32 %v165_v15, %v150_v22  ;;  %v168_v20 = vadd.f32 %v165_v15, %v151_v23  ;;  %v14726_v5 = vpop.eup %14725  ;;  %v169_v21 = vadd.f32 %v165_v15, %v152_v28 }
  0x53   :  { %v170_v6 = vadd.f32 %v165_v15, %v153_v4  ;;  %v140_v35 = vmul.f32 %v14726_v5, %v15606_v24  ;;  %v171_v11 = vadd.f32 %v165_v15, %v154_v33  ;;  %v141_v14 = vmul.f32 %v14726_v5, %v15609_v25 }
  0x54   :  { %12651 = vmatprep.mubr.f32.mxu0 %v166_v17  ;;  %v172_v39 = vadd.f32 %v165_v15, %v155_v32  ;;  %v142_v41 = vmul.f32 %v14726_v5, %v15612_v26  ;;  %v173_v38 = vadd.f32 %v165_v15, %v156_v36  ;;  %v143_v19 = vmul.f32 %v14726_v5, %v15617_v29 }
  0x55   :  { %12652 = vmatmul.mubr.f32.vlgmr.msra.gmra.mrb[0].mxu0 %v167_v3  ;;  %v157_v40 = vmul.f32 %v148_v8, %v140_v35  ;;  %v158_v44 = vmul.f32 %v148_v8, %v141_v14  ;;  %v144_v24 = vmul.f32 %v14726_v5, %v15620_v31  ;;  %v145_v25 = vmul.f32 %v14726_v5, %v15631_v27 }
  0x56   :  { %12654 = vmatprep.mubr.f32.mxu0 %v168_v20  ;;  %v159_v46 = vmul.f32 %v148_v8, %v142_v41  ;;  %v160_v49 = vmul.f32 %v148_v8, %v143_v19  ;;  %v146_v26 = vmul.f32 %v14726_v5, %v15636_v37  ;;  %v147_v29 = vmul.f32 %v14726_v5, %v15641_v43  ;;  %v198_v37 = vld [vmem:[%s20532_s5] ss:$0 sm:$0xff] }
  0x57   :  { %v174_v45 = vadd.f32 %v165_v15, %v157_v40  ;;  %v175_v48 = vadd.f32 %v165_v15, %v158_v44  ;;  %v161_v50 = vmul.f32 %v148_v8, %v144_v24  ;;  %v162_v52 = vmul.f32 %v148_v8, %v145_v25 }
  0x58   :  { %v176_v42 = vadd.f32 %v165_v15, %v159_v46  ;;  %v177_v51 = vadd.f32 %v165_v15, %v160_v49  ;;  %v163_v54 = vmul.f32 %v148_v8, %v146_v26  ;;  %v164_v47 = vmul.f32 %v148_v8, %v147_v29 }
  0x59   :  { %12655 = vmatmul.mubr.f32.gmra.mrb[2].mxu0 %v169_v21  ;;  %v178_v53 = vadd.f32 %v165_v15, %v161_v50  ;;  %v179_v31 = vadd.f32 %v165_v15, %v162_v52 }
  0x5a   :  { %12657 = vmatprep.mubr.f32.mxu0 %v170_v6  ;;  %v180_v55 = vadd.f32 %v165_v15, %v163_v54  ;;  %v181_v27 = vadd.f32 %v165_v15, %v164_v47 }
  0x5d   :  { %12658 = vmatmul.mubr.f32.gmra.mrb[4].mxu0 %v171_v11 }
  0x5e   :  { %12660 = vmatprep.mubr.f32.mxu0 %v172_v39 }
  0x61   :  { %12661 = vmatmul.mubr.f32.gmra.mrb[6].mxu0 %v173_v38 }
  0x62   :  { %12663 = vmatprep.mubr.f32.mxu0 %v174_v45 }
  0x65   :  { %12664 = vmatmul.mubr.f32.gmra.mrb[8].mxu0 %v175_v48 }
  0x66   :  { %12666 = vmatprep.mubr.f32.mxu0 %v176_v42 }
  0x69   :  { %12667 = vmatmul.mubr.f32.gmra.mrb[10].mxu0 %v177_v51 }
  0x6a   :  { %12669 = vmatprep.mubr.f32.mxu0 %v178_v53 }
  0x6d   :  { %12670 = vmatmul.mubr.f32.gmra.mrb[12].mxu0 %v179_v31 }
  0x6e   :  { %12672 = vmatprep.mubr.f32.mxu0 %v180_v55 }
  0x71   :  { %12673 = vmatmul.mubr.f32.gmra.mrb[14].mxu0 %v181_v27 }
 0x128   :  { %v12653_v56 = vpop.f32.mrb[0].mxu0 }
 0x129   :  { %v265_v57 = vpop.f32.mrb[1].mxu0  ;;  %v15676_v58 = vadd.f32 %v12653_v56, %v198_v37 }
 0x12a   :  { %v15674_v43 = vadd.f32 %v265_v57, %v198_v37 }
 0x12b   :  { %20665 = vst [vmem:[#allocation3_spill] sm:$0xff] %v15676_v58  ;;  %v350_v7 = vsel %vm346_vm0, %v15676_v58, 0.0 }
 0x12c   :  { %20664 = vst [vmem:[#allocation2_spill] sm:$0xff] %v15674_v43  ;;  %v12656_v59 = vpop.f32.mrb[2].mxu0  ;;  %v347_v60 = vsel %vm346_vm0, %v15674_v43, 0.0 }
 0x12d   :  { %v275_v61 = vpop.f32.mrb[3].mxu0  ;;  %348 = vadd.xlane.f32.xlu0 %v347_v60  ;;  %v15680_v62 = vadd.f32 %v12656_v59, %v198_v37 }
 0x12e   :  { %v15682_v63 = vadd.f32 %v275_v61, %v198_v37 }
 0x12f   :  { %20666 = vst [vmem:[#allocation4_spill] sm:$0xff] %v15680_v62  ;;  %v356_v12 = vsel %vm346_vm0, %v15680_v62, 0.0 }
 0x130   :  { %20667 = vst [vmem:[#allocation5_spill] sm:$0xff] %v15682_v63  ;;  %v12659_v0 = vpop.f32.mrb[4].mxu0  ;;  %v353_v1 = vsel %vm346_vm0, %v15682_v63, 0.0 }
 0x131   :  { %v285_v8 = vpop.f32.mrb[5].mxu0  ;;  %354 = vadd.xlane.f32.xlu1 %v353_v1  ;;  %351 = vadd.xlane.f32.xlu0 %v350_v7  ;;  %v15688_v9 = vadd.f32 %v12659_v0, %v198_v37 }
 0x132   :  { %v15690_v10 = vadd.f32 %v285_v8, %v198_v37 }
 0x133   :  { %20668 = vst [vmem:[#allocation6_spill] sm:$0xff] %v15688_v9  ;;  %v362_v23 = vsel %vm346_vm0, %v15688_v9, 0.0 }
 0x134   :  { %20669 = vst [vmem:[#allocation7_spill] sm:$0xff] %v15690_v10  ;;  %v12662_v13 = vpop.f32.mrb[6].mxu0  ;;  %v359_v15 = vsel %vm346_vm0, %v15690_v10, 0.0 }
 0x135   :  { %v295_v16 = vpop.f32.mrb[7].mxu0  ;;  %357 = vadd.xlane.f32.xlu1 %v356_v12  ;;  %360 = vadd.xlane.f32.xlu0 %v359_v15  ;;  %v15696_v18 = vadd.f32 %v12662_v13, %v198_v37 }
 0x136   :  { %v15698_v22 = vadd.f32 %v295_v16, %v198_v37 }
 0x137   :  { %20670 = vst [vmem:[#allocation8_spill] sm:$0xff] %v15696_v18  ;;  %v368_v30 = vsel %vm346_vm0, %v15696_v18, 0.0 }
 0x138   :  { %20671 = vst [vmem:[#allocation9_spill] sm:$0xff] %v15698_v22  ;;  %v365_v28 = vsel %vm346_vm0, %v15698_v22, 0.0  ;;  %v12665_v2 = vpop.f32.mrb[8].mxu0 }
 0x139   :  { %363 = vadd.xlane.f32.xlu1 %v362_v23  ;;  %366 = vadd.xlane.f32.xlu0 %v365_v28  ;;  %v15706_v17 = vadd.f32 %v12665_v2, %v198_v37  ;;  %v305_v3 = vpop.f32.mrb[9].mxu0 }
 0x13a   :  { %v15708_v20 = vadd.f32 %v305_v3, %v198_v37 }
 0x13b   :  { %20672 = vst [vmem:[#allocation10_spill] sm:$0xff] %v15706_v17  ;;  %v374_v3 = vsel %vm346_vm0, %v15706_v17, 0.0 }
 0x13c   :  { %20673 = vst [vmem:[#allocation11_spill] sm:$0xff] %v15708_v20  ;;  %v12668_v4 = vpop.f32.mrb[10].mxu0 }
 0x13d   :  { %369 = vadd.xlane.f32.xlu1 %v368_v30  ;;  %v15710_v5 = vadd.f32 %v12668_v4, %v198_v37  ;;  %v315_v21 = vpop.f32.mrb[11].mxu0  ;;  %v371_v30 = vsel %vm346_vm0, %v15708_v20, 0.0 }
 0x13e   :  { %v15712_v33 = vadd.f32 %v315_v21, %v198_v37  ;;  %v588_v21 = vld [vmem:[%s20533_s2 + $0x30] sm:$0xff] }
 0x13f   :  { %20674 = vst [vmem:[#allocation12_spill] sm:$0xff] %v15710_v5 }
 0x140   :  { %20675 = vst [vmem:[#allocation13_spill] sm:$0xff] %v15712_v33  ;;  %v12671_v34 = vpop.f32.mrb[12].mxu0  ;;  %v377_v4 = vsel %vm346_vm0, %v15712_v33, 0.0 }
 0x141   :  { %v15714_v6 = vadd.f32 %v12671_v34, %v198_v37  ;;  %v325_v32 = vpop.f32.mrb[13].mxu0  ;;  %v590_v34 = vld [vmem:[%s20533_s2 + $0x68] sm:$0xff] }
 0x142   :  { %v15716_v35 = vadd.f32 %v325_v32, %v198_v37  ;;  %v13750_v32 = vpack.c.bf16 %v590_v34, %v588_v21 }
 0x143   :  { %20676 = vst [vmem:[#allocation14_spill] sm:$0xff] %v15714_v6 }
 0x144   :  { %20677 = vst [vmem:[#allocation15_spill] sm:$0xff] %v15716_v35  ;;  %v12674_v11 = vpop.f32.mrb[14].mxu0  ;;  %13751 = vmatprep.subr.bf16.mxu1 %v13750_v32 }
 0x145   :  { %v15718_v36 = vadd.f32 %v12674_v11, %v198_v37  ;;  %v335_v14 = vpop.f32.mrb[15].mxu0  ;;  %v587_v11 = vld [vmem:[%s20533_s2 + $0x28] sm:$0xff] }
 0x146   :  { %v15720_v39 = vadd.f32 %v335_v14, %v198_v37  ;;  %v589_v14 = vld [vmem:[%s20533_s2 + $0x60] sm:$0xff] }
 0x147   :  { %20678 = vst [vmem:[#allocation16_spill] sm:$0xff] %v15718_v36 }
 0x148   :  { %20679 = vst [vmem:[#allocation17_spill] sm:$0xff] %v15720_v39 }
 0x1ba   :  { %v349_v40 = vpop.xlane.xlu0 %348 }
 0x1bb   :  { %v395_v41 = vmul.f32 0.015625, %v349_v40  ;;  %v13752_v40 = vpack.c.bf16 %v589_v14, %v587_v11 }
 0x1bd   :  { %v15723_v38 = vsub.f32 %v15674_v43, %v395_v41  ;;  %v380_v41 = vsel %vm346_vm0, %v15710_v5, 0.0  ;;  %13753 = vmatpush1.bf16.msra.mxu1 %v13752_v40 }
 0x1be   :  { %v355_v44 = vpop.xlane.xlu1 %354  ;;  %v352_v19 = vpop.xlane.xlu0 %351 }
 0x1bf   :  { %v397_v45 = vmul.f32 0.015625, %v355_v44  ;;  %v396_v46 = vmul.f32 0.015625, %v352_v19  ;;  %v427_v24 = vmul.f32 %v15723_v38, %v15723_v38  ;;  %v383_v44 = vsel %vm346_vm0, %v15716_v35, 0.0  ;;  %v592_v19 = vld [vmem:[%s20533_s2 + $0xa0] sm:$0xff] }
 0x1c1   :  { %v15728_v48 = vsub.f32 %v15682_v63, %v397_v45  ;;  %v15731_v49 = vsub.f32 %v15676_v58, %v396_v46  ;;  %v443_v25 = vsel %vm346_vm0, %v427_v24, 0.0  ;;  %v594_v45 = vld [vmem:[%s20533_s2 + $0xd8] sm:$0xff] }
 0x1c2   :  { %v358_v42 = vpop.xlane.xlu1 %357  ;;  %444 = vadd.xlane.f32.xlu0 %v443_v25  ;;  %v361_v50 = vpop.xlane.xlu0 %360  ;;  %v13754_v46 = vpack.c.bf16 %v594_v45, %v592_v19  ;;  %v591_v24 = vld [vmem:[%s20533_s2 + $0x98] sm:$0xff]  ;;  %v593_v25 = vld [vmem:[%s20533_s2 + $0xd0] sm:$0xff] }
 0x1c3   :  { %v398_v26 = vmul.f32 0.015625, %v358_v42  ;;  %v399_v51 = vmul.f32 0.015625, %v361_v50  ;;  %v429_v52 = vmul.f32 %v15728_v48, %v15728_v48  ;;  %v428_v29 = vmul.f32 %v15731_v49, %v15731_v49 }
 0x1c4   :  { %v13756_v42 = vpack.c.bf16 %v593_v25, %v591_v24  ;;  %v386_v50 = vsel %vm346_vm0, %v15714_v6, 0.0  ;;  %13755 = vmatprep.subr.bf16.mxu1 %v13754_v46  ;;  %v15838_v24 = vld [vmem:[%s20532_s5 + $0x1] ss:$0 sm:$0xff] }
 0x1c5   :  { %v15739_v53 = vsub.f32 %v15680_v62, %v398_v26  ;;  %v15742_v54 = vsub.f32 %v15690_v10, %v399_v51  ;;  %v449_v31 = vsel %vm346_vm0, %v429_v52, 0.0  ;;  %v446_v47 = vsel %vm346_vm0, %v428_v29, 0.0  ;;  %v596_v51 = vld [vmem:[%s20533_s2 + $0x110] sm:$0xff]  ;;  %v598_v52 = vld [vmem:[%s20533_s2 + $0x148] sm:$0xff] }
 0x1c6   :  { %v364_v55 = vpop.xlane.xlu1 %363  ;;  %450 = vadd.xlane.f32.xlu0 %v449_v31  ;;  %447 = vadd.xlane.f32.xlu1 %v446_v47  ;;  %v367_v27 = vpop.xlane.xlu0 %366  ;;  %v389_v26 = vsel %vm346_vm0, %v15720_v39, 0.0  ;;  %v13758_v29 = vpack.c.bf16 %v598_v52, %v596_v51  ;;  %v595_v31 = vld [vmem:[%s20533_s2 + $0x108] sm:$0xff]  ;;  %v597_v47 = vld [vmem:[%s20533_s2 + $0x140] sm:$0xff] }
 0x1c7   :  { %v400_v37 = vmul.f32 0.015625, %v364_v55  ;;  %v401_v56 = vmul.f32 0.015625, %v367_v27  ;;  %v430_v57 = vmul.f32 %v15739_v53, %v15739_v53  ;;  %v431_v59 = vmul.f32 %v15742_v54, %v15742_v54  ;;  %13757 = vmatpush1.bf16.msra.mxu1 %v13756_v42  ;;  %v15844_v51 = vld [vmem:[%s20532_s5 + $0x2] ss:$0 sm:$0xff] }
 0x1c8   :  { %v13760_v55 = vpack.c.bf16 %v597_v47, %v595_v31  ;;  %v392_v27 = vsel %vm346_vm0, %v15718_v36, 0.0  ;;  %13759 = vmatprep.subr.bf16.mxu1 %v13758_v29 }
 0x1c9   :  { %v15751_v60 = vsub.f32 %v15688_v9, %v400_v37  ;;  %v15754_v61 = vsub.f32 %v15698_v22, %v401_v56  ;;  %v452_v0 = vsel %vm346_vm0, %v430_v57, 0.0  ;;  %v455_v1 = vsel %vm346_vm0, %v431_v59, 0.0  ;;  %v600_v37 = vld [vmem:[%s20533_s2 + $0x180] sm:$0xff]  ;;  %v602_v56 = vld [vmem:[%s20533_s2 + $0x1b8] sm:$0xff] }
 0x1ca   :  { %v370_v7 = vpop.xlane.xlu1 %369  ;;  %453 = vadd.xlane.f32.xlu1 %v452_v0  ;;  %456 = vadd.xlane.f32.xlu0 %v455_v1  ;;  %v13762_v57 = vpack.c.bf16 %v602_v56, %v600_v37  ;;  %v599_v59 = vld [vmem:[%s20533_s2 + $0x178] sm:$0xff]  ;;  %v601_v0 = vld [vmem:[%s20533_s2 + $0x1b0] sm:$0xff] }
 0x1cb   :  { %v402_v8 = vmul.f32 0.015625, %v370_v7  ;;  %v432_v12 = vmul.f32 %v15751_v60, %v15751_v60  ;;  %v433_v13 = vmul.f32 %v15754_v61, %v15754_v61  ;;  %13761 = vmatpush1.bf16.msra.mxu1 %v13760_v55  ;;  %v13764_v1 = vpack.c.bf16 %v601_v0, %v599_v59 }
 0x1cc   :  { %13763 = vmatprep.subr.bf16.mxu1 %v13762_v57  ;;  %v20537_v7 = vmov 0.0  }
 0x1cd   :  { %v15763_v15 = vsub.f32 %v15696_v18, %v402_v8  ;;  %v458_v16 = vsel %vm346_vm0, %v432_v12, 0.0  ;;  %v461_v23 = vsel %vm346_vm0, %v433_v13, 0.0  ;;  %715 = vmatprep.mubr.f32.mxu1 %v20537_v7 }
 0x1ce   :  { %459 = vadd.xlane.f32.xlu1 %v458_v16  ;;  %462 = vadd.xlane.f32.xlu0 %v461_v23 }
 0x1cf   :  { %v434_v28 = vmul.f32 %v15763_v15, %v15763_v15  ;;  %13765 = vmatpush1.bf16.msra.mxu1 %v13764_v1 }
 0x1d1   :  { %v464_v2 = vsel %vm346_vm0, %v434_v28, 0.0 }
 0x1d2   :  { %465 = vadd.xlane.f32.xlu1 %v464_v2  ;;  %372 = vadd.xlane.f32.xlu0 %v371_v30 }
 0x1d6   :  { %375 = vadd.xlane.f32.xlu1 %v374_v3  ;;  %378 = vadd.xlane.f32.xlu0 %v377_v4 }
 0x1da   :  { %381 = vadd.xlane.f32.xlu1 %v380_v41  ;;  %384 = vadd.xlane.f32.xlu0 %v383_v44 }
 0x1de   :  { %387 = vadd.xlane.f32.xlu1 %v386_v50  ;;  %390 = vadd.xlane.f32.xlu0 %v389_v26 }
 0x1e2   :  { %393 = vadd.xlane.f32.xlu1 %v392_v27 }
 0x24f   :  { %v445_v8 = vpop.xlane.xlu0 %444 }
 0x250   :  { %v491_v12 = vmul.f32 0.015625, %v445_v8 }
 0x252   :  { %v507_v13 = vadd.f32 1e-05, %v491_v12 }
 0x253   :  { %v448_v16 = vpop.xlane.xlu1 %447  ;;  %v451_v23 = vpop.xlane.xlu0 %450 }
 0x254   :  { %14727 = vrsqrt.f32 %v507_v13  ;;  %v492_v28 = vmul.f32 0.015625, %v448_v16  ;;  %v493_v30 = vmul.f32 0.015625, %v451_v23 }
 0x256   :  { %v508_v2 = vadd.f32 1e-05, %v492_v28  ;;  %v509_v3 = vadd.f32 1e-05, %v493_v30 }
 0x257   :  { %v454_v4 = vpop.xlane.xlu1 %453  ;;  %v457_v21 = vpop.xlane.xlu0 %456 }
 0x258   :  { %14729 = vrsqrt.f32 %v508_v2  ;;  %v494_v34 = vmul.f32 0.015625, %v454_v4  ;;  %v495_v32 = vmul.f32 0.015625, %v457_v21 }
 0x259   :  { %14731 = vrsqrt.f32 %v509_v3 }
 0x25a   :  { %v510_v11 = vadd.f32 1e-05, %v494_v34  ;;  %v511_v14 = vadd.f32 1e-05, %v495_v32 }
 0x25b   :  { %v460_v40 = vpop.xlane.xlu1 %459  ;;  %v463_v41 = vpop.xlane.xlu0 %462 }
 0x25c   :  { %14733 = vrsqrt.f32 %v510_v11  ;;  %v496_v44 = vmul.f32 0.015625, %v460_v40  ;;  %v497_v46 = vmul.f32 0.015625, %v463_v41 }
 0x25d   :  { %14735 = vrsqrt.f32 %v511_v14 }
 0x25e   :  { %v14728_v19 = vpop.eup %14727  ;;  %v512_v45 = vadd.f32 1e-05, %v496_v44  ;;  %v513_v47 = vadd.f32 1e-05, %v497_v46 }
 0x25f   :  { %v466_v25 = vpop.xlane.xlu1 %465  ;;  %v373_v42 = vpop.xlane.xlu0 %372  ;;  %v539_v50 = vmul.f32 %v14728_v19, %v15723_v38 }
 0x260   :  { %v403_v26 = vmul.f32 0.015625, %v373_v42  ;;  %v498_v52 = vmul.f32 0.015625, %v466_v25  ;;  %14737 = vrsqrt.f32 %v512_v45 }
 0x261   :  { %v555_v29 = vmul.f32 %v539_v50, %v15838_v24  ;;  %14739 = vrsqrt.f32 %v513_v47 }
 0x262   :  { %v14730_v31 = vpop.eup %14729  ;;  %v15848_v55 = vsub.f32 %v15708_v20, %v403_v26  ;;  %v514_v8 = vadd.f32 1e-05, %v498_v52 }
 0x263   :  { %v14732_v27 = vpop.eup %14731  ;;  %v376_v37 = vpop.xlane.xlu1 %375  ;;  %v571_v38 = vadd.f32 %v555_v29, %v15844_v51  ;;  %v540_v57 = vmul.f32 %v14730_v31, %v15731_v49 }
 0x264   :  { %v379_v56 = vpop.xlane.xlu0 %378  ;;  %v404_v59 = vmul.f32 0.015625, %v376_v37  ;;  %v435_v1 = vmul.f32 %v15848_v55, %v15848_v55  ;;  %v541_v13 = vmul.f32 %v14732_v27, %v15728_v48  ;;  %14741 = vrsqrt.f32 %v514_v8 }
 0x265   :  { %v405_v0 = vmul.f32 0.015625, %v379_v56  ;;  %11311 = vmatmul.mubr.msk.f32.vlgmr.msra.gmra.mrb[0].mxu1 %vm346_vm0, %v571_v38  ;;  %v556_v12 = vmul.f32 %v540_v57, %v15838_v24 }
 0x266   :  { %v14734_v16 = vpop.eup %14733  ;;  %v15858_v23 = vsub.f32 %v15706_v17, %v404_v59  ;;  %v467_v49 = vsel %vm346_vm0, %v435_v1, 0.0  ;;  %721 = vmatprep.mubr.f32.mxu1 %v20537_v7  ;;  %v557_v4 = vmul.f32 %v541_v13, %v15838_v24 }
 0x267   :  { %v15861_v28 = vsub.f32 %v15712_v33, %v405_v0  ;;  %v382_v30 = vpop.xlane.xlu1 %381  ;;  %468 = vadd.xlane.f32.xlu0 %v467_v49  ;;  %v572_v3 = vadd.f32 %v556_v12, %v15844_v51  ;;  %v542_v48 = vmul.f32 %v14734_v16, %v15739_v53  ;;  %v14736_v21 = vpop.eup %14735 }
 0x268   :  { %v385_v2 = vpop.xlane.xlu0 %384  ;;  %v406_v34 = vmul.f32 0.015625, %v382_v30  ;;  %v436_v11 = vmul.f32 %v15858_v23, %v15858_v23  ;;  %v573_v46 = vadd.f32 %v557_v4, %v15844_v51  ;;  %v543_v42 = vmul.f32 %v14736_v21, %v15742_v54 }
 0x269   :  { %v407_v32 = vmul.f32 0.015625, %v385_v2  ;;  %v437_v14 = vmul.f32 %v15861_v28, %v15861_v28  ;;  %11312 = vmatmul.mubr.msk.f32.gmra.mrb[2].mxu1 %vm346_vm0, %v572_v3  ;;  %v558_v25 = vmul.f32 %v542_v48, %v15838_v24 }
 0x26a   :  { %v15874_v40 = vsub.f32 %v15710_v5, %v406_v34  ;;  %v470_v53 = vsel %vm346_vm0, %v436_v11, 0.0  ;;  %727 = vmatprep.mubr.f32.mxu1 %v20537_v7  ;;  %v14738_v50 = vpop.eup %14737  ;;  %v559_v57 = vmul.f32 %v543_v42, %v15838_v24 }
 0x26b   :  { %v15877_v41 = vsub.f32 %v15716_v35, %v407_v32  ;;  %v473_v44 = vsel %vm346_vm0, %v437_v14, 0.0  ;;  %471 = vadd.xlane.f32.xlu1 %v470_v53  ;;  %v388_v19 = vpop.xlane.xlu1 %387  ;;  %v574_v38 = vadd.f32 %v558_v25, %v15844_v51  ;;  %v544_v59 = vmul.f32 %v14738_v50, %v15751_v60  ;;  %v14740_v0 = vpop.eup %14739 }
 0x26c   :  { %474 = vadd.xlane.f32.xlu0 %v473_v44  ;;  %v391_v45 = vpop.xlane.xlu0 %390  ;;  %v408_v26 = vmul.f32 0.015625, %v388_v19  ;;  %v438_v29 = vmul.f32 %v15874_v40, %v15874_v40  ;;  %v575_v30 = vadd.f32 %v559_v57, %v15844_v51  ;;  %v545_v3 = vmul.f32 %v14740_v0, %v15754_v61 }
 0x26d   :  { %v409_v52 = vmul.f32 0.015625, %v391_v45  ;;  %v439_v31 = vmul.f32 %v15877_v41, %v15877_v41  ;;  %11313 = vmatmul.mubr.msk.f32.gmra.mrb[4].mxu1 %vm346_vm0, %v573_v46  ;;  %v560_v2 = vmul.f32 %v544_v59, %v15838_v24 }
 0x26e   :  { %v15891_v47 = vsub.f32 %v15714_v6, %v408_v26  ;;  %v476_v37 = vsel %vm346_vm0, %v438_v29, 0.0  ;;  %733 = vmatprep.mubr.f32.mxu1 %v20537_v7  ;;  %v14742_v60 = vpop.eup %14741  ;;  %v561_v34 = vmul.f32 %v545_v3, %v15838_v24 }
 0x26f   :  { %v15894_v27 = vsub.f32 %v15720_v39, %v409_v52  ;;  %v479_v54 = vsel %vm346_vm0, %v439_v31, 0.0  ;;  %477 = vadd.xlane.f32.xlu1 %v476_v37  ;;  %v394_v56 = vpop.xlane.xlu1 %393  ;;  %v576_v21 = vadd.f32 %v560_v2, %v15844_v51  ;;  %v546_v32 = vmul.f32 %v14742_v60, %v15763_v15 }
 0x270   :  { %480 = vadd.xlane.f32.xlu0 %v479_v54  ;;  %v410_v1 = vmul.f32 0.015625, %v394_v56  ;;  %v440_v8 = vmul.f32 %v15891_v47, %v15891_v47  ;;  %v577_v61 = vadd.f32 %v561_v34, %v15844_v51 }
 0x271   :  { %v441_v12 = vmul.f32 %v15894_v27, %v15894_v27  ;;  %11314 = vmatmul.mubr.msk.f32.gmra.mrb[6].mxu1 %vm346_vm0, %v574_v38  ;;  %v562_v11 = vmul.f32 %v546_v32, %v15838_v24 }
 0x272   :  { %v15908_v13 = vsub.f32 %v15718_v36, %v410_v1  ;;  %v482_v16 = vsel %vm346_vm0, %v440_v8, 0.0  ;;  %739 = vmatprep.mubr.f32.mxu1 %v20537_v7 }
 0x273   :  { %v485_v49 = vsel %vm346_vm0, %v441_v12, 0.0  ;;  %483 = vadd.xlane.f32.xlu1 %v482_v16  ;;  %v578_v14 = vadd.f32 %v562_v11, %v15844_v51 }
 0x274   :  { %486 = vadd.xlane.f32.xlu0 %v485_v49  ;;  %v442_v4 = vmul.f32 %v15908_v13, %v15908_v13 }
 0x275   :  { %11315 = vmatmul.mubr.msk.f32.gmra.mrb[8].mxu1 %vm346_vm0, %v575_v30 }
 0x276   :  { %v488_v48 = vsel %vm346_vm0, %v442_v4, 0.0  ;;  %745 = vmatprep.mubr.f32.mxu1 %v20537_v7 }
 0x277   :  { %489 = vadd.xlane.f32.xlu1 %v488_v48 }
 0x279   :  { %11316 = vmatmul.mubr.msk.f32.gmra.mrb[10].mxu1 %vm346_vm0, %v576_v21 }
 0x27a   :  { %751 = vmatprep.mubr.f32.mxu1 %v20537_v7 }
 0x27d   :  { %11317 = vmatmul.mubr.msk.f32.gmra.mrb[12].mxu1 %vm346_vm0, %v577_v61 }
 0x27e   :  { %757 = vmatprep.mubr.f32.mxu1 %v20537_v7 }
 0x281   :  { %11318 = vmatmul.mubr.msk.f32.gmra.mrb[14].mxu1 %vm346_vm0, %v578_v14 }
 0x282   :  { %763 = vmatprep.mubr.f32.mxu1 %v20537_v7 }
 0x2f4   :  { %v469_v53 = vpop.xlane.xlu0 %468 }
 0x2f5   :  { %v499_v15 = vmul.f32 0.015625, %v469_v53 }
 0x2f7   :  { %v515_v44 = vadd.f32 1e-05, %v499_v15 }
 0x2f8   :  { %v472_v19 = vpop.xlane.xlu1 %471 }
 0x2f9   :  { %v475_v45 = vpop.xlane.xlu0 %474  ;;  %14743 = vrsqrt.f32 %v515_v44  ;;  %v500_v46 = vmul.f32 0.015625, %v472_v19 }
 0x2fa   :  { %v501_v25 = vmul.f32 0.015625, %v475_v45 }
 0x2fb   :  { %v516_v42 = vadd.f32 1e-05, %v500_v46 }
 0x2fc   :  { %v517_v50 = vadd.f32 1e-05, %v501_v25  ;;  %v478_v26 = vpop.xlane.xlu1 %477 }
 0x2fd   :  { %v481_v52 = vpop.xlane.xlu0 %480  ;;  %14745 = vrsqrt.f32 %v516_v42  ;;  %v502_v29 = vmul.f32 0.015625, %v478_v26 }
 0x2fe   :  { %v503_v31 = vmul.f32 0.015625, %v481_v52  ;;  %14747 = vrsqrt.f32 %v517_v50 }
 0x2ff   :  { %v518_v37 = vadd.f32 1e-05, %v502_v29 }
 0x300   :  { %v519_v54 = vadd.f32 1e-05, %v503_v31  ;;  %v484_v56 = vpop.xlane.xlu1 %483 }
 0x301   :  { %v487_v38 = vpop.xlane.xlu0 %486  ;;  %14749 = vrsqrt.f32 %v518_v37  ;;  %v504_v57 = vmul.f32 0.015625, %v484_v56 }
 0x302   :  { %14751 = vrsqrt.f32 %v519_v54  ;;  %v505_v1 = vmul.f32 0.015625, %v487_v38 }
 0x303   :  { %v14744_v59 = vpop.eup %14743  ;;  %v520_v0 = vadd.f32 1e-05, %v504_v57 }
 0x304   :  { %v490_v8 = vpop.xlane.xlu1 %489  ;;  %v547_v12 = vmul.f32 %v14744_v59, %v15848_v55  ;;  %v521_v60 = vadd.f32 1e-05, %v505_v1 }
 0x305   :  { %14753 = vrsqrt.f32 %v520_v0  ;;  %v506_v30 = vmul.f32 0.015625, %v490_v8 }
 0x306   :  { %v563_v16 = vmul.f32 %v547_v12, %v15838_v24  ;;  %14755 = vrsqrt.f32 %v521_v60 }
 0x307   :  { %v14746_v49 = vpop.eup %14745  ;;  %v522_v55 = vadd.f32 1e-05, %v506_v30 }
 0x308   :  { %v14748_v2 = vpop.eup %14747  ;;  %v579_v3 = vadd.f32 %v563_v16, %v15844_v51  ;;  %v548_v4 = vmul.f32 %v14746_v49, %v15858_v23 }
 0x309   :  { %v549_v48 = vmul.f32 %v14748_v2, %v15861_v28  ;;  %14757 = vrsqrt.f32 %v522_v55 }
 0x30a   :  { %11319 = vmatmul.mubr.msk.f32.gmra.mrb[16].mxu1 %vm346_vm0, %v579_v3  ;;  %v564_v21 = vmul.f32 %v548_v4, %v15838_v24 }
 0x30b   :  { %v14750_v34 = vpop.eup %14749  ;;  %769 = vmatprep.mubr.f32.mxu1 %v20537_v7  ;;  %v565_v61 = vmul.f32 %v549_v48, %v15838_v24 }
 0x30c   :  { %v580_v32 = vadd.f32 %v564_v21, %v15844_v51  ;;  %v550_v11 = vmul.f32 %v14750_v34, %v15874_v40  ;;  %v14752_v14 = vpop.eup %14751 }
 0x30d   :  { %v581_v23 = vadd.f32 %v565_v61, %v15844_v51  ;;  %v551_v53 = vmul.f32 %v14752_v14, %v15877_v41 }
 0x30e   :  { %11320 = vmatmul.mubr.msk.f32.gmra.mrb[18].mxu1 %vm346_vm0, %v580_v32  ;;  %v566_v28 = vmul.f32 %v550_v11, %v15838_v24 }
 0x30f   :  { %775 = vmatprep.mubr.f32.mxu1 %v20537_v7  ;;  %v14754_v15 = vpop.eup %14753  ;;  %v567_v40 = vmul.f32 %v551_v53, %v15838_v24 }
 0x310   :  { %v582_v44 = vadd.f32 %v566_v28, %v15844_v51  ;;  %v552_v19 = vmul.f32 %v14754_v15, %v15891_v47  ;;  %v14756_v45 = vpop.eup %14755 }
 0x311   :  { %v583_v46 = vadd.f32 %v567_v40, %v15844_v51  ;;  %v553_v25 = vmul.f32 %v14756_v45, %v15894_v27 }
 0x312   :  { %11321 = vmatmul.mubr.msk.f32.gmra.mrb[20].mxu1 %vm346_vm0, %v581_v23  ;;  %v568_v41 = vmul.f32 %v552_v19, %v15838_v24 }
 0x313   :  { %781 = vmatprep.mubr.f32.mxu1 %v20537_v7  ;;  %v14758_v42 = vpop.eup %14757  ;;  %v569_v47 = vmul.f32 %v553_v25, %v15838_v24 }
 0x314   :  { %v584_v50 = vadd.f32 %v568_v41, %v15844_v51  ;;  %v554_v26 = vmul.f32 %v14758_v42, %v15908_v13 }
 0x315   :  { %v585_v52 = vadd.f32 %v569_v47, %v15844_v51 }
 0x316   :  { %11322 = vmatmul.mubr.msk.f32.gmra.mrb[22].mxu1 %vm346_vm0, %v582_v44  ;;  %v570_v29 = vmul.f32 %v554_v26, %v15838_v24 }
 0x317   :  { %787 = vmatprep.mubr.f32.mxu1 %v20537_v7 }
 0x318   :  { %v586_v27 = vadd.f32 %v570_v29, %v15844_v51 }
 0x31a   :  { %11323 = vmatmul.mubr.msk.f32.gmra.mrb[24].mxu1 %vm346_vm0, %v583_v46 }
 0x31b   :  { %793 = vmatprep.mubr.f32.mxu1 %v20537_v7 }
 0x31e   :  { %11324 = vmatmul.mubr.msk.f32.gmra.mrb[26].mxu1 %vm346_vm0, %v584_v50 }
 0x31f   :  { %799 = vmatprep.mubr.f32.mxu1 %v20537_v7 }
 0x322   :  { %11325 = vmatmul.mubr.msk.f32.gmra.mrb[28].mxu1 %vm346_vm0, %v585_v52 }
 0x323   :  { %805 = vmatprep.mubr.f32.mxu1 %v20537_v7 }
 0x326   :  { %11326 = vmatmul.mubr.msk.f32.gmra.mrb[30].mxu1 %vm346_vm0, %v586_v27 }
 0x338   :  { %v717_v31 = vpop.f32.mrb[0].mxu1 }
 0x339   :  { %v719_v37 = vpop.f32.mrb[1].mxu1  ;;  %12691 = vmatprep.mubr.msk.f32.mxu0 %vm1100_vm1, %v717_v31  ;;  %820 = vrot.lane.b32.xlu0 %v717_v31, %s15402_s7 }
 0x33c   :  { %v15974_v13 = vpop.f32.mrb[2].mxu1 }
 0x33d   :  { %822 = vrot.lane.b32.xlu1 %v15974_v13, %s15402_s7  ;;  %v725_v24 = vpop.f32.mrb[3].mxu1  ;;  %v14443_v54 = vpack.i.bf16 %v15974_v13, %v717_v31 }
 0x33e   :  { %v15979_v56 = vpack.i.bf16 %v725_v24, %v719_v37  ;;  %v15981_v51 = vpack.c.bf16 %v725_v24, %v719_v37 }
 0x340   :  { %v15983_v38 = vpop.f32.mrb[4].mxu1 }
 0x341   :  { %824 = vrot.lane.b32.xlu1 %v15983_v38, %s15402_s7  ;;  %v731_v57 = vpop.f32.mrb[5].mxu1 }
 0x344   :  { %v15987_v59 = vpop.f32.mrb[6].mxu1 }
 0x345   :  { %826 = vrot.lane.b32.xlu1 %v15987_v59, %s15402_s7  ;;  %v737_v0 = vpop.f32.mrb[7].mxu1  ;;  %v14448_v1 = vpack.i.bf16 %v15987_v59, %v15983_v38 }
 0x346   :  { %v15993_v8 = vpack.i.bf16 %v737_v0, %v731_v57  ;;  %v15995_v12 = vpack.c.bf16 %v737_v0, %v731_v57 }
 0x348   :  { %v15997_v16 = vpop.f32.mrb[8].mxu1 }
 0x349   :  { %v743_v49 = vpop.f32.mrb[9].mxu1  ;;  %828 = vrot.lane.b32.xlu0 %v15997_v16, %s15402_s7 }
 0x34c   :  { %v16001_v60 = vpop.f32.mrb[10].mxu1 }
 0x34d   :  { %830 = vrot.lane.b32.xlu1 %v16001_v60, %s15402_s7  ;;  %v749_v30 = vpop.f32.mrb[11].mxu1  ;;  %v14453_v2 = vpack.i.bf16 %v16001_v60, %v15997_v16 }
 0x34e   :  { %v16007_v3 = vpack.i.bf16 %v749_v30, %v743_v49  ;;  %v16009_v4 = vpack.c.bf16 %v749_v30, %v743_v49 }
 0x350   :  { %v16011_v48 = vpop.f32.mrb[12].mxu1 }
 0x351   :  { %v755_v21 = vpop.f32.mrb[13].mxu1  ;;  %832 = vrot.lane.b32.xlu0 %v16011_v48, %s15402_s7 }
 0x354   :  { %v16015_v34 = vpop.f32.mrb[14].mxu1 }
 0x355   :  { %834 = vrot.lane.b32.xlu1 %v16015_v34, %s15402_s7  ;;  %v761_v55 = vpop.f32.mrb[15].mxu1  ;;  %836 = vrot.lane.b32.xlu0 %v717_v31, %s15403_s8  ;;  %v14463_v32 = vpack.i.bf16 %v16015_v34, %v16011_v48 }
 0x356   :  { %v16022_v61 = vpack.i.bf16 %v761_v55, %v755_v21  ;;  %v16024_v11 = vpack.c.bf16 %v761_v55, %v755_v21 }
 0x359   :  { %838 = vrot.lane.b32.xlu1 %v15974_v13, %s15403_s8  ;;  %840 = vrot.lane.b32.xlu0 %v15983_v38, %s15403_s8 }
 0x35d   :  { %842 = vrot.lane.b32.xlu1 %v15987_v59, %s15403_s8  ;;  %14444 = vrot.lane.b32.xlu0 %v14443_v54, %s15404_s9 }
 0x361   :  { %844 = vrot.lane.b32.xlu1 %v15997_v16, %s15403_s8  ;;  %846 = vrot.lane.b32.xlu0 %v16001_v60, %s15403_s8 }
 0x365   :  { %852 = vrot.lane.b32.xlu1 %v717_v31, %s15405_s10  ;;  %854 = vrot.lane.b32.xlu0 %v15974_v13, %s15405_s10 }
 0x369   :  { %14449 = vrot.lane.b32.xlu1 %v14448_v1, %s15404_s9  ;;  %848 = vrot.lane.b32.xlu0 %v16011_v48, %s15403_s8 }
 0x36d   :  { %858 = vrot.lane.b32.xlu1 %v15987_v59, %s15405_s10  ;;  %856 = vrot.lane.b32.xlu0 %v15983_v38, %s15405_s10 }
 0x371   :  { %850 = vrot.lane.b32.xlu1 %v16015_v34, %s15403_s8  ;;  %14454 = vrot.lane.b32.xlu0 %v14453_v2, %s15404_s9 }
 0x375   :  { %860 = vrot.lane.b32.xlu0 %v15997_v16, %s15405_s10 }
 0x379   :  { %14464 = vrot.lane.b32.xlu0 %v14463_v32, %s15404_s9 }
 0x37d   :  { %864 = vrot.lane.b32.xlu0 %v16011_v48, %s15405_s10 }
 0x3ab   :  { %v821_v14 = vpop.permute.xlu0 %820 }
 0x3ac   :  { %12719 = vmatprep.mubr.msk.f32.mxu1 %vm1100_vm1, %v821_v14 }
 0x3af   :  { %v16056_v23 = vpop.permute.xlu1 %822 }
 0x3b0   :  { %v14458_v28 = vpack.i.bf16 %v16056_v23, %v821_v14 }
 0x3b2   :  { %14459 = vrot.lane.b32.xlu1 %v14458_v28, %s15404_s9 }
 0x3b3   :  { %v16060_v53 = vpop.permute.xlu1 %824 }
 0x3b6   :  { %862 = vrot.lane.b32.xlu1 %v16001_v60, %s15405_s10 }
 0x3b7   :  { %v16064_v15 = vpop.permute.xlu1 %826 }
 0x3b8   :  { %v14468_v44 = vpack.i.bf16 %v16064_v15, %v16060_v53 }
 0x3ba   :  { %14469 = vrot.lane.b32.xlu1 %v14468_v44, %s15404_s9 }
 0x3bb   :  { %v16071_v40 = vpop.permute.xlu0 %828 }
 0x3be   :  { %866 = vrot.lane.b32.xlu1 %v16015_v34, %s15405_s10 }
 0x3bf   :  { %v16073_v19 = vpop.permute.xlu1 %830 }
 0x3c0   :  { %v14473_v45 = vpack.i.bf16 %v16073_v19, %v16071_v40 }
 0x3c2   :  { %14474 = vrot.lane.b32.xlu0 %v14473_v45, %s15404_s9 }
 0x3c3   :  { %v16078_v46 = vpop.permute.xlu0 %832 }
 0x3c7   :  { %v16080_v41 = vpop.permute.xlu1 %834  ;;  %v16082_v25 = vpop.permute.xlu0 %836 }
 0x3c8   :  { %v14478_v42 = vpack.i.bf16 %v16080_v41, %v16078_v46 }
 0x3ca   :  { %14479 = vrot.lane.b32.xlu1 %v14478_v42, %s15404_s9 }
 0x3cb   :  { %v16087_v50 = vpop.permute.xlu1 %838  ;;  %v16089_v47 = vpop.permute.xlu0 %840 }
 0x3cc   :  { %v14483_v26 = vpack.i.bf16 %v16087_v50, %v16082_v25 }
 0x3ce   :  { %14484 = vrot.lane.b32.xlu0 %v14483_v26, %s15404_s9 }
 0x3cf   :  { %v16094_v52 = vpop.permute.xlu1 %842  ;;  %v14445_v29 = vpop.permute.xlu0 %14444 }
 0x3d0   :  { %v14488_v27 = vpack.i.bf16 %v16094_v52, %v16089_v47  ;;  %v14447_v31 = vunpack.i.h.bf16 %v14445_v29  ;;  %v14446_v37 = vunpack.i.l.bf16 %v14445_v29 }
 0x3d2   :  { %v13766_v54 = vpack.c.bf16 %v14447_v31, %v14446_v37  ;;  %14489 = vrot.lane.b32.xlu1 %v14488_v27, %s15404_s9 }
 0x3d3   :  { %v16105_v57 = vpop.permute.xlu1 %844  ;;  %v16107_v0 = vpop.permute.xlu0 %846 }
 0x3d4   :  { %v14493_v1 = vpack.i.bf16 %v16107_v0, %v16105_v57  ;;  %13768 = vmatprep.subr.msk.bf16.mxu0 %vm16100_vm2, %v13766_v54 }
 0x3d5   :  { %13771 = vmatpush3.bf16.xpose.msk.msra.mxu0 %vm16100_vm2, %v13766_v54 }
 0x3d6   :  { %14494 = vrot.lane.b32.xlu0 %v14493_v1, %s15404_s9 }
 0x3d7   :  { %v16116_v49 = vpop.permute.xlu1 %852  ;;  %v16118_v30 = vpop.permute.xlu0 %854 }
 0x3d8   :  { %v14498_v2 = vpack.i.bf16 %v16118_v30, %v16116_v49 }
 0x3da   :  { %14499 = vrot.lane.b32.xlu1 %v14498_v2, %s15404_s9 }
 0x3db   :  { %v14450_v21 = vpop.permute.xlu1 %14449  ;;  %v16123_v55 = vpop.permute.xlu0 %848 }
 0x3dc   :  { %v14452_v32 = vunpack.i.h.bf16 %v14450_v21  ;;  %v14451_v14 = vunpack.i.l.bf16 %v14450_v21 }
 0x3dd   :  { %v16125_v28 = vpop.f32.mrb[16].mxu1 }
 0x3de   :  { %v13772_v44 = vpack.c.bf16 %v14452_v32, %v14451_v14  ;;  %v767_v45 = vpop.f32.mrb[17].mxu1 }
 0x3df   :  { %v16127_v42 = vpop.permute.xlu1 %858  ;;  %v16129_v26 = vpop.permute.xlu0 %856 }
 0x3e0   :  { %v14508_v29 = vpack.i.bf16 %v16127_v42, %v16129_v26  ;;  %13774 = vmatprep.subr.msk.bf16.mxu0 %vm16100_vm2, %v13772_v44 }
 0x3e1   :  { %v16135_v27 = vpop.f32.mrb[18].mxu1  ;;  %13777 = vmatpush3.bf16.xpose.msk.msra.mxu0 %vm16100_vm2, %v13772_v44 }
 0x3e2   :  { %v773_v31 = vpop.f32.mrb[19].mxu1  ;;  %14509 = vrot.lane.b32.xlu1 %v14508_v29, %s15404_s9 }
 0x3e3   :  { %v16142_v54 = vpack.i.bf16 %v773_v31, %v767_v45  ;;  %v16144_v1 = vpop.permute.xlu1 %850  ;;  %v14455_v2 = vpop.permute.xlu0 %14454  ;;  %v16146_v21 = vpack.c.bf16 %v773_v31, %v767_v45 }
 0x3e4   :  { %v14503_v32 = vpack.i.bf16 %v16144_v1, %v16123_v55  ;;  %v14457_v14 = vunpack.i.h.bf16 %v14455_v2  ;;  %v14456_v7 = vunpack.i.l.bf16 %v14455_v2 }
 0x3e5   :  { %20682 = vst [vmem:[#allocation18_spill] sm:$0xff] %v16142_v54  ;;  %v16150_v39 = vpop.f32.mrb[20].mxu1 }
 0x3e6   :  { %v13778_v44 = vpack.c.bf16 %v14457_v14, %v14456_v7  ;;  %v779_v36 = vpop.f32.mrb[21].mxu1  ;;  %14504 = vrot.lane.b32.xlu0 %v14503_v32, %s15404_s9 }
 0x3e7   :  { %v16153_v29 = vpop.permute.xlu0 %860 }
 0x3e8   :  { %13780 = vmatprep.subr.msk.bf16.mxu0 %vm16100_vm2, %v13778_v44 }
 0x3e9   :  { %v16157_v37 = vpop.f32.mrb[22].mxu1  ;;  %13783 = vmatpush3.bf16.xpose.msk.msra.mxu0 %vm16100_vm2, %v13778_v44 }
 0x3ea   :  { %v785_v45 = vpop.f32.mrb[23].mxu1 }
 0x3eb   :  { %v16163_v2 = vpack.i.bf16 %v785_v45, %v779_v36  ;;  %v14465_v7 = vpop.permute.xlu0 %14464  ;;  %v16165_v14 = vpack.c.bf16 %v785_v45, %v779_v36 }
 0x3ec   :  { %v14467_v32 = vunpack.i.h.bf16 %v14465_v7  ;;  %v14466_v35 = vunpack.i.l.bf16 %v14465_v7 }
 0x3ed   :  { %20683 = vst [vmem:[#allocation19_spill] sm:$0xff] %v16163_v2  ;;  %v16167_v6 = vpop.f32.mrb[24].mxu1 }
 0x3ee   :  { %v13784_v33 = vpack.c.bf16 %v14467_v32, %v14466_v35  ;;  %v791_v5 = vpop.f32.mrb[25].mxu1 }
 0x3f0   :  { %13786 = vmatprep.subr.msk.bf16.mxu0 %vm16100_vm2, %v13784_v33 }
 0x3f1   :  { %v16171_v20 = vpop.f32.mrb[26].mxu1  ;;  %13789 = vmatpush3.bf16.xpose.msk.msra.mxu0 %vm16100_vm2, %v13784_v33 }
 0x3f2   :  { %v797_v44 = vpop.f32.mrb[27].mxu1 }
 0x3f3   :  { %v16177_v36 = vpack.i.bf16 %v797_v44, %v791_v5  ;;  %v16179_v45 = vpack.c.bf16 %v797_v44, %v791_v5 }
 0x3f5   :  { %20684 = vst [vmem:[#allocation20_spill] sm:$0xff] %v16177_v36  ;;  %v16181_v7 = vpop.f32.mrb[28].mxu1 }
 0x3f6   :  { %v803_v35 = vpop.f32.mrb[29].mxu1 }
 0x3f8   :  { %12692 = vmatmul.mubr.msk.f32.vlgmr.msra.gmra.mrb[16].mxu0 %vm1100_vm1, %v15974_v13 }
 0x3f9   :  { %v16185_v32 = vpop.f32.mrb[30].mxu1  ;;  %12694 = vmatprep.mubr.msk.f32.mxu0 %vm1100_vm1, %v15983_v38 }
 0x3fa   :  { %v809_v33 = vpop.f32.mrb[31].mxu1  ;;  %v14538_v17 = vpack.i.bf16 %v16185_v32, %v16181_v7 }
 0x3fb   :  { %v16191_v31 = vpack.i.bf16 %v809_v33, %v803_v35  ;;  %v16193_v22 = vpack.c.bf16 %v809_v33, %v803_v35  ;;  %v16218_v35 = vpop.permute.xlu0 %864 }
 0x3fc   :  { %12695 = vmatmul.mubr.msk.f32.gmra.mrb[18].mxu0 %vm1100_vm1, %v15987_v59 }
 0x3fd   :  { %20685 = vst [vmem:[#allocation21_spill] sm:$0xff] %v16191_v31  ;;  %20686 = vst [vmem:[#allocation22_spill] sm:$0xff] %v16193_v22  ;;  %12697 = vmatprep.mubr.msk.f32.mxu0 %vm1100_vm1, %v15997_v16 }
 0x400   :  { %12698 = vmatmul.mubr.msk.f32.gmra.mrb[20].mxu0 %vm1100_vm1, %v16001_v60 }
 0x401   :  { %12700 = vmatprep.mubr.msk.f32.mxu0 %vm1100_vm1, %v16011_v48 }
 0x404   :  { %12701 = vmatmul.mubr.msk.f32.gmra.mrb[22].mxu0 %vm1100_vm1, %v16015_v34 }
 0x405   :  { %12747 = vmatprep.mubr.msk.f32.mxu0 %vm1100_vm1, %v16082_v25 }
 0x424   :  { %v14460_v5 = vpop.permute.xlu1 %14459 }
 0x425   :  { %v14462_v13 = vunpack.i.h.bf16 %v14460_v5  ;;  %v14461_v38 = vunpack.i.l.bf16 %v14460_v5 }
 0x427   :  { %v13790_v44 = vpack.c.bf16 %v14462_v13, %v14461_v38 }
 0x428   :  { %v16207_v59 = vpop.permute.xlu1 %862 }
 0x429   :  { %v14513_v16 = vpack.i.bf16 %v16207_v59, %v16153_v29  ;;  %13792 = vmatprep.subr.msk.bf16.mxu1 %vm16100_vm2, %v13790_v44 }
 0x42a   :  { %13795 = vmatpush3.bf16.xpose.msk.msra.mxu1 %vm16100_vm2, %v13790_v44 }
 0x42b   :  { %14514 = vrot.lane.b32.xlu0 %v14513_v16, %s15404_s9 }
 0x42c   :  { %v14470_v60 = vpop.permute.xlu1 %14469 }
 0x42d   :  { %v14472_v48 = vunpack.i.h.bf16 %v14470_v60  ;;  %v14471_v34 = vunpack.i.l.bf16 %v14470_v60 }
 0x42f   :  { %v13796_v25 = vpack.c.bf16 %v14472_v48, %v14471_v34  ;;  %876 = vrot.lane.b32.xlu0 %v16125_v28, %s15402_s7 }
 0x430   :  { %v16220_v33 = vpop.permute.xlu1 %866 }
 0x431   :  { %v14518_v5 = vpack.i.bf16 %v16220_v33, %v16218_v35  ;;  %13798 = vmatprep.subr.msk.bf16.mxu1 %vm16100_vm2, %v13796_v25 }
 0x432   :  { %13801 = vmatpush3.bf16.xpose.msk.msra.mxu1 %vm16100_vm2, %v13796_v25 }
 0x433   :  { %892 = vrot.lane.b32.xlu0 %v16125_v28, %s15403_s8  ;;  %14519 = vrot.lane.b32.xlu1 %v14518_v5, %s15404_s9 }
 0x434   :  { %v14475_v13 = vpop.permute.xlu0 %14474 }
 0x435   :  { %v14477_v38 = vunpack.i.h.bf16 %v14475_v13  ;;  %v14476_v44 = vunpack.i.l.bf16 %v14475_v13 }
 0x437   :  { %v13802_v16 = vpack.c.bf16 %v14477_v38, %v14476_v44  ;;  %880 = vrot.lane.b32.xlu0 %v16150_v39, %s15402_s7  ;;  %878 = vrot.lane.b32.xlu1 %v16135_v27, %s15402_s7 }
 0x439   :  { %13804 = vmatprep.subr.msk.bf16.mxu1 %vm16100_vm2, %v13802_v16 }
 0x43a   :  { %13807 = vmatpush3.bf16.xpose.msk.msra.mxu1 %vm16100_vm2, %v13802_v16 }
 0x43b   :  { %896 = vrot.lane.b32.xlu0 %v16150_v39, %s15403_s8  ;;  %894 = vrot.lane.b32.xlu1 %v16135_v27, %s15403_s8 }
 0x43c   :  { %v14480_v60 = vpop.permute.xlu1 %14479 }
 0x43d   :  { %v14482_v48 = vunpack.i.h.bf16 %v14480_v60  ;;  %v14481_v34 = vunpack.i.l.bf16 %v14480_v60 }
 0x43f   :  { %v13808_v25 = vpack.c.bf16 %v14482_v48, %v14481_v34  ;;  %884 = vrot.lane.b32.xlu0 %v16167_v6, %s15402_s7  ;;  %882 = vrot.lane.b32.xlu1 %v16157_v37, %s15402_s7 }
 0x440   :  { %v14485_v5 = vpop.permute.xlu0 %14484 }
 0x441   :  { %v14487_v13 = vunpack.i.h.bf16 %v14485_v5  ;;  %v14486_v38 = vunpack.i.l.bf16 %v14485_v5  ;;  %13810 = vmatprep.subr.msk.bf16.mxu1 %vm16100_vm2, %v13808_v25 }
 0x442   :  { %13813 = vmatpush3.bf16.xpose.msk.msra.mxu1 %vm16100_vm2, %v13808_v25 }
 0x443   :  { %v13814_v44 = vpack.c.bf16 %v14487_v13, %v14486_v38  ;;  %900 = vrot.lane.b32.xlu0 %v16167_v6, %s15403_s8  ;;  %898 = vrot.lane.b32.xlu1 %v16157_v37, %s15403_s8 }
 0x444   :  { %v14490_v16 = vpop.permute.xlu1 %14489 }
 0x445   :  { %v14492_v60 = vunpack.i.h.bf16 %v14490_v16  ;;  %v14491_v48 = vunpack.i.l.bf16 %v14490_v16  ;;  %13816 = vmatprep.subr.msk.bf16.mxu0 %vm16100_vm2, %v13814_v44 }
 0x446   :  { %13819 = vmatpush3.bf16.xpose.msk.msra.mxu0 %vm16100_vm2, %v13814_v44 }
 0x447   :  { %v13820_v34 = vpack.c.bf16 %v14492_v60, %v14491_v48  ;;  %888 = vrot.lane.b32.xlu0 %v16181_v7, %s15402_s7  ;;  %886 = vrot.lane.b32.xlu1 %v16171_v20, %s15402_s7  ;;  %v20687_v60 = vpack.i.bf16 %v16135_v27, %v16125_v28 }
 0x448   :  { %v14495_v25 = vpop.permute.xlu0 %14494 }
 0x449   :  { %12720 = vmatmul.mubr.msk.f32.vlgmr.msra.gmra.mrb[32].mxu1 %vm1100_vm1, %v16056_v23  ;;  %13822 = vmatprep.subr.msk.bf16.mxu0 %vm16100_vm2, %v13820_v34  ;;  %v14497_v5 = vunpack.i.h.bf16 %v14495_v25  ;;  %v14496_v13 = vunpack.i.l.bf16 %v14495_v25 }
 0x44a   :  { %12722 = vmatprep.mubr.msk.f32.mxu1 %vm1100_vm1, %v16060_v53 }
 0x44b   :  { %904 = vrot.lane.b32.xlu0 %v16181_v7, %s15403_s8  ;;  %902 = vrot.lane.b32.xlu1 %v16171_v20, %s15403_s8  ;;  %v13826_v23 = vpack.c.bf16 %v14497_v5, %v14496_v13 }
 0x44c   :  { %v14500_v38 = vpop.permute.xlu1 %14499 }
 0x44d   :  { %v14502_v44 = vunpack.i.h.bf16 %v14500_v38  ;;  %v14501_v16 = vunpack.i.l.bf16 %v14500_v38  ;;  %12723 = vmatmul.mubr.msk.f32.gmra.mrb[34].mxu1 %vm1100_vm1, %v16064_v15  ;;  %v20688_v15 = vpack.i.bf16 %v16171_v20, %v16167_v6 }
 0x44e   :  { %12725 = vmatprep.mubr.msk.f32.mxu1 %vm1100_vm1, %v16071_v40  ;;  %13825 = vmatpush3.bf16.xpose.msk.msra.mxu0 %vm16100_vm2, %v13820_v34  ;;  %v20689_v34 = vpack.i.bf16 %v16157_v37, %v16150_v39 }
 0x44f   :  { %v13838_v53 = vpack.c.bf16 %v14502_v44, %v14501_v16  ;;  %14524 = vrot.lane.b32.xlu0 %v20687_v60, %s15404_s9  ;;  %890 = vrot.lane.b32.xlu1 %v16185_v32, %s15402_s7 }
 0x450   :  { %13828 = vmatprep.subr.msk.bf16.mxu0 %vm16100_vm2, %v13826_v23 }
 0x451   :  { %12726 = vmatmul.mubr.msk.f32.gmra.mrb[36].mxu1 %vm1100_vm1, %v16073_v19  ;;  %13840 = vmatprep.subr.msk.bf16.mxu1 %vm16100_vm2, %v13838_v53 }
 0x452   :  { %12728 = vmatprep.mubr.msk.f32.mxu1 %vm1100_vm1, %v16078_v46  ;;  %13843 = vmatpush3.bf16.xpose.msk.msra.mxu1 %vm16100_vm2, %v13838_v53 }
 0x453   :  { %14534 = vrot.lane.b32.xlu0 %v20688_v15, %s15404_s9  ;;  %906 = vrot.lane.b32.xlu1 %v16185_v32, %s15403_s8 }
 0x454   :  { %v14510_v40 = vpop.permute.xlu1 %14509 }
 0x455   :  { %v14512_v48 = vunpack.i.h.bf16 %v14510_v40  ;;  %v14511_v19 = vunpack.i.l.bf16 %v14510_v40  ;;  %12729 = vmatmul.mubr.msk.f32.gmra.mrb[38].mxu1 %vm1100_vm1, %v16080_v41 }
 0x456   :  { %13831 = vmatpush3.bf16.xpose.msk.msra.mxu0 %vm16100_vm2, %v13826_v23  ;;  %12775 = vmatprep.mubr.msk.f32.mxu1 %vm1100_vm1, %v16116_v49 }
 0x457   :  { %v13844_v46 = vpack.c.bf16 %v14512_v48, %v14511_v19  ;;  %910 = vrot.lane.b32.xlu0 %v16135_v27, %s15405_s10  ;;  %14529 = vrot.lane.b32.xlu1 %v20689_v34, %s15404_s9 }
 0x458   :  { %v14505_v25 = vpop.permute.xlu0 %14504 }
 0x459   :  { %v14507_v5 = vunpack.i.h.bf16 %v14505_v25  ;;  %v14506_v13 = vunpack.i.l.bf16 %v14505_v25  ;;  %13846 = vmatprep.subr.msk.bf16.mxu1 %vm16100_vm2, %v13844_v46 }
 0x45a   :  { %13849 = vmatpush3.bf16.xpose.msk.msra.mxu1 %vm16100_vm2, %v13844_v46 }
 0x45b   :  { %v13832_v41 = vpack.c.bf16 %v14507_v5, %v14506_v13  ;;  %912 = vrot.lane.b32.xlu0 %v16150_v39, %s15405_s10  ;;  %908 = vrot.lane.b32.xlu1 %v16125_v28, %s15405_s10 }
 0x45d   :  { %13834 = vmatprep.subr.msk.bf16.mxu0 %vm16100_vm2, %v13832_v41 }
 0x45e   :  { %13837 = vmatpush3.bf16.xpose.msk.msra.mxu0 %vm16100_vm2, %v13832_v41 }
 0x45f   :  { %916 = vrot.lane.b32.xlu0 %v16167_v6, %s15405_s10  ;;  %14539 = vrot.lane.b32.xlu1 %v14538_v17, %s15404_s9 }
 0x463   :  { %914 = vrot.lane.b32.xlu1 %v16157_v37, %s15405_s10 }
 0x465   :  { %12748 = vmatmul.mubr.msk.f32.vlgmr.msra.gmra.mrb[24].mxu0 %vm1100_vm1, %v16087_v50 }
 0x466   :  { %12750 = vmatprep.mubr.msk.f32.mxu0 %vm1100_vm1, %v16089_v47 }
 0x469   :  { %12751 = vmatmul.mubr.msk.f32.gmra.mrb[26].mxu0 %vm1100_vm1, %v16094_v52 }
 0x46a   :  { %12753 = vmatprep.mubr.msk.f32.mxu0 %vm1100_vm1, %v16105_v57 }
 0x46d   :  { %12754 = vmatmul.mubr.msk.f32.gmra.mrb[28].mxu0 %vm1100_vm1, %v16107_v0 }
 0x46e   :  { %12756 = vmatprep.mubr.msk.f32.mxu0 %vm1100_vm1, %v16123_v55 }
 0x471   :  { %12757 = vmatmul.mubr.msk.f32.gmra.mrb[30].mxu0 %vm1100_vm1, %v16144_v1 }
 0x472   :  { %12803 = vmatprep.mubr.msk.f32.mxu0 %vm1100_vm1, %v16125_v28 }
 0x49d   :  { %v14515_v17 = vpop.permute.xlu0 %14514 }
 0x49e   :  { %v14517_v50 = vunpack.i.h.bf16 %v14515_v17  ;;  %v14516_v47 = vunpack.i.l.bf16 %v14515_v17 }
 0x4a0   :  { %v13850_v49 = vpack.c.bf16 %v14517_v50, %v14516_v47 }
 0x4a1   :  { %v877_v52 = vpop.permute.xlu0 %876 }
 0x4a2   :  { %13852 = vmatprep.subr.msk.bf16.mxu1 %vm16100_vm2, %v13850_v49 }
 0x4a3   :  { %13855 = vmatpush3.bf16.xpose.msk.msra.mxu1 %vm16100_vm2, %v13850_v49 }
 0x4a5   :  { %v14520_v57 = vpop.permute.xlu1 %14519  ;;  %v16353_v0 = vpop.permute.xlu0 %892 }
 0x4a6   :  { %v14522_v55 = vunpack.i.h.bf16 %v14520_v57  ;;  %v14521_v38 = vunpack.i.l.bf16 %v14520_v57 }
 0x4a8   :  { %v13856_v1 = vpack.c.bf16 %v14522_v55, %v14521_v38 }
 0x4a9   :  { %v16355_v44 = vpop.permute.xlu1 %878  ;;  %v16357_v28 = vpop.permute.xlu0 %880 }
 0x4aa   :  { %v14543_v16 = vpack.i.bf16 %v16355_v44, %v877_v52  ;;  %13858 = vmatprep.subr.msk.bf16.mxu1 %vm16100_vm2, %v13856_v1 }
 0x4ab   :  { %13861 = vmatpush3.bf16.xpose.msk.msra.mxu1 %vm16100_vm2, %v13856_v1 }
 0x4ac   :  { %14544 = vrot.lane.b32.xlu0 %v14543_v16, %s15404_s9 }
 0x4ad   :  { %v16365_v23 = vpop.permute.xlu1 %894  ;;  %v16367_v53 = vpop.permute.xlu0 %896 }
 0x4ae   :  { %v14548_v60 = vpack.i.bf16 %v16365_v23, %v16353_v0 }
 0x4b0   :  { %920 = vrot.lane.b32.xlu0 %v16181_v7, %s15405_s10  ;;  %14549 = vrot.lane.b32.xlu1 %v14548_v60, %s15404_s9 }
 0x4b1   :  { %v16374_v15 = vpop.permute.xlu1 %882  ;;  %v16376_v40 = vpop.permute.xlu0 %884 }
 0x4b2   :  { %v14553_v48 = vpack.i.bf16 %v16374_v15, %v16357_v28  ;;  %12776 = vmatmul.mubr.msk.f32.vlgmr.msra.gmra.mrb[40].mxu1 %vm1100_vm1, %v16118_v30 }
 0x4b3   :  { %12778 = vmatprep.mubr.msk.f32.mxu1 %vm1100_vm1, %v16129_v26 }
 0x4b4   :  { %918 = vrot.lane.b32.xlu1 %v16171_v20, %s15405_s10  ;;  %14554 = vrot.lane.b32.xlu0 %v14553_v48, %s15404_s9 }
 0x4b5   :  { %v16387_v19 = vpop.permute.xlu1 %898  ;;  %v16389_v46 = vpop.permute.xlu0 %900 }
 0x4b6   :  { %v14558_v34 = vpack.i.bf16 %v16387_v19, %v16367_v53  ;;  %12779 = vmatmul.mubr.msk.f32.gmra.mrb[42].mxu1 %vm1100_vm1, %v16127_v42 }
 0x4b7   :  { %12781 = vmatprep.mubr.msk.f32.mxu1 %vm1100_vm1, %v16153_v29 }
 0x4b8   :  { %14559 = vrot.lane.b32.xlu1 %v14558_v34, %s15404_s9 }
 0x4b9   :  { %v16398_v30 = vpop.permute.xlu1 %886  ;;  %v16400_v26 = vpop.permute.xlu0 %888 }
 0x4ba   :  { %12782 = vmatmul.mubr.msk.f32.gmra.mrb[44].mxu1 %vm1100_vm1, %v16207_v59 }
 0x4bb   :  { %12784 = vmatprep.mubr.msk.f32.mxu1 %vm1100_vm1, %v16218_v35 }
 0x4bc   :  { %922 = vrot.lane.b32.xlu1 %v16185_v32, %s15405_s10 }
 0x4bd   :  { %v16408_v25 = vpop.permute.xlu1 %902  ;;  %v16410_v42 = vpop.permute.xlu0 %904 }
 0x4be   :  { %v14573_v29 = vpack.i.bf16 %v16408_v25, %v16389_v46  ;;  %12785 = vmatmul.mubr.msk.f32.gmra.mrb[46].mxu1 %vm1100_vm1, %v16220_v33 }
 0x4bf   :  { %12831 = vmatprep.mubr.msk.f32.mxu1 %vm1100_vm1, %v877_v52 }
 0x4c0   :  { %14574 = vrot.lane.b32.xlu1 %v14573_v29, %s15404_s9 }
 0x4c1   :  { %v16418_v59 = vpop.permute.xlu1 %890  ;;  %v14525_v35 = vpop.permute.xlu0 %14524 }
 0x4c2   :  { %v14527_v5 = vunpack.i.h.bf16 %v14525_v35  ;;  %v14526_v13 = vunpack.i.l.bf16 %v14525_v35  ;;  %v14588_v62 = vpack.i.bf16 %v16418_v59, %v16400_v26 }
 0x4c4   :  { %v13862_v41 = vpack.c.bf16 %v14527_v5, %v14526_v13  ;;  %v14568_v13 = vpack.i.bf16 %v16398_v30, %v16376_v40 }
 0x4c5   :  { %v16420_v17 = vpop.permute.xlu1 %906  ;;  %v14535_v50 = vpop.permute.xlu0 %14534 }
 0x4c6   :  { %13864 = vmatprep.subr.msk.bf16.mxu0 %vm16100_vm2, %v13862_v41  ;;  %v14537_v47 = vunpack.i.h.bf16 %v14535_v50  ;;  %v14536_v49 = vunpack.i.l.bf16 %v14535_v50 }
 0x4c7   :  { %13867 = vmatpush3.bf16.xpose.msk.msra.mxu0 %vm16100_vm2, %v13862_v41 }
 0x4c8   :  { %v13874_v48 = vpack.c.bf16 %v14537_v47, %v14536_v49 }
 0x4c9   :  { %v14530_v33 = vpop.permute.xlu1 %14529  ;;  %v16430_v16 = vpop.permute.xlu0 %910 }
 0x4ca   :  { %v14532_v52 = vunpack.i.h.bf16 %v14530_v33  ;;  %v14531_v57 = vunpack.i.l.bf16 %v14530_v33 }
 0x4cb   :  { %v16426_v55 = vpop.f32.mrb[16].mxu0 }
 0x4cc   :  { %v13868_v38 = vpack.c.bf16 %v14532_v52, %v14531_v57  ;;  %v16428_v1 = vpop.f32.mrb[17].mxu0  ;;  %v16588_v22 = vmul.f32 0.25, %v16426_v55 }
 0x4cd   :  { %v16432_v60 = vpop.permute.xlu1 %908  ;;  %v16454_v49 = vpop.permute.xlu0 %912 }
 0x4ce   :  { %v14563_v34 = vpack.i.bf16 %v16430_v16, %v16432_v60  ;;  %13870 = vmatprep.subr.msk.bf16.mxu0 %vm16100_vm2, %v13868_v38 }
 0x4cf   :  { %v16438_v29 = vpop.f32.mrb[18].mxu0  ;;  %13873 = vmatpush3.bf16.xpose.msk.msra.mxu0 %vm16100_vm2, %v13868_v38 }
 0x4d0   :  { %14564 = vrot.lane.b32.xlu0 %v14563_v34, %s15404_s9  ;;  %v16443_v35 = vpop.f32.mrb[19].mxu0  ;;  %13876 = vmatprep.subr.msk.bf16.mxu0 %vm16100_vm2, %v13874_v48 }
 0x4d1   :  { %v14540_v5 = vpop.permute.xlu1 %14539 }
 0x4d2   :  { %v14542_v41 = vunpack.i.h.bf16 %v14540_v5  ;;  %v14541_v50 = vunpack.i.l.bf16 %v14540_v5 }
 0x4d3   :  { %v16449_v33 = vpop.f32.mrb[20].mxu0 }
 0x4d4   :  { %14569 = vrot.lane.b32.xlu0 %v14568_v13, %s15404_s9  ;;  %v16452_v47 = vpop.f32.mrb[21].mxu0  ;;  %v13880_v57 = vpack.c.bf16 %v14542_v41, %v14541_v50  ;;  %v14598_v13 = vpack.i.bf16 %v16420_v17, %v16410_v42 }
 0x4d5   :  { %v16456_v52 = vpop.permute.xlu1 %914 }
 0x4d6   :  { %v14578_v38 = vpack.i.bf16 %v16456_v52, %v16454_v49 }
 0x4d7   :  { %v16460_v34 = vpop.f32.mrb[22].mxu0  ;;  %13879 = vmatpush3.bf16.xpose.msk.msra.mxu0 %vm16100_vm2, %v13874_v48 }
 0x4d8   :  { %14579 = vrot.lane.b32.xlu1 %v14578_v38, %s15404_s9  ;;  %v16465_v5 = vpop.f32.mrb[23].mxu0  ;;  %13882 = vmatprep.subr.msk.bf16.mxu0 %vm16100_vm2, %v13880_v57 }
 0x4dc   :  { %14599 = vrot.lane.b32.xlu1 %v14598_v13, %s15404_s9 }
 0x4df   :  { %13885 = vmatpush3.bf16.xpose.msk.msra.mxu0 %vm16100_vm2, %v13880_v57 }
 0x4e0   :  { %14604 = vrot.lane.b32.xlu1 %v15993_v8, %s15402_s7 }
 0x4e4   :  { %14614 = vrot.lane.b32.xlu1 %v16022_v61, %s15402_s7 }
 0x4e6   :  { %12804 = vmatmul.mubr.msk.f32.vlgmr.msra.gmra.mrb[32].mxu0 %vm1100_vm1, %v16135_v27 }
 0x4e7   :  { %12806 = vmatprep.mubr.msk.f32.mxu0 %vm1100_vm1, %v16150_v39  ;;  %v16500_v39 = vpop.permute.xlu0 %916 }
 0x4e8   :  { %14624 = vrot.lane.b32.xlu1 %v15993_v8, %s15403_s8 }
 0x4ea   :  { %12807 = vmatmul.mubr.msk.f32.gmra.mrb[34].mxu0 %vm1100_vm1, %v16157_v37 }
 0x4eb   :  { %12809 = vmatprep.mubr.msk.f32.mxu0 %vm1100_vm1, %v16167_v6 }
 0x4ec   :  { %14634 = vrot.lane.b32.xlu1 %v16022_v61, %s15403_s8 }
 0x4ee   :  { %12810 = vmatmul.mubr.msk.f32.gmra.mrb[36].mxu0 %vm1100_vm1, %v16171_v20 }
 0x4ef   :  { %12812 = vmatprep.mubr.msk.f32.mxu0 %vm1100_vm1, %v16181_v7 }
 0x4f0   :  { %14649 = vrot.lane.b32.xlu1 %v16007_v3, %s15405_s10 }
 0x4f2   :  { %12813 = vmatmul.mubr.msk.f32.gmra.mrb[38].mxu0 %vm1100_vm1, %v16185_v32 }
 0x4f3   :  { %12859 = vmatprep.mubr.msk.f32.mxu0 %vm1100_vm1, %v16353_v0 }
 0x51c   :  { %v16502_v6 = vpop.f32.mrb[32].mxu1 }
 0x51d   :  { %v16504_v27 = vpop.f32.mrb[33].mxu1  ;;  %v16608_v55 = vmul.f32 0.25, %v16502_v6 }
 0x51e   :  { %v14545_v37 = vpop.permute.xlu0 %14544 }
 0x51f   :  { %v14547_v20 = vunpack.i.h.bf16 %v14545_v37  ;;  %v14546_v48 = vunpack.i.l.bf16 %v14545_v37 }
 0x520   :  { %v16506_v41 = vpop.f32.mrb[34].mxu1 }
 0x521   :  { %v13886_v7 = vpack.c.bf16 %v14547_v20, %v14546_v48  ;;  %v16508_v50 = vpop.f32.mrb[35].mxu1 }
 0x522   :  { %v14550_v57 = vpop.permute.xlu1 %14549  ;;  %v16510_v38 = vpop.permute.xlu0 %920 }
 0x523   :  { %20690 = vst [vmem:[#allocation23_spill] sm:$0xff] %v16510_v38  ;;  %v14552_v32 = vunpack.i.h.bf16 %v14550_v57  ;;  %v14551_v13 = vunpack.i.l.bf16 %v14550_v57  ;;  %13888 = vmatprep.subr.msk.bf16.mxu1 %vm16100_vm2, %v13886_v7 }
 0x524   :  { %v16514_v0 = vpop.f32.mrb[36].mxu1  ;;  %13891 = vmatpush3.bf16.xpose.msk.msra.mxu1 %vm16100_vm2, %v13886_v7 }
 0x525   :  { %v13910_v18 = vpack.c.bf16 %v14552_v32, %v14551_v13  ;;  %v16518_v37 = vpop.f32.mrb[37].mxu1 }
 0x526   :  { %v16520_v10 = vpop.permute.xlu1 %918  ;;  %v14555_v20 = vpop.permute.xlu0 %14554 }
 0x527   :  { %v14583_v48 = vpack.i.bf16 %v16520_v10, %v16500_v39  ;;  %v14557_v9 = vunpack.i.h.bf16 %v14555_v20  ;;  %v14556_v63 = vunpack.i.l.bf16 %v14555_v20  ;;  %13912 = vmatprep.subr.msk.bf16.mxu0 %vm16100_vm2, %v13910_v18 }
 0x528   :  { %v16526_v57 = vpop.f32.mrb[38].mxu1  ;;  %13915 = vmatpush3.bf16.xpose.msk.msra.mxu0 %vm16100_vm2, %v13910_v18 }
 0x529   :  { %v13892_v7 = vpack.c.bf16 %v14557_v9, %v14556_v63  ;;  %14584 = vrot.lane.b32.xlu0 %v14583_v48, %s15404_s9  ;;  %v16531_v32 = vpop.f32.mrb[39].mxu1 }
 0x52a   :  { %v14560_v13 = vpop.permute.xlu1 %14559 }
 0x52b   :  { %v14562_v43 = vunpack.i.h.bf16 %v14560_v13  ;;  %v14561_v58 = vunpack.i.l.bf16 %v14560_v13  ;;  %13894 = vmatprep.subr.msk.bf16.mxu1 %vm16100_vm2, %v13892_v7 }
 0x52c   :  { %13897 = vmatpush3.bf16.xpose.msk.msra.mxu1 %vm16100_vm2, %v13892_v7 }
 0x52d   :  { %v13916_v20 = vpack.c.bf16 %v14562_v43, %v14561_v58  ;;  %14589 = vrot.lane.b32.xlu0 %v14588_v62, %s15404_s9 }
 0x52e   :  { %v16540_v63 = vpop.permute.xlu1 %922 }
 0x52f   :  { %20691 = vst [vmem:[#allocation24_spill] sm:$0xff] %v16540_v63  ;;  %v14658_v9 = vpack.i.bf16 %v16540_v63, %v16510_v38  ;;  %13918 = vmatprep.subr.msk.bf16.mxu0 %vm16100_vm2, %v13916_v20 }
 0x530   :  { %13921 = vmatpush3.bf16.xpose.msk.msra.mxu0 %vm16100_vm2, %v13916_v20 }
 0x531   :  { %14594 = vrot.lane.b32.xlu0 %v15979_v56, %s15402_s7  ;;  %14659 = vrot.lane.b32.xlu1 %v14658_v9, %s15404_s9 }
 0x532   :  { %v14575_v18 = vpop.permute.xlu1 %14574 }
 0x533   :  { %v14577_v43 = vunpack.i.h.bf16 %v14575_v18  ;;  %v14576_v58 = vunpack.i.l.bf16 %v14575_v18 }
 0x535   :  { %v13922_v62 = vpack.c.bf16 %v14577_v43, %v14576_v58  ;;  %14609 = vrot.lane.b32.xlu0 %v16007_v3, %s15402_s7 }
 0x537   :  { %13924 = vmatprep.subr.msk.bf16.mxu0 %vm16100_vm2, %v13922_v62 }
 0x538   :  { %v12749_v48 = vpop.f32.mrb[24].mxu0  ;;  %13927 = vmatpush3.bf16.xpose.msk.msra.mxu0 %vm16100_vm2, %v13922_v62 }
 0x539   :  { %14619 = vrot.lane.b32.xlu0 %v15979_v56, %s15403_s8  ;;  %v16559_v7 = vpop.f32.mrb[25].mxu0 }
 0x53c   :  { %v12752_v13 = vpop.f32.mrb[26].mxu0 }
 0x53d   :  { %14629 = vrot.lane.b32.xlu0 %v16007_v3, %s15403_s8  ;;  %v16563_v20 = vpop.f32.mrb[27].mxu0 }
 0x540   :  { %v16565_v9 = vpop.f32.mrb[28].mxu0 }
 0x541   :  { %14639 = vrot.lane.b32.xlu0 %v15979_v56, %s15405_s10  ;;  %v16569_v18 = vpop.f32.mrb[29].mxu0 }
 0x542   :  { %v16571_v43 = vpop.permute.xlu0 %14564 }
 0x544   :  { %v16573_v58 = vpop.f32.mrb[30].mxu0 }
 0x545   :  { %14644 = vrot.lane.b32.xlu0 %v15993_v8, %s15405_s10  ;;  %v16577_v62 = vpop.f32.mrb[31].mxu0 }
 0x546   :  { %v14570_v31 = vpop.permute.xlu0 %14569 }
 0x547   :  { %v14572_v3 = vunpack.i.h.bf16 %v14570_v31  ;;  %v14571_v36 = vunpack.i.l.bf16 %v14570_v31  ;;  %v2376_v31 = vsel %vm346_vm0, %v16588_v22, -inf }
 0x549   :  { %v13898_v2 = vpack.c.bf16 %v14572_v3, %v14571_v36  ;;  %14654 = vrot.lane.b32.xlu0 %v16022_v61, %s15405_s10  ;;  %v16593_v61 = vmul.f32 0.25, %v16449_v33 }
 0x54a   :  { %v16581_v54 = vpop.permute.xlu1 %14579 }
 0x54b   :  { %13900 = vmatprep.subr.msk.bf16.mxu1 %vm16100_vm2, %v13898_v2  ;;  %v2388_v36 = vsel %vm346_vm0, %v16593_v61, -inf }
 0x54c   :  { %13903 = vmatpush3.bf16.xpose.msk.msra.mxu1 %vm16100_vm2, %v13898_v2  ;;  %v16601_v2 = vmul.f32 0.25, %v16460_v34  ;;  %v16618_v34 = vmul.f32 0.25, %v12749_v48  ;;  %v16683_v48 = vmul.f32 0.25, %v16504_v27 }
 0x54e   :  { %v14600_v56 = vpop.permute.xlu1 %14599  ;;  %v2394_v33 = vsel %vm346_vm0, %v16601_v2, -inf  ;;  %v2397_v3 = vsel %vm346_vm0, %v16683_v48, -inf }
 0x54f   :  { %v14602_v63 = vunpack.i.h.bf16 %v14600_v56  ;;  %v14601_v8 = vunpack.i.l.bf16 %v14600_v56  ;;  %v16700_v56 = vmul.f32 0.25, %v16508_v50 }
 0x551   :  { %v13928_v38 = vpack.c.bf16 %v14602_v63, %v14601_v8  ;;  %v16705_v8 = vmul.f32 0.25, %v16563_v20 }
 0x553   :  { %13930 = vmatprep.subr.msk.bf16.mxu0 %vm16100_vm2, %v13928_v38  ;;  %v2427_v50 = vsel %vm346_vm0, %v16705_v8, -inf }
 0x554   :  { %13933 = vmatpush3.bf16.xpose.msk.msra.mxu0 %vm16100_vm2, %v13928_v38  ;;  %v16673_v38 = vmul.f32 0.25, %v16465_v5  ;;  %v16688_v5 = vmul.f32 0.25, %v16573_v58 }
 0x555   :  { %13959 = vmatprep.subr.bf16.mxu0 %v15981_v51  ;;  %2377 = vmax.xlane.f32.xlu1 %v2376_v31 }
 0x556   :  { %v2442_v27 = vsel %vm346_vm0, %v16688_v5, -inf }
 0x559   :  { %2389 = vmax.xlane.f32.xlu1 %v2388_v36 }
 0x55b   :  { %12860 = vmatmul.mubr.msk.f32.vlgmr.msra.gmra.mrb[40].mxu0 %vm1100_vm1, %v16365_v23  ;;  %v2400_v23 = vsel %vm346_vm0, %v16608_v55, -inf }
 0x55c   :  { %12862 = vmatprep.mubr.msk.f32.mxu0 %vm1100_vm1, %v16367_v53  ;;  %13961 = vmatpush3.bf16.msra.mxu0 %v15981_v51  ;;  %v16627_v51 = vmul.f32 0.25, %v16428_v1  ;;  %v16632_v53 = vmul.f32 0.25, %v16506_v41 }
 0x55d   :  { %13963 = vmatprep.subr.bf16.mxu0 %v15995_v12  ;;  %2395 = vmax.xlane.f32.xlu1 %v2394_v33 }
 0x55f   :  { %12863 = vmatmul.mubr.msk.f32.gmra.mrb[42].mxu0 %vm1100_vm1, %v16387_v19  ;;  %v16641_v19 = vmul.f32 0.25, %v16438_v29 }
 0x560   :  { %12865 = vmatprep.mubr.msk.f32.mxu0 %vm1100_vm1, %v16389_v46  ;;  %13965 = vmatpush3.bf16.msra.mxu0 %v15995_v12  ;;  %v2424_v12 = vsel %vm346_vm0, %v16618_v34, -inf  ;;  %v2373_v46 = vsel %vm346_vm0, %v16627_v51, -inf }
 0x561   :  { %13967 = vmatprep.subr.bf16.mxu0 %v16009_v4  ;;  %2401 = vmax.xlane.f32.xlu1 %v2400_v23  ;;  %v2382_v1 = vsel %vm346_vm0, %v16641_v19, -inf  ;;  %v16712_v23 = vmul.f32 0.25, %v16518_v37 }
 0x563   :  { %12866 = vmatmul.mubr.msk.f32.gmra.mrb[44].mxu0 %vm1100_vm1, %v16408_v25  ;;  %v16647_v25 = vmul.f32 0.25, %v12752_v13  ;;  %v2391_v13 = vsel %vm346_vm0, %v16673_v38, -inf }
 0x564   :  { %12868 = vmatprep.mubr.msk.f32.mxu0 %vm1100_vm1, %v16410_v42  ;;  %13969 = vmatpush3.bf16.msra.mxu0 %v16009_v4  ;;  %v2406_v4 = vsel %vm346_vm0, %v16632_v53, -inf  ;;  %v16653_v42 = vmul.f32 0.25, %v16443_v35  ;;  %v16668_v35 = vmul.f32 0.25, %v16565_v9 }
 0x565   :  { %13971 = vmatprep.subr.bf16.mxu0 %v16024_v11  ;;  %2425 = vmax.xlane.f32.xlu1 %v2424_v12  ;;  %v2430_v29 = vsel %vm346_vm0, %v16647_v25, -inf }
 0x566   :  { %v2379_v6 = vsel %vm346_vm0, %v16653_v42, -inf  ;;  %v2436_v63 = vsel %vm346_vm0, %v16668_v35, -inf }
 0x567   :  { %12869 = vmatmul.mubr.msk.f32.gmra.mrb[46].mxu0 %vm1100_vm1, %v16420_v17  ;;  %v16658_v17 = vmul.f32 0.25, %v16514_v0 }
 0x568   :  { %13973 = vmatpush3.bf16.msra.mxu0 %v16024_v11  ;;  %2374 = vmax.xlane.f32.xlu0 %v2373_v46  ;;  %v16663_v11 = vmul.f32 0.25, %v16452_v47  ;;  %v16678_v47 = vmul.f32 0.25, %v16526_v57  ;;  %v16693_v57 = vmul.f32 0.25, %v16559_v7  ;;  %v2403_v7 = vsel %vm346_vm0, %v16700_v56, -inf }
 0x569   :  { %2407 = vmax.xlane.f32.xlu1 %v2406_v4  ;;  %v2412_v41 = vsel %vm346_vm0, %v16658_v17, -inf  ;;  %v16723_v4 = vmul.f32 0.25, %v16569_v18  ;;  %v16741_v18 = vmul.f32 0.25, %v16577_v62 }
 0x56a   :  { %v2385_v0 = vsel %vm346_vm0, %v16663_v11, -inf  ;;  %v2418_v9 = vsel %vm346_vm0, %v16678_v47, -inf  ;;  %v2421_v58 = vsel %vm346_vm0, %v16693_v57, -inf }
 0x56b   :  { %20692 = vst [vmem:[#allocation25_spill] sm:$0xff] %v16723_v4 }
 0x56c   :  { %2383 = vmax.xlane.f32.xlu0 %v2382_v1  ;;  %v2409_v1 = vsel %vm346_vm0, %v16712_v23, -inf }
 0x56d   :  { %2431 = vmax.xlane.f32.xlu1 %v2430_v29 }
 0x570   :  { %2380 = vmax.xlane.f32.xlu0 %v2379_v6  ;;  %v16732_v6 = vmul.f32 0.25, %v16531_v32  ;;  %v2439_v32 = vsel %vm346_vm0, %v16741_v18, -inf }
 0x571   :  { %2413 = vmax.xlane.f32.xlu1 %v2412_v41  ;;  %v2433_v41 = vsel %vm346_vm0, %v16723_v4, -inf }
 0x574   :  { %2386 = vmax.xlane.f32.xlu0 %v2385_v0 }
 0x575   :  { %2437 = vmax.xlane.f32.xlu1 %v2436_v63 }
 0x578   :  { %2392 = vmax.xlane.f32.xlu0 %v2391_v13  ;;  %v2415_v13 = vsel %vm346_vm0, %v16732_v6, -inf }
 0x579   :  { %2419 = vmax.xlane.f32.xlu1 %v2418_v9 }
 0x57c   :  { %2398 = vmax.xlane.f32.xlu0 %v2397_v3  ;;  %v16749_v3 = vpop.permute.xlu1 %14604 }
 0x57d   :  { %2443 = vmax.xlane.f32.xlu1 %v2442_v27  ;;  %20693 = vst [vmem:[#allocation26_spill] sm:$0xff] %v16749_v3 }
 0x580   :  { %2422 = vmax.xlane.f32.xlu0 %v2421_v58 }
 0x584   :  { %2404 = vmax.xlane.f32.xlu0 %v2403_v7  ;;  %v16753_v7 = vpop.permute.xlu1 %14614 }
 0x585   :  { %v12777_v31 = vpop.f32.mrb[40].mxu1 }
 0x586   :  { %v16709_v36 = vmul.f32 0.25, %v12777_v31  ;;  %v1658_v33 = vpop.f32.mrb[41].mxu1  ;;  %v14567_v31 = vunpack.i.h.bf16 %v16571_v43 }
 0x587   :  { %v16745_v9 = vmul.f32 0.25, %v1658_v33 }
 0x588   :  { %2428 = vmax.xlane.f32.xlu0 %v2427_v50  ;;  %v2448_v12 = vsel %vm346_vm0, %v16709_v36, -inf  ;;  %v14566_v50 = vunpack.i.l.bf16 %v16571_v43  ;;  %v16759_v3 = vpop.permute.xlu1 %14624  ;;  %v14582_v43 = vunpack.i.h.bf16 %v16581_v54 }
 0x589   :  { %v16718_v20 = vpop.f32.mrb[42].mxu1  ;;  %2449 = vmax.xlane.f32.xlu1 %v2448_v12  ;;  %v2445_v58 = vsel %vm346_vm0, %v16745_v9, -inf  ;;  %20694 = vst [vmem:[#allocation27_spill] sm:$0xff] %v16759_v3 }
 0x58a   :  { %v16720_v46 = vpop.f32.mrb[43].mxu1 }
 0x58c   :  { %2410 = vmax.xlane.f32.xlu0 %v2409_v1 }
 0x58d   :  { %v16727_v37 = vpop.f32.mrb[44].mxu1 }
 0x58e   :  { %v16729_v29 = vpop.f32.mrb[45].mxu1 }
 0x58f   :  { %v16843_v24 = vmul.f32 0.25, %v16729_v29 }
 0x590   :  { %2434 = vmax.xlane.f32.xlu0 %v2433_v41 }
 0x591   :  { %v16736_v0 = vpop.f32.mrb[46].mxu1 }
 0x592   :  { %v16738_v63 = vpop.f32.mrb[47].mxu1 }
 0x594   :  { %2416 = vmax.xlane.f32.xlu0 %v2415_v13  ;;  %v13934_v13 = vpack.c.bf16 %v14567_v31, %v14566_v50  ;;  %v16770_v31 = vpop.permute.xlu1 %14634 }
 0x595   :  { %20695 = vst [vmem:[#allocation28_spill] sm:$0xff] %v16770_v31 }
 0x598   :  { %2440 = vmax.xlane.f32.xlu0 %v2439_v32 }
 0x59b   :  { %v14585_v27 = vpop.permute.xlu0 %14584 }
 0x59c   :  { %2446 = vmax.xlane.f32.xlu0 %v2445_v58 }
 0x59f   :  { %v14590_v62 = vpop.permute.xlu0 %14589 }
 0x5a0   :  { %v14592_v33 = vunpack.i.h.bf16 %v14590_v62  ;;  %v14591_v12 = vunpack.i.l.bf16 %v14590_v62  ;;  %v14581_v62 = vunpack.i.l.bf16 %v16581_v54  ;;  %v16782_v54 = vpop.permute.xlu1 %14649 }
 0x5a1   :  { %20696 = vst [vmem:[#allocation29_spill] sm:$0xff] %v16782_v54 }
 0x5a2   :  { %v13904_v1 = vpack.c.bf16 %v14592_v33, %v14591_v12  ;;  %v13940_v50 = vpack.c.bf16 %v14582_v43, %v14581_v62  ;;  %v14586_v33 = vunpack.i.l.bf16 %v14585_v27  ;;  %v16816_v43 = vmul.f32 0.25, %v16727_v37 }
 0x5a3   :  { %v14595_v41 = vpop.permute.xlu0 %14594 }
 0x5a4   :  { %v14597_v32 = vunpack.i.h.bf16 %v14595_v41  ;;  %v14596_v4 = vunpack.i.l.bf16 %v14595_v41  ;;  %13906 = vmatprep.subr.msk.bf16.mxu1 %vm16100_vm2, %v13904_v1 }
 0x5a5   :  { %13909 = vmatpush3.bf16.xpose.msk.msra.mxu1 %vm16100_vm2, %v13904_v1 }
 0x5a6   :  { %13936 = vmatprep.subr.msk.bf16.mxu1 %vm16100_vm2, %v13934_v13  ;;  %v16765_v58 = vpack.c.bf16 %v14597_v32, %v14596_v4  ;;  %v14587_v4 = vunpack.i.h.bf16 %v14585_v27 }
 0x5a8   :  { %13975 = vmatprep.subr.bf16.mxu0 %v16765_v58 }
 0x5ac   :  { %12832 = vmatmul.mubr.msk.f32.vlgmr.msra.gmra.mrb[48].mxu1 %vm1100_vm1, %v16355_v44  ;;  %v13946_v44 = vpack.c.bf16 %v14587_v4, %v14586_v33  ;;  %v16823_v4 = vmul.f32 0.25, %v16720_v46 }
 0x5ad   :  { %12834 = vmatprep.mubr.msk.f32.mxu1 %vm1100_vm1, %v16357_v28  ;;  %13939 = vmatpush3.bf16.xpose.msk.msra.mxu1 %vm16100_vm2, %v13934_v13  ;;  %v14660_v28 = vpop.permute.xlu1 %14659 }
 0x5ae   :  { %13942 = vmatprep.subr.msk.bf16.mxu1 %vm16100_vm2, %v13940_v50  ;;  %v14661_v27 = vunpack.i.l.bf16 %v14660_v28 }
 0x5b0   :  { %12835 = vmatmul.mubr.msk.f32.gmra.mrb[50].mxu1 %vm1100_vm1, %v16374_v15  ;;  %v14662_v15 = vunpack.i.h.bf16 %v14660_v28  ;;  %v2460_v28 = vsel %vm346_vm0, %v16816_v43, -inf }
 0x5b1   :  { %12837 = vmatprep.mubr.msk.f32.mxu1 %vm1100_vm1, %v16376_v40 }
 0x5b2   :  { %v13952_v41 = vpack.c.bf16 %v14662_v15, %v14661_v27  ;;  %v2451_v27 = vsel %vm346_vm0, %v16823_v4, -inf }
 0x5b4   :  { %12838 = vmatmul.mubr.msk.f32.gmra.mrb[52].mxu1 %vm1100_vm1, %v16398_v30 }
 0x5b5   :  { %12840 = vmatprep.mubr.msk.f32.mxu1 %vm1100_vm1, %v16400_v26  ;;  %13945 = vmatpush3.bf16.xpose.msk.msra.mxu1 %vm16100_vm2, %v13940_v50  ;;  %v16803_v26 = vmul.f32 0.25, %v16718_v20 }
 0x5b6   :  { %13948 = vmatprep.subr.msk.bf16.mxu1 %vm16100_vm2, %v13946_v44 }
 0x5b7   :  { %v2454_v62 = vsel %vm346_vm0, %v16803_v26, -inf }
 0x5b8   :  { %12841 = vmatmul.mubr.msk.f32.gmra.mrb[54].mxu1 %vm1100_vm1, %v16418_v59 }
 0x5b9   :  { %v12805_v40 = vpop.f32.mrb[32].mxu0  ;;  %12887 = vmatprep.mubr.msk.f32.mxu1 %vm1100_vm1, %v16432_v60 }
 0x5ba   :  { %v16798_v30 = vmul.f32 0.25, %v12805_v40  ;;  %v1811_v12 = vpop.f32.mrb[33].mxu0 }
 0x5bb   :  { %v16800_v1 = vmul.f32 0.25, %v1811_v12 }
 0x5bc   :  { %v2472_v13 = vsel %vm346_vm0, %v16798_v30, -inf }
 0x5bd   :  { %13951 = vmatpush3.bf16.xpose.msk.msra.mxu1 %vm16100_vm2, %v13946_v44  ;;  %2473 = vmax.xlane.f32.xlu1 %v2472_v13  ;;  %v12808_v59 = vpop.f32.mrb[34].mxu0  ;;  %v2469_v60 = vsel %vm346_vm0, %v16800_v1, -inf }
 0x5be   :  { %v16811_v32 = vmul.f32 0.25, %v12808_v59  ;;  %13954 = vmatprep.subr.msk.bf16.mxu1 %vm16100_vm2, %v13952_v41  ;;  %2470 = vmax.xlane.f32.xlu0 %v2469_v60  ;;  %v1821_v20 = vpop.f32.mrb[35].mxu0 }
 0x5bf   :  { %v16827_v15 = vmul.f32 0.25, %v1821_v20 }
 0x5c0   :  { %v2478_v50 = vsel %vm346_vm0, %v16811_v32, -inf }
 0x5c1   :  { %2455 = vmax.xlane.f32.xlu1 %v2454_v62  ;;  %v12811_v33 = vpop.f32.mrb[36].mxu0  ;;  %v2475_v12 = vsel %vm346_vm0, %v16827_v15, -inf }
 0x5c2   :  { %2479 = vmax.xlane.f32.xlu0 %v2478_v50  ;;  %v1831_v44 = vpop.f32.mrb[37].mxu0  ;;  %v16836_v40 = vmul.f32 0.25, %v12811_v33 }
 0x5c3   :  { %v16853_v13 = vmul.f32 0.25, %v1831_v44  ;;  %v16888_v44 = vmul.f32 0.25, %v16736_v0 }
 0x5c5   :  { %13957 = vmatpush3.bf16.xpose.msk.msra.mxu1 %vm16100_vm2, %v13952_v41  ;;  %2461 = vmax.xlane.f32.xlu1 %v2460_v28  ;;  %v12814_v37 = vpop.f32.mrb[38].mxu0  ;;  %v2484_v41 = vsel %vm346_vm0, %v16836_v40, -inf }
 0x5c6   :  { %14023 = vmatprep.subr.bf16.mxu1 %v16146_v21  ;;  %2452 = vmax.xlane.f32.xlu0 %v2451_v27  ;;  %v16834_v46 = vpop.f32.mrb[39].mxu0 }
 0x5ca   :  { %2476 = vmax.xlane.f32.xlu0 %v2475_v12 }
 0x5cc   :  { %12888 = vmatmul.mubr.msk.f32.vlgmr.msra.gmra.mrb[56].mxu1 %vm1100_vm1, %v16430_v16  ;;  %v2457_v16 = vsel %vm346_vm0, %v16843_v24, -inf }
 0x5cd   :  { %12890 = vmatprep.mubr.msk.f32.mxu1 %vm1100_vm1, %v16454_v49  ;;  %14025 = vmatpush3.bf16.msra.mxu1 %v16146_v21  ;;  %v16861_v21 = vpop.permute.xlu0 %14609  ;;  %v20697_v49 = vld [vmem:[#allocation23_spill] sm:$0xff] }
 0x5ce   :  { %14027 = vmatprep.subr.bf16.mxu1 %v16165_v14  ;;  %2485 = vmax.xlane.f32.xlu0 %v2484_v41 }
 0x5d0   :  { %12891 = vmatmul.mubr.msk.f32.gmra.mrb[58].mxu1 %vm1100_vm1, %v16456_v52  ;;  %v2481_v52 = vsel %vm346_vm0, %v16853_v13, -inf }
 0x5d1   :  { %12893 = vmatprep.mubr.msk.f32.mxu1 %vm1100_vm1, %v16500_v39  ;;  %14029 = vmatpush3.bf16.msra.mxu1 %v16165_v14  ;;  %v20698_v14 = vld [vmem:[#allocation22_spill] sm:$0xff]  ;;  %v20699_v39 = vld [vmem:[#allocation24_spill] sm:$0xff]  ;;  %v16873_v29 = vpop.permute.xlu0 %14619 }
 0x5d2   :  { %14031 = vmatprep.subr.bf16.mxu1 %v16179_v45  ;;  %2458 = vmax.xlane.f32.xlu0 %v2457_v16  ;;  %v2466_v16 = vsel %vm346_vm0, %v16888_v44, -inf }
 0x5d4   :  { %12894 = vmatmul.mubr.msk.f32.gmra.mrb[60].mxu1 %vm1100_vm1, %v16520_v10 }
 0x5d5   :  { %12896 = vmatprep.mubr.msk.f32.mxu1 %vm1100_vm1, %v20697_v49  ;;  %14033 = vmatpush3.bf16.msra.mxu1 %v16179_v45  ;;  %v16876_v59 = vpop.permute.xlu0 %14629 }
 0x5d6   :  { %14035 = vmatprep.subr.bf16.mxu1 %v20698_v14  ;;  %2482 = vmax.xlane.f32.xlu0 %v2481_v52  ;;  %20700 = vst [vmem:[#allocation23_spill] sm:$0xff] %v16876_v59 }
 0x5d8   :  { %12897 = vmatmul.mubr.msk.f32.gmra.mrb[62].mxu1 %vm1100_vm1, %v20699_v39 }
 0x5d9   :  { %14037 = vmatpush3.bf16.msra.mxu1 %v20698_v14  ;;  %v16879_v20 = vpop.permute.xlu0 %14639 }
 0x5da   :  { %20701 = vst [vmem:[#allocation22_spill] sm:$0xff] %v16879_v20 }
 0x5dd   :  { %v16881_v62 = vpop.permute.xlu0 %14644 }
 0x5de   :  { %20702 = vst [vmem:[#allocation24_spill] sm:$0xff] %v16881_v62 }
 0x5e1   :  { %v16885_v33 = vpop.permute.xlu0 %14654 }
 0x5e2   :  { %v2378_v10 = vpop.xlane.xlu1 %2377  ;;  %20703 = vst [vmem:[#allocation30_spill] sm:$0xff] %v16885_v33 }
 0x5e3   :  { %v2566_v60 = vsub.f32 %v16588_v22, %v2378_v10  ;;  %v16892_v22 = vmul.f32 0.25, %v12814_v37 }
 0x5e5   :  { %v2631_v45 = vmul.f32 1.442695, %v2566_v60  ;;  %v2490_v10 = vsel %vm346_vm0, %v16892_v22, -inf }
 0x5e6   :  { %v2390_v28 = vpop.xlane.xlu1 %2389 }
 0x5e7   :  { %14759 = vpow2.f32 %v2631_v45  ;;  %v2570_v49 = vsub.f32 %v16593_v61, %v2390_v28 }
 0x5e9   :  { %v2639_v60 = vmul.f32 1.442695, %v2570_v49 }
 0x5ea   :  { %v2396_v52 = vpop.xlane.xlu1 %2395 }
 0x5eb   :  { %v2572_v37 = vsub.f32 %v16601_v2, %v2396_v52  ;;  %v16907_v2 = vmul.f32 0.25, %v16738_v63 }
 0x5f1   :  { %v16883_v50 = vpop.eup %14759 }
 0x5f2   :  { %v2760_v27 = vsel %vm346_vm0, %v16883_v50, 0.0 }
 0x5f3   :  { %2761 = vadd.xlane.f32.xlu1 %v2760_v27 }
 0x5f5   :  { %v2375_v12 = vpop.xlane.xlu0 %2374 }
 0x5f6   :  { %v2565_v41 = vsub.f32 %v16627_v51, %v2375_v12  ;;  %v2643_v12 = vmul.f32 1.442695, %v2572_v37 }
 0x5f7   :  { %2467 = vmax.xlane.f32.xlu1 %v2466_v16 }
 0x5f8   :  { %v2629_v14 = vmul.f32 1.442695, %v2565_v41 }
 0x5f9   :  { %v2384_v0 = vpop.xlane.xlu0 %2383 }
 0x5fa   :  { %14761 = vpow2.f32 %v2629_v14  ;;  %v2568_v39 = vsub.f32 %v16641_v19, %v2384_v0 }
 0x5fb   :  { %2491 = vmax.xlane.f32.xlu1 %v2490_v10 }
 0x5fc   :  { %v2635_v51 = vmul.f32 1.442695, %v2568_v39  ;;  %v2463_v39 = vsel %vm346_vm0, %v16907_v2, -inf }
 0x5fd   :  { %v2381_v45 = vpop.xlane.xlu0 %2380 }
 0x5fe   :  { %14763 = vpow2.f32 %v2635_v51  ;;  %v2567_v27 = vsub.f32 %v16653_v42, %v2381_v45  ;;  %v2402_v51 = vpop.xlane.xlu1 %2401 }
 0x5ff   :  { %14765 = vpow2.f32 %v2639_v60 }
 0x600   :  { %v2633_v61 = vmul.f32 1.442695, %v2567_v27  ;;  %14767 = vpow2.f32 %v2643_v12 }
 0x601   :  { %v2387_v28 = vpop.xlane.xlu0 %2386 }
 0x602   :  { %v2569_v41 = vsub.f32 %v16663_v11, %v2387_v28  ;;  %14769 = vpow2.f32 %v2633_v61  ;;  %v16915_v11 = vmul.f32 0.25, %v16834_v46 }
 0x604   :  { %v16904_v19 = vpop.eup %14761  ;;  %v2637_v16 = vmul.f32 1.442695, %v2569_v41  ;;  %20704 = vst [vmem:[#allocation31_spill] sm:$0xff] %v16915_v11  ;;  %v2487_v46 = vsel %vm346_vm0, %v16915_v11, -inf  ;;  %v2426_v41 = vpop.xlane.xlu1 %2425 }
 0x605   :  { %v2393_v49 = vpop.xlane.xlu0 %2392  ;;  %v2757_v52 = vsel %vm346_vm0, %v16904_v19, 0.0 }
 0x606   :  { %v2571_v42 = vsub.f32 %v16673_v38, %v2393_v49  ;;  %2758 = vadd.xlane.f32.xlu0 %v2757_v52  ;;  %14771 = vpow2.f32 %v2637_v16  ;;  %v2574_v52 = vsub.f32 %v16608_v55, %v2402_v51 }
 0x608   :  { %v16912_v14 = vpop.eup %14763  ;;  %v2641_v0 = vmul.f32 1.442695, %v2571_v42  ;;  %v2408_v49 = vpop.xlane.xlu1 %2407 }
 0x609   :  { %v2766_v63 = vsel %vm346_vm0, %v16912_v14, 0.0  ;;  %v16921_v10 = vpop.eup %14765 }
 0x60a   :  { %2464 = vmax.xlane.f32.xlu0 %v2463_v39  ;;  %2767 = vadd.xlane.f32.xlu1 %v2766_v63  ;;  %14773 = vpow2.f32 %v2641_v0  ;;  %v16923_v38 = vpop.eup %14767  ;;  %v2772_v37 = vsel %vm346_vm0, %v16921_v10, 0.0  ;;  %v2647_v0 = vmul.f32 1.442695, %v2574_v52  ;;  %v2582_v39 = vsub.f32 %v16618_v34, %v2426_v41  ;;  %v16952_v52 = vpop.xlane.xlu0 %2398 }
 0x60b   :  { %v2778_v45 = vsel %vm346_vm0, %v16923_v38, 0.0 }
 0x60c   :  { %v16929_v60 = vpop.eup %14769  ;;  %v16944_v42 = vpop.xlane.xlu1 %2431  ;;  %14775 = vpow2.f32 %v2647_v0 }
 0x60d   :  { %v2763_v27 = vsel %vm346_vm0, %v16929_v60, 0.0 }
 0x60e   :  { %2773 = vadd.xlane.f32.xlu1 %v2772_v37  ;;  %2488 = vmax.xlane.f32.xlu0 %v2487_v46  ;;  %v2663_v37 = vmul.f32 1.442695, %v2582_v39  ;;  %v2576_v46 = vsub.f32 %v16632_v53, %v2408_v49 }
 0x610   :  { %v16935_v12 = vpop.eup %14771  ;;  %v2414_v63 = vpop.xlane.xlu1 %2413  ;;  %14777 = vpow2.f32 %v2663_v37 }
 0x611   :  { %v2769_v61 = vsel %vm346_vm0, %v16935_v12, 0.0  ;;  %v16962_v37 = vpop.xlane.xlu0 %2422 }
 0x612   :  { %2779 = vadd.xlane.f32.xlu1 %v2778_v45  ;;  %2764 = vadd.xlane.f32.xlu0 %v2763_v27  ;;  %v2651_v45 = vmul.f32 1.442695, %v2576_v46  ;;  %v2578_v27 = vsub.f32 %v16658_v17, %v2414_v63 }
 0x614   :  { %v16939_v28 = vpop.eup %14773  ;;  %14779 = vpow2.f32 %v2651_v45  ;;  %v2655_v55 = vmul.f32 1.442695, %v2578_v27 }
 0x615   :  { %v2775_v16 = vsel %vm346_vm0, %v16939_v28, 0.0 }
 0x616   :  { %2770 = vadd.xlane.f32.xlu0 %v2769_v61  ;;  %v2438_v61 = vpop.xlane.xlu1 %2437  ;;  %v16956_v53 = vpop.eup %14775  ;;  %14781 = vpow2.f32 %v2655_v55 }
 0x617   :  { %v2586_v51 = vsub.f32 %v16668_v35, %v2438_v61  ;;  %20706 = vst [vmem:[#allocation33_spill] sm:$0xff] %v16956_v53  ;;  %v2784_v39 = vsel %vm346_vm0, %v16956_v53, 0.0 }
 0x619   :  { %v2671_v17 = vmul.f32 1.442695, %v2586_v51 }
 0x61a   :  { %2776 = vadd.xlane.f32.xlu0 %v2775_v16  ;;  %v16960_v63 = vpop.eup %14777 }
 0x61b   :  { %20707 = vst [vmem:[#allocation34_spill] sm:$0xff] %v16960_v63  ;;  %14783 = vpow2.f32 %v2671_v17  ;;  %v2808_v45 = vsel %vm346_vm0, %v16960_v63, 0.0 }
 0x61e   :  { %v16966_v27 = vpop.eup %14779 }
 0x61f   :  { %20708 = vst [vmem:[#allocation35_spill] sm:$0xff] %v16966_v27  ;;  %v2790_v55 = vsel %vm346_vm0, %v16966_v27, 0.0 }
 0x620   :  { %v16972_v51 = vpop.eup %14781 }
 0x621   :  { %20709 = vst [vmem:[#allocation36_spill] sm:$0xff] %v16972_v51 }
 0x625   :  { %v16976_v17 = vpop.eup %14783 }
 0x626   :  { %20710 = vst [vmem:[#allocation37_spill] sm:$0xff] %v16976_v17 }
 0x62e   :  { %v12861_v33 = vpop.f32.mrb[40].mxu0 }
 0x62f   :  { %v2117_v16 = vpop.f32.mrb[41].mxu0  ;;  %v16980_v63 = vmul.f32 0.25, %v12861_v33 }
 0x630   :  { %v16949_v54 = vmul.f32 0.25, %v2117_v16  ;;  %v16968_v16 = vpop.xlane.xlu0 %2404 }
 0x631   :  { %20711 = vst [vmem:[#allocation38_spill] sm:$0xff] %v16980_v63 }
 0x632   :  { %20705 = vst [vmem:[#allocation32_spill] sm:$0xff] %v16949_v54  ;;  %v12864_v34 = vpop.f32.mrb[42].mxu0  ;;  %v2517_v41 = vsel %vm346_vm0, %v16949_v54, -inf }
 0x633   :  { %2518 = vmax.xlane.f32.xlu1 %v2517_v41  ;;  %v2127_v49 = vpop.f32.mrb[43].mxu0  ;;  %v2796_v41 = vsel %vm346_vm0, %v16972_v51, 0.0  ;;  %v2420_v51 = vpop.xlane.xlu1 %2419  ;;  %v16990_v20 = vmul.f32 0.25, %v12864_v34 }
 0x634   :  { %v16986_v27 = vmul.f32 0.25, %v2127_v49 }
 0x635   :  { %20713 = vst [vmem:[#allocation40_spill] sm:$0xff] %v16990_v20  ;;  %v2526_v49 = vsel %vm346_vm0, %v16990_v20, -inf }
 0x636   :  { %v12867_v0 = vpop.f32.mrb[44].mxu0  ;;  %20712 = vst [vmem:[#allocation39_spill] sm:$0xff] %v16986_v27 }
 0x637   :  { %2785 = vadd.xlane.f32.xlu1 %v2784_v39  ;;  %v2137_v35 = vpop.f32.mrb[45].mxu0  ;;  %v16978_v39 = vpop.xlane.xlu0 %2428  ;;  %v17002_v53 = vmul.f32 0.25, %v12867_v0 }
 0x638   :  { %v16997_v31 = vmul.f32 0.25, %v2137_v35 }
 0x639   :  { %20715 = vst [vmem:[#allocation42_spill] sm:$0xff] %v17002_v53 }
 0x63a   :  { %v12870_v46 = vpop.f32.mrb[46].mxu0  ;;  %20714 = vst [vmem:[#allocation41_spill] sm:$0xff] %v16997_v31 }
 0x63b   :  { %2809 = vadd.xlane.f32.xlu1 %v2808_v45  ;;  %v2147_v61 = vpop.f32.mrb[47].mxu0  ;;  %v2820_v45 = vsel %vm346_vm0, %v16976_v17, 0.0  ;;  %v16984_v62 = vpop.xlane.xlu0 %2410  ;;  %v2580_v17 = vsub.f32 %v16678_v47, %v2420_v51  ;;  %v2532_v51 = vsel %vm346_vm0, %v17002_v53, -inf }
 0x63c   :  { %v17007_v35 = vmul.f32 0.25, %v2147_v61 }
 0x63d   :  { %v2659_v59 = vmul.f32 1.442695, %v2580_v17 }
 0x63e   :  { %20716 = vst [vmem:[#allocation43_spill] sm:$0xff] %v17007_v35  ;;  %v2535_v0 = vsel %vm346_vm0, %v17007_v35, -inf }
 0x63f   :  { %2791 = vadd.xlane.f32.xlu1 %v2790_v55  ;;  %v2520_v55 = vsel %vm346_vm0, %v16980_v63, -inf  ;;  %v16994_v33 = vpop.xlane.xlu0 %2434  ;;  %14785 = vpow2.f32 %v2659_v59 }
 0x643   :  { %2797 = vadd.xlane.f32.xlu1 %v2796_v41  ;;  %v2523_v41 = vsel %vm346_vm0, %v16986_v27, -inf  ;;  %v2417_v34 = vpop.xlane.xlu0 %2416 }
 0x644   :  { %v2579_v47 = vsub.f32 %v16732_v6, %v2417_v34 }
 0x646   :  { %v2657_v17 = vmul.f32 1.442695, %v2579_v47 }
 0x647   :  { %2821 = vadd.xlane.f32.xlu1 %v2820_v45  ;;  %v2444_v45 = vpop.xlane.xlu1 %2443 }
 0x649   :  { %v17019_v59 = vpop.eup %14785 }
 0x64a   :  { %20718 = vst [vmem:[#allocation45_spill] sm:$0xff] %v17019_v59  ;;  %v2802_v61 = vsel %vm346_vm0, %v17019_v59, 0.0 }
 0x64b   :  { %2521 = vmax.xlane.f32.xlu1 %v2520_v55  ;;  %v2588_v55 = vsub.f32 %v16688_v5, %v2444_v45  ;;  %v17011_v5 = vmul.f32 0.25, %v12870_v46  ;;  %v17015_v45 = vpop.xlane.xlu0 %2440 }
 0x64d   :  { %v2675_v3 = vmul.f32 1.442695, %v2588_v55  ;;  %20717 = vst [vmem:[#allocation44_spill] sm:$0xff] %v17011_v5  ;;  %v2538_v6 = vsel %vm346_vm0, %v17011_v5, -inf }
 0x64f   :  { %2524 = vmax.xlane.f32.xlu1 %v2523_v41  ;;  %v2529_v41 = vsel %vm346_vm0, %v16997_v31, -inf  ;;  %14787 = vpow2.f32 %v2675_v3  ;;  %v17025_v46 = vpop.xlane.xlu0 %2446 }
 0x650   :  { %14789 = vpow2.f32 %v2657_v17  ;;  %v17039_v17 = vpop.xlane.xlu1 %2449 }
 0x653   :  { %2527 = vmax.xlane.f32.xlu1 %v2526_v49  ;;  %v17031_v34 = vpop.xlane.xlu0 %2470 }
 0x657   :  { %2530 = vmax.xlane.f32.xlu1 %v2529_v41  ;;  %v17035_v47 = vpop.xlane.xlu0 %2479 }
 0x659   :  { %v17023_v3 = vpop.eup %14787 }
 0x65a   :  { %20719 = vst [vmem:[#allocation46_spill] sm:$0xff] %v17023_v3  ;;  %v2826_v49 = vsel %vm346_vm0, %v17023_v3, 0.0  ;;  %v17029_v55 = vpop.eup %14789  ;;  %v17045_v3 = vpop.xlane.xlu1 %2473 }
 0x65b   :  { %2533 = vmax.xlane.f32.xlu1 %v2532_v51  ;;  %20720 = vst [vmem:[#allocation47_spill] sm:$0xff] %v17029_v55  ;;  %v2799_v41 = vsel %vm346_vm0, %v17029_v55, 0.0  ;;  %v2573_v51 = vsub.f32 %v16683_v48, %v16952_v52  ;;  %v2575_v48 = vsub.f32 %v16700_v56, %v16968_v16 }
 0x65d   :  { %v2649_v55 = vmul.f32 1.442695, %v2575_v48 }
 0x65e   :  { %v17053_v52 = vpop.xlane.xlu1 %2455 }
 0x65f   :  { %2536 = vmax.xlane.f32.xlu1 %v2535_v0  ;;  %v2645_v0 = vmul.f32 1.442695, %v2573_v51 }
 0x661   :  { %14791 = vpow2.f32 %v2645_v0 }
 0x662   :  { %v17067_v16 = vpop.xlane.xlu1 %2461 }
 0x663   :  { %2539 = vmax.xlane.f32.xlu1 %v2538_v6  ;;  %v2581_v6 = vsub.f32 %v16693_v57, %v16962_v37 }
 0x667   :  { %2803 = vadd.xlane.f32.xlu1 %v2802_v61  ;;  %v17043_v61 = vpop.xlane.xlu0 %2452 }
 0x66b   :  { %2827 = vadd.xlane.f32.xlu1 %v2826_v49  ;;  %v2584_v49 = vsub.f32 %v16647_v25, %v16944_v42  ;;  %v17049_v35 = vpop.xlane.xlu0 %2476  ;;  %v2583_v25 = vsub.f32 %v16705_v8, %v16978_v39 }
 0x66d   :  { %v2667_v59 = vmul.f32 1.442695, %v2584_v49  ;;  %v17065_v49 = vpop.eup %14791 }
 0x66e   :  { %20722 = vst [vmem:[#allocation49_spill] sm:$0xff] %v17065_v49  ;;  %v2781_v8 = vsel %vm346_vm0, %v17065_v49, 0.0 }
 0x66f   :  { %2800 = vadd.xlane.f32.xlu1 %v2799_v41  ;;  %v2661_v41 = vmul.f32 1.442695, %v2581_v6  ;;  %v17059_v42 = vpop.xlane.xlu0 %2485 }
 0x671   :  { %14793 = vpow2.f32 %v2661_v41  ;;  %v2665_v41 = vmul.f32 1.442695, %v2583_v25 }
 0x672   :  { %14795 = vpow2.f32 %v2667_v59  ;;  %v2577_v59 = vsub.f32 %v16712_v23, %v16984_v62 }
 0x673   :  { %14797 = vpow2.f32 %v2649_v55 }
 0x674   :  { %14799 = vpow2.f32 %v2665_v41  ;;  %v2653_v5 = vmul.f32 1.442695, %v2577_v59  ;;  %v2587_v59 = vsub.f32 %v16741_v18, %v17015_v45 }
 0x676   :  { %14801 = vpow2.f32 %v2653_v5  ;;  %v2590_v5 = vsub.f32 %v16709_v36, %v17039_v17  ;;  %v2673_v27 = vmul.f32 1.442695, %v2587_v59 }
 0x67b   :  { %v17075_v39 = vpop.eup %14793 }
 0x67c   :  { %20723 = vst [vmem:[#allocation50_spill] sm:$0xff] %v17075_v39  ;;  %v2805_v23 = vsel %vm346_vm0, %v17075_v39, 0.0  ;;  %v17085_v62 = vpop.eup %14795 }
 0x67d   :  { %20724 = vst [vmem:[#allocation51_spill] sm:$0xff] %v17085_v62  ;;  %v17095_v41 = vpop.eup %14797 }
 0x67e   :  { %20725 = vst [vmem:[#allocation52_spill] sm:$0xff] %v17095_v41  ;;  %v2787_v53 = vsel %vm346_vm0, %v17095_v41, 0.0 }
 0x67f   :  { %v12833_v51 = vpop.f32.mrb[48].mxu1 }
 0x680   :  { %v1964_v57 = vpop.f32.mrb[49].mxu1  ;;  %v17113_v41 = vmul.f32 0.25, %v12833_v51 }
 0x681   :  { %v17055_v37 = vmul.f32 0.25, %v1964_v57 }
 0x682   :  { %v2496_v63 = vsel %vm346_vm0, %v17113_v41, -inf }
 0x683   :  { %20721 = vst [vmem:[#allocation48_spill] sm:$0xff] %v17055_v37  ;;  %v17061_v0 = vpop.f32.mrb[50].mxu1  ;;  %v2493_v6 = vsel %vm346_vm0, %v17055_v37, -inf  ;;  %v17079_v37 = vpop.xlane.xlu0 %2458 }
 0x684   :  { %v1974_v56 = vpop.f32.mrb[51].mxu1  ;;  %2494 = vmax.xlane.f32.xlu0 %v2493_v6  ;;  %v2762_v6 = vpop.xlane.xlu1 %2761 }
 0x685   :  { %14803 = vrcp.f32 %v2762_v6  ;;  %v2679_v6 = vmul.f32 1.442695, %v2590_v5  ;;  %v2592_v5 = vsub.f32 %v16803_v26, %v17053_v52  ;;  %v14611_v52 = vunpack.i.l.bf16 %v16861_v21 }
 0x687   :  { %v17071_v48 = vpop.f32.mrb[52].mxu1  ;;  %v17089_v49 = vpop.xlane.xlu0 %2482 }
 0x688   :  { %v17077_v57 = vpop.f32.mrb[53].mxu1  ;;  %2782 = vadd.xlane.f32.xlu0 %v2781_v8  ;;  %v17091_v31 = vpop.xlane.xlu1 %2467  ;;  %v2814_v8 = vsel %vm346_vm0, %v17085_v62, 0.0 }
 0x68b   :  { %v17081_v55 = vpop.f32.mrb[54].mxu1 }
 0x68c   :  { %v17087_v25 = vpop.f32.mrb[55].mxu1  ;;  %2806 = vadd.xlane.f32.xlu0 %v2805_v23  ;;  %v17101_v23 = vpop.eup %14799 }
 0x68d   :  { %20726 = vst [vmem:[#allocation53_spill] sm:$0xff] %v17101_v23  ;;  %v17105_v62 = vpop.xlane.xlu1 %2491  ;;  %v2811_v18 = vsel %vm346_vm0, %v17101_v23, 0.0  ;;  %v17111_v45 = vpop.eup %14801 }
 0x68e   :  { %20727 = vst [vmem:[#allocation54_spill] sm:$0xff] %v17111_v45  ;;  %v2793_v36 = vsel %vm346_vm0, %v17111_v45, 0.0 }
 0x68f   :  { %v14804_v17 = vpop.eup %14803 }
 0x690   :  { %2815 = vadd.xlane.f32.xlu0 %v2814_v8 }
 0x693   :  { %v2759_v39 = vpop.xlane.xlu0 %2758 }
 0x694   :  { %14805 = vrcp.f32 %v2759_v39  ;;  %2788 = vadd.xlane.f32.xlu0 %v2787_v53  ;;  %v20729_v39 = vld [vmem:[#allocation26_spill] sm:$0xff] }
 0x695   :  { %14807 = vpow2.f32 %v2673_v27  ;;  %v14607_v59 = vunpack.i.h.bf16 %v20729_v39  ;;  %v14606_v54 = vunpack.i.l.bf16 %v20729_v39  ;;  %v17123_v27 = vmul.f32 0.25, %v1974_v56 }
 0x696   :  { %14809 = vpow2.f32 %v2679_v6  ;;  %v14612_v6 = vunpack.i.h.bf16 %v16861_v21  ;;  %v2683_v56 = vmul.f32 1.442695, %v2592_v5 }
 0x697   :  { %v17107_v20 = vpop.xlane.xlu0 %2464  ;;  %v2768_v8 = vpop.xlane.xlu1 %2767  ;;  %v13978_v26 = vpack.c.bf16 %v14607_v59, %v14606_v54  ;;  %v2499_v21 = vsel %vm346_vm0, %v17123_v27, -inf }
 0x698   :  { %2812 = vadd.xlane.f32.xlu0 %v2811_v18  ;;  %14811 = vrcp.f32 %v2768_v8 }
 0x69b   :  { %v17115_v53 = vpop.xlane.xlu0 %2488  ;;  %v2774_v51 = vpop.xlane.xlu1 %2773 }
 0x69c   :  { %20728 = vst [vmem:[#allocation55_spill] sm:$0xff] %v17115_v53  ;;  %2794 = vadd.xlane.f32.xlu0 %v2793_v36  ;;  %v3014_v36 = vmul.f32 %v14804_v17, %v16883_v50  ;;  %v13982_v17 = vpack.c.bf16 %v14612_v6, %v14611_v52 }
 0x69e   :  { %v14806_v23 = vpop.eup %14805 }
 0x69f   :  { %v12889_v18 = vpop.f32.mrb[56].mxu1  ;;  %v3013_v45 = vmul.f32 %v14806_v23, %v16904_v19  ;;  %v2765_v53 = vpop.xlane.xlu0 %2764  ;;  %v17144_v23 = vmul.f32 0.25, %v17061_v0  ;;  %v20730_v0 = vld [vmem:[#allocation25_spill] sm:$0xff] }
 0x6a0   :  { %v17129_v11 = vmul.f32 0.25, %v12889_v18  ;;  %v17131_v39 = vpop.f32.mrb[57].mxu1  ;;  %2497 = vmax.xlane.f32.xlu0 %v2496_v63  ;;  %14813 = vrcp.f32 %v2765_v53  ;;  %v17139_v19 = vpop.eup %14807  ;;  %v2591_v63 = vsub.f32 %v16823_v4, %v17043_v61  ;;  %v14617_v53 = vunpack.i.h.bf16 %v16753_v7 }
 0x6a1   :  { %12915 = vmatprep.mubr.msk.f32.mxu0 %vm346_vm0, %v3013_v45  ;;  %14815 = vrcp.f32 %v2774_v51  ;;  %v14616_v4 = vunpack.i.l.bf16 %v16753_v7  ;;  %v2780_v61 = vpop.xlane.xlu1 %2779  ;;  %v2823_v59 = vsel %vm346_vm0, %v17139_v19, 0.0  ;;  %v17157_v5 = vpop.eup %14809  ;;  %v2594_v51 = vsub.f32 %v16816_v43, %v17067_v16 }
 0x6a2   :  { %12916 = vmatmul.mubr.msk.f32.vlgmr.msra.gmra.mrb[48].mxu0 %vm346_vm0, %v3014_v36  ;;  %v2544_v50 = vsel %vm346_vm0, %v17129_v11, -inf  ;;  %v2681_v18 = vmul.f32 1.442695, %v2591_v63  ;;  %v17162_v36 = vmul.f32 0.25, %v17077_v57  ;;  %v14622_v43 = vunpack.i.h.bf16 %v16873_v29 }
 0x6a3   :  { %13977 = vmatpush3.bf16.msra.mxu0 %v16765_v58  ;;  %v12892_v54 = vpop.f32.mrb[58].mxu1  ;;  %2545 = vmax.xlane.f32.xlu1 %v2544_v50  ;;  %v2771_v45 = vpop.xlane.xlu0 %2770  ;;  %v2585_v58 = vsub.f32 %v20730_v0, %v16994_v33  ;;  %v2502_v33 = vsel %vm346_vm0, %v17144_v23, -inf  ;;  %v14621_v16 = vunpack.i.l.bf16 %v16873_v29  ;;  %v2687_v63 = vmul.f32 1.442695, %v2594_v51 }
 0x6a4   :  { %13979 = vmatprep.subr.bf16.mxu0 %v13978_v26  ;;  %v17149_v8 = vpop.f32.mrb[59].mxu1  ;;  %2500 = vmax.xlane.f32.xlu0 %v2499_v21  ;;  %14817 = vrcp.f32 %v2771_v45  ;;  %v14812_v50 = vpop.eup %14811  ;;  %v2505_v45 = vsel %vm346_vm0, %v17162_v36, -inf }
 0x6a5   :  { %14819 = vpow2.f32 %v2683_v56  ;;  %v13986_v56 = vpack.c.bf16 %v14617_v53, %v14616_v4  ;;  %v2669_v57 = vmul.f32 1.442695, %v2585_v58  ;;  %v17179_v53 = vmul.f32 0.25, %v17071_v48 }
 0x6a6   :  { %14821 = vrcp.f32 %v2780_v61  ;;  %v17181_v4 = vmul.f32 0.25, %v12892_v54  ;;  %v17195_v54 = vmul.f32 0.25, %v17087_v25 }
 0x6a7   :  { %13981 = vmatpush3.bf16.msra.mxu0 %v13978_v26  ;;  %v17164_v7 = vpop.f32.mrb[60].mxu1  ;;  %2824 = vadd.xlane.f32.xlu1 %v2823_v59  ;;  %v2777_v6 = vpop.xlane.xlu0 %2776  ;;  %v2832_v26 = vsel %vm346_vm0, %v17157_v5, 0.0  ;;  %v17187_v59 = vpack.c.bf16 %v14622_v43, %v14621_v16  ;;  %v17209_v43 = vmul.f32 0.25, %v17081_v55  ;;  %v2596_v55 = vsub.f32 %v16888_v44, %v17091_v31 }
 0x6a8   :  { %13983 = vmatprep.subr.bf16.mxu0 %v13982_v17  ;;  %v17168_v52 = vpop.f32.mrb[61].mxu1  ;;  %2503 = vmax.xlane.f32.xlu0 %v2502_v33  ;;  %14823 = vrcp.f32 %v2777_v6  ;;  %v2511_v16 = vsel %vm346_vm0, %v17195_v54, -inf  ;;  %v2595_v31 = vsub.f32 %v16907_v2, %v17107_v20  ;;  %v17237_v44 = vmul.f32 0.25, %v17131_v39 }
 0x6a9   :  { %14825 = vpow2.f32 %v2681_v18  ;;  %v2589_v18 = vsub.f32 %v16745_v9, %v17025_v46 }
 0x6aa   :  { %v14814_v61 = vpop.eup %14813  ;;  %14827 = vpow2.f32 %v2669_v57  ;;  %v2689_v20 = vmul.f32 1.442695, %v2595_v31 }
 0x6ab   :  { %13985 = vmatpush3.bf16.msra.mxu0 %v13982_v17  ;;  %v17174_v21 = vpop.f32.mrb[62].mxu1  ;;  %2833 = vadd.xlane.f32.xlu1 %v2832_v26  ;;  %v3015_v0 = vmul.f32 %v14814_v61, %v16929_v60  ;;  %v14816_v58 = vpop.eup %14815  ;;  %v3016_v17 = vmul.f32 %v14812_v50, %v16912_v14  ;;  %14829 = vpow2.f32 %v2687_v63  ;;  %v2550_v14 = vsel %vm346_vm0, %v17181_v4, -inf }
 0x6ac   :  { %13987 = vmatprep.subr.bf16.mxu0 %v13986_v56  ;;  %v17183_v29 = vpop.f32.mrb[63].mxu1  ;;  %2506 = vmax.xlane.f32.xlu0 %v2505_v45  ;;  %v2508_v60 = vsel %vm346_vm0, %v17179_v53, -inf  ;;  %v3018_v25 = vmul.f32 %v14816_v58, %v16921_v10  ;;  %v2677_v6 = vmul.f32 1.442695, %v2589_v18  ;;  %v2514_v63 = vsel %vm346_vm0, %v17209_v43, -inf }
 0x6ad   :  { %12918 = vmatprep.mubr.msk.f32.mxu0 %vm346_vm0, %v3015_v0  ;;  %v17240_v45 = vmul.f32 0.25, %v17164_v7  ;;  %v2600_v58 = vsub.f32 %v16811_v32, %v17035_v47  ;;  %v17249_v2 = vmul.f32 0.25, %v17174_v21  ;;  %v2541_v7 = vsel %vm346_vm0, %v17237_v44, -inf }
 0x6ae   :  { %v14818_v51 = vpop.eup %14817  ;;  %12919 = vmatmul.mubr.msk.f32.gmra.mrb[50].mxu0 %vm346_vm0, %v3016_v17  ;;  %14831 = vpow2.f32 %v2677_v6  ;;  %v2602_v32 = vsub.f32 %v16836_v40, %v17059_v42  ;;  %v17262_v47 = vmul.f32 0.25, %v17149_v8 }
 0x6af   :  { %13989 = vmatpush3.bf16.msra.mxu0 %v13986_v56  ;;  %v17192_v48 = vpop.eup %14819  ;;  %v3017_v9 = vmul.f32 %v14818_v51, %v16935_v12  ;;  %2551 = vmax.xlane.f32.xlu1 %v2550_v14  ;;  %v2598_v56 = vsub.f32 %v16798_v30, %v17045_v3  ;;  %v2593_v30 = vsub.f32 %v16843_v24, %v17079_v37  ;;  %v2691_v37 = vmul.f32 1.442695, %v2596_v55 }
 0x6b0   :  { %13991 = vmatprep.subr.bf16.mxu0 %v17187_v59  ;;  %2509 = vmax.xlane.f32.xlu0 %v2508_v60  ;;  %v14822_v46 = vpop.eup %14821  ;;  %v2838_v12 = vsel %vm346_vm0, %v17192_v48, 0.0  ;;  %v2556_v39 = vsel %vm346_vm0, %v17240_v45, -inf  ;;  %v2597_v51 = vsub.f32 %v16800_v1, %v17031_v34  ;;  %v2699_v18 = vmul.f32 1.442695, %v2600_v58 }
 0x6b1   :  { %12921 = vmatprep.mubr.msk.f32.mxu0 %vm346_vm0, %v3017_v9  ;;  %v3020_v10 = vmul.f32 %v14822_v46, %v16923_v38  ;;  %v2695_v3 = vmul.f32 1.442695, %v2598_v56  ;;  %v2685_v38 = vmul.f32 1.442695, %v2593_v30  ;;  %v2562_v21 = vsel %vm346_vm0, %v17249_v2, -inf }
 0x6b2   :  { %v14824_v33 = vpop.eup %14823  ;;  %12922 = vmatmul.mubr.msk.f32.gmra.mrb[52].mxu0 %vm346_vm0, %v3018_v25  ;;  %v2693_v9 = vmul.f32 1.442695, %v2597_v51  ;;  %v2599_v1 = vsub.f32 %v16827_v15, %v17049_v35  ;;  %v2703_v40 = vmul.f32 1.442695, %v2602_v32  ;;  %v2604_v34 = vsub.f32 %v16892_v22, %v17105_v62 }
 0x6b3   :  { %v3019_v57 = vmul.f32 %v14824_v33, %v16939_v28  ;;  %v17217_v26 = vpop.eup %14825  ;;  %2839 = vadd.xlane.f32.xlu1 %v2838_v12  ;;  %14833 = vpow2.f32 %v2695_v3  ;;  %v2547_v46 = vsel %vm346_vm0, %v17262_v47, -inf  ;;  %v2601_v15 = vsub.f32 %v16853_v13, %v17089_v49 }
 0x6b4   :  { %2512 = vmax.xlane.f32.xlu0 %v2511_v16  ;;  %v17225_v50 = vpop.eup %14827  ;;  %v2835_v28 = vsel %vm346_vm0, %v17217_v26, 0.0  ;;  %14835 = vpow2.f32 %v2685_v38  ;;  %v2697_v33 = vmul.f32 1.442695, %v2599_v1  ;;  %v2707_v35 = vmul.f32 1.442695, %v2604_v34 }
 0x6b5   :  { %12924 = vmatprep.mubr.msk.f32.mxu0 %vm346_vm0, %v3019_v57  ;;  %v17232_v24 = vpop.eup %14829  ;;  %v2817_v0 = vsel %vm346_vm0, %v17225_v50, 0.0  ;;  %14837 = vpow2.f32 %v2691_v37  ;;  %v17285_v22 = vmul.f32 0.25, %v17168_v52  ;;  %v2701_v16 = vmul.f32 1.442695, %v2601_v15 }
 0x6b6   :  { %12925 = vmatmul.mubr.msk.f32.gmra.mrb[54].mxu0 %vm346_vm0, %v3020_v10  ;;  %v2844_v61 = vsel %vm346_vm0, %v17232_v24, 0.0  ;;  %14839 = vpow2.f32 %v2689_v20  ;;  %v17294_v13 = vmul.f32 0.25, %v17183_v29 }
 0x6b7   :  { %2836 = vadd.xlane.f32.xlu1 %v2835_v28  ;;  %14841 = vpow2.f32 %v2699_v18  ;;  %v2553_v52 = vsel %vm346_vm0, %v17285_v22, -inf  ;;  %v20732_v18 = vld [vmem:[#allocation18_spill] sm:$0xff] }
 0x6b8   :  { %2515 = vmax.xlane.f32.xlu0 %v2514_v63  ;;  %v17255_v17 = vpop.eup %14831  ;;  %14843 = vpow2.f32 %v2693_v9  ;;  %v2559_v29 = vsel %vm346_vm0, %v17294_v13, -inf  ;;  %v20734_v9 = vld [vmem:[#allocation20_spill] sm:$0xff] }
 0x6b9   :  { %v2829_v14 = vsel %vm346_vm0, %v17255_v17, 0.0  ;;  %14845 = vpow2.f32 %v2703_v40  ;;  %v20735_v40 = vld [vmem:[#allocation21_spill] sm:$0xff] }
 0x6ba   :  { %14847 = vpow2.f32 %v2697_v33 }
 0x6bb   :  { %2845 = vadd.xlane.f32.xlu1 %v2844_v61  ;;  %14849 = vpow2.f32 %v2707_v35 }
 0x6bc   :  { %2818 = vadd.xlane.f32.xlu0 %v2817_v0  ;;  %14851 = vpow2.f32 %v2701_v16 }
 0x6bd   :  { %v17268_v60 = vpop.eup %14833 }
 0x6be   :  { %v17274_v42 = vpop.eup %14835  ;;  %v2856_v8 = vsel %vm346_vm0, %v17268_v60, 0.0 }
 0x6bf   :  { %2557 = vmax.xlane.f32.xlu1 %v2556_v39  ;;  %v17280_v25 = vpop.eup %14837  ;;  %v2841_v56 = vsel %vm346_vm0, %v17274_v42, 0.0 }
 0x6c0   :  { %2542 = vmax.xlane.f32.xlu0 %v2541_v7  ;;  %v2519_v62 = vpop.xlane.xlu1 %2518  ;;  %v2850_v6 = vsel %vm346_vm0, %v17280_v25, 0.0  ;;  %v17291_v12 = vpop.eup %14839 }
 0x6c1   :  { %v2847_v49 = vsel %vm346_vm0, %v17291_v12, 0.0  ;;  %v17300_v57 = vpop.eup %14841 }
 0x6c2   :  { %v17302_v10 = vpop.eup %14843  ;;  %v2862_v3 = vsel %vm346_vm0, %v17300_v57, 0.0 }
 0x6c3   :  { %2563 = vmax.xlane.f32.xlu1 %v2562_v21  ;;  %v17308_v55 = vpop.eup %14845  ;;  %v2853_v37 = vsel %vm346_vm0, %v17302_v10, 0.0  ;;  %v20733_v21 = vld [vmem:[#allocation19_spill] sm:$0xff] }
 0x6c4   :  { %2830 = vadd.xlane.f32.xlu0 %v2829_v14  ;;  %v2786_v30 = vpop.xlane.xlu1 %2785  ;;  %v17310_v28 = vpop.eup %14847  ;;  %v2868_v38 = vsel %vm346_vm0, %v17308_v55, 0.0 }
 0x6c5   :  { %v17318_v31 = vpop.eup %14849  ;;  %v2859_v0 = vsel %vm346_vm0, %v17310_v28, 0.0 }
 0x6c6   :  { %20731 = vst [vmem:[#allocation26_spill] sm:$0xff] %v17318_v31  ;;  %v2874_v61 = vsel %vm346_vm0, %v17318_v31, 0.0  ;;  %v17324_v58 = vpop.eup %14851 }
 0x6c7   :  { %2857 = vadd.xlane.f32.xlu1 %v2856_v8  ;;  %v2865_v39 = vsel %vm346_vm0, %v17324_v58, 0.0  ;;  %v20736_v8 = vld [vmem:[#allocation55_spill] sm:$0xff] }
 0x6c8   :  { %2548 = vmax.xlane.f32.xlu0 %v2547_v46  ;;  %v17312_v63 = vpop.xlane.xlu1 %2809  ;;  %v20737_v46 = vld [vmem:[#allocation31_spill] sm:$0xff] }
 0x6c9   :  { %v2603_v33 = vsub.f32 %v20737_v46, %v20736_v8  ;;  %v20741_v8 = vld [vmem:[#allocation39_spill] sm:$0xff] }
 0x6cb   :  { %2851 = vadd.xlane.f32.xlu1 %v2850_v6  ;;  %v2705_v35 = vmul.f32 1.442695, %v2603_v33  ;;  %v20738_v6 = vld [vmem:[#allocation38_spill] sm:$0xff] }
 0x6cc   :  { %2842 = vadd.xlane.f32.xlu0 %v2841_v56  ;;  %v2792_v20 = vpop.xlane.xlu1 %2791 }
 0x6cd   :  { %14853 = vpow2.f32 %v2705_v35 }
 0x6cf   :  { %2848 = vadd.xlane.f32.xlu1 %v2847_v49  ;;  %v20739_v49 = vld [vmem:[#allocation32_spill] sm:$0xff] }
 0x6d0   :  { %2554 = vmax.xlane.f32.xlu0 %v2553_v52  ;;  %v17328_v7 = vpop.xlane.xlu1 %2797  ;;  %v2613_v52 = vsub.f32 %v20739_v49, %v2519_v62 }
 0x6d3   :  { %2863 = vadd.xlane.f32.xlu1 %v2862_v3 }
 0x6d4   :  { %2560 = vmax.xlane.f32.xlu0 %v2559_v29  ;;  %v17330_v51 = vpop.xlane.xlu1 %2821 }
 0x6d7   :  { %2869 = vadd.xlane.f32.xlu1 %v2868_v38  ;;  %v2725_v38 = vmul.f32 1.442695, %v2613_v52  ;;  %v17360_v35 = vpop.eup %14853 }
 0x6d8   :  { %2854 = vadd.xlane.f32.xlu0 %v2853_v37  ;;  %v2522_v32 = vpop.xlane.xlu1 %2521  ;;  %v20740_v37 = vld [vmem:[#allocation40_spill] sm:$0xff]  ;;  %20742 = vst [vmem:[#allocation25_spill] sm:$0xff] %v17360_v35 }
 0x6d9   :  { %v2614_v56 = vsub.f32 %v20738_v6, %v2522_v32 }
 0x6db   :  { %2875 = vadd.xlane.f32.xlu1 %v2874_v61  ;;  %v2727_v3 = vmul.f32 1.442695, %v2614_v56  ;;  %v20743_v56 = vld [vmem:[#allocation42_spill] sm:$0xff] }
 0x6dc   :  { %2860 = vadd.xlane.f32.xlu0 %v2859_v0  ;;  %v2525_v14 = vpop.xlane.xlu1 %2524 }
 0x6dd   :  { %14855 = vpow2.f32 %v2727_v3  ;;  %v2615_v46 = vsub.f32 %v20741_v8, %v2525_v14  ;;  %v20745_v14 = vld [vmem:[#allocation41_spill] sm:$0xff]  ;;  %v20746_v8 = vld [vmem:[#allocation27_spill] sm:$0xff] }
 0x6de   :  { %14857 = vrcp.f32 %v2786_v30 }
 0x6df   :  { %v2729_v6 = vmul.f32 1.442695, %v2615_v46  ;;  %v14627_v46 = vunpack.i.h.bf16 %v20746_v8 }
 0x6e0   :  { %2866 = vadd.xlane.f32.xlu0 %v2865_v39  ;;  %v2528_v1 = vpop.xlane.xlu1 %2527 }
 0x6e1   :  { %v2616_v61 = vsub.f32 %v20740_v37, %v2528_v1  ;;  %v2871_v1 = vsel %vm346_vm0, %v17360_v35, 0.0  ;;  %v20749_v35 = vld [vmem:[#allocation44_spill] sm:$0xff] }
 0x6e3   :  { %v2731_v32 = vmul.f32 1.442695, %v2616_v61 }
 0x6e4   :  { %v2531_v34 = vpop.xlane.xlu1 %2530 }
 0x6e7   :  { %v17367_v30 = vpop.eup %14855 }
 0x6e8   :  { %v2534_v15 = vpop.xlane.xlu1 %2533  ;;  %20744 = vst [vmem:[#allocation18_spill] sm:$0xff] %v17367_v30  ;;  %v14858_v3 = vpop.eup %14857 }
 0x6e9   :  { %v2618_v49 = vsub.f32 %v20743_v56, %v2534_v15  ;;  %v14626_v15 = vunpack.i.l.bf16 %v20746_v8  ;;  %v20750_v8 = vld [vmem:[#allocation23_spill] sm:$0xff] }
 0x6eb   :  { %v2735_v37 = vmul.f32 1.442695, %v2618_v49 }
 0x6ec   :  { %14669 = vrot.lane.b32.xlu1 %v20732_v18, %s15403_s8  ;;  %v17351_v16 = vpop.xlane.xlu1 %2536 }
 0x6f0   :  { %14679 = vrot.lane.b32.xlu1 %v20733_v21, %s15403_s8  ;;  %v2540_v0 = vpop.xlane.xlu1 %2539 }
 0x6f4   :  { %14684 = vrot.lane.b32.xlu1 %v20734_v9, %s15402_s7  ;;  %v2804_v62 = vpop.xlane.xlu1 %2803 }
 0x6f6   :  { %14664 = vrot.lane.b32.xlu0 %v20732_v18, %s15402_s7 }
 0x6f8   :  { %14689 = vrot.lane.b32.xlu1 %v20734_v9, %s15403_s8  ;;  %v17370_v61 = vpop.xlane.xlu1 %2827  ;;  %v2620_v9 = vsub.f32 %v20749_v35, %v2540_v0  ;;  %v20751_v0 = vld [vmem:[#allocation28_spill] sm:$0xff] }
 0x6f9   :  { %v14637_v35 = vunpack.i.h.bf16 %v20751_v0 }
 0x6fa   :  { %14674 = vrot.lane.b32.xlu0 %v20733_v21, %s15402_s7 }
 0x6fc   :  { %14699 = vrot.lane.b32.xlu1 %v20735_v40, %s15403_s8 }
 0x6fe   :  { %14694 = vrot.lane.b32.xlu0 %v20735_v40, %s15402_s7  ;;  %v14631_v40 = vunpack.i.l.bf16 %v20750_v8 }
 0x711   :  { %v17354_v29 = vpop.xlane.xlu0 %2494 }
 0x715   :  { %v2783_v39 = vpop.xlane.xlu0 %2782 }
 0x716   :  { %14859 = vrcp.f32 %v2783_v39 }
 0x717   :  { %14861 = vpow2.f32 %v2725_v38  ;;  %v2617_v38 = vsub.f32 %v20745_v14, %v2531_v34  ;;  %v20748_v34 = vld [vmem:[#allocation33_spill] sm:$0xff] }
 0x718   :  { %14863 = vpow2.f32 %v2731_v32  ;;  %v2904_v32 = vsel %vm346_vm0, %v17367_v30, 0.0  ;;  %v3022_v49 = vmul.f32 %v14858_v3, %v20748_v34  ;;  %v13994_v30 = vpack.c.bf16 %v14627_v46, %v14626_v15  ;;  %v2801_v3 = vpop.xlane.xlu1 %2800  ;;  %v20752_v34 = vld [vmem:[#allocation22_spill] sm:$0xff] }
 0x719   :  { %v17358_v33 = vpop.xlane.xlu0 %2806  ;;  %14865 = vpow2.f32 %v2729_v6  ;;  %v20747_v6 = vld [vmem:[#allocation49_spill] sm:$0xff]  ;;  %v2733_v14 = vmul.f32 1.442695, %v2617_v38  ;;  %v14636_v38 = vunpack.i.l.bf16 %v20751_v0 }
 0x71a   :  { %14867 = vrcp.f32 %v2792_v20  ;;  %v14632_v20 = vunpack.i.h.bf16 %v20750_v8 }
 0x71b   :  { %v14002_v8 = vpack.c.bf16 %v14637_v35, %v14636_v38 }
 0x71c   :  { %v13998_v15 = vpack.c.bf16 %v14632_v20, %v14631_v40 }
 0x71d   :  { %v17365_v52 = vpop.xlane.xlu0 %2815  ;;  %2872 = vadd.xlane.f32.xlu0 %v2871_v1 }
 0x720   :  { %v14860_v39 = vpop.eup %14859  ;;  %2905 = vadd.xlane.f32.xlu1 %v2904_v32 }
 0x721   :  { %v2789_v56 = vpop.xlane.xlu0 %2788  ;;  %v17376_v31 = vpop.eup %14861  ;;  %v3021_v1 = vmul.f32 %v14860_v39, %v20747_v6 }
 0x722   :  { %14869 = vrcp.f32 %v2789_v56  ;;  %v2901_v32 = vsel %vm346_vm0, %v17376_v31, 0.0  ;;  %v17387_v39 = vpop.eup %14863 }
 0x723   :  { %14871 = vpow2.f32 %v2735_v37  ;;  %12943 = vmatprep.mubr.msk.f32.mxu0 %vm346_vm0, %v3021_v1  ;;  %v2739_v37 = vmul.f32 1.442695, %v2620_v9  ;;  %v2910_v6 = vsel %vm346_vm0, %v17387_v39, 0.0  ;;  %v17395_v1 = vpop.eup %14865 }
 0x724   :  { %12944 = vmatmul.mubr.msk.f32.vlgmr.msra.gmra.mrb[56].mxu0 %vm346_vm0, %v3022_v49  ;;  %2902 = vadd.xlane.f32.xlu1 %v2901_v32  ;;  %14873 = vrcp.f32 %v17328_v7  ;;  %v14642_v49 = vunpack.i.h.bf16 %v20752_v34  ;;  %v14641_v32 = vunpack.i.l.bf16 %v20752_v34  ;;  %v2907_v40 = vsel %vm346_vm0, %v17395_v1, 0.0 }
 0x725   :  { %v2813_v56 = vpop.xlane.xlu0 %2812  ;;  %13993 = vmatpush3.bf16.msra.mxu0 %v17187_v59  ;;  %14875 = vpow2.f32 %v2733_v14  ;;  %v14868_v59 = vpop.eup %14867  ;;  %v20753_v14 = vld [vmem:[#allocation48_spill] sm:$0xff] }
 0x726   :  { %13995 = vmatprep.subr.bf16.mxu0 %v13994_v30  ;;  %14877 = vrcp.f32 %v2801_v3  ;;  %v2605_v9 = vsub.f32 %v20753_v14, %v17354_v29 }
 0x728   :  { %2911 = vadd.xlane.f32.xlu1 %v2910_v6  ;;  %v20755_v6 = vld [vmem:[#allocation35_spill] sm:$0xff] }
 0x729   :  { %v2795_v46 = vpop.xlane.xlu0 %2794  ;;  %13997 = vmatpush3.bf16.msra.mxu0 %v13994_v30  ;;  %v20754_v30 = vld [vmem:[#allocation52_spill] sm:$0xff]  ;;  %v3024_v29 = vmul.f32 %v14868_v59, %v20755_v6 }
 0x72a   :  { %14879 = vrcp.f32 %v2795_v46  ;;  %13999 = vmatprep.subr.bf16.mxu0 %v13998_v15 }
 0x72b   :  { %14881 = vpow2.f32 %v2739_v37 }
 0x72c   :  { %v14870_v7 = vpop.eup %14869  ;;  %14883 = vrcp.f32 %v2804_v62  ;;  %2908 = vadd.xlane.f32.xlu1 %v2907_v40  ;;  %v2709_v62 = vmul.f32 1.442695, %v2605_v9 }
 0x72d   :  { %v2498_v20 = vpop.xlane.xlu0 %2497  ;;  %v3023_v3 = vmul.f32 %v14870_v7, %v20754_v30  ;;  %v17404_v0 = vpop.eup %14871  ;;  %14885 = vrcp.f32 %v17358_v33  ;;  %14001 = vmatpush3.bf16.msra.mxu0 %v13998_v15 }
 0x72e   :  { %v2606_v37 = vsub.f32 %v17113_v41, %v2498_v20  ;;  %14003 = vmatprep.subr.bf16.mxu0 %v14002_v8  ;;  %14887 = vrcp.f32 %v17312_v63  ;;  %v14874_v46 = vpop.eup %14873  ;;  %v2916_v33 = vsel %vm346_vm0, %v17404_v0, 0.0  ;;  %v14006_v41 = vpack.c.bf16 %v14642_v49, %v14641_v32  ;;  %v20756_v49 = vld [vmem:[#allocation54_spill] sm:$0xff]  ;;  %v20758_v20 = vld [vmem:[#allocation36_spill] sm:$0xff] }
 0x72f   :  { %12946 = vmatprep.mubr.msk.f32.mxu0 %vm346_vm0, %v3023_v3  ;;  %14889 = vrcp.f32 %v2813_v56  ;;  %v17416_v7 = vpop.eup %14875  ;;  %v3026_v30 = vmul.f32 %v14874_v46, %v20758_v20  ;;  %v20760_v46 = vld [vmem:[#allocation45_spill] sm:$0xff] }
 0x730   :  { %v2711_v35 = vmul.f32 1.442695, %v2606_v37  ;;  %12947 = vmatmul.mubr.msk.f32.gmra.mrb[58].mxu0 %vm346_vm0, %v3024_v29  ;;  %v17412_v38 = vpop.xlane.xlu1 %2545  ;;  %2917 = vadd.xlane.f32.xlu1 %v2916_v33  ;;  %v14878_v59 = vpop.eup %14877  ;;  %v2913_v56 = vsel %vm346_vm0, %v17416_v7, 0.0 }
 0x731   :  { %v2501_v15 = vpop.xlane.xlu0 %2500  ;;  %14005 = vmatpush3.bf16.msra.mxu0 %v14002_v8 }
 0x732   :  { %14891 = vpow2.f32 %v2711_v35  ;;  %14007 = vmatprep.subr.bf16.mxu0 %v14006_v41  ;;  %v2607_v34 = vsub.f32 %v17123_v27, %v2501_v15  ;;  %v20759_v27 = vld [vmem:[#allocation47_spill] sm:$0xff] }
 0x733   :  { %14893 = vpow2.f32 %v2709_v62  ;;  %v3027_v37 = vmul.f32 %v14878_v59, %v20759_v27  ;;  %v20761_v59 = vld [vmem:[#allocation50_spill] sm:$0xff] }
 0x734   :  { %v14880_v63 = vpop.eup %14879  ;;  %v17419_v14 = vpop.xlane.xlu1 %2824  ;;  %14895 = vrcp.f32 %v17365_v52  ;;  %2914 = vadd.xlane.f32.xlu1 %v2913_v56  ;;  %v2713_v52 = vmul.f32 1.442695, %v2607_v34 }
 0x735   :  { %v2504_v9 = vpop.xlane.xlu0 %2503  ;;  %v3025_v32 = vmul.f32 %v14880_v63, %v20756_v49  ;;  %v17425_v40 = vpop.eup %14881 }
 0x736   :  { %20757 = vst [vmem:[#allocation19_spill] sm:$0xff] %v17425_v40  ;;  %v2608_v8 = vsub.f32 %v17144_v23, %v2504_v9  ;;  %v14884_v3 = vpop.eup %14883  ;;  %v2922_v35 = vsel %vm346_vm0, %v17425_v40, 0.0  ;;  %v20762_v9 = vld [vmem:[#allocation24_spill] sm:$0xff] }
 0x737   :  { %12949 = vmatprep.mubr.msk.f32.mxu0 %vm346_vm0, %v3025_v32  ;;  %v14886_v6 = vpop.eup %14885  ;;  %v3028_v15 = vmul.f32 %v14884_v3, %v20760_v46  ;;  %v14647_v49 = vunpack.i.h.bf16 %v20762_v9  ;;  %v14646_v32 = vunpack.i.l.bf16 %v20762_v9 }
 0x738   :  { %v2715_v29 = vmul.f32 1.442695, %v2608_v8  ;;  %12950 = vmatmul.mubr.msk.f32.gmra.mrb[60].mxu0 %vm346_vm0, %v3026_v30  ;;  %v17432_v62 = vpop.xlane.xlu1 %2833  ;;  %v14888_v23 = vpop.eup %14887  ;;  %2923 = vadd.xlane.f32.xlu1 %v2922_v35  ;;  %v3029_v56 = vmul.f32 %v14886_v6, %v20761_v59  ;;  %v20763_v30 = vld [vmem:[#allocation34_spill] sm:$0xff]  ;;  %v20764_v35 = vld [vmem:[#allocation53_spill] sm:$0xff] }
 0x739   :  { %v2507_v33 = vpop.xlane.xlu0 %2506  ;;  %12952 = vmatprep.mubr.msk.f32.mxu0 %vm346_vm0, %v3027_v37  ;;  %v14890_v63 = vpop.eup %14889  ;;  %v3030_v3 = vmul.f32 %v14888_v23, %v20763_v30  ;;  %v14010_v9 = vpack.c.bf16 %v14647_v49, %v14646_v32  ;;  %v20767_v49 = vld [vmem:[#allocation30_spill] sm:$0xff] }
 0x73a   :  { %14897 = vpow2.f32 %v2715_v29  ;;  %v2609_v27 = vsub.f32 %v17162_v36, %v2507_v33  ;;  %v3031_v46 = vmul.f32 %v14890_v63, %v20764_v35  ;;  %v20766_v63 = vld [vmem:[#allocation51_spill] sm:$0xff]  ;;  %v14657_v32 = vunpack.i.h.bf16 %v20767_v49 }
 0x73b   :  { %14899 = vpow2.f32 %v2713_v52 }
 0x73c   :  { %v17439_v34 = vpop.eup %14891  ;;  %12953 = vmatmul.mubr.msk.f32.gmra.mrb[62].mxu0 %vm346_vm0, %v3028_v15  ;;  %v17451_v37 = vpop.xlane.xlu1 %2551  ;;  %v20765_v15 = vld [vmem:[#allocation29_spill] sm:$0xff]  ;;  %v2717_v33 = vmul.f32 1.442695, %v2609_v27 }
 0x73d   :  { %12971 = vmatprep.mubr.msk.f32.mxu0 %vm346_vm0, %v3029_v56  ;;  %v2880_v8 = vsel %vm346_vm0, %v17439_v34, 0.0  ;;  %v17447_v20 = vpop.eup %14893  ;;  %v2510_v6 = vpop.xlane.xlu0 %2509  ;;  %v14652_v59 = vunpack.i.h.bf16 %v20765_v15  ;;  %v14651_v56 = vunpack.i.l.bf16 %v20765_v15 }
 0x73e   :  { %2881 = vadd.xlane.f32.xlu0 %v2880_v8  ;;  %v14896_v29 = vpop.eup %14895  ;;  %v2610_v52 = vsub.f32 %v17179_v53, %v2510_v6  ;;  %v2877_v36 = vsel %vm346_vm0, %v17447_v20, 0.0 }
 0x73f   :  { %v3032_v8 = vmul.f32 %v14896_v29, %v20766_v63  ;;  %v20768_v29 = vld [vmem:[#allocation43_spill] sm:$0xff] }
 0x740   :  { %12972 = vmatmul.mubr.msk.f32.vlgmr.msra.gmra.mrb[64].mxu0 %vm346_vm0, %v3030_v3  ;;  %v2719_v40 = vmul.f32 1.442695, %v2610_v52  ;;  %v17461_v23 = vpop.xlane.xlu1 %2839  ;;  %v14014_v3 = vpack.c.bf16 %v14652_v59, %v14651_v56 }
 0x741   :  { %14009 = vmatpush3.bf16.msra.mxu0 %v14006_v41  ;;  %12974 = vmatprep.mubr.msk.f32.mxu0 %vm346_vm0, %v3031_v46  ;;  %v2513_v53 = vpop.xlane.xlu0 %2512  ;;  %v14656_v41 = vunpack.i.l.bf16 %v20767_v49 }
 0x742   :  { %14011 = vmatprep.subr.bf16.mxu0 %v14010_v9  ;;  %2878 = vadd.xlane.f32.xlu0 %v2877_v36  ;;  %v2611_v30 = vsub.f32 %v17195_v54, %v2513_v53  ;;  %14901 = vpow2.f32 %v2719_v40  ;;  %v2619_v54 = vsub.f32 %v20768_v29, %v17351_v16 }
 0x743   :  { %14903 = vpow2.f32 %v2717_v33  ;;  %v14018_v36 = vpack.c.bf16 %v14657_v32, %v14656_v41 }
 0x744   :  { %v17465_v6 = vpop.eup %14897  ;;  %12975 = vmatmul.mubr.msk.f32.gmra.mrb[66].mxu0 %vm346_vm0, %v3032_v8  ;;  %v2721_v27 = vmul.f32 1.442695, %v2611_v30  ;;  %v2837_v46 = vpop.xlane.xlu1 %2836 }
 0x745   :  { %14013 = vmatpush3.bf16.msra.mxu0 %v14010_v9  ;;  %v2886_v52 = vsel %vm346_vm0, %v17465_v6, 0.0  ;;  %v17472_v35 = vpop.eup %14899  ;;  %v2516_v15 = vpop.xlane.xlu0 %2515  ;;  %v2737_v9 = vmul.f32 1.442695, %v2619_v54 }
 0x746   :  { %14015 = vmatprep.subr.bf16.mxu0 %v14014_v3  ;;  %2887 = vadd.xlane.f32.xlu0 %v2886_v52  ;;  %14905 = vpow2.f32 %v2721_v27  ;;  %v2612_v40 = vsub.f32 %v17209_v43, %v2516_v15  ;;  %v2883_v56 = vsel %vm346_vm0, %v17472_v35, 0.0 }
 0x747   :  { %14907 = vrcp.f32 %v17330_v51 }
 0x748   :  { %v2723_v59 = vmul.f32 1.442695, %v2612_v40  ;;  %v2846_v53 = vpop.xlane.xlu1 %2845 }
 0x749   :  { %14017 = vmatpush3.bf16.msra.mxu0 %v14014_v3  ;;  %v2819_v63 = vpop.xlane.xlu0 %2818 }
 0x74a   :  { %14019 = vmatprep.subr.bf16.mxu0 %v14018_v36  ;;  %2884 = vadd.xlane.f32.xlu0 %v2883_v56  ;;  %14909 = vpow2.f32 %v2723_v59 }
 0x74b   :  { %14911 = vrcp.f32 %v17419_v14 }
 0x74c   :  { %14913 = vrcp.f32 %v2819_v63  ;;  %v17481_v16 = vpop.eup %14901  ;;  %v17483_v43 = vpop.xlane.xlu1 %2557 }
 0x74d   :  { %14021 = vmatpush3.bf16.msra.mxu0 %v14018_v36  ;;  %14915 = vpow2.f32 %v2737_v9  ;;  %v17485_v33 = vpop.xlane.xlu0 %2542  ;;  %v2892_v51 = vsel %vm346_vm0, %v17481_v16, 0.0  ;;  %v17489_v8 = vpop.eup %14903 }
 0x74e   :  { %14917 = vrcp.f32 %v17370_v61  ;;  %2893 = vadd.xlane.f32.xlu0 %v2892_v51  ;;  %v2889_v41 = vsel %vm346_vm0, %v17489_v8, 0.0 }
 0x74f   :  { %14919 = vrcp.f32 %v17432_v62 }
 0x750   :  { %v17492_v30 = vpop.eup %14905  ;;  %v17494_v14 = vpop.xlane.xlu1 %2563  ;;  %14921 = vrcp.f32 %v2837_v46  ;;  %v20769_v46 = vld [vmem:[#allocation37_spill] sm:$0xff] }
 0x751   :  { %v2831_v49 = vpop.xlane.xlu0 %2830  ;;  %v2895_v32 = vsel %vm346_vm0, %v17492_v30, 0.0  ;;  %v14908_v3 = vpop.eup %14907 }
 0x752   :  { %2896 = vadd.xlane.f32.xlu1 %v2895_v32  ;;  %2890 = vadd.xlane.f32.xlu0 %v2889_v41  ;;  %14923 = vrcp.f32 %v2831_v49  ;;  %v3034_v36 = vmul.f32 %v14908_v3, %v20769_v46 }
 0x753   :  { %14925 = vrcp.f32 %v17461_v23 }
 0x754   :  { %v17501_v27 = vpop.eup %14909  ;;  %v2858_v52 = vpop.xlane.xlu1 %2857  ;;  %14927 = vrcp.f32 %v2846_v53 }
 0x755   :  { %v14912_v61 = vpop.eup %14911  ;;  %v17503_v29 = vpop.xlane.xlu0 %2548  ;;  %v2898_v54 = vsel %vm346_vm0, %v17501_v27, 0.0 }
 0x756   :  { %v14914_v15 = vpop.eup %14913  ;;  %2899 = vadd.xlane.f32.xlu0 %v2898_v54  ;;  %v3035_v63 = vmul.f32 %v14912_v61, %v17139_v19 }
 0x757   :  { %v17507_v40 = vpop.eup %14915  ;;  %v3033_v62 = vmul.f32 %v14914_v15, %v17225_v50  ;;  %v20770_v50 = vld [vmem:[#allocation46_spill] sm:$0xff] }
 0x758   :  { %v14918_v59 = vpop.eup %14917  ;;  %v2852_v56 = vpop.xlane.xlu1 %2851  ;;  %v2919_v51 = vsel %vm346_vm0, %v17507_v40, 0.0 }
 0x759   :  { %12977 = vmatprep.mubr.msk.f32.mxu0 %vm346_vm0, %v3033_v62  ;;  %v2843_v9 = vpop.xlane.xlu0 %2842  ;;  %v14920_v23 = vpop.eup %14919  ;;  %v3036_v49 = vmul.f32 %v14918_v59, %v20770_v50 }
 0x75a   :  { %12978 = vmatmul.mubr.msk.f32.gmra.mrb[68].mxu0 %vm346_vm0, %v3034_v36  ;;  %2920 = vadd.xlane.f32.xlu0 %v2919_v51  ;;  %14929 = vrcp.f32 %v2843_v9  ;;  %v14922_v32 = vpop.eup %14921  ;;  %v3038_v53 = vmul.f32 %v14920_v23, %v17157_v5 }
 0x75b   :  { %12980 = vmatprep.mubr.msk.f32.mxu0 %vm346_vm0, %v3035_v63  ;;  %v3039_v46 = vmul.f32 %v14922_v32, %v17217_v26 }
 0x75c   :  { %v2849_v41 = vpop.xlane.xlu1 %2848  ;;  %v14924_v54 = vpop.eup %14923 }
 0x75d   :  { %v17519_v3 = vpop.xlane.xlu0 %2554  ;;  %14931 = vrcp.f32 %v2849_v41  ;;  %v3037_v19 = vmul.f32 %v14924_v54, %v17255_v17  ;;  %v14926_v61 = vpop.eup %14925 }
 0x75e   :  { %12981 = vmatmul.mubr.msk.f32.gmra.mrb[70].mxu0 %vm346_vm0, %v3036_v49  ;;  %14933 = vrcp.f32 %v2852_v56  ;;  %v3040_v36 = vmul.f32 %v14926_v61, %v17192_v48  ;;  %v14928_v17 = vpop.eup %14927 }
 0x75f   :  { %12999 = vmatprep.mubr.msk.f32.mxu0 %vm346_vm0, %v3037_v19  ;;  %14935 = vrcp.f32 %v2858_v52  ;;  %v3042_v26 = vmul.f32 %v14928_v17, %v17232_v24 }
 0x760   :  { %v2864_v15 = vpop.xlane.xlu1 %2863 }
 0x761   :  { %v17525_v62 = vpop.xlane.xlu0 %2560 }
 0x762   :  { %13000 = vmatmul.mubr.msk.f32.vlgmr.msra.gmra.mrb[72].mxu0 %vm346_vm0, %v3038_v53 }
 0x763   :  { %13002 = vmatprep.mubr.msk.f32.mxu0 %vm346_vm0, %v3039_v46  ;;  %14709 = vrot.lane.b32.xlu1 %v20733_v21, %s15405_s10 }
 0x764   :  { %v2870_v59 = vpop.xlane.xlu1 %2869  ;;  %v14930_v56 = vpop.eup %14929 }
 0x765   :  { %v2855_v5 = vpop.xlane.xlu0 %2854  ;;  %v3041_v9 = vmul.f32 %v14930_v56, %v17274_v42 }
 0x766   :  { %13003 = vmatmul.mubr.msk.f32.gmra.mrb[74].mxu0 %vm346_vm0, %v3040_v36  ;;  %14937 = vrcp.f32 %v2855_v5 }
 0x767   :  { %v14932_v63 = vpop.eup %14931  ;;  %13005 = vmatprep.mubr.msk.f32.mxu0 %vm346_vm0, %v3041_v9  ;;  %14939 = vrcp.f32 %v2864_v15 }
 0x768   :  { %v14934_v51 = vpop.eup %14933  ;;  %v17537_v23 = vpop.xlane.xlu1 %2875  ;;  %v3043_v48 = vmul.f32 %v14932_v63, %v17291_v12  ;;  %v2622_v12 = vsub.f32 %v17129_v11, %v17412_v38 }
 0x769   :  { %v2861_v21 = vpop.xlane.xlu0 %2860  ;;  %v3044_v42 = vmul.f32 %v14934_v51, %v17280_v25  ;;  %v14936_v41 = vpop.eup %14935 }
 0x76a   :  { %13006 = vmatmul.mubr.msk.f32.gmra.mrb[76].mxu0 %vm346_vm0, %v3042_v26  ;;  %14941 = vrcp.f32 %v2861_v21  ;;  %v2743_v9 = vmul.f32 1.442695, %v2622_v12 }
 0x76b   :  { %13008 = vmatprep.mubr.msk.f32.mxu0 %vm346_vm0, %v3043_v48 }
 0x76c   :  { %v14670_v52 = vpop.permute.xlu1 %14669 }
 0x76d   :  { %v2867_v50 = vpop.xlane.xlu0 %2866  ;;  %v14672_v24 = vunpack.i.h.bf16 %v14670_v52  ;;  %v14671_v49 = vunpack.i.l.bf16 %v14670_v52 }
 0x76e   :  { %13009 = vmatmul.mubr.msk.f32.gmra.mrb[78].mxu0 %vm346_vm0, %v3044_v42  ;;  %14943 = vrcp.f32 %v2867_v50 }
 0x76f   :  { %14945 = vrcp.f32 %v2870_v59  ;;  %v14054_v32 = vpack.c.bf16 %v14672_v24, %v14671_v49  ;;  %v3046_v59 = vmul.f32 %v14936_v41, %v17268_v60  ;;  %v2628_v49 = vsub.f32 %v17249_v2, %v17494_v14 }
 0x770   :  { %14704 = vrot.lane.b32.xlu0 %v20732_v18, %s15405_s10  ;;  %v14680_v54 = vpop.permute.xlu1 %14679  ;;  %v14938_v53 = vpop.eup %14937  ;;  %v2626_v18 = vsub.f32 %v17240_v45, %v17483_v43  ;;  %14947 = vpow2.f32 %v2743_v9 }
 0x771   :  { %v14665_v19 = vpop.permute.xlu0 %14664  ;;  %v14682_v25 = vunpack.i.h.bf16 %v14680_v54  ;;  %v14681_v61 = vunpack.i.l.bf16 %v14680_v54  ;;  %14055 = vmatprep.subr.bf16.mxu1 %v14054_v32  ;;  %v3045_v36 = vmul.f32 %v14938_v53, %v17302_v10  ;;  %v14940_v17 = vpop.eup %14939 }
 0x772   :  { %v14667_v15 = vunpack.i.h.bf16 %v14665_v19  ;;  %v14666_v46 = vunpack.i.l.bf16 %v14665_v19  ;;  %v3048_v45 = vmul.f32 %v14940_v17, %v17300_v57  ;;  %v2751_v24 = vmul.f32 1.442695, %v2626_v18 }
 0x773   :  { %v14058_v56 = vpack.c.bf16 %v14682_v25, %v14681_v61  ;;  %13027 = vmatprep.mubr.msk.f32.mxu1 %vm346_vm0, %v3045_v36  ;;  %v4111_v61 = vld [vmem:[%s20534_s3 + $0x50] sm:$0xff] }
 0x774   :  { %v14038_v11 = vpack.c.bf16 %v14667_v15, %v14666_v46  ;;  %v14942_v38 = vpop.eup %14941  ;;  %v14685_v63 = vpop.permute.xlu1 %14684  ;;  %13028 = vmatmul.mubr.msk.f32.vlgmr.msra.gmra.mrb[64].mxu1 %vm346_vm0, %v3046_v59  ;;  %14949 = vpow2.f32 %v2751_v24  ;;  %v4112_v15 = vld [vmem:[%s20534_s3 + $0x58] sm:$0xff]  ;;  %v2624_v46 = vsub.f32 %v17181_v4, %v17451_v37  ;;  %v2623_v4 = vsub.f32 %v17262_v47, %v17503_v29 }
 0x775   :  { %v17550_v5 = vpop.f32.mrb[48].mxu0  ;;  %v14675_v26 = vpop.permute.xlu0 %14674  ;;  %v14687_v60 = vunpack.i.h.bf16 %v14685_v63  ;;  %v14686_v48 = vunpack.i.l.bf16 %v14685_v63  ;;  %14057 = vmatpush3.bf16.msra.mxu1 %v14054_v32  ;;  %v3047_v42 = vmul.f32 %v14942_v38, %v17310_v28  ;;  %v2621_v28 = vsub.f32 %v17237_v44, %v17485_v33 }
 0x776   :  { %v14677_v51 = vunpack.i.h.bf16 %v14675_v26  ;;  %v14676_v10 = vunpack.i.l.bf16 %v14675_v26  ;;  %v17556_v21 = vpop.f32.mrb[49].mxu0  ;;  %14039 = vmatprep.subr.bf16.mxu0 %v14038_v11  ;;  %14059 = vmatprep.subr.bf16.mxu1 %v14058_v56  ;;  %v2627_v44 = vsub.f32 %v17294_v13, %v17525_v62  ;;  %v17580_v59 = vpack.c.bf16 %v4112_v15, %v4111_v61  ;;  %v20774_v61 = vld [vmem:[#allocation26_spill] sm:$0xff] }
 0x777   :  { %14041 = vmatpush3.bf16.msra.mxu0 %v14038_v11  ;;  %13030 = vmatprep.mubr.msk.f32.mxu1 %vm346_vm0, %v3047_v42  ;;  %v14046_v2 = vpack.c.bf16 %v14687_v60, %v14686_v48  ;;  %v2747_v11 = vmul.f32 1.442695, %v2624_v46  ;;  %v2745_v18 = vmul.f32 1.442695, %v2623_v4  ;;  %v2625_v63 = vsub.f32 %v17285_v22, %v17519_v3 }
 0x778   :  { %v14944_v52 = vpop.eup %14943  ;;  %v14042_v43 = vpack.c.bf16 %v14677_v51, %v14676_v10  ;;  %v14690_v41 = vpop.permute.xlu1 %14689  ;;  %13031 = vmatmul.mubr.msk.f32.gmra.mrb[66].mxu1 %vm346_vm0, %v3048_v45 }
 0x779   :  { %v14946_v50 = vpop.eup %14945  ;;  %v14695_v12 = vpop.permute.xlu0 %14694  ;;  %v3049_v32 = vmul.f32 %v14944_v52, %v17324_v58  ;;  %v14692_v54 = vunpack.i.h.bf16 %v14690_v41  ;;  %v14691_v57 = vunpack.i.l.bf16 %v14690_v41  ;;  %14061 = vmatpush3.bf16.msra.mxu1 %v14058_v56  ;;  %v2755_v58 = vmul.f32 1.442695, %v2628_v49 }
 0x77a   :  { %14043 = vmatprep.subr.bf16.mxu0 %v14042_v43  ;;  %v14697_v19 = vunpack.i.h.bf16 %v14695_v12  ;;  %v14696_v53 = vunpack.i.l.bf16 %v14695_v12  ;;  %v3050_v14 = vmul.f32 %v14946_v50, %v17308_v55  ;;  %v2741_v55 = vmul.f32 1.442695, %v2621_v28  ;;  %v17586_v38 = vpop.eup %14947 }
 0x77b   :  { %13033 = vmatprep.mubr.msk.f32.mxu1 %vm346_vm0, %v3049_v32  ;;  %14045 = vmatpush3.bf16.msra.mxu0 %v14042_v43  ;;  %v14062_v25 = vpack.c.bf16 %v14692_v54, %v14691_v57  ;;  %14951 = vpow2.f32 %v2755_v58  ;;  %v2753_v56 = vmul.f32 1.442695, %v2627_v44  ;;  %v2928_v47 = vsel %vm346_vm0, %v17586_v38, 0.0  ;;  %v20771_v54 = vld [vmem:[#allocation21_spill] sm:$0xff] }
 0x77c   :  { %v14700_v33 = vpop.permute.xlu1 %14699  ;;  %14047 = vmatprep.subr.bf16.mxu0 %v14046_v2  ;;  %13034 = vmatmul.mubr.msk.f32.gmra.mrb[68].mxu1 %vm346_vm0, %v3050_v14  ;;  %v14050_v13 = vpack.c.bf16 %v14697_v19, %v14696_v53  ;;  %14953 = vpow2.f32 %v2741_v55  ;;  %v2749_v10 = vmul.f32 1.442695, %v2625_v63  ;;  %v20772_v53 = vld [vmem:[#allocation20_spill] sm:$0xff]  ;;  %v20773_v44 = vld [vmem:[#allocation25_spill] sm:$0xff]  ;;  %v4109_v55 = vld [vmem:[%s20534_s3 + $0x40] sm:$0xff] }
 0x77d   :  { %v14702_v36 = vunpack.i.h.bf16 %v14700_v33  ;;  %v14701_v17 = vunpack.i.l.bf16 %v14700_v33  ;;  %14063 = vmatprep.subr.bf16.mxu1 %v14062_v25  ;;  %14955 = vpow2.f32 %v2753_v56  ;;  %v20775_v56 = vld [vmem:[#allocation18_spill] sm:$0xff] }
 0x77e   :  { %14065 = vmatpush3.bf16.msra.mxu1 %v14062_v25  ;;  %14957 = vpow2.f32 %v2747_v11  ;;  %v17597_v29 = vpop.eup %14949 }
 0x77f   :  { %14049 = vmatpush3.bf16.msra.mxu0 %v14046_v2  ;;  %v14066_v62 = vpack.c.bf16 %v14702_v36, %v14701_v17  ;;  %14959 = vpow2.f32 %v2745_v18  ;;  %v2940_v48 = vsel %vm346_vm0, %v17597_v29, 0.0  ;;  %v4110_v36 = vld [vmem:[%s20534_s3 + $0x48] sm:$0xff] }
 0x780   :  { %14051 = vmatprep.subr.bf16.mxu0 %v14050_v13  ;;  %14961 = vpow2.f32 %v2749_v10  ;;  %v17648_v4 = vpack.c.bf16 %v4110_v36, %v4109_v55 }
 0x781   :  { %v17584_v37 = vpop.f32.mrb[50].mxu0  ;;  %14067 = vmatprep.subr.bf16.mxu1 %v14066_v62  ;;  %14963 = vrcp.f32 %v17537_v23 }
 0x782   :  { %v17588_v9 = vpop.f32.mrb[51].mxu0  ;;  %14069 = vmatpush3.bf16.msra.mxu1 %v14066_v62 }
 0x783   :  { %14053 = vmatpush3.bf16.msra.mxu0 %v14050_v13  ;;  %14087 = vmatprep.subr.bf16.mxu1 %v17580_v59 }
 0x785   :  { %v17593_v26 = vpop.f32.mrb[52].mxu0  ;;  %v17605_v42 = vpop.eup %14951 }
 0x786   :  { %v17599_v51 = vpop.f32.mrb[53].mxu0  ;;  %v17609_v3 = vpop.eup %14953  ;;  %v2946_v52 = vsel %vm346_vm0, %v17605_v42, 0.0 }
 0x787   :  { %2929 = vadd.xlane.f32.xlu1 %v2928_v47  ;;  %v17613_v45 = vpop.eup %14955  ;;  %v2925_v43 = vsel %vm346_vm0, %v17609_v3, 0.0 }
 0x788   :  { %v17617_v50 = vpop.eup %14957  ;;  %v2943_v24 = vsel %vm346_vm0, %v17613_v45, 0.0 }
 0x789   :  { %v17601_v60 = vpop.f32.mrb[54].mxu0  ;;  %v2934_v49 = vsel %vm346_vm0, %v17617_v50, 0.0  ;;  %v17623_v41 = vpop.eup %14959 }
 0x78a   :  { %v17607_v22 = vpop.f32.mrb[55].mxu0  ;;  %v2931_v12 = vsel %vm346_vm0, %v17623_v41, 0.0  ;;  %v17627_v32 = vpop.eup %14961 }
 0x78b   :  { %2941 = vadd.xlane.f32.xlu1 %v2940_v48  ;;  %v2937_v28 = vsel %vm346_vm0, %v17627_v32, 0.0  ;;  %v14964_v14 = vpop.eup %14963 }
 0x78c   :  { %v3052_v15 = vmul.f32 %v14964_v14, %v20774_v61 }
 0x78f   :  { %2947 = vadd.xlane.f32.xlu1 %v2946_v52  ;;  %2926 = vadd.xlane.f32.xlu0 %v2925_v43 }
 0x793   :  { %2944 = vadd.xlane.f32.xlu1 %v2943_v24  ;;  %2935 = vadd.xlane.f32.xlu0 %v2934_v49 }
 0x797   :  { %2932 = vadd.xlane.f32.xlu0 %v2931_v12 }
 0x79b   :  { %2938 = vadd.xlane.f32.xlu0 %v2937_v28 }
 0x7a4   :  { %14719 = vrot.lane.b32.xlu1 %v20771_v54, %s15405_s10 }
 0x7aa   :  { %v2873_v57 = vpop.xlane.xlu0 %2872 }
 0x7ab   :  { %14965 = vrcp.f32 %v2873_v57 }
 0x7ad   :  { %v2906_v19 = vpop.xlane.xlu1 %2905 }
 0x7ae   :  { %14967 = vrcp.f32 %v2906_v19 }
 0x7b1   :  { %14714 = vrot.lane.b32.xlu0 %v20772_v53, %s15405_s10  ;;  %v2903_v2 = vpop.xlane.xlu1 %2902 }
 0x7b2   :  { %14969 = vrcp.f32 %v2903_v2 }
 0x7b5   :  { %v14966_v25 = vpop.eup %14965  ;;  %v2912_v58 = vpop.xlane.xlu1 %2911 }
 0x7b6   :  { %v3051_v33 = vmul.f32 %v14966_v25, %v20773_v44  ;;  %14971 = vrcp.f32 %v2912_v58 }
 0x7b8   :  { %13036 = vmatprep.mubr.msk.f32.mxu1 %vm346_vm0, %v3051_v33  ;;  %v14968_v46 = vpop.eup %14967 }
 0x7b9   :  { %13037 = vmatmul.mubr.msk.f32.gmra.mrb[70].mxu1 %vm346_vm0, %v3052_v15  ;;  %v2909_v23 = vpop.xlane.xlu1 %2908  ;;  %v3062_v11 = vmul.f32 %v14968_v46, %v20775_v56 }
 0x7ba   :  { %14973 = vrcp.f32 %v2909_v23 }
 0x7bc   :  { %v14970_v17 = vpop.eup %14969 }
 0x7bd   :  { %v2918_v13 = vpop.xlane.xlu1 %2917  ;;  %v3061_v62 = vmul.f32 %v14970_v17, %v17376_v31 }
 0x7be   :  { %14975 = vrcp.f32 %v2918_v13 }
 0x7bf   :  { %13083 = vmatprep.mubr.msk.f32.mxu1 %vm346_vm0, %v3061_v62 }
 0x7c0   :  { %13084 = vmatmul.mubr.msk.f32.vlgmr.msra.gmra.mrb[72].mxu1 %vm346_vm0, %v3062_v11  ;;  %v14972_v63 = vpop.eup %14971 }
 0x7c1   :  { %v2915_v18 = vpop.xlane.xlu1 %2914  ;;  %14089 = vmatpush3.bf16.msra.mxu1 %v17580_v59  ;;  %v3064_v31 = vmul.f32 %v14972_v63, %v17387_v39 }
 0x7c2   :  { %14977 = vrcp.f32 %v2915_v18  ;;  %14091 = vmatprep.subr.bf16.mxu1 %v17648_v4 }
 0x7c4   :  { %v14974_v47 = vpop.eup %14973 }
 0x7c5   :  { %v3063_v10 = vmul.f32 %v14974_v47, %v17395_v1  ;;  %v2924_v19 = vpop.xlane.xlu1 %2923 }
 0x7c7   :  { %13086 = vmatprep.mubr.msk.f32.mxu1 %vm346_vm0, %v3063_v10  ;;  %v20776_v10 = vld [vmem:[#allocation19_spill] sm:$0xff] }
 0x7c8   :  { %13087 = vmatmul.mubr.msk.f32.gmra.mrb[74].mxu1 %vm346_vm0, %v3064_v31  ;;  %v14976_v52 = vpop.eup %14975  ;;  %v4113_v31 = vld [vmem:[%s20534_s3 + $0x60] sm:$0xff] }
 0x7c9   :  { %v3066_v12 = vmul.f32 %v14976_v52, %v17404_v0 }
 0x7cb   :  { %v2882_v48 = vpop.xlane.xlu0 %2881 }
 0x7cc   :  { %v14978_v43 = vpop.eup %14977  ;;  %14979 = vrcp.f32 %v2882_v48 }
 0x7cd   :  { %v3065_v49 = vmul.f32 %v14978_v43, %v17416_v7 }
 0x7cf   :  { %v2879_v24 = vpop.xlane.xlu0 %2878  ;;  %13089 = vmatprep.mubr.msk.f32.mxu1 %vm346_vm0, %v3065_v49 }
 0x7d0   :  { %14981 = vrcp.f32 %v2879_v24  ;;  %13090 = vmatmul.mubr.msk.f32.gmra.mrb[76].mxu1 %vm346_vm0, %v3066_v12 }
 0x7d3   :  { %v2888_v1 = vpop.xlane.xlu0 %2887 }
 0x7d4   :  { %14983 = vrcp.f32 %v2888_v1 }
 0x7d6   :  { %v14980_v28 = vpop.eup %14979 }
 0x7d7   :  { %v2885_v39 = vpop.xlane.xlu0 %2884  ;;  %v3054_v53 = vmul.f32 %v14980_v28, %v17439_v34  ;;  %v4115_v28 = vld [vmem:[%s20534_s3 + $0x70] sm:$0xff] }
 0x7d8   :  { %14985 = vrcp.f32 %v2885_v39 }
 0x7da   :  { %v14982_v54 = vpop.eup %14981 }
 0x7db   :  { %v3053_v57 = vmul.f32 %v14982_v54, %v17447_v20  ;;  %v2894_v2 = vpop.xlane.xlu0 %2893  ;;  %v4116_v54 = vld [vmem:[%s20534_s3 + $0x78] sm:$0xff] }
 0x7dc   :  { %14987 = vrcp.f32 %v2894_v2 }
 0x7dd   :  { %13055 = vmatprep.mubr.msk.f32.mxu0 %vm346_vm0, %v3053_v57 }
 0x7de   :  { %13056 = vmatmul.mubr.msk.f32.vlgmr.msra.gmra.mrb[80].mxu0 %vm346_vm0, %v3054_v53  ;;  %v14984_v7 = vpop.eup %14983  ;;  %v17708_v53 = vpack.c.bf16 %v4116_v54, %v4115_v28 }
 0x7df   :  { %v2897_v0 = vpop.xlane.xlu1 %2896  ;;  %v2891_v14 = vpop.xlane.xlu0 %2890  ;;  %v3056_v44 = vmul.f32 %v14984_v7, %v17465_v6 }
 0x7e0   :  { %14989 = vrcp.f32 %v2897_v0 }
 0x7e1   :  { %14991 = vrcp.f32 %v2891_v14 }
 0x7e2   :  { %v14986_v25 = vpop.eup %14985 }
 0x7e3   :  { %v3055_v58 = vmul.f32 %v14986_v25, %v17472_v35  ;;  %v2900_v20 = vpop.xlane.xlu0 %2899  ;;  %v14710_v61 = vpop.permute.xlu1 %14709 }
 0x7e4   :  { %14993 = vrcp.f32 %v2900_v20  ;;  %v14712_v46 = vunpack.i.h.bf16 %v14710_v61  ;;  %v14711_v35 = vunpack.i.l.bf16 %v14710_v61 }
 0x7e5   :  { %13058 = vmatprep.mubr.msk.f32.mxu0 %vm346_vm0, %v3055_v58  ;;  %14995 = vrcp.f32 %v2924_v19 }
 0x7e6   :  { %13059 = vmatmul.mubr.msk.f32.gmra.mrb[82].mxu0 %vm346_vm0, %v3056_v44  ;;  %v14988_v33 = vpop.eup %14987  ;;  %v14074_v63 = vpack.c.bf16 %v14712_v46, %v14711_v35 }
 0x7e7   :  { %v2921_v34 = vpop.xlane.xlu0 %2920  ;;  %v3058_v13 = vmul.f32 %v14988_v33, %v17481_v16 }
 0x7e8   :  { %14997 = vrcp.f32 %v2921_v34 }
 0x7ea   :  { %v14990_v15 = vpop.eup %14989 }
 0x7eb   :  { %v14992_v23 = vpop.eup %14991  ;;  %v14705_v55 = vpop.permute.xlu0 %14704  ;;  %v3059_v62 = vmul.f32 %v14990_v15, %v17492_v30 }
 0x7ec   :  { %v3057_v36 = vmul.f32 %v14992_v23, %v17489_v8  ;;  %v14707_v17 = vunpack.i.h.bf16 %v14705_v55  ;;  %v14706_v6 = vunpack.i.l.bf16 %v14705_v55 }
 0x7ee   :  { %13061 = vmatprep.mubr.msk.f32.mxu0 %vm346_vm0, %v3057_v36  ;;  %v14994_v56 = vpop.eup %14993  ;;  %v14070_v11 = vpack.c.bf16 %v14707_v17, %v14706_v6 }
 0x7ef   :  { %13062 = vmatmul.mubr.msk.f32.gmra.mrb[84].mxu0 %vm346_vm0, %v3058_v13  ;;  %v3060_v18 = vmul.f32 %v14994_v56, %v17501_v27  ;;  %v14996_v8 = vpop.eup %14995  ;;  %v4114_v27 = vld [vmem:[%s20534_s3 + $0x68] sm:$0xff] }
 0x7f0   :  { %13064 = vmatprep.mubr.msk.f32.mxu0 %vm346_vm0, %v3059_v62  ;;  %14071 = vmatprep.subr.bf16.mxu0 %v14070_v11  ;;  %v3068_v30 = vmul.f32 %v14996_v8, %v20776_v10 }
 0x7f1   :  { %14073 = vmatpush3.bf16.msra.mxu0 %v14070_v11 }
 0x7f2   :  { %v14998_v47 = vpop.eup %14997  ;;  %14075 = vmatprep.subr.bf16.mxu0 %v14074_v63 }
 0x7f3   :  { %13065 = vmatmul.mubr.msk.f32.gmra.mrb[86].mxu0 %vm346_vm0, %v3060_v18  ;;  %v3067_v16 = vmul.f32 %v14998_v47, %v17507_v40  ;;  %v17689_v40 = vpack.c.bf16 %v4114_v27, %v4113_v31 }
 0x7f5   :  { %13092 = vmatprep.mubr.msk.f32.mxu1 %vm346_vm0, %v3067_v16  ;;  %14077 = vmatpush3.bf16.msra.mxu0 %v14074_v63 }
 0x7f6   :  { %13093 = vmatmul.mubr.msk.f32.gmra.mrb[78].mxu1 %vm346_vm0, %v3068_v30 }
 0x7f7   :  { %v12945_v48 = vpop.f32.mrb[56].mxu0 }
 0x7f8   :  { %v3296_v52 = vpop.f32.mrb[57].mxu0 }
 0x7f9   :  { %13127 = vmatprep.mubr.msk.f32.mxu1 %vm1100_vm1, %v3296_v52 }
 0x7fa   :  { %13128 = vmatmul.mubr.msk.f32.vlgmr.msra.gmra.mrb[80].mxu1 %vm1100_vm1, %v12945_v48 }
 0x7fb   :  { %14093 = vmatpush3.bf16.msra.mxu1 %v17648_v4 }
 0x7fc   :  { %14095 = vmatprep.subr.bf16.mxu1 %v17689_v40 }
 0x803   :  { %v12948_v43 = vpop.f32.mrb[58].mxu0 }
 0x804   :  { %v3306_v24 = vpop.f32.mrb[59].mxu0 }
 0x805   :  { %13130 = vmatprep.mubr.msk.f32.mxu1 %vm1100_vm1, %v3306_v24 }
 0x806   :  { %13131 = vmatmul.mubr.msk.f32.gmra.mrb[82].mxu1 %vm1100_vm1, %v12948_v43 }
 0x80b   :  { %v12951_v49 = vpop.f32.mrb[60].mxu0 }
 0x80c   :  { %v3316_v12 = vpop.f32.mrb[61].mxu0 }
 0x80d   :  { %13133 = vmatprep.mubr.msk.f32.mxu1 %vm1100_vm1, %v3316_v12 }
 0x80e   :  { %13134 = vmatmul.mubr.msk.f32.gmra.mrb[84].mxu1 %vm1100_vm1, %v12951_v49 }
 0x80f   :  { %v12954_v1 = vpop.f32.mrb[62].mxu0 }
 0x810   :  { %v3326_v39 = vpop.f32.mrb[63].mxu0 }
 0x811   :  { %13136 = vmatprep.mubr.msk.f32.mxu1 %vm1100_vm1, %v3326_v39 }
 0x812   :  { %13137 = vmatmul.mubr.msk.f32.gmra.mrb[86].mxu1 %vm1100_vm1, %v12954_v1 }
 0x813   :  { %v12973_v57 = vpop.f32.mrb[64].mxu0  ;;  %13143 = vmatprep.mubr.msk.f32.mxu1 %vm1100_vm1, %v17556_v21 }
 0x814   :  { %v3425_v19 = vpop.f32.mrb[65].mxu0  ;;  %v2930_v2 = vpop.xlane.xlu1 %2929 }
 0x816   :  { %13144 = vmatmul.mubr.msk.f32.vlgmr.msra.gmra.mrb[80].mxu1 %vm1100_vm1, %v17550_v5 }
 0x817   :  { %v12976_v0 = vpop.f32.mrb[66].mxu0  ;;  %13146 = vmatprep.mubr.msk.f32.mxu1 %vm1100_vm1, %v17588_v9  ;;  %14097 = vmatpush3.bf16.msra.mxu1 %v17689_v40 }
 0x818   :  { %v3435_v7 = vpop.f32.mrb[67].mxu0  ;;  %14099 = vmatprep.subr.bf16.mxu1 %v17708_v53  ;;  %v2942_v14 = vpop.xlane.xlu1 %2941 }
 0x81a   :  { %13147 = vmatmul.mubr.msk.f32.gmra.mrb[82].mxu1 %vm1100_vm1, %v17584_v37 }
 0x81b   :  { %13149 = vmatprep.mubr.msk.f32.mxu1 %vm1100_vm1, %v17599_v51 }
 0x81c   :  { %v2927_v21 = vpop.xlane.xlu0 %2926  ;;  %v2948_v5 = vpop.xlane.xlu1 %2947 }
 0x81d   :  { %14999 = vrcp.f32 %v2927_v21 }
 0x81e   :  { %13150 = vmatmul.mubr.msk.f32.gmra.mrb[84].mxu1 %vm1100_vm1, %v17593_v26  ;;  %15001 = vrcp.f32 %v2930_v2 }
 0x81f   :  { %13152 = vmatprep.mubr.msk.f32.mxu1 %vm1100_vm1, %v17607_v22 }
 0x820   :  { %v2936_v9 = vpop.xlane.xlu0 %2935  ;;  %v2945_v25 = vpop.xlane.xlu1 %2944 }
 0x822   :  { %13153 = vmatmul.mubr.msk.f32.gmra.mrb[86].mxu1 %vm1100_vm1, %v17601_v60 }
 0x823   :  { %13159 = vmatprep.mubr.msk.f32.mxu1 %vm1100_vm1, %v3425_v19 }
 0x824   :  { %v2933_v37 = vpop.xlane.xlu0 %2932  ;;  %v14720_v22 = vpop.permute.xlu1 %14719 }
 0x825   :  { %15003 = vrcp.f32 %v2933_v37  ;;  %v14722_v20 = vunpack.i.h.bf16 %v14720_v22  ;;  %v14721_v34 = vunpack.i.l.bf16 %v14720_v22  ;;  %v17794_v37 = vld [vmem:[%s20532_s5 + $0x3] ss:$0 sm:$0xff] }
 0x826   :  { %13160 = vmatmul.mubr.msk.f32.vlgmr.msra.gmra.mrb[80].mxu1 %vm1100_vm1, %v12973_v57  ;;  %15005 = vrcp.f32 %v2936_v9 }
 0x827   :  { %13162 = vmatprep.mubr.msk.f32.mxu1 %vm1100_vm1, %v3435_v7  ;;  %14101 = vmatpush3.bf16.msra.mxu1 %v17708_v53  ;;  %v15000_v26 = vpop.eup %14999  ;;  %v14082_v55 = vpack.c.bf16 %v14722_v20, %v14721_v34 }
 0x828   :  { %v2939_v51 = vpop.xlane.xlu0 %2938  ;;  %v3069_v58 = vmul.f32 %v15000_v26, %v17609_v3  ;;  %v15002_v36 = vpop.eup %15001  ;;  %v20777_v26 = vld [vmem:[#allocation3_spill] sm:$0xff] }
 0x829   :  { %15007 = vrcp.f32 %v2939_v51  ;;  %v3070_v13 = vmul.f32 %v15002_v36, %v17586_v38 }
 0x82a   :  { %13163 = vmatmul.mubr.msk.f32.gmra.mrb[82].mxu1 %vm1100_vm1, %v12976_v0  ;;  %13111 = vmatprep.mubr.msk.f32.mxu0 %vm346_vm0, %v3069_v58  ;;  %15009 = vrcp.f32 %v2942_v14 }
 0x82b   :  { %15011 = vrcp.f32 %v2945_v25 }
 0x82c   :  { %v14715_v44 = vpop.permute.xlu0 %14714  ;;  %15013 = vrcp.f32 %v2948_v5 }
 0x82d   :  { %v12979_v60 = vpop.f32.mrb[68].mxu0  ;;  %v14717_v61 = vunpack.i.h.bf16 %v14715_v44  ;;  %v14716_v15 = vunpack.i.l.bf16 %v14715_v44 }
 0x82e   :  { %v3445_v33 = vpop.f32.mrb[69].mxu0 }
 0x82f   :  { %13165 = vmatprep.mubr.msk.f32.mxu1 %vm1100_vm1, %v3445_v33  ;;  %v14078_v3 = vpack.c.bf16 %v14717_v61, %v14716_v15  ;;  %v15004_v17 = vpop.eup %15003  ;;  %v20781_v61 = vld [vmem:[#allocation4_spill] sm:$0xff] }
 0x830   :  { %13166 = vmatmul.mubr.msk.f32.gmra.mrb[84].mxu1 %vm1100_vm1, %v12979_v60  ;;  %v15006_v62 = vpop.eup %15005  ;;  %v3071_v11 = vmul.f32 %v15004_v17, %v17623_v41 }
 0x831   :  { %v12982_v23 = vpop.f32.mrb[70].mxu0  ;;  %14079 = vmatprep.subr.bf16.mxu0 %v14078_v3  ;;  %v3072_v38 = vmul.f32 %v15006_v62, %v17617_v50  ;;  %v20784_v62 = vld [vmem:[#allocation6_spill] sm:$0xff] }
 0x832   :  { %v3455_v46 = vpop.f32.mrb[71].mxu0  ;;  %14081 = vmatpush3.bf16.msra.mxu0 %v14078_v3 }
 0x833   :  { %13168 = vmatprep.mubr.msk.f32.mxu1 %vm1100_vm1, %v3455_v46  ;;  %14083 = vmatprep.subr.bf16.mxu0 %v14082_v55  ;;  %v15008_v18 = vpop.eup %15007  ;;  %v20782_v46 = vld [vmem:[#allocation5_spill] sm:$0xff] }
 0x834   :  { %13169 = vmatmul.mubr.msk.f32.gmra.mrb[86].mxu1 %vm1100_vm1, %v12982_v23  ;;  %v15010_v8 = vpop.eup %15009  ;;  %v3073_v16 = vmul.f32 %v15008_v18, %v17627_v32 }
 0x835   :  { %v13001_v35 = vpop.f32.mrb[72].mxu0  ;;  %v15012_v41 = vpop.eup %15011  ;;  %v3074_v50 = vmul.f32 %v15010_v8, %v17597_v29 }
 0x836   :  { %v3554_v6 = vpop.f32.mrb[73].mxu0  ;;  %14085 = vmatpush3.bf16.msra.mxu0 %v14082_v55  ;;  %v15014_v30 = vpop.eup %15013  ;;  %v3075_v31 = vmul.f32 %v15012_v41, %v17613_v45 }
 0x837   :  { %13175 = vmatprep.mubr.msk.f32.mxu1 %vm1100_vm1, %v3554_v6  ;;  %14103 = vmatprep.subr.bf16.mxu0 %v17580_v59  ;;  %v3076_v32 = vmul.f32 %v15014_v30, %v17605_v42 }
 0x838   :  { %13176 = vmatmul.mubr.msk.f32.vlgmr.msra.gmra.mrb[80].mxu1 %vm1100_vm1, %v13001_v35 }
 0x839   :  { %v13004_v56 = vpop.f32.mrb[74].mxu0  ;;  %13112 = vmatmul.mubr.msk.f32.vlgmr.msra.gmra.mrb[88].mxu0 %vm346_vm0, %v3070_v13 }
 0x83a   :  { %v3564_v63 = vpop.f32.mrb[75].mxu0  ;;  %13114 = vmatprep.mubr.msk.f32.mxu0 %vm346_vm0, %v3071_v11  ;;  %14105 = vmatpush3.bf16.msra.mxu0 %v17580_v59 }
 0x83b   :  { %13178 = vmatprep.mubr.msk.f32.mxu1 %vm1100_vm1, %v3564_v63  ;;  %14107 = vmatprep.subr.bf16.mxu0 %v17648_v4 }
 0x83c   :  { %13179 = vmatmul.mubr.msk.f32.gmra.mrb[82].mxu1 %vm1100_vm1, %v13004_v56 }
 0x83d   :  { %v13007_v47 = vpop.f32.mrb[76].mxu0  ;;  %13115 = vmatmul.mubr.msk.f32.gmra.mrb[90].mxu0 %vm346_vm0, %v3072_v38  ;;  %v20786_v38 = vld [vmem:[#allocation7_spill] sm:$0xff] }
 0x83e   :  { %v3574_v10 = vpop.f32.mrb[77].mxu0  ;;  %13117 = vmatprep.mubr.msk.f32.mxu0 %vm346_vm0, %v3073_v16 }
 0x83f   :  { %13181 = vmatprep.mubr.msk.f32.mxu1 %vm1100_vm1, %v3574_v10 }
 0x840   :  { %13182 = vmatmul.mubr.msk.f32.gmra.mrb[84].mxu1 %vm1100_vm1, %v13007_v47 }
 0x841   :  { %v13010_v59 = vpop.f32.mrb[78].mxu0  ;;  %13118 = vmatmul.mubr.msk.f32.gmra.mrb[92].mxu0 %vm346_vm0, %v3074_v50  ;;  %v20788_v50 = vld [vmem:[#allocation8_spill] sm:$0xff] }
 0x842   :  { %v3584_v27 = vpop.f32.mrb[79].mxu0  ;;  %13120 = vmatprep.mubr.msk.f32.mxu0 %vm346_vm0, %v3075_v31 }
 0x843   :  { %13184 = vmatprep.mubr.msk.f32.mxu1 %vm1100_vm1, %v3584_v27 }
 0x844   :  { %13185 = vmatmul.mubr.msk.f32.gmra.mrb[86].mxu1 %vm1100_vm1, %v13010_v59 }
 0x845   :  { %13121 = vmatmul.mubr.msk.f32.gmra.mrb[94].mxu0 %vm346_vm0, %v3076_v32  ;;  %v20790_v32 = vld [vmem:[#allocation9_spill] sm:$0xff] }
 0x847   :  { %v13029_v48 = vpop.f32.mrb[64].mxu1 }
 0x848   :  { %v3683_v52 = vpop.f32.mrb[65].mxu1 }
 0x84b   :  { %v13032_v29 = vpop.f32.mrb[66].mxu1 }
 0x84c   :  { %v3693_v43 = vpop.f32.mrb[67].mxu1 }
 0x84f   :  { %v13035_v24 = vpop.f32.mrb[68].mxu1 }
 0x850   :  { %v3703_v49 = vpop.f32.mrb[69].mxu1 }
 0x88c   :  { %v13038_v45 = vpop.f32.mrb[70].mxu1 }
 0x88d   :  { %v3713_v12 = vpop.f32.mrb[71].mxu1 }
 0x893   :  { %v13085_v1 = vpop.f32.mrb[72].mxu1 }
 0x894   :  { %v3941_v39 = vpop.f32.mrb[73].mxu1 }
 0x89b   :  { %v13088_v28 = vpop.f32.mrb[74].mxu1 }
 0x89c   :  { %v3951_v54 = vpop.f32.mrb[75].mxu1 }
 0x8a3   :  { %v13091_v57 = vpop.f32.mrb[76].mxu1 }
 0x8a4   :  { %v3961_v19 = vpop.f32.mrb[77].mxu1 }
 0x8b1   :  { %v13057_v2 = vpop.f32.mrb[80].mxu0 }
 0x8b2   :  { %v3812_v0 = vpop.f32.mrb[81].mxu0 }
 0x8b3   :  { %13191 = vmatprep.mubr.msk.f32.mxu0 %vm1100_vm1, %v3812_v0  ;;  %v5663_v0 = vld [vmem:[%s20530_s4 + $0x40] sm:$0xff] }
 0x8b4   :  { %13192 = vmatmul.mubr.msk.f32.vlgmr.msra.gmra.mrb[96].mxu0 %vm1100_vm1, %v13057_v2 }
 0x8b5   :  { %14109 = vmatpush3.bf16.msra.mxu0 %v17648_v4 }
 0x8b6   :  { %14111 = vmatprep.subr.bf16.mxu0 %v17689_v40 }
 0x8b9   :  { %v13060_v42 = vpop.f32.mrb[82].mxu0 }
 0x8ba   :  { %v3822_v7 = vpop.f32.mrb[83].mxu0 }
 0x8bb   :  { %13194 = vmatprep.mubr.msk.f32.mxu0 %vm1100_vm1, %v3822_v7 }
 0x8bc   :  { %13195 = vmatmul.mubr.msk.f32.gmra.mrb[98].mxu0 %vm1100_vm1, %v13060_v42  ;;  %v5664_v42 = vld [vmem:[%s20530_s4 + $0x50] sm:$0xff] }
 0x8bd   :  { %v14142_v7 = vpack.c.bf16 %v5664_v42, %v5663_v0  ;;  %v5670_v42 = vld [vmem:[%s20530_s4 + $0xb0] sm:$0xff] }
 0x8c2   :  { %v13063_v14 = vpop.f32.mrb[84].mxu0 }
 0x8c3   :  { %v3832_v21 = vpop.f32.mrb[85].mxu0 }
 0x8c4   :  { %13197 = vmatprep.mubr.msk.f32.mxu0 %vm1100_vm1, %v3832_v21 }
 0x8c5   :  { %13198 = vmatmul.mubr.msk.f32.gmra.mrb[100].mxu0 %vm1100_vm1, %v13063_v14 }
 0x8c6   :  { %v13066_v5 = vpop.f32.mrb[86].mxu0 }
 0x8c7   :  { %v3842_v9 = vpop.f32.mrb[87].mxu0 }
 0x8c8   :  { %13200 = vmatprep.mubr.msk.f32.mxu0 %vm1100_vm1, %v3842_v9 }
 0x8c9   :  { %13201 = vmatmul.mubr.msk.f32.gmra.mrb[102].mxu0 %vm1100_vm1, %v13066_v5  ;;  %v13094_v4 = vpop.f32.mrb[78].mxu1 }
 0x8ca   :  { %13207 = vmatprep.mubr.msk.f32.mxu0 %vm1100_vm1, %v3683_v52  ;;  %v3971_v25 = vpop.f32.mrb[79].mxu1 }
 0x8cd   :  { %13208 = vmatmul.mubr.msk.f32.vlgmr.msra.gmra.mrb[96].mxu0 %vm1100_vm1, %v13029_v48 }
 0x8ce   :  { %13210 = vmatprep.mubr.msk.f32.mxu0 %vm1100_vm1, %v3693_v43  ;;  %14113 = vmatpush3.bf16.msra.mxu0 %v17689_v40 }
 0x8cf   :  { %14115 = vmatprep.subr.bf16.mxu0 %v17708_v53 }
 0x8d1   :  { %13211 = vmatmul.mubr.msk.f32.gmra.mrb[98].mxu0 %vm1100_vm1, %v13032_v29 }
 0x8d2   :  { %13213 = vmatprep.mubr.msk.f32.mxu0 %vm1100_vm1, %v3703_v49 }
 0x8d5   :  { %13214 = vmatmul.mubr.msk.f32.gmra.mrb[100].mxu0 %vm1100_vm1, %v13035_v24 }
 0x8d6   :  { %13216 = vmatprep.mubr.msk.f32.mxu0 %vm1100_vm1, %v3713_v12 }
 0x8d9   :  { %13217 = vmatmul.mubr.msk.f32.gmra.mrb[102].mxu0 %vm1100_vm1, %v13038_v45 }
 0x8da   :  { %13223 = vmatprep.mubr.msk.f32.mxu0 %vm1100_vm1, %v3941_v39  ;;  %v5659_v39 = vld [vmem:[%s20530_s4] sm:$0xff] }
 0x8dd   :  { %13224 = vmatmul.mubr.msk.f32.vlgmr.msra.gmra.mrb[96].mxu0 %vm1100_vm1, %v13085_v1 }
 0x8de   :  { %13226 = vmatprep.mubr.msk.f32.mxu0 %vm1100_vm1, %v3951_v54  ;;  %14117 = vmatpush3.bf16.msra.mxu0 %v17708_v53  ;;  %v20778_v53 = vld [vmem:[#allocation2_spill] sm:$0xff] }
 0x8df   :  { %v5661_v54 = vld [vmem:[%s20530_s4 + $0x20] sm:$0xff] }
 0x8e1   :  { %13227 = vmatmul.mubr.msk.f32.gmra.mrb[98].mxu0 %vm1100_vm1, %v13088_v28  ;;  %v5660_v28 = vld [vmem:[%s20530_s4 + $0x10] sm:$0xff] }
 0x8e2   :  { %13229 = vmatprep.mubr.msk.f32.mxu0 %vm1100_vm1, %v3961_v19  ;;  %v5662_v19 = vld [vmem:[%s20530_s4 + $0x30] sm:$0xff] }
 0x8e3   :  { %v14138_v2 = vpack.c.bf16 %v5662_v19, %v5661_v54  ;;  %v5459_v19 = vld [vmem:[%s20534_s3 + $0x18] sm:$0xff] }
 0x8e5   :  { %13230 = vmatmul.mubr.msk.f32.gmra.mrb[100].mxu0 %vm1100_vm1, %v13091_v57  ;;  %v14134_v57 = vpack.c.bf16 %v5660_v28, %v5659_v39  ;;  %v5668_v28 = vld [vmem:[%s20530_s4 + $0x90] sm:$0xff] }
 0x8e6   :  { %13232 = vmatprep.mubr.msk.f32.mxu0 %vm1100_vm1, %v3971_v25 }
 0x8e7   :  { %14135 = vmatprep.subr.bf16.mxu0 %v14134_v57 }
 0x8e9   :  { %13233 = vmatmul.mubr.msk.f32.gmra.mrb[102].mxu0 %vm1100_vm1, %v13094_v4 }
 0x90b   :  { %v13177_v40 = vpop.f32.mrb[80].mxu1 }
 0x90c   :  { %v5182_v51 = vadd.f32 %v13177_v40, %v20777_v26  ;;  %v4602_v58 = vpop.f32.mrb[81].mxu1  ;;  %v13113_v60 = vpop.f32.mrb[88].mxu0 }
 0x90d   :  { %v5181_v22 = vadd.f32 %v4602_v58, %v20778_v53  ;;  %v4070_v20 = vpop.f32.mrb[89].mxu0 }
 0x90e   :  { %v17799_v44 = vadd.f32 %v17794_v37, %v5182_v51  ;;  %13239 = vmatprep.mubr.msk.f32.mxu0 %vm1100_vm1, %v4070_v20 }
 0x90f   :  { %v17802_v34 = vadd.f32 %v17794_v37, %v5181_v22  ;;  %v13180_v33 = vpop.f32.mrb[82].mxu1  ;;  %13240 = vmatmul.mubr.msk.f32.vlgmr.msra.gmra.mrb[96].mxu0 %vm1100_vm1, %v13113_v60 }
 0x910   :  { %20779 = vst [vmem:[#allocation55_spill] sm:$0xff] %v17799_v44  ;;  %v5184_v15 = vadd.f32 %v13180_v33, %v20781_v61  ;;  %v4612_v3 = vpop.f32.mrb[83].mxu1  ;;  %v5219_v23 = vsel %vm346_vm0, %v17799_v44, 0.0  ;;  %v13116_v36 = vpop.f32.mrb[90].mxu0  ;;  %14137 = vmatpush3.bf16.msra.mxu0 %v14134_v57  ;;  %v5458_v57 = vld [vmem:[%s20534_s3 + $0x10] sm:$0xff] }
 0x911   :  { %20780 = vst [vmem:[#allocation31_spill] sm:$0xff] %v17802_v34  ;;  %v5183_v55 = vadd.f32 %v4612_v3, %v20782_v46  ;;  %5220 = vadd.xlane.f32.xlu1 %v5219_v23  ;;  %v5216_v35 = vsel %vm346_vm0, %v17802_v34, 0.0  ;;  %v4080_v6 = vpop.f32.mrb[91].mxu0  ;;  %14139 = vmatprep.subr.bf16.mxu0 %v14138_v2  ;;  %v14122_v0 = vpack.c.bf16 %v5459_v19, %v5458_v57 }
 0x912   :  { %v17813_v17 = vadd.f32 %v17794_v37, %v5184_v15  ;;  %5217 = vadd.xlane.f32.xlu0 %v5216_v35  ;;  %13242 = vmatprep.mubr.msk.f32.mxu0 %vm1100_vm1, %v4080_v6 }
 0x913   :  { %v13183_v13 = vpop.f32.mrb[84].mxu1  ;;  %13243 = vmatmul.mubr.msk.f32.gmra.mrb[98].mxu0 %vm1100_vm1, %v13116_v36  ;;  %v17821_v63 = vadd.f32 %v17794_v37, %v5183_v55 }
 0x914   :  { %20783 = vst [vmem:[#allocation38_spill] sm:$0xff] %v17813_v17  ;;  %v5186_v56 = vadd.f32 %v13183_v13, %v20784_v62  ;;  %v4622_v11 = vpop.f32.mrb[85].mxu1  ;;  %v5225_v18 = vsel %vm346_vm0, %v17813_v17, 0.0  ;;  %v13119_v47 = vpop.f32.mrb[92].mxu0  ;;  %14141 = vmatpush3.bf16.msra.mxu0 %v14138_v2  ;;  %v5669_v2 = vld [vmem:[%s20530_s4 + $0xa0] sm:$0xff] }
 0x915   :  { %20785 = vst [vmem:[#allocation32_spill] sm:$0xff] %v17821_v63  ;;  %v5185_v8 = vadd.f32 %v4622_v11, %v20786_v38  ;;  %v4090_v41 = vpop.f32.mrb[93].mxu0  ;;  %v5222_v29 = vsel %vm346_vm0, %v17821_v63, 0.0  ;;  %14143 = vmatprep.subr.bf16.mxu0 %v14142_v7 }
 0x916   :  { %v17825_v16 = vadd.f32 %v17794_v37, %v5186_v56  ;;  %5226 = vadd.xlane.f32.xlu0 %v5225_v18  ;;  %13245 = vmatprep.mubr.msk.f32.mxu0 %vm1100_vm1, %v4090_v41 }
 0x917   :  { %v13186_v10 = vpop.f32.mrb[86].mxu1  ;;  %13246 = vmatmul.mubr.msk.f32.gmra.mrb[100].mxu0 %vm1100_vm1, %v13119_v47  ;;  %v17833_v27 = vadd.f32 %v17794_v37, %v5185_v8 }
 0x918   :  { %20787 = vst [vmem:[#allocation40_spill] sm:$0xff] %v17825_v16  ;;  %v5188_v30 = vadd.f32 %v13186_v10, %v20788_v50  ;;  %v4632_v59 = vpop.f32.mrb[87].mxu1  ;;  %v5231_v31 = vsel %vm346_vm0, %v17825_v16, 0.0  ;;  %v13122_v52 = vpop.f32.mrb[94].mxu0  ;;  %14145 = vmatpush3.bf16.msra.mxu0 %v14142_v7  ;;  %v14154_v7 = vpack.c.bf16 %v5670_v42, %v5669_v2  ;;  %v20805_v2 = vld [vmem:[#allocation16_spill] sm:$0xff] }
 0x919   :  { %20789 = vst [vmem:[#allocation39_spill] sm:$0xff] %v17833_v27  ;;  %v5187_v48 = vadd.f32 %v4632_v59, %v20790_v32  ;;  %5232 = vadd.xlane.f32.xlu1 %v5231_v31  ;;  %v4100_v24 = vpop.f32.mrb[95].mxu0  ;;  %v5228_v12 = vsel %vm346_vm0, %v17833_v27, 0.0 }
 0x91a   :  { %v17839_v43 = vadd.f32 %v17794_v37, %v5188_v30  ;;  %5223 = vadd.xlane.f32.xlu0 %v5222_v29  ;;  %13248 = vmatprep.mubr.msk.f32.mxu0 %vm1100_vm1, %v4100_v24 }
 0x91b   :  { %13249 = vmatmul.mubr.msk.f32.gmra.mrb[102].mxu0 %vm1100_vm1, %v13122_v52  ;;  %v17846_v45 = vadd.f32 %v17794_v37, %v5187_v48  ;;  %v5665_v48 = vld [vmem:[%s20530_s4 + $0x60] sm:$0xff]  ;;  %v5666_v52 = vld [vmem:[%s20530_s4 + $0x70] sm:$0xff] }
 0x91c   :  { %20791 = vst [vmem:[#allocation42_spill] sm:$0xff] %v17839_v43  ;;  %v5237_v49 = vsel %vm346_vm0, %v17839_v43, 0.0  ;;  %v14146_v24 = vpack.c.bf16 %v5666_v52, %v5665_v48 }
 0x91d   :  { %20792 = vst [vmem:[#allocation41_spill] sm:$0xff] %v17846_v45  ;;  %5238 = vadd.xlane.f32.xlu1 %v5237_v49  ;;  %v5234_v1 = vsel %vm346_vm0, %v17846_v45, 0.0  ;;  %v5456_v49 = vld [vmem:[%s20534_s3] sm:$0xff] }
 0x91e   :  { %5229 = vadd.xlane.f32.xlu0 %v5228_v12  ;;  %14147 = vmatprep.subr.bf16.mxu0 %v14146_v24  ;;  %v5457_v12 = vld [vmem:[%s20534_s3 + $0x8] sm:$0xff] }
 0x91f   :  { %14149 = vmatpush3.bf16.msra.mxu0 %v14146_v24  ;;  %v14118_v39 = vpack.c.bf16 %v5457_v12, %v5456_v49 }
 0x921   :  { %14119 = vmatprep.subr.bf16.mxu1 %v14118_v39 }
 0x922   :  { %5235 = vadd.xlane.f32.xlu0 %v5234_v1  ;;  %v5667_v1 = vld [vmem:[%s20530_s4 + $0x80] sm:$0xff]  ;;  %14121 = vmatpush3.bf16.msra.mxu1 %v14118_v39 }
 0x923   :  { %v14150_v54 = vpack.c.bf16 %v5668_v28, %v5667_v1  ;;  %14123 = vmatprep.subr.bf16.mxu1 %v14122_v0  ;;  %v20802_v1 = vld [vmem:[#allocation15_spill] sm:$0xff] }
 0x925   :  { %14151 = vmatprep.subr.bf16.mxu0 %v14150_v54 }
 0x926   :  { %14153 = vmatpush3.bf16.msra.mxu0 %v14150_v54  ;;  %14125 = vmatpush3.bf16.msra.mxu1 %v14122_v0 }
 0x927   :  { %14155 = vmatprep.subr.bf16.mxu0 %v14154_v7 }
 0x92a   :  { %14157 = vmatpush3.bf16.msra.mxu0 %v14154_v7 }
 0x99e   :  { %v5221_v14 = vpop.xlane.xlu1 %5220 }
 0x99f   :  { %v5265_v21 = vmul.f32 0.015625, %v5221_v14  ;;  %v5218_v5 = vpop.xlane.xlu0 %5217  ;;  %v5460_v14 = vld [vmem:[%s20534_s3 + $0x20] sm:$0xff] }
 0x9a0   :  { %v5264_v9 = vmul.f32 0.015625, %v5218_v5  ;;  %v5671_v5 = vld [vmem:[%s20530_s4 + $0xc0] sm:$0xff] }
 0x9a1   :  { %v17871_v4 = vsub.f32 %v17799_v44, %v5265_v21  ;;  %v5461_v21 = vld [vmem:[%s20534_s3 + $0x28] sm:$0xff] }
 0x9a2   :  { %v17874_v25 = vsub.f32 %v17802_v34, %v5264_v9  ;;  %v14126_v9 = vpack.c.bf16 %v5461_v21, %v5460_v14  ;;  %v20806_v14 = vld [vmem:[#allocation17_spill] sm:$0xff] }
 0x9a3   :  { %v5227_v40 = vpop.xlane.xlu0 %5226  ;;  %v5297_v26 = vmul.f32 %v17871_v4, %v17871_v4 }
 0x9a4   :  { %v5267_v51 = vmul.f32 0.015625, %v5227_v40  ;;  %v5296_v58 = vmul.f32 %v17874_v25, %v17874_v25  ;;  %v5672_v40 = vld [vmem:[%s20530_s4 + $0xd0] sm:$0xff]  ;;  %14127 = vmatprep.subr.bf16.mxu1 %v14126_v9 }
 0x9a5   :  { %v5315_v53 = vsel %vm346_vm0, %v5297_v26, 0.0  ;;  %v14158_v26 = vpack.c.bf16 %v5672_v40, %v5671_v5  ;;  %14129 = vmatpush3.bf16.msra.mxu1 %v14126_v9 }
 0x9a6   :  { %v17882_v22 = vsub.f32 %v17813_v17, %v5267_v51  ;;  %v5233_v60 = vpop.xlane.xlu1 %5232  ;;  %5316 = vadd.xlane.f32.xlu1 %v5315_v53  ;;  %v5312_v20 = vsel %vm346_vm0, %v5296_v58, 0.0  ;;  %v5462_v51 = vld [vmem:[%s20534_s3 + $0x30] sm:$0xff]  ;;  %v5463_v58 = vld [vmem:[%s20534_s3 + $0x38] sm:$0xff]  ;;  %v5673_v53 = vld [vmem:[%s20530_s4 + $0xe0] sm:$0xff] }
 0x9a7   :  { %v5269_v33 = vmul.f32 0.015625, %v5233_v60  ;;  %v5224_v61 = vpop.xlane.xlu0 %5223  ;;  %5313 = vadd.xlane.f32.xlu0 %v5312_v20  ;;  %14159 = vmatprep.subr.bf16.mxu0 %v14158_v26  ;;  %v14130_v60 = vpack.c.bf16 %v5463_v58, %v5462_v51  ;;  %v5674_v20 = vld [vmem:[%s20530_s4 + $0xf0] sm:$0xff] }
 0x9a8   :  { %v5266_v15 = vmul.f32 0.015625, %v5224_v61  ;;  %v5299_v3 = vmul.f32 %v17882_v22, %v17882_v22  ;;  %14161 = vmatpush3.bf16.msra.mxu0 %v14158_v26  ;;  %v5657_v61 = vld [vmem:[%s20535_s1] sm:$0xff] }
 0x9a9   :  { %v17888_v23 = vsub.f32 %v17825_v16, %v5269_v33  ;;  %v14162_v33 = vpack.c.bf16 %v5674_v20, %v5673_v53  ;;  %14131 = vmatprep.subr.bf16.mxu1 %v14130_v60  ;;  %13323 = vmatprep.mubr.f32.mxu0 %v5657_v61 }
 0x9aa   :  { %v17891_v46 = vsub.f32 %v17821_v63, %v5266_v15  ;;  %v5239_v55 = vpop.xlane.xlu1 %5238  ;;  %v5321_v36 = vsel %vm346_vm0, %v5299_v3, 0.0  ;;  %14133 = vmatpush3.bf16.msra.mxu1 %v14130_v60  ;;  %v5658_v15 = vld [vmem:[%s20535_s1 + $0x8] sm:$0xff] }
 0x9ab   :  { %v5271_v35 = vmul.f32 0.015625, %v5239_v55  ;;  %v5230_v6 = vpop.xlane.xlu0 %5229  ;;  %5322 = vadd.xlane.f32.xlu1 %v5321_v36  ;;  %v5301_v13 = vmul.f32 %v17888_v23, %v17888_v23  ;;  %14163 = vmatprep.subr.bf16.mxu0 %v14162_v33  ;;  %v20793_v55 = vld [vmem:[#allocation10_spill] sm:$0xff] }
 0x9ac   :  { %v5268_v62 = vmul.f32 0.015625, %v5230_v6  ;;  %v5298_v56 = vmul.f32 %v17891_v46, %v17891_v46  ;;  %14165 = vmatpush3.bf16.msra.mxu0 %v14162_v33  ;;  %v20794_v6 = vld [vmem:[#allocation11_spill] sm:$0xff] }
 0x9ad   :  { %v17899_v11 = vsub.f32 %v17839_v43, %v5271_v35  ;;  %v5327_v18 = vsel %vm346_vm0, %v5301_v13, 0.0 }
 0x9ae   :  { %v17903_v38 = vsub.f32 %v17833_v27, %v5268_v62  ;;  %v5318_v8 = vsel %vm346_vm0, %v5298_v56, 0.0 }
 0x9af   :  { %5328 = vadd.xlane.f32.xlu1 %v5327_v18  ;;  %5319 = vadd.xlane.f32.xlu0 %v5318_v8  ;;  %v5236_v47 = vpop.xlane.xlu0 %5235  ;;  %v5303_v41 = vmul.f32 %v17899_v11, %v17899_v11  ;;  %v20797_v8 = vld [vmem:[#allocation12_spill] sm:$0xff] }
 0x9b0   :  { %v5270_v10 = vmul.f32 0.015625, %v5236_v47  ;;  %v5300_v50 = vmul.f32 %v17903_v38, %v17903_v38  ;;  %13324 = vmatmul.mubr.f32.vlgmr.msra.gmra.mrb[104].mxu0 %v5658_v15 }
 0x9b1   :  { %v5333_v30 = vsel %vm346_vm0, %v5303_v41, 0.0 }
 0x9b2   :  { %v17912_v59 = vsub.f32 %v17846_v45, %v5270_v10  ;;  %v5324_v31 = vsel %vm346_vm0, %v5300_v50, 0.0  ;;  %v20798_v50 = vld [vmem:[#allocation13_spill] sm:$0xff] }
 0x9b3   :  { %5334 = vadd.xlane.f32.xlu1 %v5333_v30  ;;  %5325 = vadd.xlane.f32.xlu0 %v5324_v31 }
 0x9b4   :  { %v5302_v32 = vmul.f32 %v17912_v59, %v17912_v59 }
 0x9b6   :  { %v5330_v29 = vsel %vm346_vm0, %v5302_v32, 0.0 }
 0x9b7   :  { %5331 = vadd.xlane.f32.xlu0 %v5330_v29  ;;  %v20801_v29 = vld [vmem:[#allocation14_spill] sm:$0xff] }
 0x9e2   :  { %v13241_v3 = vpop.f32.mrb[96].mxu0 }
 0x9e3   :  { %v5190_v36 = vadd.f32 %v13241_v3, %v20793_v55  ;;  %v5134_v35 = vpop.f32.mrb[97].mxu0 }
 0x9e4   :  { %v5189_v13 = vadd.f32 %v5134_v35, %v20794_v6 }
 0x9e5   :  { %v17981_v62 = vadd.f32 %v17794_v37, %v5190_v36 }
 0x9e6   :  { %v17984_v56 = vadd.f32 %v17794_v37, %v5189_v13  ;;  %v13244_v18 = vpop.f32.mrb[98].mxu0 }
 0x9e7   :  { %20795 = vst [vmem:[#allocation27_spill] sm:$0xff] %v17981_v62  ;;  %v5192_v47 = vadd.f32 %v13244_v18, %v20797_v8  ;;  %v5144_v41 = vpop.f32.mrb[99].mxu0  ;;  %v5243_v10 = vsel %vm346_vm0, %v17981_v62, 0.0 }
 0x9e8   :  { %20796 = vst [vmem:[#allocation49_spill] sm:$0xff] %v17984_v56  ;;  %v5191_v30 = vadd.f32 %v5144_v41, %v20798_v50  ;;  %5244 = vadd.xlane.f32.xlu1 %v5243_v10  ;;  %v5240_v31 = vsel %vm346_vm0, %v17984_v56, 0.0 }
 0x9e9   :  { %v17993_v32 = vadd.f32 %v17794_v37, %v5192_v47  ;;  %5241 = vadd.xlane.f32.xlu0 %v5240_v31 }
 0x9ea   :  { %v17996_v48 = vadd.f32 %v17794_v37, %v5191_v30  ;;  %v13247_v52 = vpop.f32.mrb[100].mxu0  ;;  %v18029_v30 = vld [vmem:[%s20532_s5 + $0x4] ss:$0 sm:$0xff] }
 0x9eb   :  { %20799 = vst [vmem:[#allocation33_spill] sm:$0xff] %v17993_v32  ;;  %v5194_v24 = vadd.f32 %v13247_v52, %v20801_v29  ;;  %v5154_v49 = vpop.f32.mrb[101].mxu0  ;;  %v5249_v12 = vsel %vm346_vm0, %v17993_v32, 0.0 }
 0x9ec   :  { %20800 = vst [vmem:[#allocation44_spill] sm:$0xff] %v17996_v48  ;;  %v5193_v39 = vadd.f32 %v5154_v49, %v20802_v1  ;;  %5250 = vadd.xlane.f32.xlu1 %v5249_v12  ;;  %v5246_v28 = vsel %vm346_vm0, %v17996_v48, 0.0 }
 0x9ed   :  { %v18005_v54 = vadd.f32 %v17794_v37, %v5194_v24  ;;  %5247 = vadd.xlane.f32.xlu0 %v5246_v28  ;;  %v18037_v28 = vld [vmem:[%s20532_s5 + $0x5] ss:$0 sm:$0xff] }
 0x9ee   :  { %v18008_v57 = vadd.f32 %v17794_v37, %v5193_v39  ;;  %v13250_v19 = vpop.f32.mrb[102].mxu0 }
 0x9ef   :  { %20803 = vst [vmem:[#allocation23_spill] sm:$0xff] %v18005_v54  ;;  %v5196_v0 = vadd.f32 %v13250_v19, %v20805_v2  ;;  %v5164_v42 = vpop.f32.mrb[103].mxu0  ;;  %v5255_v7 = vsel %vm346_vm0, %v18005_v54, 0.0 }
 0x9f0   :  { %20804 = vst [vmem:[#allocation28_spill] sm:$0xff] %v18008_v57  ;;  %v5195_v21 = vadd.f32 %v5164_v42, %v20806_v14  ;;  %5256 = vadd.xlane.f32.xlu1 %v5255_v7  ;;  %v5252_v5 = vsel %vm346_vm0, %v18008_v57, 0.0 }
 0x9f1   :  { %v18017_v9 = vadd.f32 %v17794_v37, %v5196_v0  ;;  %5253 = vadd.xlane.f32.xlu0 %v5252_v5 }
 0x9f2   :  { %v18020_v40 = vadd.f32 %v17794_v37, %v5195_v21 }
 0x9f3   :  { %20807 = vst [vmem:[#allocation22_spill] sm:$0xff] %v18017_v9  ;;  %v5261_v26 = vsel %vm346_vm0, %v18017_v9, 0.0 }
 0x9f4   :  { %20808 = vst [vmem:[#allocation48_spill] sm:$0xff] %v18020_v40  ;;  %5262 = vadd.xlane.f32.xlu1 %v5261_v26  ;;  %v5258_v51 = vsel %vm346_vm0, %v18020_v40, 0.0 }
 0x9f5   :  { %5259 = vadd.xlane.f32.xlu0 %v5258_v51 }
 0xa33   :  { %v5317_v58 = vpop.xlane.xlu1 %5316 }
 0xa34   :  { %v5361_v53 = vmul.f32 0.015625, %v5317_v58  ;;  %v5314_v60 = vpop.xlane.xlu0 %5313 }
 0xa35   :  { %v5360_v20 = vmul.f32 0.015625, %v5314_v60 }
 0xa36   :  { %v5377_v33 = vadd.f32 1e-05, %v5361_v53 }
 0xa37   :  { %v5376_v61 = vadd.f32 1e-05, %v5360_v20 }
 0xa38   :  { %15015 = vrsqrt.f32 %v5377_v33  ;;  %v5323_v15 = vpop.xlane.xlu1 %5322 }
 0xa39   :  { %15017 = vrsqrt.f32 %v5376_v61  ;;  %v5363_v3 = vmul.f32 0.015625, %v5323_v15 }
 0xa3b   :  { %v5379_v37 = vadd.f32 1e-05, %v5363_v3 }
 0xa3c   :  { %v5329_v55 = vpop.xlane.xlu1 %5328  ;;  %v5320_v36 = vpop.xlane.xlu0 %5319 }
 0xa3d   :  { %15019 = vrsqrt.f32 %v5379_v37  ;;  %v5365_v35 = vmul.f32 0.015625, %v5329_v55  ;;  %v5362_v6 = vmul.f32 0.015625, %v5320_v36 }
 0xa3f   :  { %v5381_v13 = vadd.f32 1e-05, %v5365_v35  ;;  %v5378_v18 = vadd.f32 1e-05, %v5362_v6 }
 0xa40   :  { %v5335_v8 = vpop.xlane.xlu1 %5334  ;;  %v5326_v47 = vpop.xlane.xlu0 %5325 }
 0xa41   :  { %15021 = vrsqrt.f32 %v5381_v13  ;;  %v5367_v41 = vmul.f32 0.015625, %v5335_v8  ;;  %v5364_v10 = vmul.f32 0.015625, %v5326_v47 }
 0xa42   :  { %v15016_v50 = vpop.eup %15015  ;;  %15023 = vrsqrt.f32 %v5378_v18 }
 0xa43   :  { %v15018_v31 = vpop.eup %15017  ;;  %v5409_v52 = vmul.f32 %v15016_v50, %v17871_v4  ;;  %v5383_v29 = vadd.f32 1e-05, %v5367_v41  ;;  %v5380_v24 = vadd.f32 1e-05, %v5364_v10 }
 0xa44   :  { %v5332_v49 = vpop.xlane.xlu0 %5331  ;;  %v5408_v12 = vmul.f32 %v15018_v31, %v17874_v25 }
 0xa45   :  { %v5425_v1 = vmul.f32 %v5409_v52, %v18029_v30  ;;  %15025 = vrsqrt.f32 %v5383_v29  ;;  %v5366_v39 = vmul.f32 0.015625, %v5332_v49 }
 0xa46   :  { %15027 = vrsqrt.f32 %v5380_v24  ;;  %v5424_v19 = vmul.f32 %v5408_v12, %v18029_v30 }
 0xa47   :  { %v15020_v2 = vpop.eup %15019  ;;  %v5382_v0 = vadd.f32 1e-05, %v5366_v39  ;;  %v5441_v42 = vadd.f32 %v5425_v1, %v18037_v28 }
 0xa48   :  { %v5440_v4 = vadd.f32 %v5424_v19, %v18037_v28  ;;  %v5411_v25 = vmul.f32 %v15020_v2, %v17882_v22 }
 0xa49   :  { %15029 = vrsqrt.f32 %v5382_v0 }
 0xa4a   :  { %13267 = vmatprep.mubr.msk.f32.mxu1 %vm346_vm0, %v5440_v4  ;;  %v5427_v5 = vmul.f32 %v5411_v25, %v18029_v30 }
 0xa4b   :  { %v15022_v7 = vpop.eup %15021  ;;  %13268 = vmatmul.mubr.msk.f32.vlgmr.msra.gmra.mrb[88].mxu1 %vm346_vm0, %v5441_v42 }
 0xa4c   :  { %v15024_v14 = vpop.eup %15023  ;;  %v5413_v26 = vmul.f32 %v15022_v7, %v17888_v23  ;;  %v5443_v22 = vadd.f32 %v5427_v5, %v18037_v28 }
 0xa4d   :  { %v5410_v21 = vmul.f32 %v15024_v14, %v17891_v46 }
 0xa4e   :  { %v5429_v33 = vmul.f32 %v5413_v26, %v18029_v30 }
 0xa4f   :  { %v15026_v51 = vpop.eup %15025  ;;  %v5426_v58 = vmul.f32 %v5410_v21, %v18029_v30 }
 0xa50   :  { %v15028_v53 = vpop.eup %15027  ;;  %v5415_v61 = vmul.f32 %v15026_v51, %v17899_v11  ;;  %v5445_v37 = vadd.f32 %v5429_v33, %v18037_v28 }
 0xa51   :  { %v5442_v60 = vadd.f32 %v5426_v58, %v18037_v28  ;;  %v5412_v20 = vmul.f32 %v15028_v53, %v17903_v38 }
 0xa52   :  { %v5431_v55 = vmul.f32 %v5415_v61, %v18029_v30 }
 0xa53   :  { %v15030_v15 = vpop.eup %15029  ;;  %13270 = vmatprep.mubr.msk.f32.mxu1 %vm346_vm0, %v5442_v60  ;;  %v5428_v46 = vmul.f32 %v5412_v20, %v18029_v30 }
 0xa54   :  { %13271 = vmatmul.mubr.msk.f32.gmra.mrb[90].mxu1 %vm346_vm0, %v5443_v22  ;;  %v5414_v23 = vmul.f32 %v15030_v15, %v17912_v59  ;;  %v5447_v36 = vadd.f32 %v5431_v55, %v18037_v28 }
 0xa55   :  { %v5444_v3 = vadd.f32 %v5428_v46, %v18037_v28 }
 0xa56   :  { %v5430_v38 = vmul.f32 %v5414_v23, %v18029_v30 }
 0xa57   :  { %13273 = vmatprep.mubr.msk.f32.mxu1 %vm346_vm0, %v5444_v3 }
 0xa58   :  { %13274 = vmatmul.mubr.msk.f32.gmra.mrb[92].mxu1 %vm346_vm0, %v5445_v37  ;;  %v5446_v11 = vadd.f32 %v5430_v38, %v18037_v28 }
 0xa5a   :  { %13276 = vmatprep.mubr.msk.f32.mxu1 %vm346_vm0, %v5446_v11 }
 0xa5c   :  { %13277 = vmatmul.mubr.msk.f32.gmra.mrb[94].mxu1 %vm346_vm0, %v5447_v36 }
 0xa75   :  { %v5245_v59 = vpop.xlane.xlu1 %5244 }
 0xa76   :  { %v5273_v35 = vmul.f32 0.015625, %v5245_v59  ;;  %v5242_v6 = vpop.xlane.xlu0 %5241 }
 0xa77   :  { %v5272_v13 = vmul.f32 0.015625, %v5242_v6 }
 0xa78   :  { %v18069_v18 = vsub.f32 %v17981_v62, %v5273_v35 }
 0xa79   :  { %v18072_v8 = vsub.f32 %v17984_v56, %v5272_v13  ;;  %v5251_v47 = vpop.xlane.xlu1 %5250 }
 0xa7a   :  { %v5275_v41 = vmul.f32 0.015625, %v5251_v47  ;;  %v5248_v10 = vpop.xlane.xlu0 %5247  ;;  %v5305_v50 = vmul.f32 %v18069_v18, %v18069_v18 }
 0xa7b   :  { %v5274_v31 = vmul.f32 0.015625, %v5248_v10  ;;  %v5304_v52 = vmul.f32 %v18072_v8, %v18072_v8 }
 0xa7c   :  { %v18079_v29 = vsub.f32 %v17993_v32, %v5275_v41  ;;  %v5339_v24 = vsel %vm346_vm0, %v5305_v50, 0.0 }
 0xa7d   :  { %v18083_v49 = vsub.f32 %v17996_v48, %v5274_v31  ;;  %5340 = vadd.xlane.f32.xlu1 %v5339_v24  ;;  %v5257_v12 = vpop.xlane.xlu1 %5256  ;;  %v5336_v1 = vsel %vm346_vm0, %v5304_v52, 0.0 }
 0xa7e   :  { %v5277_v39 = vmul.f32 0.015625, %v5257_v12  ;;  %5337 = vadd.xlane.f32.xlu0 %v5336_v1  ;;  %v5254_v19 = vpop.xlane.xlu0 %5253  ;;  %v5307_v2 = vmul.f32 %v18079_v29, %v18079_v29 }
 0xa7f   :  { %v5276_v0 = vmul.f32 0.015625, %v5254_v19  ;;  %v5306_v4 = vmul.f32 %v18083_v49, %v18083_v49 }
 0xa80   :  { %v18091_v42 = vsub.f32 %v18005_v54, %v5277_v39  ;;  %v5345_v25 = vsel %vm346_vm0, %v5307_v2, 0.0 }
 0xa81   :  { %v18095_v7 = vsub.f32 %v18008_v57, %v5276_v0  ;;  %5346 = vadd.xlane.f32.xlu1 %v5345_v25  ;;  %v5263_v14 = vpop.xlane.xlu1 %5262  ;;  %v5342_v21 = vsel %vm346_vm0, %v5306_v4, 0.0 }
 0xa82   :  { %v5279_v5 = vmul.f32 0.015625, %v5263_v14  ;;  %5343 = vadd.xlane.f32.xlu0 %v5342_v21  ;;  %v5260_v26 = vpop.xlane.xlu0 %5259  ;;  %v5309_v51 = vmul.f32 %v18091_v42, %v18091_v42 }
 0xa83   :  { %v5278_v58 = vmul.f32 0.015625, %v5260_v26  ;;  %v5308_v53 = vmul.f32 %v18095_v7, %v18095_v7  ;;  %v18116_v3 = vpop.f32.mrb[104].mxu0 }
 0xa84   :  { %v18103_v60 = vsub.f32 %v18017_v9, %v5279_v5  ;;  %v5351_v20 = vsel %vm346_vm0, %v5309_v51, 0.0  ;;  %20809 = vst [vmem:[#allocation52_spill] sm:$0xff] %v18116_v3  ;;  %v18118_v37 = vpop.f32.mrb[105].mxu0 }
 0xa85   :  { %v18107_v22 = vsub.f32 %v18020_v40, %v5278_v58  ;;  %5352 = vadd.xlane.f32.xlu1 %v5351_v20  ;;  %v5348_v33 = vsel %vm346_vm0, %v5308_v53, 0.0  ;;  %13326 = vmatprep.subr.msk.mxu1 %vm1100_vm1, %v18118_v37 }
 0xa86   :  { %5349 = vadd.xlane.f32.xlu0 %v5348_v33  ;;  %v5311_v61 = vmul.f32 %v18103_v60, %v18103_v60  ;;  %13327 = vmatpush3.xpose.msk.msra.mxu1 %vm1100_vm1, %v18118_v37 }
 0xa87   :  { %v5310_v15 = vmul.f32 %v18107_v22, %v18107_v22 }
 0xa88   :  { %v5357_v46 = vsel %vm346_vm0, %v5311_v61, 0.0 }
 0xa89   :  { %5358 = vadd.xlane.f32.xlu1 %v5357_v46  ;;  %v5354_v23 = vsel %vm346_vm0, %v5310_v15, 0.0 }
 0xa8a   :  { %5355 = vadd.xlane.f32.xlu0 %v5354_v23 }
 0xaa0   :  { %5863 = vrot.lane.b32.xlu0 %v18118_v37, %s15402_s7 }
 0xb0a   :  { %v5341_v38 = vpop.xlane.xlu1 %5340 }
 0xb0b   :  { %v5369_v55 = vmul.f32 0.015625, %v5341_v38  ;;  %v5338_v11 = vpop.xlane.xlu0 %5337 }
 0xb0c   :  { %v5368_v36 = vmul.f32 0.015625, %v5338_v11 }
 0xb0d   :  { %v5385_v59 = vadd.f32 1e-05, %v5369_v55 }
 0xb0e   :  { %v5384_v35 = vadd.f32 1e-05, %v5368_v36  ;;  %v5347_v6 = vpop.xlane.xlu1 %5346 }
 0xb0f   :  { %15031 = vrsqrt.f32 %v5385_v59  ;;  %v5371_v13 = vmul.f32 0.015625, %v5347_v6  ;;  %v5344_v47 = vpop.xlane.xlu0 %5343 }
 0xb10   :  { %15033 = vrsqrt.f32 %v5384_v35  ;;  %v5370_v41 = vmul.f32 0.015625, %v5344_v47 }
 0xb11   :  { %v5387_v10 = vadd.f32 1e-05, %v5371_v13 }
 0xb12   :  { %v5386_v50 = vadd.f32 1e-05, %v5370_v41  ;;  %v5353_v31 = vpop.xlane.xlu1 %5352 }
 0xb13   :  { %15035 = vrsqrt.f32 %v5387_v10  ;;  %v5373_v52 = vmul.f32 0.015625, %v5353_v31  ;;  %v5350_v24 = vpop.xlane.xlu0 %5349 }
 0xb14   :  { %15037 = vrsqrt.f32 %v5386_v50  ;;  %v5372_v12 = vmul.f32 0.015625, %v5350_v24 }
 0xb15   :  { %v5389_v1 = vadd.f32 1e-05, %v5373_v52 }
 0xb16   :  { %v5388_v39 = vadd.f32 1e-05, %v5372_v12  ;;  %v5359_v19 = vpop.xlane.xlu1 %5358 }
 0xb17   :  { %15039 = vrsqrt.f32 %v5389_v1  ;;  %v5375_v2 = vmul.f32 0.015625, %v5359_v19  ;;  %v5356_v0 = vpop.xlane.xlu0 %5355 }
 0xb18   :  { %15041 = vrsqrt.f32 %v5388_v39  ;;  %v5374_v4 = vmul.f32 0.015625, %v5356_v0 }
 0xb19   :  { %v15032_v25 = vpop.eup %15031  ;;  %v5391_v14 = vadd.f32 1e-05, %v5375_v2 }
 0xb1a   :  { %v15034_v21 = vpop.eup %15033  ;;  %v5390_v5 = vadd.f32 1e-05, %v5374_v4  ;;  %v5417_v26 = vmul.f32 %v15032_v25, %v18069_v18 }
 0xb1b   :  { %15043 = vrsqrt.f32 %v5391_v14  ;;  %v5416_v51 = vmul.f32 %v15034_v21, %v18072_v8  ;;  %v18128_v58 = vpop.permute.xlu0 %5863 }
 0xb1c   :  { %15045 = vrsqrt.f32 %v5390_v5  ;;  %v5433_v53 = vmul.f32 %v5417_v26, %v18029_v30  ;;  %13340 = vmatprep.subr.msk.mxu0 %vm1100_vm1, %v18128_v58 }
 0xb1d   :  { %v15036_v20 = vpop.eup %15035  ;;  %v5432_v61 = vmul.f32 %v5416_v51, %v18029_v30  ;;  %13341 = vmatpush3.xpose.msk.msra.mxu0 %vm1100_vm1, %v18128_v58 }
 0xb1e   :  { %v18133_v33 = vpop.f32.mrb[88].mxu1  ;;  %v15038_v18 = vpop.eup %15037  ;;  %v5419_v15 = vmul.f32 %v15036_v20, %v18079_v29  ;;  %v5449_v38 = vadd.f32 %v5433_v53, %v18037_v28 }
 0xb1f   :  { %5760 = vrot.lane.b32.xlu1 %v18133_v33, %s15402_s7  ;;  %v18140_v8 = vpop.f32.mrb[89].mxu1  ;;  %v5448_v46 = vadd.f32 %v5432_v61, %v18037_v28  ;;  %v5418_v23 = vmul.f32 %v15038_v18, %v18083_v49 }
 0xb20   :  { %v5435_v55 = vmul.f32 %v5419_v15, %v18029_v30 }
 0xb21   :  { %v15040_v11 = vpop.eup %15039  ;;  %13279 = vmatprep.mubr.msk.f32.mxu1 %vm346_vm0, %v5448_v46  ;;  %v5434_v36 = vmul.f32 %v5418_v23, %v18029_v30 }
 0xb22   :  { %v15042_v59 = vpop.eup %15041  ;;  %13280 = vmatmul.mubr.msk.f32.gmra.mrb[96].mxu1 %vm346_vm0, %v5449_v38  ;;  %v5421_v29 = vmul.f32 %v15040_v11, %v18091_v42  ;;  %v5451_v6 = vadd.f32 %v5435_v55, %v18037_v28 }
 0xb23   :  { %5758 = vrot.lane.b32.xlu1 %v18140_v8, %s15402_s7  ;;  %v5450_v35 = vadd.f32 %v5434_v36, %v18037_v28  ;;  %v5420_v49 = vmul.f32 %v15042_v59, %v18095_v7 }
 0xb24   :  { %v5437_v13 = vmul.f32 %v5421_v29, %v18029_v30 }
 0xb25   :  { %v15044_v47 = vpop.eup %15043  ;;  %13282 = vmatprep.mubr.msk.f32.mxu1 %vm346_vm0, %v5450_v35  ;;  %v5436_v41 = vmul.f32 %v5420_v49, %v18029_v30 }
 0xb26   :  { %v15046_v10 = vpop.eup %15045  ;;  %13283 = vmatmul.mubr.msk.f32.gmra.mrb[98].mxu1 %vm346_vm0, %v5451_v6  ;;  %v5423_v31 = vmul.f32 %v15044_v47, %v18103_v60  ;;  %v5453_v24 = vadd.f32 %v5437_v13, %v18037_v28 }
 0xb27   :  { %v13272_v50 = vpop.f32.mrb[90].mxu1  ;;  %v5452_v7 = vadd.f32 %v5436_v41, %v18037_v28  ;;  %v5422_v52 = vmul.f32 %v15046_v10, %v18107_v22 }
 0xb28   :  { %v5588_v42 = vpop.f32.mrb[91].mxu1  ;;  %5764 = vrot.lane.b32.xlu0 %v13272_v50, %s15402_s7  ;;  %v5439_v12 = vmul.f32 %v5423_v31, %v18029_v30 }
 0xb29   :  { %5762 = vrot.lane.b32.xlu1 %v5588_v42, %s15402_s7  ;;  %13285 = vmatprep.mubr.msk.f32.mxu1 %vm346_vm0, %v5452_v7  ;;  %v5438_v1 = vmul.f32 %v5422_v52, %v18029_v30 }
 0xb2a   :  { %13286 = vmatmul.mubr.msk.f32.gmra.mrb[100].mxu1 %vm346_vm0, %v5453_v24  ;;  %v5455_v22 = vadd.f32 %v5439_v12, %v18037_v28 }
 0xb2b   :  { %v13275_v39 = vpop.f32.mrb[92].mxu1  ;;  %v5454_v19 = vadd.f32 %v5438_v1, %v18037_v28 }
 0xb2c   :  { %v5598_v60 = vpop.f32.mrb[93].mxu1  ;;  %5768 = vrot.lane.b32.xlu0 %v13275_v39, %s15402_s7 }
 0xb2d   :  { %5766 = vrot.lane.b32.xlu1 %v5598_v60, %s15402_s7  ;;  %13288 = vmatprep.mubr.msk.f32.mxu1 %vm346_vm0, %v5454_v19 }
 0xb2e   :  { %13289 = vmatmul.mubr.msk.f32.gmra.mrb[102].mxu1 %vm346_vm0, %v5455_v22 }
 0xb2f   :  { %v13278_v2 = vpop.f32.mrb[94].mxu1  ;;  %13328 = vmatprep.mubr.msk.f32.mxu1 %vm1100_vm1, %v18140_v8 }
 0xb30   :  { %v5608_v0 = vpop.f32.mrb[95].mxu1  ;;  %5772 = vrot.lane.b32.xlu0 %v13278_v2, %s15402_s7 }
 0xb31   :  { %5770 = vrot.lane.b32.xlu1 %v5608_v0, %s15402_s7 }
 0xb32   :  { %13329 = vmatmul.mubr.msk.f32.vlgmr.msra.gmra.mrb[104].mxu1 %vm1100_vm1, %v18133_v33 }
 0xb33   :  { %13331 = vmatprep.mubr.msk.f32.mxu1 %vm1100_vm1, %v5588_v42 }
 0xb34   :  { %5774 = vrot.lane.b32.xlu0 %v18140_v8, %s15403_s8 }
 0xb35   :  { %5865 = vrot.lane.b32.xlu1 %v18118_v37, %s15403_s8 }
 0xb36   :  { %13332 = vmatmul.mubr.msk.f32.gmra.mrb[106].mxu1 %vm1100_vm1, %v13272_v50 }
 0xb37   :  { %13334 = vmatprep.mubr.msk.f32.mxu1 %vm1100_vm1, %v5598_v60 }
 0xb38   :  { %5778 = vrot.lane.b32.xlu0 %v5588_v42, %s15403_s8 }
 0xb39   :  { %5776 = vrot.lane.b32.xlu1 %v18133_v33, %s15403_s8 }
 0xb3a   :  { %13335 = vmatmul.mubr.msk.f32.gmra.mrb[108].mxu1 %vm1100_vm1, %v13275_v39 }
 0xb3b   :  { %13337 = vmatprep.mubr.msk.f32.mxu1 %vm1100_vm1, %v5608_v0 }
 0xb3c   :  { %5782 = vrot.lane.b32.xlu0 %v5598_v60, %s15403_s8 }
 0xb3d   :  { %5780 = vrot.lane.b32.xlu1 %v13272_v50, %s15403_s8 }
 0xb3e   :  { %13338 = vmatmul.mubr.msk.f32.gmra.mrb[110].mxu1 %vm1100_vm1, %v13278_v2 }
 0xb40   :  { %5786 = vrot.lane.b32.xlu0 %v5608_v0, %s15403_s8 }
 0xb41   :  { %5784 = vrot.lane.b32.xlu1 %v13275_v39, %s15403_s8 }
 0xb44   :  { %5867 = vrot.lane.b32.xlu0 %v18118_v37, %s15405_s10 }
 0xb45   :  { %5788 = vrot.lane.b32.xlu1 %v13278_v2, %s15403_s8 }
 0xb48   :  { %5792 = vrot.lane.b32.xlu0 %v18133_v33, %s15405_s10 }
 0xb49   :  { %5790 = vrot.lane.b32.xlu1 %v18140_v8, %s15405_s10 }
 0xb4c   :  { %5796 = vrot.lane.b32.xlu0 %v13272_v50, %s15405_s10 }
 0xb4d   :  { %5794 = vrot.lane.b32.xlu1 %v5588_v42, %s15405_s10 }
 0xb50   :  { %5800 = vrot.lane.b32.xlu0 %v13275_v39, %s15405_s10 }
 0xb51   :  { %5798 = vrot.lane.b32.xlu1 %v5598_v60, %s15405_s10 }
 0xb54   :  { %5804 = vrot.lane.b32.xlu0 %v13278_v2, %s15405_s10 }
 0xb55   :  { %5802 = vrot.lane.b32.xlu1 %v5608_v0, %s15405_s10 }
 0xb58   :  { %5870 = vrot.lane.b32.xlu0 %v18116_v3, %s15402_s7 }
 0xb59   :  { %5872 = vrot.lane.b32.xlu1 %v18116_v3, %s15403_s8 }
 0xb5d   :  { %5874 = vrot.lane.b32.xlu1 %v18116_v3, %s15405_s10 }
 0xb91   :  { %v5761_v30 = vpop.permute.xlu1 %5760 }
 0xb95   :  { %v5759_v28 = vpop.permute.xlu1 %5758 }
 0xb96   :  { %13342 = vmatprep.mubr.msk.f32.mxu0 %vm1100_vm1, %v5759_v28 }
 0xb97   :  { %13343 = vmatmul.mubr.msk.f32.vlgmr.msra.gmra.mrb[106].mxu0 %vm1100_vm1, %v5761_v30 }
 0xb9a   :  { %v5765_v4 = vpop.permute.xlu0 %5764 }
 0xb9b   :  { %v5763_v25 = vpop.permute.xlu1 %5762 }
 0xb9c   :  { %13345 = vmatprep.mubr.msk.f32.mxu0 %vm1100_vm1, %v5763_v25 }
 0xb9d   :  { %13346 = vmatmul.mubr.msk.f32.gmra.mrb[108].mxu0 %vm1100_vm1, %v5765_v4 }
 0xb9e   :  { %v5769_v14 = vpop.permute.xlu0 %5768 }
 0xb9f   :  { %v5767_v21 = vpop.permute.xlu1 %5766 }
 0xba0   :  { %13348 = vmatprep.mubr.msk.f32.mxu0 %vm1100_vm1, %v5767_v21 }
 0xba1   :  { %13349 = vmatmul.mubr.msk.f32.gmra.mrb[110].mxu0 %vm1100_vm1, %v5769_v14 }
 0xba2   :  { %v5773_v5 = vpop.permute.xlu0 %5772 }
 0xba3   :  { %v5771_v26 = vpop.permute.xlu1 %5770 }
 0xba4   :  { %13351 = vmatprep.mubr.msk.f32.mxu0 %vm1100_vm1, %v5771_v26 }
 0xba5   :  { %13352 = vmatmul.mubr.msk.f32.gmra.mrb[112].mxu0 %vm1100_vm1, %v5773_v5 }
 0xba6   :  { %v5775_v51 = vpop.permute.xlu0 %5774 }
 0xba7   :  { %v18226_v53 = vpop.permute.xlu1 %5865  ;;  %13356 = vmatprep.mubr.msk.f32.mxu1 %vm1100_vm1, %v5775_v51 }
 0xba8   :  { %13354 = vmatprep.subr.msk.mxu1 %vm1100_vm1, %v18226_v53 }
 0xba9   :  { %13355 = vmatpush3.xpose.msk.msra.mxu1 %vm1100_vm1, %v18226_v53 }
 0xbaa   :  { %13382 = vmatprep.subr.msk.mxu1 %vm1100_vm1, %v18116_v3  ;;  %v5779_v20 = vpop.permute.xlu0 %5778 }
 0xbab   :  { %v5777_v33 = vpop.permute.xlu1 %5776 }
 0xbac   :  { %13357 = vmatmul.mubr.msk.f32.vlgmr.msra.gmra.mrb[112].mxu1 %vm1100_vm1, %v5777_v33 }
 0xbad   :  { %13359 = vmatprep.mubr.msk.f32.mxu1 %vm1100_vm1, %v5779_v20  ;;  %13383 = vmatpush3.xpose.msk.msra.mxu1 %vm1100_vm1, %v18116_v3 }
 0xbae   :  { %v5783_v61 = vpop.permute.xlu0 %5782 }
 0xbaf   :  { %v5781_v18 = vpop.permute.xlu1 %5780 }
 0xbb0   :  { %13360 = vmatmul.mubr.msk.f32.gmra.mrb[114].mxu1 %vm1100_vm1, %v5781_v18 }
 0xbb1   :  { %13362 = vmatprep.mubr.msk.f32.mxu1 %vm1100_vm1, %v5783_v61 }
 0xbb2   :  { %v5787_v8 = vpop.permute.xlu0 %5786 }
 0xbb3   :  { %v5785_v15 = vpop.permute.xlu1 %5784 }
 0xbb4   :  { %13363 = vmatmul.mubr.msk.f32.gmra.mrb[116].mxu1 %vm1100_vm1, %v5785_v15 }
 0xbb5   :  { %13365 = vmatprep.mubr.msk.f32.mxu1 %vm1100_vm1, %v5787_v8 }
 0xbb6   :  { %v18243_v46 = vpop.permute.xlu0 %5867 }
 0xbb7   :  { %v5789_v23 = vpop.permute.xlu1 %5788  ;;  %13368 = vmatprep.subr.msk.mxu0 %vm1100_vm1, %v18243_v46 }
 0xbb8   :  { %13366 = vmatmul.mubr.msk.f32.gmra.mrb[118].mxu1 %vm1100_vm1, %v5789_v23  ;;  %13369 = vmatpush3.xpose.msk.msra.mxu0 %vm1100_vm1, %v18243_v46 }
 0xbba   :  { %v5793_v38 = vpop.permute.xlu0 %5792 }
 0xbbb   :  { %v5791_v55 = vpop.permute.xlu1 %5790 }
 0xbbc   :  { %13370 = vmatprep.mubr.msk.f32.mxu0 %vm1100_vm1, %v5791_v55 }
 0xbbd   :  { %13371 = vmatmul.mubr.msk.f32.vlgmr.msra.gmra.mrb[114].mxu0 %vm1100_vm1, %v5793_v38 }
 0xbbe   :  { %v5797_v11 = vpop.permute.xlu0 %5796 }
 0xbbf   :  { %v5795_v36 = vpop.permute.xlu1 %5794 }
 0xbc0   :  { %13373 = vmatprep.mubr.msk.f32.mxu0 %vm1100_vm1, %v5795_v36 }
 0xbc1   :  { %13374 = vmatmul.mubr.msk.f32.gmra.mrb[116].mxu0 %vm1100_vm1, %v5797_v11 }
 0xbc2   :  { %v5801_v59 = vpop.permute.xlu0 %5800 }
 0xbc3   :  { %v5799_v29 = vpop.permute.xlu1 %5798 }
 0xbc4   :  { %13376 = vmatprep.mubr.msk.f32.mxu0 %vm1100_vm1, %v5799_v29 }
 0xbc5   :  { %13377 = vmatmul.mubr.msk.f32.gmra.mrb[118].mxu0 %vm1100_vm1, %v5801_v59 }
 0xbc6   :  { %v5805_v35 = vpop.permute.xlu0 %5804 }
 0xbc7   :  { %v5803_v49 = vpop.permute.xlu1 %5802 }
 0xbc8   :  { %13379 = vmatprep.mubr.msk.f32.mxu0 %vm1100_vm1, %v5803_v49 }
 0xbc9   :  { %13380 = vmatmul.mubr.msk.f32.gmra.mrb[120].mxu0 %vm1100_vm1, %v5805_v35 }
 0xbca   :  { %v18258_v6 = vpop.permute.xlu0 %5870 }
 0xbcb   :  { %20810 = vst [vmem:[#allocation35_spill] sm:$0xff] %v18258_v6  ;;  %v18260_v13 = vpop.permute.xlu1 %5872  ;;  %13396 = vmatprep.subr.msk.mxu0 %vm1100_vm1, %v18258_v6 }
 0xbcc   :  { %20811 = vst [vmem:[#allocation54_spill] sm:$0xff] %v18260_v13  ;;  %13397 = vmatpush3.xpose.msk.msra.mxu0 %vm1100_vm1, %v18258_v6  ;;  %13410 = vmatprep.subr.msk.mxu1 %vm1100_vm1, %v18260_v13 }
 0xbcf   :  { %v18268_v47 = vpop.permute.xlu1 %5874 }
 0xbd0   :  { %20812 = vst [vmem:[#allocation36_spill] sm:$0xff] %v18268_v47  ;;  %13424 = vmatprep.subr.msk.mxu0 %vm1100_vm1, %v18268_v47 }
 0xbf5   :  { %v13281_v41 = vpop.f32.mrb[96].mxu1 }
 0xbf6   :  { %5816 = vrot.lane.b32.xlu0 %v13281_v41, %s15402_s7  ;;  %5832 = vrot.lane.b32.xlu1 %v13281_v41, %s15403_s8  ;;  %v5618_v10 = vpop.f32.mrb[97].mxu1 }
 0xbf7   :  { %13384 = vmatprep.mubr.msk.f32.mxu1 %vm1100_vm1, %v5618_v10 }
 0xbf8   :  { %13385 = vmatmul.mubr.msk.f32.vlgmr.msra.gmra.mrb[120].mxu1 %vm1100_vm1, %v13281_v41 }
 0xbf9   :  { %13411 = vmatpush3.xpose.msk.msra.mxu1 %vm1100_vm1, %v18260_v13  ;;  %v13284_v50 = vpop.f32.mrb[98].mxu1 }
 0xbfa   :  { %5848 = vrot.lane.b32.xlu1 %v13281_v41, %s15405_s10  ;;  %5830 = vrot.lane.b32.xlu0 %v5618_v10, %s15403_s8  ;;  %v5628_v31 = vpop.f32.mrb[99].mxu1 }
 0xbfb   :  { %13387 = vmatprep.mubr.msk.f32.mxu1 %vm1100_vm1, %v5628_v31 }
 0xbfc   :  { %13388 = vmatmul.mubr.msk.f32.gmra.mrb[122].mxu1 %vm1100_vm1, %v13284_v50 }
 0xbfd   :  { %v13287_v42 = vpop.f32.mrb[100].mxu1 }
 0xbfe   :  { %5814 = vrot.lane.b32.xlu1 %v5618_v10, %s15402_s7  ;;  %5846 = vrot.lane.b32.xlu0 %v5618_v10, %s15405_s10  ;;  %v5638_v7 = vpop.f32.mrb[101].mxu1 }
 0xbff   :  { %13390 = vmatprep.mubr.msk.f32.mxu1 %vm1100_vm1, %v5638_v7 }
 0xc00   :  { %13391 = vmatmul.mubr.msk.f32.gmra.mrb[124].mxu1 %vm1100_vm1, %v13287_v42 }
 0xc01   :  { %v13290_v52 = vpop.f32.mrb[102].mxu1 }
 0xc02   :  { %5820 = vrot.lane.b32.xlu0 %v13284_v50, %s15402_s7  ;;  %5836 = vrot.lane.b32.xlu1 %v13284_v50, %s15403_s8  ;;  %v5648_v24 = vpop.f32.mrb[103].mxu1 }
 0xc03   :  { %13393 = vmatprep.mubr.msk.f32.mxu1 %vm1100_vm1, %v5648_v24 }
 0xc04   :  { %13394 = vmatmul.mubr.msk.f32.gmra.mrb[126].mxu1 %vm1100_vm1, %v13290_v52 }
 0xc05   :  { %v13330_v12 = vpop.f32.mrb[104].mxu1 }
 0xc06   :  { %5818 = vrot.lane.b32.xlu1 %v5628_v31, %s15402_s7  ;;  %5834 = vrot.lane.b32.xlu0 %v5628_v31, %s15403_s8  ;;  %v5960_v1 = vpop.f32.mrb[105].mxu1  ;;  %v18308_v30 = vmul.f32 0.25, %v13330_v12 }
 0xc07   :  { %v18310_v28 = vmul.f32 0.25, %v5960_v1 }
 0xc08   :  { %v6928_v25 = vsel %vm6924_vm3, %v18308_v30, -inf }
 0xc09   :  { %v13333_v39 = vpop.f32.mrb[106].mxu1  ;;  %v6925_v21 = vsel %vm6924_vm3, %v18310_v28, -inf }
 0xc0a   :  { %5850 = vrot.lane.b32.xlu0 %v5628_v31, %s15405_s10  ;;  %5840 = vrot.lane.b32.xlu1 %v13287_v42, %s15403_s8  ;;  %v5970_v60 = vpop.f32.mrb[107].mxu1  ;;  %v18312_v4 = vmul.f32 0.25, %v13333_v39 }
 0xc0c   :  { %v6934_v5 = vsel %vm6924_vm3, %v18312_v4, -inf }
 0xc0d   :  { %v13336_v19 = vpop.f32.mrb[108].mxu1 }
 0xc0e   :  { %5824 = vrot.lane.b32.xlu0 %v13287_v42, %s15402_s7  ;;  %5822 = vrot.lane.b32.xlu1 %v5638_v7, %s15402_s7  ;;  %v5980_v22 = vpop.f32.mrb[109].mxu1  ;;  %v18328_v20 = vmul.f32 0.25, %v13336_v19 }
 0xc0f   :  { %v18316_v14 = vmul.f32 0.25, %v5980_v22 }
 0xc10   :  { %v6940_v8 = vsel %vm6924_vm3, %v18328_v20, -inf }
 0xc11   :  { %v13339_v2 = vpop.f32.mrb[110].mxu1  ;;  %v6937_v51 = vsel %vm6924_vm3, %v18316_v14, -inf }
 0xc12   :  { %5838 = vrot.lane.b32.xlu0 %v5638_v7, %s15403_s8  ;;  %5844 = vrot.lane.b32.xlu1 %v13290_v52, %s15403_s8  ;;  %v5990_v0 = vpop.f32.mrb[111].mxu1  ;;  %v18324_v26 = vmul.f32 0.25, %v13339_v2 }
 0xc13   :  { %v18332_v61 = vmul.f32 0.25, %v5990_v0 }
 0xc14   :  { %v6946_v18 = vsel %vm6924_vm3, %v18324_v26, -inf }
 0xc15   :  { %v6943_v15 = vsel %vm6924_vm3, %v18332_v61, -inf }
 0xc16   :  { %5854 = vrot.lane.b32.xlu0 %v5638_v7, %s15405_s10  ;;  %5852 = vrot.lane.b32.xlu1 %v13284_v50, %s15405_s10 }
 0xc1a   :  { %5828 = vrot.lane.b32.xlu0 %v13290_v52, %s15402_s7  ;;  %5856 = vrot.lane.b32.xlu1 %v13287_v42, %s15405_s10 }
 0xc1e   :  { %5860 = vrot.lane.b32.xlu1 %v13290_v52, %s15405_s10  ;;  %5842 = vrot.lane.b32.xlu0 %v5648_v24, %s15403_s8 }
 0xc22   :  { %5826 = vrot.lane.b32.xlu1 %v5648_v24, %s15402_s7  ;;  %7761 = vrot.lane.b32.xlu0 %v18128_v58, %s15404_s9  ;;  %v18320_v58 = vmul.f32 0.25, %v5970_v60 }
 0xc24   :  { %v6931_v33 = vsel %vm6924_vm3, %v18320_v58, -inf }
 0xc26   :  { %5858 = vrot.lane.b32.xlu0 %v5648_v24, %s15405_s10 }
 0xc45   :  { %6929 = vmax.xlane.f32.xlu0 %v6928_v25 }
 0xc46   :  { %6926 = vmax.xlane.f32.xlu1 %v6925_v21 }
 0xc49   :  { %6935 = vmax.xlane.f32.xlu0 %v6934_v5 }
 0xc4a   :  { %6938 = vmax.xlane.f32.xlu1 %v6937_v51 }
 0xc4d   :  { %6932 = vmax.xlane.f32.xlu0 %v6931_v33 }
 0xc4e   :  { %6947 = vmax.xlane.f32.xlu1 %v6946_v18 }
 0xc51   :  { %6941 = vmax.xlane.f32.xlu0 %v6940_v8 }
 0xc52   :  { %6944 = vmax.xlane.f32.xlu1 %v6943_v15 }
 0xc68   :  { %v5833_v23 = vpop.permute.xlu1 %5832  ;;  %v5817_v38 = vpop.permute.xlu0 %5816 }
 0xc6a   :  { %v13344_v55 = vpop.f32.mrb[106].mxu0 }
 0xc6b   :  { %v18340_v11 = vmul.f32 0.25, %v13344_v55  ;;  %v6083_v36 = vpop.f32.mrb[107].mxu0 }
 0xc6c   :  { %v18342_v59 = vmul.f32 0.25, %v6083_v36  ;;  %v18344_v29 = vpop.permute.xlu1 %5848  ;;  %v5831_v49 = vpop.permute.xlu0 %5830 }
 0xc6d   :  { %v6952_v35 = vsel %vm6924_vm3, %v18340_v11, -inf  ;;  %13412 = vmatprep.mubr.msk.f32.mxu1 %vm1100_vm1, %v5831_v49 }
 0xc6e   :  { %6953 = vmax.xlane.f32.xlu0 %v6952_v35  ;;  %v6949_v41 = vsel %vm6924_vm3, %v18342_v59, -inf  ;;  %13413 = vmatmul.mubr.msk.f32.vlgmr.msra.gmra.mrb[128].mxu1 %vm1100_vm1, %v5833_v23 }
 0xc6f   :  { %6950 = vmax.xlane.f32.xlu1 %v6949_v41 }
 0xc70   :  { %v13347_v10 = vpop.f32.mrb[108].mxu0  ;;  %v5815_v31 = vpop.permute.xlu1 %5814 }
 0xc71   :  { %v6093_v50 = vpop.f32.mrb[109].mxu0  ;;  %v18352_v42 = vpop.permute.xlu0 %5846  ;;  %13398 = vmatprep.mubr.msk.f32.mxu0 %vm1100_vm1, %v5815_v31  ;;  %v18370_v33 = vmul.f32 0.25, %v13347_v10 }
 0xc72   :  { %13399 = vmatmul.mubr.msk.f32.vlgmr.msra.gmra.mrb[122].mxu0 %vm1100_vm1, %v5817_v38  ;;  %v18380_v35 = vmul.f32 0.25, %v6093_v50 }
 0xc73   :  { %13425 = vmatpush3.xpose.msk.msra.mxu0 %vm1100_vm1, %v18268_v47  ;;  %v6958_v49 = vsel %vm6924_vm3, %v18370_v33, -inf }
 0xc74   :  { %v13350_v7 = vpop.f32.mrb[110].mxu0  ;;  %v5837_v24 = vpop.permute.xlu1 %5836 }
 0xc75   :  { %v6103_v52 = vpop.f32.mrb[111].mxu0  ;;  %v5821_v12 = vpop.permute.xlu0 %5820 }
 0xc76   :  { %v18386_v31 = vmul.f32 0.25, %v6103_v52 }
 0xc78   :  { %v18358_v1 = vpop.f32.mrb[112].mxu0  ;;  %v5819_v60 = vpop.permute.xlu1 %5818 }
 0xc79   :  { %v6113_v39 = vpop.f32.mrb[113].mxu0  ;;  %v5835_v19 = vpop.permute.xlu0 %5834  ;;  %13401 = vmatprep.mubr.msk.f32.mxu0 %vm1100_vm1, %v5819_v60 }
 0xc7a   :  { %13415 = vmatprep.mubr.msk.f32.mxu1 %vm1100_vm1, %v5835_v19  ;;  %13402 = vmatmul.mubr.msk.f32.gmra.mrb[124].mxu0 %vm1100_vm1, %v5821_v12  ;;  %v6955_v19 = vsel %vm6924_vm3, %v18380_v35, -inf  ;;  %v18412_v40 = vmul.f32 0.25, %v6113_v39 }
 0xc7b   :  { %13416 = vmatmul.mubr.msk.f32.gmra.mrb[130].mxu1 %vm1100_vm1, %v5837_v24 }
 0xc7c   :  { %v5841_v22 = vpop.permute.xlu1 %5840 }
 0xc7d   :  { %v18364_v2 = vpop.permute.xlu0 %5850 }
 0xc7f   :  { %v13358_v0 = vpop.f32.mrb[112].mxu1 }
 0xc80   :  { %v18366_v25 = vmul.f32 0.25, %v13358_v0  ;;  %v6206_v21 = vpop.f32.mrb[113].mxu1  ;;  %v5823_v51 = vpop.permute.xlu1 %5822 }
 0xc81   :  { %v18368_v5 = vmul.f32 0.25, %v6206_v21  ;;  %v5825_v8 = vpop.permute.xlu0 %5824  ;;  %13404 = vmatprep.mubr.msk.f32.mxu0 %vm1100_vm1, %v5823_v51  ;;  %v6961_v51 = vsel %vm6924_vm3, %v18386_v31, -inf }
 0xc82   :  { %v6976_v18 = vsel %vm6924_vm3, %v18366_v25, -inf  ;;  %13405 = vmatmul.mubr.msk.f32.gmra.mrb[126].mxu0 %vm1100_vm1, %v5825_v8 }
 0xc83   :  { %6977 = vmax.xlane.f32.xlu0 %v6976_v18  ;;  %v13361_v15 = vpop.f32.mrb[114].mxu1  ;;  %v6973_v23 = vsel %vm6924_vm3, %v18368_v5, -inf }
 0xc84   :  { %v18378_v38 = vmul.f32 0.25, %v13361_v15  ;;  %6974 = vmax.xlane.f32.xlu1 %v6973_v23  ;;  %v6216_v55 = vpop.f32.mrb[115].mxu1  ;;  %v5845_v36 = vpop.permute.xlu1 %5844  ;;  %v18400_v15 = vmul.f32 0.25, %v13350_v7 }
 0xc85   :  { %v5839_v41 = vpop.permute.xlu0 %5838  ;;  %v18392_v50 = vmul.f32 0.25, %v6216_v55 }
 0xc86   :  { %v6982_v10 = vsel %vm6924_vm3, %v18378_v38, -inf  ;;  %13418 = vmatprep.mubr.msk.f32.mxu1 %vm1100_vm1, %v5839_v41  ;;  %v6964_v7 = vsel %vm6924_vm3, %v18400_v15, -inf }
 0xc87   :  { %6959 = vmax.xlane.f32.xlu0 %v6958_v49  ;;  %v13364_v24 = vpop.f32.mrb[116].mxu1  ;;  %13419 = vmatmul.mubr.msk.f32.gmra.mrb[132].mxu1 %vm1100_vm1, %v5841_v22  ;;  %v6979_v22 = vsel %vm6924_vm3, %v18392_v50, -inf }
 0xc88   :  { %6983 = vmax.xlane.f32.xlu1 %v6982_v10  ;;  %v6226_v12 = vpop.f32.mrb[117].mxu1  ;;  %v18390_v60 = vpop.permute.xlu1 %5852 }
 0xc89   :  { %v5855_v0 = vpop.permute.xlu0 %5854  ;;  %v18396_v21 = vmul.f32 0.25, %v6226_v12 }
 0xc8b   :  { %6956 = vmax.xlane.f32.xlu0 %v6955_v19  ;;  %v13367_v52 = vpop.f32.mrb[118].mxu1  ;;  %v6985_v49 = vsel %vm6924_vm3, %v18396_v21, -inf  ;;  %v18408_v19 = vmul.f32 0.25, %v13364_v24  ;;  %v18419_v24 = vmul.f32 0.25, %v18358_v1 }
 0xc8c   :  { %6962 = vmax.xlane.f32.xlu1 %v6961_v51  ;;  %v6236_v18 = vpop.f32.mrb[119].mxu1  ;;  %v5857_v8 = vpop.permute.xlu1 %5856  ;;  %v18404_v55 = vmul.f32 0.25, %v13367_v52 }
 0xc8d   :  { %v5829_v23 = vpop.permute.xlu0 %5828  ;;  %v6988_v57 = vsel %vm6924_vm3, %v18408_v19, -inf  ;;  %v18431_v1 = vmul.f32 0.25, %v6236_v18 }
 0xc8e   :  { %v6994_v52 = vsel %vm6924_vm3, %v18404_v55, -inf }
 0xc8f   :  { %6980 = vmax.xlane.f32.xlu0 %v6979_v22  ;;  %v6991_v18 = vsel %vm6924_vm3, %v18431_v1, -inf }
 0xc90   :  { %6986 = vmax.xlane.f32.xlu1 %v6985_v49  ;;  %v13372_v41 = vpop.f32.mrb[114].mxu0  ;;  %v5861_v12 = vpop.permute.xlu1 %5860 }
 0xc91   :  { %v6329_v10 = vpop.f32.mrb[115].mxu0  ;;  %v5843_v51 = vpop.permute.xlu0 %5842 }
 0xc92   :  { %13421 = vmatprep.mubr.msk.f32.mxu1 %vm1100_vm1, %v5843_v51  ;;  %v6967_v51 = vsel %vm6924_vm3, %v18412_v40, -inf }
 0xc93   :  { %6965 = vmax.xlane.f32.xlu0 %v6964_v7  ;;  %13422 = vmatmul.mubr.msk.f32.gmra.mrb[134].mxu1 %vm1100_vm1, %v5845_v36  ;;  %v18424_v7 = vmul.f32 0.25, %v6329_v10 }
 0xc94   :  { %6995 = vmax.xlane.f32.xlu1 %v6994_v52  ;;  %v13375_v22 = vpop.f32.mrb[116].mxu0  ;;  %v5827_v9 = vpop.permute.xlu1 %5826 }
 0xc95   :  { %v6339_v49 = vpop.f32.mrb[117].mxu0  ;;  %v7762_v39 = vpop.permute.xlu0 %7761  ;;  %13407 = vmatprep.mubr.msk.f32.mxu0 %vm1100_vm1, %v5827_v9  ;;  %v6970_v9 = vsel %vm6924_vm3, %v18419_v24, -inf  ;;  %v18435_v10 = vmul.f32 0.25, %v13375_v22 }
 0xc96   :  { %13452 = vmatprep.subr.mxu0 %v7762_v39  ;;  %13408 = vmatmul.mubr.msk.f32.gmra.mrb[128].mxu0 %vm1100_vm1, %v5829_v23 }
 0xc97   :  { %6989 = vmax.xlane.f32.xlu0 %v6988_v57  ;;  %13426 = vmatprep.mubr.msk.f32.mxu0 %vm1100_vm1, %v18352_v42  ;;  %v6997_v57 = vsel %vm6924_vm3, %v18424_v7, -inf  ;;  %v18443_v42 = vmul.f32 0.25, %v13372_v41 }
 0xc98   :  { %6968 = vmax.xlane.f32.xlu1 %v6967_v51  ;;  %v13378_v36 = vpop.f32.mrb[118].mxu0 }
 0xc99   :  { %v6349_v52 = vpop.f32.mrb[119].mxu0  ;;  %v18447_v22 = vmul.f32 0.25, %v13378_v36  ;;  %v5859_v36 = vpop.permute.xlu0 %5858 }
 0xc9a   :  { %13427 = vmatmul.mubr.msk.f32.vlgmr.msra.gmra.mrb[130].mxu0 %vm1100_vm1, %v18344_v29  ;;  %v18454_v29 = vmul.f32 0.25, %v6339_v49 }
 0xc9b   :  { %6971 = vmax.xlane.f32.xlu0 %v6970_v9  ;;  %13453 = vmatpush3.msra.mxu0 %v7762_v39  ;;  %v7006_v9 = vsel %vm6924_vm3, %v18435_v10, -inf  ;;  %v7012_v39 = vsel %vm6924_vm3, %v18447_v22, -inf }
 0xc9c   :  { %6998 = vmax.xlane.f32.xlu1 %v6997_v57  ;;  %v13381_v51 = vpop.f32.mrb[120].mxu0  ;;  %13429 = vmatprep.mubr.msk.f32.mxu0 %vm1100_vm1, %v18364_v2  ;;  %v7000_v2 = vsel %vm6924_vm3, %v18443_v42, -inf }
 0xc9d   :  { %v6359_v23 = vpop.f32.mrb[121].mxu0  ;;  %v18458_v41 = vmul.f32 0.25, %v13381_v51 }
 0xc9e   :  { %13430 = vmatmul.mubr.msk.f32.gmra.mrb[132].mxu0 %vm1100_vm1, %v18390_v60  ;;  %v18464_v60 = vmul.f32 0.25, %v6349_v52  ;;  %v18471_v57 = vmul.f32 0.25, %v6359_v23 }
 0xc9f   :  { %6992 = vmax.xlane.f32.xlu0 %v6991_v18  ;;  %13432 = vmatprep.mubr.msk.f32.mxu0 %vm1100_vm1, %v5855_v0  ;;  %v7003_v0 = vsel %vm6924_vm3, %v18454_v29, -inf  ;;  %v7018_v49 = vsel %vm6924_vm3, %v18458_v41, -inf }
 0xca0   :  { %7007 = vmax.xlane.f32.xlu1 %v7006_v9  ;;  %v7009_v51 = vsel %vm6924_vm3, %v18464_v60, -inf }
 0xca2   :  { %13433 = vmatmul.mubr.msk.f32.gmra.mrb[134].mxu0 %vm1100_vm1, %v5857_v8  ;;  %v7015_v8 = vsel %vm6924_vm3, %v18471_v57, -inf }
 0xca3   :  { %7001 = vmax.xlane.f32.xlu0 %v7000_v2  ;;  %13435 = vmatprep.mubr.msk.f32.mxu0 %vm1100_vm1, %v5859_v36 }
 0xca4   :  { %7013 = vmax.xlane.f32.xlu1 %v7012_v39 }
 0xca6   :  { %13436 = vmatmul.mubr.msk.f32.gmra.mrb[136].mxu0 %vm1100_vm1, %v5861_v12 }
 0xca7   :  { %7004 = vmax.xlane.f32.xlu0 %v7003_v0 }
 0xca8   :  { %7019 = vmax.xlane.f32.xlu1 %v7018_v49 }
 0xcab   :  { %7010 = vmax.xlane.f32.xlu0 %v7009_v51 }
 0xcaf   :  { %7016 = vmax.xlane.f32.xlu0 %v7015_v8 }
 0xccb   :  { %v18477_v52 = vpop.f32.mrb[120].mxu1 }
 0xccc   :  { %v18479_v18 = vpop.f32.mrb[121].mxu1 }
 0xccf   :  { %v18481_v9 = vpop.f32.mrb[122].mxu1 }
 0xcd0   :  { %v18483_v2 = vpop.f32.mrb[123].mxu1 }
 0xcd2   :  { %v6930_v39 = vpop.xlane.xlu0 %6929 }
 0xcd3   :  { %v7118_v12 = vsub.f32 %v18308_v30, %v6930_v39  ;;  %v6927_v23 = vpop.xlane.xlu1 %6926  ;;  %v18486_v36 = vpop.f32.mrb[124].mxu1 }
 0xcd4   :  { %v7117_v0 = vsub.f32 %v18310_v28, %v6927_v23  ;;  %v18489_v49 = vpop.f32.mrb[125].mxu1 }
 0xcd5   :  { %v7183_v51 = vmul.f32 1.442695, %v7118_v12 }
 0xcd6   :  { %v7181_v8 = vmul.f32 1.442695, %v7117_v0  ;;  %v6936_v54 = vpop.xlane.xlu0 %6935 }
 0xcd7   :  { %15047 = vpow2.f32 %v7183_v51  ;;  %v7120_v48 = vsub.f32 %v18312_v4, %v6936_v54  ;;  %v6939_v32 = vpop.xlane.xlu1 %6938  ;;  %v18492_v56 = vpop.f32.mrb[126].mxu1 }
 0xcd8   :  { %15049 = vpow2.f32 %v7181_v8  ;;  %v18494_v62 = vpop.f32.mrb[127].mxu1  ;;  %v7121_v39 = vsub.f32 %v18316_v14, %v6939_v32 }
 0xcd9   :  { %v7187_v30 = vmul.f32 1.442695, %v7120_v48 }
 0xcda   :  { %v6933_v43 = vpop.xlane.xlu0 %6932  ;;  %v7189_v12 = vmul.f32 1.442695, %v7121_v39 }
 0xcdb   :  { %15051 = vpow2.f32 %v7187_v30  ;;  %v7119_v28 = vsub.f32 %v18320_v58, %v6933_v43  ;;  %v6948_v23 = vpop.xlane.xlu1 %6947 }
 0xcdc   :  { %v7124_v51 = vsub.f32 %v18324_v26, %v6948_v23 }
 0xcdd   :  { %v7185_v0 = vmul.f32 1.442695, %v7119_v28 }
 0xcde   :  { %v6942_v45 = vpop.xlane.xlu0 %6941  ;;  %v7195_v48 = vmul.f32 1.442695, %v7124_v51 }
 0xcdf   :  { %15053 = vpow2.f32 %v7185_v0  ;;  %v7122_v54 = vsub.f32 %v18328_v20, %v6942_v45  ;;  %v6945_v4 = vpop.xlane.xlu1 %6944 }
 0xce0   :  { %15055 = vpow2.f32 %v7189_v12  ;;  %v7123_v32 = vsub.f32 %v18332_v61, %v6945_v4 }
 0xce1   :  { %v18500_v8 = vpop.eup %15047  ;;  %v7191_v16 = vmul.f32 1.442695, %v7122_v54 }
 0xce2   :  { %v18503_v14 = vpop.eup %15049  ;;  %v7312_v43 = vsel %vm6924_vm3, %v18500_v8, 0.0  ;;  %v7193_v26 = vmul.f32 1.442695, %v7123_v32 }
 0xce3   :  { %15057 = vpow2.f32 %v7191_v16  ;;  %7313 = vadd.xlane.f32.xlu1 %v7312_v43  ;;  %v7309_v58 = vsel %vm6924_vm3, %v18503_v14, 0.0 }
 0xce4   :  { %7310 = vadd.xlane.f32.xlu0 %v7309_v58  ;;  %15059 = vpow2.f32 %v7195_v48 }
 0xce5   :  { %v18509_v45 = vpop.eup %15051  ;;  %15061 = vpow2.f32 %v7193_v26 }
 0xce6   :  { %v7318_v20 = vsel %vm6924_vm3, %v18509_v45, 0.0 }
 0xce7   :  { %7319 = vadd.xlane.f32.xlu1 %v7318_v20 }
 0xce9   :  { %v18513_v61 = vpop.eup %15053 }
 0xcea   :  { %v7315_v30 = vsel %vm6924_vm3, %v18513_v61, 0.0  ;;  %v18517_v16 = vpop.eup %15055 }
 0xceb   :  { %7316 = vadd.xlane.f32.xlu0 %v7315_v30  ;;  %v7321_v28 = vsel %vm6924_vm3, %v18517_v16, 0.0 }
 0xced   :  { %v18519_v39 = vpop.eup %15057 }
 0xcee   :  { %v7324_v23 = vsel %vm6924_vm3, %v18519_v39, 0.0  ;;  %v18525_v12 = vpop.eup %15059 }
 0xcef   :  { %7322 = vadd.xlane.f32.xlu0 %v7321_v28  ;;  %7325 = vadd.xlane.f32.xlu1 %v7324_v23  ;;  %v7330_v0 = vsel %vm6924_vm3, %v18525_v12, 0.0  ;;  %v18529_v51 = vpop.eup %15061 }
 0xcf0   :  { %v7327_v54 = vsel %vm6924_vm3, %v18529_v51, 0.0 }
 0xcf3   :  { %7331 = vadd.xlane.f32.xlu1 %v7330_v0 }
 0xcf7   :  { %7328 = vadd.xlane.f32.xlu1 %v7327_v54 }
 0xcfb   :  { %v6954_v4 = vpop.xlane.xlu0 %6953 }
 0xcfc   :  { %v7126_v48 = vsub.f32 %v18340_v11, %v6954_v4  ;;  %v6951_v32 = vpop.xlane.xlu1 %6950 }
 0xcfd   :  { %v7125_v43 = vsub.f32 %v18342_v59, %v6951_v32 }
 0xcfe   :  { %v7199_v58 = vmul.f32 1.442695, %v7126_v48 }
 0xcff   :  { %v7197_v26 = vmul.f32 1.442695, %v7125_v43 }
 0xd00   :  { %15063 = vpow2.f32 %v7199_v58 }
 0xd01   :  { %15065 = vpow2.f32 %v7197_v26 }
 0xd0a   :  { %v18535_v20 = vpop.eup %15063 }
 0xd0b   :  { %v18537_v30 = vpop.eup %15065  ;;  %v7336_v28 = vsel %vm6924_vm3, %v18535_v20, 0.0 }
 0xd0c   :  { %7337 = vadd.xlane.f32.xlu1 %v7336_v28  ;;  %v7333_v23 = vsel %vm6924_vm3, %v18537_v30, 0.0 }
 0xd0d   :  { %7334 = vadd.xlane.f32.xlu0 %v7333_v23 }
 0xd10   :  { %v6978_v11 = vpop.xlane.xlu0 %6977 }
 0xd11   :  { %v7134_v0 = vsub.f32 %v18366_v25, %v6978_v11  ;;  %v6975_v59 = vpop.xlane.xlu1 %6974 }
 0xd12   :  { %v7133_v54 = vsub.f32 %v18368_v5, %v6975_v59 }
 0xd13   :  { %v7215_v4 = vmul.f32 1.442695, %v7134_v0 }
 0xd14   :  { %v7213_v48 = vmul.f32 1.442695, %v7133_v54  ;;  %v6960_v32 = vpop.xlane.xlu0 %6959 }
 0xd15   :  { %15067 = vpow2.f32 %v7215_v4  ;;  %v7128_v43 = vsub.f32 %v18370_v33, %v6960_v32  ;;  %v6984_v58 = vpop.xlane.xlu1 %6983 }
 0xd16   :  { %v7136_v26 = vsub.f32 %v18378_v38, %v6984_v58  ;;  %15069 = vpow2.f32 %v7213_v48 }
 0xd17   :  { %v7203_v28 = vmul.f32 1.442695, %v7128_v43 }
 0xd18   :  { %v6957_v27 = vpop.xlane.xlu0 %6956  ;;  %v7219_v17 = vmul.f32 1.442695, %v7136_v26 }
 0xd19   :  { %v7127_v23 = vsub.f32 %v18380_v35, %v6957_v27  ;;  %v6963_v63 = vpop.xlane.xlu1 %6962  ;;  %15071 = vpow2.f32 %v7203_v28 }
 0xd1a   :  { %v7129_v25 = vsub.f32 %v18386_v31, %v6963_v63 }
 0xd1b   :  { %v7201_v5 = vmul.f32 1.442695, %v7127_v23 }
 0xd1c   :  { %v7205_v11 = vmul.f32 1.442695, %v7129_v25  ;;  %v6981_v0 = vpop.xlane.xlu0 %6980 }
 0xd1d   :  { %15073 = vpow2.f32 %v7201_v5  ;;  %v7135_v59 = vsub.f32 %v18392_v50, %v6981_v0  ;;  %v6987_v33 = vpop.xlane.xlu1 %6986 }
 0xd1e   :  { %15075 = vpow2.f32 %v7219_v17  ;;  %v7137_v38 = vsub.f32 %v18396_v21, %v6987_v33 }
 0xd1f   :  { %v18551_v54 = vpop.eup %15067  ;;  %15077 = vpow2.f32 %v7205_v11  ;;  %v7217_v4 = vmul.f32 1.442695, %v7135_v59 }
 0xd20   :  { %v7221_v27 = vmul.f32 1.442695, %v7137_v38  ;;  %v6966_v35 = vpop.xlane.xlu0 %6965  ;;  %v7360_v63 = vsel %vm6924_vm3, %v18551_v54, 0.0  ;;  %v18555_v31 = vpop.eup %15069 }
 0xd21   :  { %v7130_v48 = vsub.f32 %v18400_v15, %v6966_v35  ;;  %v6996_v32 = vpop.xlane.xlu1 %6995  ;;  %7361 = vadd.xlane.f32.xlu1 %v7360_v63  ;;  %15079 = vpow2.f32 %v7217_v4  ;;  %v7357_v43 = vsel %vm6924_vm3, %v18555_v31, 0.0 }
 0xd22   :  { %15081 = vpow2.f32 %v7221_v27  ;;  %v7140_v50 = vsub.f32 %v18404_v55, %v6996_v32 }
 0xd23   :  { %v7207_v17 = vmul.f32 1.442695, %v7130_v48  ;;  %v18561_v58 = vpop.eup %15071 }
 0xd24   :  { %v6990_v21 = vpop.xlane.xlu0 %6989  ;;  %v7227_v11 = vmul.f32 1.442695, %v7140_v50  ;;  %v7342_v59 = vsel %vm6924_vm3, %v18561_v58, 0.0 }
 0xd25   :  { %v7138_v26 = vsub.f32 %v18408_v19, %v6990_v21  ;;  %v6969_v28 = vpop.xlane.xlu1 %6968  ;;  %7358 = vadd.xlane.f32.xlu1 %v7357_v43  ;;  %15083 = vpow2.f32 %v7207_v17 }
 0xd26   :  { %v7131_v23 = vsub.f32 %v18412_v40, %v6969_v28 }
 0xd27   :  { %v18565_v15 = vpop.eup %15073  ;;  %v7223_v25 = vmul.f32 1.442695, %v7138_v26 }
 0xd28   :  { %v18567_v5 = vpop.eup %15075  ;;  %v7209_v55 = vmul.f32 1.442695, %v7131_v23  ;;  %v6972_v0 = vpop.xlane.xlu0 %6971  ;;  %v7339_v33 = vsel %vm6924_vm3, %v18565_v15, 0.0 }
 0xd29   :  { %v18573_v19 = vpop.eup %15077  ;;  %v7132_v38 = vsub.f32 %v18419_v24, %v6972_v0  ;;  %7343 = vadd.xlane.f32.xlu1 %v7342_v59  ;;  %7340 = vadd.xlane.f32.xlu0 %v7339_v33  ;;  %v7366_v27 = vsel %vm6924_vm3, %v18567_v5, 0.0 }
 0xd2a   :  { %15085 = vpow2.f32 %v7209_v55  ;;  %v7345_v35 = vsel %vm6924_vm3, %v18573_v19, 0.0 }
 0xd2b   :  { %15087 = vpow2.f32 %v7223_v25  ;;  %v7211_v40 = vmul.f32 1.442695, %v7132_v38  ;;  %v18576_v4 = vpop.eup %15079 }
 0xd2c   :  { %15089 = vpow2.f32 %v7227_v11  ;;  %v18582_v63 = vpop.eup %15081  ;;  %v7363_v48 = vsel %vm6924_vm3, %v18576_v4, 0.0 }
 0xd2d   :  { %20813 = vst [vmem:[#allocation47_spill] sm:$0xff] %v18582_v63  ;;  %7367 = vadd.xlane.f32.xlu1 %v7366_v27  ;;  %7346 = vadd.xlane.f32.xlu0 %v7345_v35  ;;  %15091 = vpow2.f32 %v7211_v40  ;;  %v7369_v24 = vsel %vm6924_vm3, %v18582_v63, 0.0  ;;  %v6993_v35 = vpop.xlane.xlu0 %6992 }
 0xd2f   :  { %v18588_v32 = vpop.eup %15083 }
 0xd30   :  { %v7348_v50 = vsel %vm6924_vm3, %v18588_v32, 0.0 }
 0xd31   :  { %7370 = vadd.xlane.f32.xlu0 %v7369_v24  ;;  %7364 = vadd.xlane.f32.xlu1 %v7363_v48  ;;  %v7002_v48 = vpop.xlane.xlu0 %7001 }
 0xd34   :  { %v18590_v17 = vpop.eup %15085 }
 0xd35   :  { %v18594_v21 = vpop.eup %15087  ;;  %7349 = vadd.xlane.f32.xlu1 %v7348_v50  ;;  %v7351_v43 = vsel %vm6924_vm3, %v18590_v17, 0.0 }
 0xd36   :  { %20814 = vst [vmem:[#allocation45_spill] sm:$0xff] %v18594_v21  ;;  %v18598_v26 = vpop.eup %15089  ;;  %7352 = vadd.xlane.f32.xlu0 %v7351_v43  ;;  %v7372_v28 = vsel %vm6924_vm3, %v18594_v21, 0.0 }
 0xd37   :  { %20815 = vst [vmem:[#allocation50_spill] sm:$0xff] %v18598_v26  ;;  %v18602_v23 = vpop.eup %15091  ;;  %v7378_v25 = vsel %vm6924_vm3, %v18598_v26, 0.0  ;;  %v7005_v26 = vpop.xlane.xlu0 %7004 }
 0xd38   :  { %v7354_v11 = vsel %vm6924_vm3, %v18602_v23, 0.0 }
 0xd39   :  { %7373 = vadd.xlane.f32.xlu1 %v7372_v28  ;;  %v6999_v28 = vpop.xlane.xlu1 %6998 }
 0xd3a   :  { %7379 = vadd.xlane.f32.xlu0 %v7378_v25  ;;  %v7141_v44 = vsub.f32 %v18424_v7, %v6999_v28 }
 0xd3c   :  { %v7229_v13 = vmul.f32 1.442695, %v7141_v44 }
 0xd3d   :  { %7355 = vadd.xlane.f32.xlu1 %v7354_v11  ;;  %v7139_v11 = vsub.f32 %v18431_v1, %v6993_v35  ;;  %v7011_v35 = vpop.xlane.xlu0 %7010 }
 0xd3f   :  { %v7225_v6 = vmul.f32 1.442695, %v7139_v11 }
 0xd41   :  { %v18608_v55 = vpop.f32.mrb[128].mxu1 }
 0xd42   :  { %v18610_v0 = vpop.f32.mrb[129].mxu1 }
 0xd45   :  { %v18612_v59 = vpop.f32.mrb[122].mxu0 }
 0xd46   :  { %v18614_v33 = vpop.f32.mrb[123].mxu0 }
 0xd4d   :  { %v18618_v38 = vpop.f32.mrb[124].mxu0 }
 0xd4e   :  { %7629 = vrot.lane.b32.xlu1 %v18118_v37, %s15404_s9  ;;  %v18620_v40 = vpop.f32.mrb[130].mxu1  ;;  %v18622_v27 = vpop.f32.mrb[125].mxu0  ;;  %v7142_v37 = vsub.f32 %v18443_v42, %v7002_v48  ;;  %v7143_v48 = vsub.f32 %v18454_v29, %v7005_v26 }
 0xd4f   :  { %v18626_v24 = vpop.f32.mrb[131].mxu1  ;;  %v7017_v26 = vpop.xlane.xlu0 %7016 }
 0xd50   :  { %7893 = vrot.lane.b32.xlu0 %v18226_v53, %s15404_s9  ;;  %v7231_v47 = vmul.f32 1.442695, %v7142_v37  ;;  %v7008_v53 = vpop.xlane.xlu1 %7007  ;;  %v7233_v28 = vmul.f32 1.442695, %v7143_v48 }
 0xd51   :  { %v7144_v3 = vsub.f32 %v18435_v10, %v7008_v53 }
 0xd52   :  { %15093 = vpow2.f32 %v7231_v47 }
 0xd53   :  { %15095 = vpow2.f32 %v7225_v6  ;;  %v7235_v21 = vmul.f32 1.442695, %v7144_v3  ;;  %v7145_v6 = vsub.f32 %v18464_v60, %v7011_v35 }
 0xd54   :  { %15097 = vpow2.f32 %v7229_v13  ;;  %v7014_v42 = vpop.xlane.xlu1 %7013 }
 0xd55   :  { %v18628_v50 = vpop.f32.mrb[126].mxu0  ;;  %v7146_v1 = vsub.f32 %v18447_v22, %v7014_v42  ;;  %15099 = vpow2.f32 %v7235_v21  ;;  %v7237_v53 = vmul.f32 1.442695, %v7145_v6  ;;  %v18665_v42 = vmul.f32 0.25, %v18479_v18 }
 0xd56   :  { %v18630_v43 = vpop.f32.mrb[127].mxu0  ;;  %15101 = vpow2.f32 %v7233_v28  ;;  %v7147_v6 = vsub.f32 %v18471_v57, %v7017_v26 }
 0xd57   :  { %v7239_v47 = vmul.f32 1.442695, %v7146_v1 }
 0xd58   :  { %v7020_v13 = vpop.xlane.xlu1 %7019 }
 0xd59   :  { %15103 = vpow2.f32 %v7239_v47  ;;  %v7148_v11 = vsub.f32 %v18458_v41, %v7020_v13  ;;  %v18679_v13 = vmul.f32 0.25, %v18483_v2 }
 0xd5a   :  { %v18633_v25 = vpop.f32.mrb[132].mxu1 }
 0xd5b   :  { %v18636_v34 = vpop.f32.mrb[133].mxu1  ;;  %v7243_v41 = vmul.f32 1.442695, %v7148_v11  ;;  %v7241_v11 = vmul.f32 1.442695, %v7147_v6  ;;  %v7027_v2 = vsel %vm6924_vm3, %v18679_v13, -inf }
 0xd5c   :  { %v18646_v44 = vpop.eup %15093 }
 0xd5d   :  { %v18653_v29 = vpop.eup %15095  ;;  %v7384_v22 = vsel %vm6924_vm3, %v18646_v44, 0.0 }
 0xd5e   :  { %v18657_v37 = vpop.eup %15097  ;;  %v7375_v48 = vsel %vm6924_vm3, %v18653_v29, 0.0 }
 0xd5f   :  { %v7381_v1 = vsel %vm6924_vm3, %v18657_v37, 0.0  ;;  %v18671_v28 = vpop.eup %15099 }
 0xd66   :  { %v18641_v63 = vpop.f32.mrb[134].mxu1 }
 0xd67   :  { %v18644_v7 = vpop.f32.mrb[135].mxu1 }
 0xd69   :  { %v18648_v10 = vpop.f32.mrb[128].mxu0 }
 0xd6a   :  { %v18651_v3 = vpop.f32.mrb[129].mxu0 }
 0xd6d   :  { %v18659_v21 = vpop.f32.mrb[130].mxu0 }
 0xd6e   :  { %20816 = vst [vmem:[#allocation24_spill] sm:$0xff] %v18659_v21  ;;  %v18662_v60 = vpop.f32.mrb[131].mxu0 }
 0xd6f   :  { %7385 = vadd.xlane.f32.xlu0 %v7384_v22  ;;  %20817 = vst [vmem:[#allocation34_spill] sm:$0xff] %v18662_v60  ;;  %v7021_v22 = vsel %vm6924_vm3, %v18665_v42, -inf }
 0xd71   :  { %v7311_v35 = vpop.xlane.xlu0 %7310  ;;  %v18673_v47 = vpop.f32.mrb[132].mxu0 }
 0xd72   :  { %7376 = vadd.xlane.f32.xlu1 %v7375_v48  ;;  %20818 = vst [vmem:[#allocation53_spill] sm:$0xff] %v18673_v47  ;;  %15105 = vrcp.f32 %v7311_v35  ;;  %v18676_v18 = vpop.f32.mrb[133].mxu0  ;;  %v7390_v48 = vsel %vm6924_vm3, %v18671_v28, 0.0  ;;  %v18706_v47 = vpop.xlane.xlu1 %7313 }
 0xd73   :  { %7382 = vadd.xlane.f32.xlu0 %v7381_v1  ;;  %15107 = vpow2.f32 %v7237_v53  ;;  %20819 = vst [vmem:[#allocation29_spill] sm:$0xff] %v18676_v18  ;;  %v18685_v1 = vpop.eup %15101 }
 0xd74   :  { %15109 = vpow2.f32 %v7243_v41  ;;  %v18693_v26 = vpop.eup %15103  ;;  %v7387_v53 = vsel %vm6924_vm3, %v18685_v1, 0.0 }
 0xd75   :  { %v18687_v35 = vpop.f32.mrb[134].mxu0  ;;  %15111 = vpow2.f32 %v7241_v11  ;;  %v7396_v41 = vsel %vm6924_vm3, %v18693_v26, 0.0 }
 0xd76   :  { %7022 = vmax.xlane.f32.xlu1 %v7021_v22  ;;  %20820 = vst [vmem:[#allocation51_spill] sm:$0xff] %v18687_v35  ;;  %v18689_v57 = vpop.f32.mrb[135].mxu0  ;;  %v18713_v11 = vpop.xlane.xlu1 %7319 }
 0xd77   :  { %7391 = vadd.xlane.f32.xlu0 %v7390_v48  ;;  %20821 = vst [vmem:[#allocation30_spill] sm:$0xff] %v18689_v57 }
 0xd78   :  { %v18733_v21 = vpop.xlane.xlu0 %7316 }
 0xd79   :  { %v18697_v22 = vpop.f32.mrb[136].mxu0 }
 0xd7a   :  { %7028 = vmax.xlane.f32.xlu1 %v7027_v2  ;;  %20822 = vst [vmem:[#allocation43_spill] sm:$0xff] %v18697_v22  ;;  %v18699_v48 = vpop.f32.mrb[137].mxu0 }
 0xd7b   :  { %7388 = vadd.xlane.f32.xlu0 %v7387_v53  ;;  %20823 = vst [vmem:[#allocation37_spill] sm:$0xff] %v18699_v48 }
 0xd7c   :  { %v15106_v35 = vpop.eup %15105  ;;  %v18749_v60 = vpop.xlane.xlu0 %7322 }
 0xd7d   :  { %v18703_v6 = vpop.eup %15107  ;;  %v7565_v57 = vmul.f32 %v15106_v35, %v18503_v14  ;;  %v18720_v14 = vmul.f32 0.25, %v18481_v9  ;;  %v18722_v35 = vpop.xlane.xlu1 %7325  ;;  %v18736_v9 = vmul.f32 0.25, %v18486_v36  ;;  %v18752_v36 = vmul.f32 0.25, %v18492_v56 }
 0xd7e   :  { %7397 = vadd.xlane.f32.xlu1 %v7396_v41  ;;  %v7393_v2 = vsel %vm6924_vm3, %v18703_v6, 0.0  ;;  %v18711_v53 = vpop.eup %15109  ;;  %v18727_v41 = vmul.f32 0.25, %v18489_v49  ;;  %v18743_v49 = vmul.f32 0.25, %v18494_v62  ;;  %v18757_v62 = vmul.f32 0.25, %v18610_v0 }
 0xd7f   :  { %13440 = vmatprep.mubr.msk.f32.mxu1 %vm6924_vm3, %v7565_v57  ;;  %20824 = vst [vmem:[#allocation46_spill] sm:$0xff] %v18711_v53  ;;  %v7402_v22 = vsel %vm6924_vm3, %v18711_v53, 0.0  ;;  %v18717_v48 = vpop.eup %15111  ;;  %20825 = vst [vmem:[#allocation21_spill] sm:$0xff] %v18720_v14 }
 0xd80   :  { %v7399_v57 = vsel %vm6924_vm3, %v18717_v48, 0.0  ;;  %20826 = vst [vmem:[#allocation20_spill] sm:$0xff] %v18736_v9  ;;  %20827 = vst [vmem:[#allocation25_spill] sm:$0xff] %v18743_v49  ;;  %v7069_v56 = vsel %vm6924_vm3, %v18757_v62, -inf }
 0xd81   :  { %v18731_v18 = vpop.xlane.xlu1 %7331 }
 0xd82   :  { %7394 = vadd.xlane.f32.xlu1 %v7393_v2  ;;  %v7030_v2 = vsel %vm6924_vm3, %v18720_v14, -inf }
 0xd86   :  { %7403 = vadd.xlane.f32.xlu1 %v7402_v22  ;;  %v7033_v22 = vsel %vm6924_vm3, %v18727_v41, -inf }
 0xd8a   :  { %7400 = vadd.xlane.f32.xlu1 %v7399_v57  ;;  %v18745_v57 = vpop.xlane.xlu1 %7328 }
 0xd8e   :  { %7031 = vmax.xlane.f32.xlu1 %v7030_v2  ;;  %v7036_v2 = vsel %vm6924_vm3, %v18736_v9, -inf  ;;  %v7042_v9 = vsel %vm6924_vm3, %v18752_v36, -inf }
 0xd91   :  { %8025 = vrot.lane.b32.xlu0 %v18243_v46, %s15404_s9  ;;  %v7039_v46 = vsel %vm6924_vm3, %v18743_v49, -inf }
 0xd92   :  { %7034 = vmax.xlane.f32.xlu1 %v7033_v22 }
 0xd96   :  { %7037 = vmax.xlane.f32.xlu1 %v7036_v2  ;;  %v18762_v2 = vmul.f32 0.25, %v18608_v55  ;;  %v18775_v55 = vmul.f32 0.25, %v18633_v25  ;;  %v18791_v25 = vmul.f32 0.25, %v18626_v24 }
 0xd98   :  { %v7072_v0 = vsel %vm6924_vm3, %v18762_v2, -inf  ;;  %v7075_v24 = vsel %vm6924_vm3, %v18791_v25, -inf }
 0xd99   :  { %v7338_v14 = vpop.xlane.xlu1 %7337 }
 0xd9a   :  { %15113 = vrcp.f32 %v7338_v14  ;;  %7040 = vmax.xlane.f32.xlu1 %v7039_v46  ;;  %v7335_v22 = vpop.xlane.xlu0 %7334  ;;  %v18767_v14 = vmul.f32 0.25, %v18620_v40  ;;  %v18781_v40 = vmul.f32 0.25, %v18477_v52 }
 0xd9b   :  { %15115 = vrcp.f32 %v7335_v22 }
 0xd9c   :  { %v7078_v22 = vsel %vm6924_vm3, %v18767_v14, -inf }
 0xd9e   :  { %7043 = vmax.xlane.f32.xlu1 %v7042_v9 }
 0xda2   :  { %7070 = vmax.xlane.f32.xlu1 %v7069_v56  ;;  %v18784_v56 = vmul.f32 0.25, %v18641_v63 }
 0xda4   :  { %v15114_v53 = vpop.eup %15113  ;;  %v7090_v52 = vsel %vm6924_vm3, %v18784_v56, -inf }
 0xda5   :  { %v15116_v49 = vpop.eup %15115  ;;  %v7574_v9 = vmul.f32 %v15114_v53, %v18535_v20  ;;  %v7084_v20 = vsel %vm6924_vm3, %v18775_v55, -inf  ;;  %v7024_v53 = vsel %vm6924_vm3, %v18781_v40, -inf }
 0xda6   :  { %7073 = vmax.xlane.f32.xlu1 %v7072_v0  ;;  %v7573_v46 = vmul.f32 %v15116_v49, %v18537_v30  ;;  %v18796_v49 = vmul.f32 0.25, %v18612_v59  ;;  %v18803_v0 = vmul.f32 0.25, %v18636_v34 }
 0xda8   :  { %13454 = vmatprep.mubr.msk.f32.mxu0 %vm6924_vm3, %v7573_v46  ;;  %v18808_v46 = vmul.f32 0.25, %v18618_v38  ;;  %v7048_v59 = vsel %vm6924_vm3, %v18796_v49, -inf  ;;  %v7081_v34 = vsel %vm6924_vm3, %v18803_v0, -inf }
 0xda9   :  { %13455 = vmatmul.mubr.msk.f32.vlgmr.msra.gmra.mrb[138].mxu0 %vm6924_vm3, %v7574_v9 }
 0xdaa   :  { %7079 = vmax.xlane.f32.xlu1 %v7078_v22  ;;  %20828 = vst [vmem:[#allocation26_spill] sm:$0xff] %v18808_v46  ;;  %v7054_v38 = vsel %vm6924_vm3, %v18808_v46, -inf }
 0xdae   :  { %v18788_v30 = vpop.xlane.xlu1 %7361  ;;  %7085 = vmax.xlane.f32.xlu1 %v7084_v20  ;;  %v18813_v20 = vmul.f32 0.25, %v18644_v7 }
 0xdb0   :  { %7025 = vmax.xlane.f32.xlu0 %v7024_v53  ;;  %v18818_v53 = vmul.f32 0.25, %v18628_v50  ;;  %v7087_v7 = vsel %vm6924_vm3, %v18813_v20, -inf }
 0xdb2   :  { %v18800_v63 = vpop.xlane.xlu1 %7358  ;;  %7091 = vmax.xlane.f32.xlu1 %v7090_v52  ;;  %20829 = vst [vmem:[#allocation18_spill] sm:$0xff] %v18818_v53  ;;  %v7060_v50 = vsel %vm6924_vm3, %v18818_v53, -inf }
 0xdb4   :  { %7076 = vmax.xlane.f32.xlu0 %v7075_v24 }
 0xdb6   :  { %v7344_v9 = vpop.xlane.xlu1 %7343  ;;  %7049 = vmax.xlane.f32.xlu1 %v7048_v59  ;;  %v7341_v22 = vpop.xlane.xlu0 %7340  ;;  %v18825_v59 = vmul.f32 0.25, %v18614_v33 }
 0xdb7   :  { %15117 = vrcp.f32 %v7344_v9  ;;  %v18830_v9 = vmul.f32 0.25, %v18648_v10 }
 0xdb8   :  { %15119 = vrcp.f32 %v7341_v22  ;;  %7082 = vmax.xlane.f32.xlu0 %v7081_v34  ;;  %v7045_v33 = vsel %vm6924_vm3, %v18825_v59, -inf }
 0xdb9   :  { %20830 = vst [vmem:[#allocation19_spill] sm:$0xff] %v18830_v9  ;;  %v7066_v10 = vsel %vm6924_vm3, %v18830_v9, -inf }
 0xdba   :  { %v18822_v52 = vpop.xlane.xlu1 %7367  ;;  %7055 = vmax.xlane.f32.xlu1 %v7054_v38  ;;  %v7347_v24 = vpop.xlane.xlu0 %7346  ;;  %v18837_v38 = vmul.f32 0.25, %v18622_v27  ;;  %v18847_v27 = vmul.f32 0.25, %v18630_v43  ;;  %v18856_v43 = vmul.f32 0.25, %v18651_v3 }
 0xdbb   :  { %15121 = vrcp.f32 %v7347_v24 }
 0xdbc   :  { %7088 = vmax.xlane.f32.xlu0 %v7087_v7  ;;  %15123 = vrcp.f32 %v18706_v47  ;;  %v7063_v3 = vsel %vm6924_vm3, %v18856_v43, -inf }
 0xdbd   :  { %15125 = vrcp.f32 %v18733_v21  ;;  %v7057_v21 = vsel %vm6924_vm3, %v18847_v27, -inf }
 0xdbe   :  { %v7365_v22 = vpop.xlane.xlu1 %7364  ;;  %7061 = vmax.xlane.f32.xlu1 %v7060_v50  ;;  %v18834_v34 = vpop.xlane.xlu0 %7370 }
 0xdc0   :  { %7046 = vmax.xlane.f32.xlu0 %v7045_v33  ;;  %v7051_v33 = vsel %vm6924_vm3, %v18837_v38, -inf }
 0xdc1   :  { %v15118_v46 = vpop.eup %15117 }
 0xdc2   :  { %v15120_v24 = vpop.eup %15119  ;;  %v7350_v7 = vpop.xlane.xlu1 %7349  ;;  %7067 = vmax.xlane.f32.xlu1 %v7066_v10  ;;  %v7576_v50 = vmul.f32 %v15118_v46, %v18561_v58 }
 0xdc3   :  { %15127 = vrcp.f32 %v7350_v7  ;;  %v7353_v53 = vpop.xlane.xlu0 %7352  ;;  %v7575_v47 = vmul.f32 %v15120_v24, %v18565_v15 }
 0xdc4   :  { %15129 = vrcp.f32 %v7353_v53  ;;  %7052 = vmax.xlane.f32.xlu0 %v7051_v33 }
 0xdc5   :  { %13457 = vmatprep.mubr.msk.f32.mxu0 %vm6924_vm3, %v7575_v47  ;;  %v15122_v9 = vpop.eup %15121  ;;  %15131 = vrcp.f32 %v18713_v11 }
 0xdc6   :  { %13458 = vmatmul.mubr.msk.f32.gmra.mrb[140].mxu0 %vm6924_vm3, %v7576_v50  ;;  %v7374_v58 = vpop.xlane.xlu1 %7373  ;;  %15133 = vrcp.f32 %v18749_v60  ;;  %v7577_v15 = vmul.f32 %v15122_v9, %v18573_v19  ;;  %v15124_v46 = vpop.eup %15123 }
 0xdc7   :  { %15135 = vrcp.f32 %v18722_v35  ;;  %v18865_v53 = vpop.xlane.xlu0 %7379  ;;  %v15126_v60 = vpop.eup %15125  ;;  %v7566_v9 = vmul.f32 %v15124_v46, %v18500_v8  ;;  %v20831_v46 = vld [vmem:[#allocation47_spill] sm:$0xff] }
 0xdc8   :  { %7058 = vmax.xlane.f32.xlu0 %v7057_v21  ;;  %13460 = vmatprep.mubr.msk.f32.mxu0 %vm6924_vm3, %v7577_v15  ;;  %15137 = vrcp.f32 %v18745_v57  ;;  %v7567_v50 = vmul.f32 %v15126_v60, %v18513_v61 }
 0xdca   :  { %v7356_v11 = vpop.xlane.xlu1 %7355 }
 0xdcb   :  { %15139 = vrcp.f32 %v7356_v11  ;;  %v7894_v47 = vpop.permute.xlu0 %7893 }
 0xdcc   :  { %7064 = vmax.xlane.f32.xlu0 %v7063_v3  ;;  %15141 = vrcp.f32 %v18731_v18  ;;  %v20832_v3 = vld [vmem:[#allocation45_spill] sm:$0xff] }
 0xdcd   :  { %v15128_v10 = vpop.eup %15127  ;;  %15143 = vrcp.f32 %v18800_v63 }
 0xdce   :  { %v15130_v24 = vpop.eup %15129  ;;  %v7630_v19 = vpop.permute.xlu1 %7629  ;;  %v7578_v35 = vmul.f32 %v15128_v10, %v18588_v32  ;;  %15145 = vrcp.f32 %v18788_v30 }
 0xdcf   :  { %13438 = vmatprep.subr.mxu1 %v7630_v19  ;;  %v7579_v57 = vmul.f32 %v15130_v24, %v18590_v17  ;;  %v15132_v7 = vpop.eup %15131  ;;  %15147 = vrcp.f32 %v7365_v22 }
 0xdd0   :  { %13439 = vmatpush3.msra.mxu1 %v7630_v19  ;;  %13461 = vmatmul.mubr.msk.f32.gmra.mrb[142].mxu0 %vm6924_vm3, %v7578_v35  ;;  %v15134_v33 = vpop.eup %15133  ;;  %v7568_v32 = vmul.f32 %v15132_v7, %v18509_v45  ;;  %15149 = vrcp.f32 %v18822_v52 }
 0xdd1   :  { %13441 = vmatmul.mubr.msk.f32.vlgmr.msra.gmra.mrb[136].mxu1 %vm6924_vm3, %v7566_v9  ;;  %13463 = vmatprep.mubr.msk.f32.mxu0 %vm6924_vm3, %v7579_v57  ;;  %v15136_v8 = vpop.eup %15135  ;;  %v7569_v18 = vmul.f32 %v15134_v33, %v18517_v16  ;;  %15151 = vrcp.f32 %v18834_v34 }
 0xdd2   :  { %13466 = vmatprep.subr.mxu1 %v7894_v47  ;;  %13443 = vmatprep.mubr.msk.f32.mxu1 %vm6924_vm3, %v7567_v50  ;;  %v15138_v17 = vpop.eup %15137  ;;  %v7570_v63 = vmul.f32 %v15136_v8, %v18519_v39  ;;  %15153 = vrcp.f32 %v7374_v58 }
 0xdd3   :  { %13467 = vmatpush3.msra.mxu1 %v7894_v47  ;;  %v7571_v45 = vmul.f32 %v15138_v17, %v18529_v51  ;;  %15155 = vrcp.f32 %v18865_v53 }
 0xdd5   :  { %v15140_v61 = vpop.eup %15139  ;;  %13444 = vmatmul.mubr.msk.f32.gmra.mrb[138].mxu1 %vm6924_vm3, %v7568_v32 }
 0xdd6   :  { %13446 = vmatprep.mubr.msk.f32.mxu1 %vm6924_vm3, %v7569_v18  ;;  %v7580_v30 = vmul.f32 %v15140_v61, %v18602_v23  ;;  %v15142_v22 = vpop.eup %15141 }
 0xdd7   :  { %v15144_v21 = vpop.eup %15143  ;;  %v7572_v16 = vmul.f32 %v15142_v22, %v18525_v12 }
 0xdd8   :  { %13464 = vmatmul.mubr.msk.f32.gmra.mrb[144].mxu0 %vm6924_vm3, %v7580_v30  ;;  %v15146_v52 = vpop.eup %15145  ;;  %v7581_v23 = vmul.f32 %v15144_v21, %v18555_v31 }
 0xdd9   :  { %13447 = vmatmul.mubr.msk.f32.gmra.mrb[140].mxu1 %vm6924_vm3, %v7570_v63  ;;  %v15148_v15 = vpop.eup %15147  ;;  %v7582_v39 = vmul.f32 %v15146_v52, %v18551_v54 }
 0xdda   :  { %13449 = vmatprep.mubr.msk.f32.mxu1 %vm6924_vm3, %v7571_v45  ;;  %v15150_v34 = vpop.eup %15149  ;;  %v7583_v51 = vmul.f32 %v15148_v15, %v18576_v4 }
 0xddb   :  { %v15152_v11 = vpop.eup %15151  ;;  %v7584_v12 = vmul.f32 %v15150_v34, %v18567_v5 }
 0xddc   :  { %v15154_v58 = vpop.eup %15153  ;;  %v7585_v31 = vmul.f32 %v15152_v11, %v20831_v46 }
 0xddd   :  { %13450 = vmatmul.mubr.msk.f32.gmra.mrb[142].mxu1 %vm6924_vm3, %v7572_v16  ;;  %v7586_v60 = vmul.f32 %v15154_v58, %v20832_v3  ;;  %v15156_v57 = vpop.eup %15155 }
 0xdde   :  { %13468 = vmatprep.mubr.msk.f32.mxu1 %vm6924_vm3, %v7581_v23 }
 0xde1   :  { %13469 = vmatmul.mubr.msk.f32.vlgmr.msra.gmra.mrb[144].mxu1 %vm6924_vm3, %v7582_v39 }
 0xde2   :  { %13471 = vmatprep.mubr.msk.f32.mxu1 %vm6924_vm3, %v7583_v51 }
 0xde5   :  { %13472 = vmatmul.mubr.msk.f32.gmra.mrb[146].mxu1 %vm6924_vm3, %v7584_v12 }
 0xde6   :  { %13474 = vmatprep.mubr.msk.f32.mxu1 %vm6924_vm3, %v7585_v31 }
 0xde9   :  { %13475 = vmatmul.mubr.msk.f32.gmra.mrb[148].mxu1 %vm6924_vm3, %v7586_v60 }
 0xdfc   :  { %v7386_v54 = vpop.xlane.xlu0 %7385 }
 0xdfd   :  { %15157 = vrcp.f32 %v7386_v54  ;;  %v20834_v54 = vld [vmem:[#allocation46_spill] sm:$0xff] }
 0xdff   :  { %v7377_v4 = vpop.xlane.xlu1 %7376 }
 0xe00   :  { %15159 = vrcp.f32 %v7377_v4  ;;  %v7383_v10 = vpop.xlane.xlu0 %7382 }
 0xe01   :  { %15161 = vrcp.f32 %v7383_v10 }
 0xe03   :  { %v7023_v5 = vpop.xlane.xlu1 %7022 }
 0xe04   :  { %v7149_v24 = vsub.f32 %v18665_v42, %v7023_v5  ;;  %v7392_v19 = vpop.xlane.xlu0 %7391  ;;  %v20833_v42 = vld [vmem:[#allocation50_spill] sm:$0xff] }
 0xe05   :  { %15163 = vrcp.f32 %v7392_v19  ;;  %v7588_v61 = vmul.f32 %v15156_v57, %v20833_v42 }
 0xe06   :  { %v7245_v35 = vmul.f32 1.442695, %v7149_v24 }
 0xe07   :  { %v7029_v9 = vpop.xlane.xlu1 %7028  ;;  %v15158_v33 = vpop.eup %15157 }
 0xe08   :  { %15165 = vpow2.f32 %v7245_v35  ;;  %v7151_v7 = vsub.f32 %v18679_v13, %v7029_v9  ;;  %v7389_v50 = vpop.xlane.xlu0 %7388  ;;  %v7590_v13 = vmul.f32 %v15158_v33, %v18646_v44 }
 0xe09   :  { %15167 = vrcp.f32 %v7389_v50  ;;  %v20836_v50 = vld [vmem:[#allocation21_spill] sm:$0xff] }
 0xe0a   :  { %v15160_v53 = vpop.eup %15159  ;;  %v7249_v47 = vmul.f32 1.442695, %v7151_v7 }
 0xe0b   :  { %v15162_v8 = vpop.eup %15161  ;;  %v7398_v32 = vpop.xlane.xlu1 %7397  ;;  %v7587_v17 = vmul.f32 %v15160_v53, %v18653_v29 }
 0xe0c   :  { %15169 = vpow2.f32 %v7249_v47  ;;  %v8026_v18 = vpop.permute.xlu0 %8025  ;;  %v7589_v30 = vmul.f32 %v15162_v8, %v18657_v37 }
 0xe0d   :  { %13477 = vmatprep.mubr.msk.f32.mxu1 %vm6924_vm3, %v7587_v17  ;;  %13480 = vmatprep.subr.mxu0 %v8026_v18  ;;  %15171 = vrcp.f32 %v7398_v32  ;;  %v20837_v17 = vld [vmem:[#allocation20_spill] sm:$0xff] }
 0xe0e   :  { %13478 = vmatmul.mubr.msk.f32.gmra.mrb[150].mxu1 %vm6924_vm3, %v7588_v61  ;;  %13481 = vmatpush3.msra.mxu0 %v8026_v18 }
 0xe0f   :  { %13482 = vmatprep.mubr.msk.f32.mxu0 %vm6924_vm3, %v7589_v30  ;;  %v7395_v63 = vpop.xlane.xlu1 %7394  ;;  %v15164_v29 = vpop.eup %15163 }
 0xe10   :  { %15173 = vrcp.f32 %v7395_v63  ;;  %13483 = vmatmul.mubr.msk.f32.vlgmr.msra.gmra.mrb[146].mxu0 %vm6924_vm3, %v7590_v13  ;;  %v7592_v16 = vmul.f32 %v15164_v29, %v18671_v28 }
 0xe12   :  { %v18917_v22 = vpop.eup %15165 }
 0xe13   :  { %v15168_v45 = vpop.eup %15167  ;;  %v7404_v37 = vpop.xlane.xlu1 %7403  ;;  %v7405_v21 = vsel %vm6924_vm3, %v18917_v22, 0.0 }
 0xe14   :  { %7406 = vadd.xlane.f32.xlu0 %v7405_v21  ;;  %v7591_v44 = vmul.f32 %v15168_v45, %v18685_v1  ;;  %15175 = vrcp.f32 %v7404_v37 }
 0xe16   :  { %v18923_v52 = vpop.eup %15169  ;;  %13485 = vmatprep.mubr.msk.f32.mxu0 %vm6924_vm3, %v7591_v44 }
 0xe17   :  { %v7401_v23 = vpop.xlane.xlu1 %7400  ;;  %13486 = vmatmul.mubr.msk.f32.gmra.mrb[148].mxu0 %vm6924_vm3, %v7592_v16  ;;  %v7411_v15 = vsel %vm6924_vm3, %v18923_v52, 0.0  ;;  %v15172_v39 = vpop.eup %15171 }
 0xe18   :  { %15177 = vrcp.f32 %v7401_v23  ;;  %7412 = vadd.xlane.f32.xlu0 %v7411_v15  ;;  %v7594_v28 = vmul.f32 %v15172_v39, %v18693_v26 }
 0xe1a   :  { %v15174_v34 = vpop.eup %15173 }
 0xe1b   :  { %v7032_v51 = vpop.xlane.xlu1 %7031  ;;  %v7593_v1 = vmul.f32 %v15174_v34, %v18703_v6  ;;  %v20835_v6 = vld [vmem:[#allocation25_spill] sm:$0xff] }
 0xe1c   :  { %v7152_v33 = vsub.f32 %v20836_v50, %v7032_v51 }
 0xe1d   :  { %13488 = vmatprep.mubr.msk.f32.mxu0 %vm6924_vm3, %v7593_v1 }
 0xe1e   :  { %13489 = vmatmul.mubr.msk.f32.gmra.mrb[150].mxu0 %vm6924_vm3, %v7594_v28  ;;  %v15176_v58 = vpop.eup %15175 }
 0xe1f   :  { %v7035_v11 = vpop.xlane.xlu1 %7034  ;;  %v7596_v4 = vmul.f32 %v15176_v58, %v20834_v54 }
 0xe20   :  { %v7153_v12 = vsub.f32 %v18727_v41, %v7035_v11 }
 0xe22   :  { %v15178_v46 = vpop.eup %15177  ;;  %v7253_v31 = vmul.f32 1.442695, %v7153_v12 }
 0xe23   :  { %v7038_v3 = vpop.xlane.xlu1 %7037  ;;  %v7595_v60 = vmul.f32 %v15178_v46, %v18717_v48 }
 0xe24   :  { %15179 = vpow2.f32 %v7253_v31  ;;  %v7154_v18 = vsub.f32 %v20837_v17, %v7038_v3 }
 0xe25   :  { %13491 = vmatprep.mubr.msk.f32.mxu0 %vm6924_vm3, %v7595_v60 }
 0xe26   :  { %13492 = vmatmul.mubr.msk.f32.gmra.mrb[152].mxu0 %vm6924_vm3, %v7596_v4  ;;  %v7255_v63 = vmul.f32 1.442695, %v7154_v18 }
 0xe27   :  { %v7041_v26 = vpop.xlane.xlu1 %7040 }
 0xe28   :  { %v7155_v10 = vsub.f32 %v20835_v6, %v7041_v26 }
 0xe2a   :  { %v7257_v5 = vmul.f32 1.442695, %v7155_v10 }
 0xe2b   :  { %v7044_v24 = vpop.xlane.xlu1 %7043 }
 0xe2c   :  { %15181 = vpow2.f32 %v7257_v5  ;;  %v7156_v29 = vsub.f32 %v18752_v36, %v7044_v24 }
 0xe2e   :  { %v18939_v41 = vpop.eup %15179  ;;  %v7259_v44 = vmul.f32 1.442695, %v7156_v29 }
 0xe2f   :  { %v7071_v19 = vpop.xlane.xlu1 %7070  ;;  %v7417_v35 = vsel %vm6924_vm3, %v18939_v41, 0.0 }
 0xe30   :  { %v7165_v48 = vsub.f32 %v18757_v62, %v7071_v19  ;;  %7418 = vadd.xlane.f32.xlu0 %v7417_v35  ;;  %v7251_v62 = vmul.f32 1.442695, %v7152_v33 }
 0xe32   :  { %v7277_v9 = vmul.f32 1.442695, %v7165_v48  ;;  %v20838_v48 = vld [vmem:[#allocation34_spill] sm:$0xff] }
 0xe33   :  { %v7074_v61 = vpop.xlane.xlu1 %7073 }
 0xe34   :  { %15183 = vpow2.f32 %v7277_v9  ;;  %v7166_v16 = vsub.f32 %v18762_v2, %v7074_v61  ;;  %v18998_v9 = vmul.f32 0.25, %v20838_v48 }
 0xe36   :  { %v18944_v57 = vpop.eup %15181 }
 0xe37   :  { %v7423_v7 = vsel %vm6924_vm3, %v18944_v57, 0.0  ;;  %v7080_v21 = vpop.xlane.xlu1 %7079 }
 0xe38   :  { %7424 = vadd.xlane.f32.xlu0 %v7423_v7  ;;  %v7168_v39 = vsub.f32 %v18767_v14, %v7080_v21 }
 0xe3a   :  { %v7283_v1 = vmul.f32 1.442695, %v7168_v39 }
 0xe3b   :  { %v7086_v34 = vpop.xlane.xlu1 %7085 }
 0xe3c   :  { %v7170_v2 = vsub.f32 %v18775_v55, %v7086_v34 }
 0xe3d   :  { %v7026_v53 = vpop.xlane.xlu0 %7025 }
 0xe3e   :  { %v18949_v47 = vpop.eup %15183  ;;  %v7150_v8 = vsub.f32 %v18781_v40, %v7026_v53  ;;  %v7287_v58 = vmul.f32 1.442695, %v7170_v2  ;;  %v7093_v53 = vsel %vm6924_vm3, %v18998_v9, -inf }
 0xe3f   :  { %v7453_v32 = vsel %vm6924_vm3, %v18949_v47, 0.0  ;;  %v7092_v54 = vpop.xlane.xlu1 %7091 }
 0xe40   :  { %v7247_v42 = vmul.f32 1.442695, %v7150_v8  ;;  %7454 = vadd.xlane.f32.xlu0 %v7453_v32  ;;  %v7172_v6 = vsub.f32 %v18784_v56, %v7092_v54  ;;  %v20839_v56 = vld [vmem:[#allocation24_spill] sm:$0xff] }
 0xe41   :  { %v7077_v30 = vpop.xlane.xlu0 %7076  ;;  %v19003_v33 = vmul.f32 0.25, %v20839_v56  ;;  %v20840_v8 = vld [vmem:[#allocation52_spill] sm:$0xff]  ;;  %v20847_v56 = vld [vmem:[#allocation26_spill] sm:$0xff] }
 0xe42   :  { %15185 = vpow2.f32 %v7247_v42  ;;  %v7167_v13 = vsub.f32 %v18791_v25, %v7077_v30  ;;  %v7279_v25 = vmul.f32 1.442695, %v7166_v16  ;;  %v7291_v19 = vmul.f32 1.442695, %v7172_v6 }
 0xe43   :  { %15187 = vpow2.f32 %v7251_v62  ;;  %v7096_v62 = vsel %vm6924_vm3, %v19003_v33, -inf  ;;  %v7050_v21 = vpop.xlane.xlu1 %7049 }
 0xe44   :  { %v7281_v45 = vmul.f32 1.442695, %v7167_v13  ;;  %v7158_v16 = vsub.f32 %v18796_v49, %v7050_v21 }
 0xe45   :  { %v7083_v37 = vpop.xlane.xlu0 %7082 }
 0xe46   :  { %15189 = vpow2.f32 %v7281_v45  ;;  %v7169_v40 = vsub.f32 %v18803_v0, %v7083_v37  ;;  %v20842_v37 = vld [vmem:[#allocation53_spill] sm:$0xff] }
 0xe47   :  { %15191 = vpow2.f32 %v7255_v63 }
 0xe48   :  { %v7285_v23 = vmul.f32 1.442695, %v7169_v40  ;;  %v19030_v40 = vmul.f32 0.25, %v20842_v37 }
 0xe49   :  { %v7089_v10 = vpop.xlane.xlu0 %7088 }
 0xe4a   :  { %15193 = vpow2.f32 %v7285_v23  ;;  %v7171_v35 = vsub.f32 %v18813_v20, %v7089_v10  ;;  %v20841_v20 = vld [vmem:[#allocation29_spill] sm:$0xff]  ;;  %v7102_v34 = vsel %vm6924_vm3, %v19030_v40, -inf  ;;  %v7056_v10 = vpop.xlane.xlu1 %7055 }
 0xe4b   :  { %15195 = vpow2.f32 %v7259_v44  ;;  %v19010_v32 = vmul.f32 0.25, %v20841_v20 }
 0xe4c   :  { %v18959_v15 = vpop.eup %15185  ;;  %15197 = vpow2.f32 %v7279_v25  ;;  %v7289_v50 = vmul.f32 1.442695, %v7171_v35  ;;  %v20843_v25 = vld [vmem:[#allocation51_spill] sm:$0xff] }
 0xe4d   :  { %v7408_v36 = vsel %vm6924_vm3, %v18959_v15, 0.0  ;;  %v18964_v51 = vpop.eup %15187  ;;  %15199 = vpow2.f32 %v7283_v1  ;;  %v7099_v17 = vsel %vm6924_vm3, %v19010_v32, -inf  ;;  %v7047_v29 = vpop.xlane.xlu0 %7046  ;;  %v19034_v39 = vmul.f32 0.25, %v20843_v25  ;;  %v20850_v25 = vld [vmem:[#allocation19_spill] sm:$0xff] }
 0xe4e   :  { %7409 = vadd.xlane.f32.xlu1 %v7408_v36  ;;  %v7414_v28 = vsel %vm6924_vm3, %v18964_v51, 0.0  ;;  %15201 = vpow2.f32 %v7287_v58  ;;  %v7157_v45 = vsub.f32 %v18825_v59, %v7047_v29  ;;  %v20844_v36 = vld [vmem:[#allocation54_spill] sm:$0xff]  ;;  %v7263_v59 = vmul.f32 1.442695, %v7158_v16 }
 0xe4f   :  { %15203 = vpow2.f32 %v7291_v19  ;;  %v7108_v49 = vsel %vm6924_vm3, %v19034_v39, -inf }
 0xe50   :  { %v18966_v0 = vpop.eup %15189  ;;  %15205 = vpow2.f32 %v7289_v50  ;;  %v7261_v23 = vmul.f32 1.442695, %v7157_v45 }
 0xe51   :  { %v7459_v11 = vsel %vm6924_vm3, %v18966_v0, 0.0  ;;  %v18973_v14 = vpop.eup %15191  ;;  %v7053_v44 = vpop.xlane.xlu0 %7052 }
 0xe52   :  { %7415 = vadd.xlane.f32.xlu1 %v7414_v28  ;;  %7460 = vadd.xlane.f32.xlu0 %v7459_v11  ;;  %v7420_v46 = vsel %vm6924_vm3, %v18973_v14, 0.0  ;;  %15207 = vpow2.f32 %v7261_v23  ;;  %v7159_v2 = vsub.f32 %v18837_v38, %v7053_v44  ;;  %v20845_v28 = vld [vmem:[#allocation37_spill] sm:$0xff] }
 0xe53   :  { %v19042_v11 = vmul.f32 0.25, %v20845_v28  ;;  %15209 = vpow2.f32 %v7263_v59 }
 0xe54   :  { %v18975_v12 = vpop.eup %15193  ;;  %v7265_v58 = vmul.f32 1.442695, %v7159_v2 }
 0xe55   :  { %v7465_v55 = vsel %vm6924_vm3, %v18975_v12, 0.0  ;;  %v18981_v31 = vpop.eup %15195  ;;  %v7059_v1 = vpop.xlane.xlu0 %7058 }
 0xe56   :  { %7421 = vadd.xlane.f32.xlu1 %v7420_v46  ;;  %7466 = vadd.xlane.f32.xlu0 %v7465_v55  ;;  %v7426_v3 = vsel %vm6924_vm3, %v18981_v31, 0.0  ;;  %v18985_v60 = vpop.eup %15197  ;;  %v7161_v46 = vsub.f32 %v18847_v27, %v7059_v1  ;;  %v20846_v55 = vld [vmem:[#allocation43_spill] sm:$0xff]  ;;  %15211 = vpow2.f32 %v7265_v58  ;;  %v20852_v58 = vld [vmem:[#allocation30_spill] sm:$0xff] }
 0xe57   :  { %v7456_v4 = vsel %vm6924_vm3, %v18985_v60, 0.0  ;;  %v18989_v26 = vpop.eup %15199 }
 0xe58   :  { %v7462_v5 = vsel %vm6924_vm3, %v18989_v26, 0.0  ;;  %v18994_v24 = vpop.eup %15201  ;;  %v7269_v38 = vmul.f32 1.442695, %v7161_v46  ;;  %v19093_v46 = vmul.f32 0.25, %v20852_v58 }
 0xe59   :  { %v7468_v7 = vsel %vm6924_vm3, %v18994_v24, 0.0  ;;  %v19016_v18 = vpop.eup %15203  ;;  %v7065_v54 = vpop.xlane.xlu0 %7064 }
 0xe5a   :  { %7427 = vadd.xlane.f32.xlu1 %v7426_v3  ;;  %v7474_v42 = vsel %vm6924_vm3, %v19016_v18, 0.0  ;;  %v19020_v61 = vpop.eup %15205  ;;  %v19048_v3 = vmul.f32 0.25, %v20846_v55  ;;  %v7163_v6 = vsub.f32 %v18856_v43, %v7065_v54  ;;  %15213 = vpow2.f32 %v7269_v38  ;;  %v7062_v43 = vpop.xlane.xlu1 %7061 }
 0xe5b   :  { %v7471_v30 = vsel %vm6924_vm3, %v19020_v61, 0.0 }
 0xe5c   :  { %v19055_v19 = vpop.eup %15207  ;;  %v7273_v27 = vmul.f32 1.442695, %v7163_v6 }
 0xe5d   :  { %v19063_v50 = vpop.eup %15209 }
 0xe5e   :  { %7457 = vadd.xlane.f32.xlu1 %v7456_v4  ;;  %v7111_v4 = vsel %vm6924_vm3, %v19042_v11, -inf  ;;  %15215 = vpow2.f32 %v7273_v27  ;;  %v7068_v29 = vpop.xlane.xlu1 %7067  ;;  %v7105_v27 = vsel %vm6924_vm3, %v19093_v46, -inf }
 0xe60   :  { %v19068_v20 = vpop.eup %15211 }
 0xe61   :  { %v7435_v45 = vsel %vm6924_vm3, %v19068_v20, 0.0 }
 0xe62   :  { %7463 = vadd.xlane.f32.xlu1 %v7462_v5  ;;  %v7114_v5 = vsel %vm6924_vm3, %v19048_v3, -inf }
 0xe64   :  { %v19073_v37 = vpop.eup %15213 }
 0xe65   :  { %20849 = vst [vmem:[#allocation3_spill] sm:$0xff] %v19073_v37  ;;  %v7441_v1 = vsel %vm6924_vm3, %v19073_v37, 0.0 }
 0xe66   :  { %7469 = vadd.xlane.f32.xlu1 %v7468_v7  ;;  %v7429_v7 = vsel %vm6924_vm3, %v19055_v19, 0.0 }
 0xe68   :  { %v19086_v59 = vpop.eup %15215 }
 0xe69   :  { %20851 = vst [vmem:[#allocation2_spill] sm:$0xff] %v19086_v59  ;;  %v7447_v55 = vsel %vm6924_vm3, %v19086_v59, 0.0 }
 0xe6a   :  { %7094 = vmax.xlane.f32.xlu1 %v7093_v53  ;;  %v7160_v53 = vsub.f32 %v20847_v56, %v7056_v10 }
 0xe6c   :  { %8157 = vrot.lane.b32.xlu0 %v20840_v8, %s15404_s9  ;;  %v7432_v8 = vsel %vm6924_vm3, %v19063_v50, 0.0 }
 0xe6e   :  { %7097 = vmax.xlane.f32.xlu1 %v7096_v62  ;;  %v7267_v62 = vmul.f32 1.442695, %v7160_v53 }
 0xe72   :  { %7100 = vmax.xlane.f32.xlu1 %v7099_v17  ;;  %v20848_v17 = vld [vmem:[#allocation18_spill] sm:$0xff] }
 0xe76   :  { %7475 = vadd.xlane.f32.xlu1 %v7474_v42  ;;  %v7162_v42 = vsub.f32 %v20848_v17, %v7062_v43 }
 0xe78   :  { %v7271_v23 = vmul.f32 1.442695, %v7162_v42 }
 0xe7a   :  { %7472 = vadd.xlane.f32.xlu1 %v7471_v30 }
 0xe7c   :  { %v19024_v13 = vpop.f32.mrb[138].mxu0 }
 0xe7d   :  { %v19026_v63 = vpop.f32.mrb[139].mxu0 }
 0xe8b   :  { %7103 = vmax.xlane.f32.xlu0 %v7102_v34  ;;  %8421 = vrot.lane.b32.xlu1 %v20844_v36, %s15404_s9  ;;  %v7164_v34 = vsub.f32 %v20850_v25, %v7068_v29 }
 0xe8d   :  { %v7275_v28 = vmul.f32 1.442695, %v7164_v34  ;;  %v20856_v34 = vld [vmem:[#allocation35_spill] sm:$0xff] }
 0xe8f   :  { %7109 = vmax.xlane.f32.xlu0 %v7108_v49 }
 0xe93   :  { %7112 = vmax.xlane.f32.xlu0 %v7111_v4 }
 0xe97   :  { %7115 = vmax.xlane.f32.xlu0 %v7114_v5 }
 0xe99   :  { %v19057_v35 = vpop.f32.mrb[140].mxu0 }
 0xe9a   :  { %v19059_v48 = vpop.f32.mrb[141].mxu0 }
 0xe9b   :  { %7430 = vadd.xlane.f32.xlu0 %v7429_v7 }
 0xe9f   :  { %7433 = vadd.xlane.f32.xlu0 %v7432_v8 }
 0xea1   :  { %v7407_v30 = vpop.xlane.xlu0 %7406 }
 0xea2   :  { %15217 = vrcp.f32 %v7407_v30 }
 0xea3   :  { %v19075_v21 = vpop.f32.mrb[142].mxu0  ;;  %7436 = vadd.xlane.f32.xlu0 %v7435_v45  ;;  %15219 = vpow2.f32 %v7267_v62 }
 0xea4   :  { %v19077_v44 = vpop.f32.mrb[136].mxu1  ;;  %v19079_v16 = vpop.f32.mrb[143].mxu0  ;;  %15221 = vpow2.f32 %v7271_v23 }
 0xea5   :  { %v19082_v36 = vpop.f32.mrb[137].mxu1  ;;  %15223 = vpow2.f32 %v7275_v28 }
 0xea7   :  { %7442 = vadd.xlane.f32.xlu0 %v7441_v1  ;;  %v7413_v1 = vpop.xlane.xlu0 %7412 }
 0xea8   :  { %v19088_v2 = vpop.f32.mrb[138].mxu1 }
 0xea9   :  { %v19090_v49 = vpop.f32.mrb[139].mxu1 }
 0xeab   :  { %v19097_v54 = vpop.f32.mrb[144].mxu0  ;;  %7448 = vadd.xlane.f32.xlu0 %v7447_v55 }
 0xeac   :  { %v15218_v4 = vpop.eup %15217  ;;  %v19099_v38 = vpop.f32.mrb[140].mxu1 }
 0xead   :  { %v19101_v6 = vpop.f32.mrb[145].mxu0  ;;  %v19103_v10 = vpop.f32.mrb[141].mxu1  ;;  %v7597_v5 = vmul.f32 %v15218_v4, %v18917_v22 }
 0xeae   :  { %v19108_v7 = vpop.eup %15219 }
 0xeaf   :  { %20853 = vst [vmem:[#allocation4_spill] sm:$0xff] %v19108_v7  ;;  %7106 = vmax.xlane.f32.xlu1 %v7105_v27  ;;  %13496 = vmatprep.mubr.msk.f32.mxu1 %vm6924_vm3, %v7597_v5  ;;  %v7438_v53 = vsel %vm6924_vm3, %v19108_v7, 0.0  ;;  %v19117_v8 = vpop.eup %15221 }
 0xeb0   :  { %v19111_v43 = vpop.f32.mrb[142].mxu1  ;;  %20854 = vst [vmem:[#allocation5_spill] sm:$0xff] %v19117_v8  ;;  %v7444_v17 = vsel %vm6924_vm3, %v19117_v8, 0.0  ;;  %v19125_v42 = vpop.eup %15223 }
 0xeb1   :  { %v19113_v56 = vpop.f32.mrb[143].mxu1  ;;  %20855 = vst [vmem:[#allocation6_spill] sm:$0xff] %v19125_v42  ;;  %v7450_v45 = vsel %vm6924_vm3, %v19125_v42, 0.0 }
 0xeb3   :  { %7439 = vadd.xlane.f32.xlu1 %v7438_v53 }
 0xeb4   :  { %v19119_v62 = vpop.f32.mrb[144].mxu1 }
 0xeb5   :  { %v19121_v22 = vpop.f32.mrb[145].mxu1 }
 0xeb7   :  { %7445 = vadd.xlane.f32.xlu1 %v7444_v17 }
 0xeb8   :  { %v19127_v30 = vpop.f32.mrb[146].mxu1 }
 0xeb9   :  { %v19129_v29 = vpop.f32.mrb[147].mxu1 }
 0xebb   :  { %7451 = vadd.xlane.f32.xlu1 %v7450_v45 }
 0xebc   :  { %v19133_v23 = vpop.f32.mrb[148].mxu1 }
 0xebd   :  { %v19135_v25 = vpop.f32.mrb[149].mxu1  ;;  %v7419_v28 = vpop.xlane.xlu0 %7418 }
 0xec1   :  { %8289 = vrot.lane.b32.xlu0 %v20856_v34, %s15404_s9 }
 0xec5   :  { %v7425_v58 = vpop.xlane.xlu0 %7424 }
 0xecd   :  { %v7455_v55 = vpop.xlane.xlu0 %7454 }
 0xedb   :  { %v7410_v4 = vpop.xlane.xlu1 %7409 }
 0xedc   :  { %15225 = vrcp.f32 %v7410_v4 }
 0xedd   :  { %15227 = vrcp.f32 %v7413_v1 }
 0xedf   :  { %v7416_v5 = vpop.xlane.xlu1 %7415  ;;  %v7461_v27 = vpop.xlane.xlu0 %7460 }
 0xee0   :  { %15229 = vrcp.f32 %v7416_v5 }
 0xee1   :  { %15231 = vrcp.f32 %v7419_v28  ;;  %v19139_v53 = vpop.f32.mrb[150].mxu1 }
 0xee2   :  { %20857 = vst [vmem:[#allocation7_spill] sm:$0xff] %v19139_v53  ;;  %v19141_v17 = vpop.f32.mrb[151].mxu1 }
 0xee3   :  { %v19143_v45 = vpop.f32.mrb[146].mxu0  ;;  %v7422_v42 = vpop.xlane.xlu1 %7421 }
 0xee4   :  { %20858 = vst [vmem:[#allocation8_spill] sm:$0xff] %v19143_v45  ;;  %v19145_v59 = vpop.f32.mrb[147].mxu0  ;;  %15233 = vrcp.f32 %v7422_v42  ;;  %v7467_v34 = vpop.xlane.xlu0 %7466 }
 0xee5   :  { %20859 = vst [vmem:[#allocation9_spill] sm:$0xff] %v19145_v59  ;;  %15235 = vrcp.f32 %v7425_v58 }
 0xee6   :  { %v15226_v8 = vpop.eup %15225 }
 0xee7   :  { %v15228_v37 = vpop.eup %15227  ;;  %v7598_v1 = vmul.f32 %v15226_v8, %v18959_v15  ;;  %v7428_v4 = vpop.xlane.xlu1 %7427 }
 0xee8   :  { %15237 = vrcp.f32 %v7428_v4  ;;  %v8158_v5 = vpop.permute.xlu0 %8157  ;;  %v7599_v45 = vmul.f32 %v15228_v37, %v18923_v52 }
 0xee9   :  { %15239 = vrcp.f32 %v7455_v55  ;;  %13494 = vmatprep.subr.mxu1 %v8158_v5 }
 0xeea   :  { %v15230_v28 = vpop.eup %15229  ;;  %13495 = vmatpush3.msra.mxu1 %v8158_v5  ;;  %v19148_v7 = vpop.f32.mrb[148].mxu0  ;;  %15241 = vrcp.f32 %v7461_v27 }
 0xeeb   :  { %v15232_v53 = vpop.eup %15231  ;;  %13497 = vmatmul.mubr.msk.f32.vlgmr.msra.gmra.mrb[152].mxu1 %vm6924_vm3, %v7598_v1  ;;  %v19152_v42 = vpop.f32.mrb[149].mxu0  ;;  %v7600_v59 = vmul.f32 %v15230_v28, %v18964_v51 }
 0xeec   :  { %v7458_v58 = vpop.xlane.xlu1 %7457  ;;  %13499 = vmatprep.mubr.msk.f32.mxu1 %vm6924_vm3, %v7599_v45  ;;  %v7601_v8 = vmul.f32 %v15232_v53, %v18939_v41 }
 0xeed   :  { %15243 = vrcp.f32 %v7458_v58  ;;  %v8685_v58 = vld [vmem:[%s20534_s3 + $0x80] sm:$0xff] }
 0xeee   :  { %v15234_v15 = vpop.eup %15233 }
 0xeef   :  { %v15236_v55 = vpop.eup %15235  ;;  %13500 = vmatmul.mubr.msk.f32.gmra.mrb[154].mxu1 %vm6924_vm3, %v7600_v59  ;;  %v7602_v5 = vmul.f32 %v15234_v15, %v18973_v14 }
 0xef0   :  { %v7464_v4 = vpop.xlane.xlu1 %7463  ;;  %13502 = vmatprep.mubr.msk.f32.mxu1 %vm6924_vm3, %v7601_v8  ;;  %v7603_v51 = vmul.f32 %v15236_v55, %v18944_v57 }
 0xef1   :  { %v19160_v52 = vpop.f32.mrb[150].mxu0 }
 0xef2   :  { %v15238_v37 = vpop.eup %15237  ;;  %v19162_v1 = vpop.f32.mrb[151].mxu0 }
 0xef3   :  { %v15240_v28 = vpop.eup %15239  ;;  %13503 = vmatmul.mubr.msk.f32.gmra.mrb[156].mxu1 %vm6924_vm3, %v7602_v5  ;;  %v7604_v41 = vmul.f32 %v15238_v37, %v18981_v31 }
 0xef4   :  { %v7470_v45 = vpop.xlane.xlu1 %7469  ;;  %13505 = vmatprep.mubr.msk.f32.mxu1 %vm6924_vm3, %v7603_v51  ;;  %v7613_v59 = vmul.f32 %v15240_v28, %v18949_v47  ;;  %v15242_v27 = vpop.eup %15241 }
 0xef7   :  { %13506 = vmatmul.mubr.msk.f32.gmra.mrb[158].mxu1 %vm6924_vm3, %v7604_v41  ;;  %v15244_v28 = vpop.eup %15243 }
 0xef8   :  { %v7095_v14 = vpop.xlane.xlu1 %7094  ;;  %13524 = vmatprep.mubr.msk.f32.mxu1 %vm6924_vm3, %v7613_v59 }
 0xef9   :  { %v19171_v53 = vpop.f32.mrb[152].mxu0  ;;  %v7173_v15 = vsub.f32 %v18998_v9, %v7095_v14  ;;  %v8687_v9 = vld [vmem:[%s20534_s3 + $0x90] sm:$0xff] }
 0xefa   :  { %v19174_v57 = vpop.f32.mrb[153].mxu0 }
 0xefb   :  { %v7293_v31 = vmul.f32 1.442695, %v7173_v15  ;;  %v7614_v15 = vmul.f32 %v15244_v28, %v18985_v60 }
 0xefc   :  { %v7098_v8 = vpop.xlane.xlu1 %7097 }
 0xefd   :  { %v7174_v55 = vsub.f32 %v19003_v33, %v7098_v8  ;;  %v8688_v33 = vld [vmem:[%s20534_s3 + $0x98] sm:$0xff] }
 0xeff   :  { %v7295_v5 = vmul.f32 1.442695, %v7174_v55 }
 0xf00   :  { %v7101_v37 = vpop.xlane.xlu1 %7100 }
 0xf01   :  { %15245 = vpow2.f32 %v7295_v5 }
 0xf02   :  { %15247 = vpow2.f32 %v7293_v31  ;;  %v7615_v31 = vmul.f32 %v15242_v27, %v18966_v0 }
 0xf03   :  { %15249 = vrcp.f32 %v7464_v4 }
 0xf04   :  { %v7476_v47 = vpop.xlane.xlu1 %7475  ;;  %15251 = vrcp.f32 %v7467_v34  ;;  %v8686_v34 = vld [vmem:[%s20534_s3 + $0x88] sm:$0xff] }
 0xf05   :  { %15253 = vrcp.f32 %v7470_v45  ;;  %v19191_v45 = vpack.c.bf16 %v8688_v33, %v8687_v9  ;;  %v19198_v8 = vpack.c.bf16 %v8686_v34, %v8685_v58  ;;  %v7175_v58 = vsub.f32 %v19010_v32, %v7101_v37 }
 0xf08   :  { %v7473_v51 = vpop.xlane.xlu1 %7472 }
 0xf09   :  { %15255 = vrcp.f32 %v7473_v51 }
 0xf0a   :  { %15257 = vrcp.f32 %v7476_v47 }
 0xf0b   :  { %v19189_v4 = vpop.eup %15245 }
 0xf0c   :  { %v8422_v41 = vpop.permute.xlu1 %8421  ;;  %v7480_v59 = vsel %vm6924_vm3, %v19189_v4, 0.0  ;;  %v19195_v14 = vpop.eup %15247 }
 0xf0d   :  { %7481 = vadd.xlane.f32.xlu1 %v7480_v59  ;;  %13522 = vmatprep.subr.mxu1 %v8422_v41  ;;  %v15250_v55 = vpop.eup %15249  ;;  %v7477_v47 = vsel %vm6924_vm3, %v19195_v14, 0.0 }
 0xf0e   :  { %13523 = vmatpush3.msra.mxu1 %v8422_v41  ;;  %v15252_v5 = vpop.eup %15251  ;;  %v7616_v60 = vmul.f32 %v15250_v55, %v18989_v26  ;;  %v8689_v41 = vld [vmem:[%s20534_s3 + $0xa0] sm:$0xff] }
 0xf0f   :  { %13525 = vmatmul.mubr.msk.f32.vlgmr.msra.gmra.mrb[160].mxu1 %vm6924_vm3, %v7614_v15  ;;  %14167 = vmatprep.subr.bf16.mxu1 %v19191_v45  ;;  %v15254_v51 = vpop.eup %15253  ;;  %v7617_v0 = vmul.f32 %v15252_v5, %v18975_v12 }
 0xf10   :  { %13527 = vmatprep.mubr.msk.f32.mxu1 %vm6924_vm3, %v7615_v31  ;;  %14169 = vmatpush3.bf16.msra.mxu1 %v19191_v45  ;;  %v7618_v33 = vmul.f32 %v15254_v51, %v18994_v24  ;;  %v8690_v24 = vld [vmem:[%s20534_s3 + $0xa8] sm:$0xff] }
 0xf11   :  { %7478 = vadd.xlane.f32.xlu1 %v7477_v47  ;;  %14171 = vmatprep.subr.bf16.mxu1 %v19198_v8  ;;  %v19228_v37 = vpack.c.bf16 %v8690_v24, %v8689_v41 }
 0xf13   :  { %v15256_v9 = vpop.eup %15255  ;;  %13528 = vmatmul.mubr.msk.f32.gmra.mrb[162].mxu1 %vm6924_vm3, %v7616_v60 }
 0xf14   :  { %13530 = vmatprep.mubr.msk.f32.mxu1 %vm6924_vm3, %v7617_v0  ;;  %v15258_v27 = vpop.eup %15257  ;;  %v7619_v28 = vmul.f32 %v15256_v9, %v19020_v61  ;;  %v7297_v61 = vmul.f32 1.442695, %v7175_v58 }
 0xf15   :  { %v7620_v34 = vmul.f32 %v15258_v27, %v19016_v18 }
 0xf17   :  { %13531 = vmatmul.mubr.msk.f32.gmra.mrb[164].mxu1 %vm6924_vm3, %v7618_v33 }
 0xf18   :  { %13533 = vmatprep.mubr.msk.f32.mxu1 %vm6924_vm3, %v7619_v28  ;;  %v7104_v26 = vpop.xlane.xlu0 %7103  ;;  %v20862_v28 = vld [vmem:[#allocation4_spill] sm:$0xff] }
 0xf19   :  { %v7176_v12 = vsub.f32 %v19030_v40, %v7104_v26  ;;  %v20863_v26 = vld [vmem:[#allocation8_spill] sm:$0xff] }
 0xf1b   :  { %13534 = vmatmul.mubr.msk.f32.gmra.mrb[166].mxu1 %vm6924_vm3, %v7620_v34  ;;  %v7299_v59 = vmul.f32 1.442695, %v7176_v12  ;;  %v20864_v34 = vld [vmem:[#allocation3_spill] sm:$0xff] }
 0xf1c   :  { %13554 = vmatprep.mubr.msk.f32.mxu1 %vm1100_vm1, %v19026_v63  ;;  %v7110_v32 = vpop.xlane.xlu0 %7109 }
 0xf1d   :  { %15259 = vpow2.f32 %v7299_v59  ;;  %v7178_v18 = vsub.f32 %v19034_v39, %v7110_v32 }
 0xf1e   :  { %15261 = vpow2.f32 %v7297_v61  ;;  %v20865_v61 = vld [vmem:[#allocation5_spill] sm:$0xff] }
 0xf1f   :  { %13555 = vmatmul.mubr.msk.f32.vlgmr.msra.gmra.mrb[168].mxu1 %vm1100_vm1, %v19024_v13  ;;  %v7303_v40 = vmul.f32 1.442695, %v7178_v18  ;;  %v20866_v18 = vld [vmem:[#allocation2_spill] sm:$0xff] }
 0xf20   :  { %13557 = vmatprep.mubr.msk.f32.mxu1 %vm1100_vm1, %v19059_v48  ;;  %14173 = vmatpush3.bf16.msra.mxu1 %v19198_v8  ;;  %v19236_v15 = vpop.xlane.xlu0 %7112 }
 0xf21   :  { %14175 = vmatprep.subr.bf16.mxu1 %v19228_v37  ;;  %15263 = vpow2.f32 %v7303_v40 }
 0xf23   :  { %13558 = vmatmul.mubr.msk.f32.gmra.mrb[170].mxu1 %vm1100_vm1, %v19057_v35  ;;  %v8691_v35 = vld [vmem:[%s20534_s3 + $0xb0] sm:$0xff] }
 0xf24   :  { %13560 = vmatprep.mubr.msk.f32.mxu1 %vm1100_vm1, %v19079_v16  ;;  %v7116_v63 = vpop.xlane.xlu0 %7115 }
 0xf27   :  { %13561 = vmatmul.mubr.msk.f32.gmra.mrb[172].mxu1 %vm1100_vm1, %v19075_v21  ;;  %v19245_v13 = vpop.eup %15259  ;;  %v8692_v21 = vld [vmem:[%s20534_s3 + $0xb8] sm:$0xff] }
 0xf28   :  { %13563 = vmatprep.mubr.msk.f32.mxu1 %vm1100_vm1, %v19101_v6  ;;  %v7431_v39 = vpop.xlane.xlu0 %7430  ;;  %v7486_v48 = vsel %vm6924_vm3, %v19245_v13, 0.0  ;;  %v19251_v55 = vpop.eup %15261  ;;  %v19269_v47 = vpack.c.bf16 %v8692_v21, %v8691_v35 }
 0xf29   :  { %7487 = vadd.xlane.f32.xlu1 %v7486_v48  ;;  %15265 = vrcp.f32 %v7431_v39  ;;  %v7483_v31 = vsel %vm6924_vm3, %v19251_v55, 0.0 }
 0xf2b   :  { %13564 = vmatmul.mubr.msk.f32.gmra.mrb[174].mxu1 %vm1100_vm1, %v19097_v54  ;;  %v19261_v16 = vpop.eup %15263 }
 0xf2c   :  { %13570 = vmatprep.mubr.msk.f32.mxu1 %vm1100_vm1, %v19082_v36  ;;  %v7434_v6 = vpop.xlane.xlu0 %7433  ;;  %v7492_v5 = vsel %vm6924_vm3, %v19261_v16, 0.0 }
 0xf2d   :  { %7484 = vadd.xlane.f32.xlu1 %v7483_v31  ;;  %7493 = vadd.xlane.f32.xlu0 %v7492_v5  ;;  %15267 = vrcp.f32 %v7434_v6 }
 0xf2f   :  { %13571 = vmatmul.mubr.msk.f32.vlgmr.msra.gmra.mrb[168].mxu1 %vm1100_vm1, %v19077_v44 }
 0xf30   :  { %13573 = vmatprep.mubr.msk.f32.mxu1 %vm1100_vm1, %v19090_v49  ;;  %14177 = vmatpush3.bf16.msra.mxu1 %v19228_v37  ;;  %v7437_v36 = vpop.xlane.xlu0 %7436 }
 0xf31   :  { %14179 = vmatprep.subr.bf16.mxu1 %v19269_v47  ;;  %15269 = vrcp.f32 %v7437_v36 }
 0xf33   :  { %13574 = vmatmul.mubr.msk.f32.gmra.mrb[170].mxu1 %vm1100_vm1, %v19088_v2  ;;  %v15266_v54 = vpop.eup %15265 }
 0xf34   :  { %13576 = vmatprep.mubr.msk.f32.mxu1 %vm1100_vm1, %v19103_v10  ;;  %v7443_v60 = vpop.xlane.xlu0 %7442  ;;  %v7605_v44 = vmul.f32 %v15266_v54, %v19055_v19  ;;  %v7180_v10 = vsub.f32 %v19048_v3, %v7116_v63  ;;  %v20867_v63 = vld [vmem:[#allocation6_spill] sm:$0xff] }
 0xf35   :  { %15271 = vrcp.f32 %v7443_v60 }
 0xf36   :  { %13510 = vmatprep.mubr.msk.f32.mxu0 %vm6924_vm3, %v7605_v44  ;;  %v7307_v3 = vmul.f32 1.442695, %v7180_v10 }
 0xf37   :  { %13577 = vmatmul.mubr.msk.f32.gmra.mrb[172].mxu1 %vm1100_vm1, %v19099_v38  ;;  %v15268_v51 = vpop.eup %15267 }
 0xf38   :  { %13579 = vmatprep.mubr.msk.f32.mxu1 %vm1100_vm1, %v19113_v56  ;;  %v7449_v49 = vpop.xlane.xlu0 %7448  ;;  %v7606_v38 = vmul.f32 %v15268_v51, %v19063_v50 }
 0xf3b   :  { %13580 = vmatmul.mubr.msk.f32.gmra.mrb[174].mxu1 %vm1100_vm1, %v19111_v43  ;;  %v15270_v2 = vpop.eup %15269  ;;  %v7179_v43 = vsub.f32 %v19042_v11, %v19236_v15 }
 0xf3c   :  { %13586 = vmatprep.mubr.msk.f32.mxu1 %vm1100_vm1, %v19121_v22  ;;  %v7107_v19 = vpop.xlane.xlu1 %7106  ;;  %v8290_v0 = vpop.permute.xlu0 %8289  ;;  %v7607_v56 = vmul.f32 %v15270_v2, %v19068_v20  ;;  %v20860_v22 = vld [vmem:[#allocation7_spill] sm:$0xff] }
 0xf3d   :  { %v7177_v9 = vsub.f32 %v19093_v46, %v7107_v19  ;;  %13508 = vmatprep.subr.mxu0 %v8290_v0  ;;  %v7305_v20 = vmul.f32 1.442695, %v7179_v43 }
 0xf3e   :  { %13509 = vmatpush3.msra.mxu0 %v8290_v0 }
 0xf3f   :  { %13587 = vmatmul.mubr.msk.f32.vlgmr.msra.gmra.mrb[168].mxu1 %vm1100_vm1, %v19119_v62  ;;  %v7301_v33 = vmul.f32 1.442695, %v7177_v9  ;;  %13511 = vmatmul.mubr.msk.f32.vlgmr.msra.gmra.mrb[154].mxu0 %vm6924_vm3, %v7606_v38  ;;  %v15272_v62 = vpop.eup %15271 }
 0xf40   :  { %13589 = vmatprep.mubr.msk.f32.mxu1 %vm1100_vm1, %v19129_v29  ;;  %v7440_v50 = vpop.xlane.xlu1 %7439  ;;  %13513 = vmatprep.mubr.msk.f32.mxu0 %vm6924_vm3, %v7607_v56  ;;  %v20861_v29 = vld [vmem:[#allocation9_spill] sm:$0xff]  ;;  %v7609_v12 = vmul.f32 %v15272_v62, %v20864_v34 }
 0xf41   :  { %14181 = vmatpush3.bf16.msra.mxu1 %v19269_v47  ;;  %15273 = vpow2.f32 %v7301_v33 }
 0xf42   :  { %15275 = vrcp.f32 %v7440_v50 }
 0xf43   :  { %13590 = vmatmul.mubr.msk.f32.gmra.mrb[170].mxu1 %vm1100_vm1, %v19127_v30  ;;  %15277 = vpow2.f32 %v7307_v3 }
 0xf44   :  { %13592 = vmatprep.mubr.msk.f32.mxu1 %vm1100_vm1, %v19135_v25  ;;  %15279 = vrcp.f32 %v7449_v49  ;;  %v7446_v11 = vpop.xlane.xlu1 %7445 }
 0xf45   :  { %15281 = vrcp.f32 %v7446_v11 }
 0xf46   :  { %15283 = vpow2.f32 %v7305_v20 }
 0xf47   :  { %13593 = vmatmul.mubr.msk.f32.gmra.mrb[172].mxu1 %vm1100_vm1, %v19133_v23 }
 0xf48   :  { %13595 = vmatprep.mubr.msk.f32.mxu1 %vm1100_vm1, %v19141_v17  ;;  %v7452_v46 = vpop.xlane.xlu1 %7451 }
 0xf49   :  { %15285 = vrcp.f32 %v7452_v46 }
 0xf4b   :  { %13596 = vmatmul.mubr.msk.f32.gmra.mrb[174].mxu1 %vm1100_vm1, %v20860_v22  ;;  %v19314_v30 = vpop.eup %15273 }
 0xf4c   :  { %13602 = vmatprep.mubr.msk.f32.mxu1 %vm1100_vm1, %v20861_v29  ;;  %v15276_v25 = vpop.eup %15275  ;;  %v7489_v27 = vsel %vm6924_vm3, %v19314_v30, 0.0 }
 0xf4d   :  { %v19320_v23 = vpop.eup %15277  ;;  %7490 = vadd.xlane.f32.xlu1 %v7489_v27  ;;  %v7608_v17 = vmul.f32 %v15276_v25, %v20862_v28 }
 0xf4e   :  { %v15280_v58 = vpop.eup %15279  ;;  %v7498_v24 = vsel %vm6924_vm3, %v19320_v23, 0.0 }
 0xf4f   :  { %13603 = vmatmul.mubr.msk.f32.vlgmr.msra.gmra.mrb[168].mxu1 %vm1100_vm1, %v20863_v26  ;;  %v15282_v41 = vpop.eup %15281  ;;  %13514 = vmatmul.mubr.msk.f32.gmra.mrb[156].mxu0 %vm6924_vm3, %v7608_v17  ;;  %v7611_v40 = vmul.f32 %v15280_v58, %v20866_v18  ;;  %v19413_v26 = vld [vmem:[%s20532_s5 + $0x6] ss:$0 sm:$0xff] }
 0xf50   :  { %13605 = vmatprep.mubr.msk.f32.mxu1 %vm1100_vm1, %v19152_v42  ;;  %13516 = vmatprep.mubr.msk.f32.mxu0 %vm6924_vm3, %v7609_v12  ;;  %v7610_v59 = vmul.f32 %v15282_v41, %v20865_v61  ;;  %v19333_v32 = vpop.eup %15283  ;;  %v20871_v61 = vld [vmem:[#allocation31_spill] sm:$0xff] }
 0xf51   :  { %7499 = vadd.xlane.f32.xlu1 %v7498_v24  ;;  %v7495_v42 = vsel %vm6924_vm3, %v19333_v32, 0.0 }
 0xf53   :  { %13606 = vmatmul.mubr.msk.f32.gmra.mrb[170].mxu1 %vm1100_vm1, %v19148_v7  ;;  %v15286_v15 = vpop.eup %15285  ;;  %13517 = vmatmul.mubr.msk.f32.gmra.mrb[158].mxu0 %vm6924_vm3, %v7610_v59  ;;  %v20868_v7 = vmov 0.0  }
 0xf54   :  { %13608 = vmatprep.mubr.msk.f32.mxu1 %vm1100_vm1, %v19162_v1  ;;  %13519 = vmatprep.mubr.msk.f32.mxu0 %vm6924_vm3, %v7611_v40  ;;  %v7612_v39 = vmul.f32 %v15286_v15, %v20867_v63  ;;  %v20869_v1 = vld [vmem:[#allocation36_spill] sm:$0xff]  ;;  %v20874_v63 = vld [vmem:[#allocation38_spill] sm:$0xff] }
 0xf55   :  { %7496 = vadd.xlane.f32.xlu1 %v7495_v42 }
 0xf57   :  { %13609 = vmatmul.mubr.msk.f32.gmra.mrb[172].mxu1 %vm1100_vm1, %v19160_v52  ;;  %13520 = vmatmul.mubr.msk.f32.gmra.mrb[160].mxu0 %vm6924_vm3, %v7612_v39 }
 0xf58   :  { %13611 = vmatprep.mubr.msk.f32.mxu1 %vm1100_vm1, %v19174_v57 }
 0xf5b   :  { %13612 = vmatmul.mubr.msk.f32.gmra.mrb[174].mxu1 %vm1100_vm1, %v19171_v53 }
 0xf5c   :  { %10149 = vmatprep.mubr.f32.mxu1 %v20868_v7 }
 0xf66   :  { %8553 = vrot.lane.b32.xlu1 %v20869_v1, %s15404_s9 }
 0xf9a   :  { %v7482_v48 = vpop.xlane.xlu1 %7481 }
 0xf9e   :  { %v7479_v35 = vpop.xlane.xlu1 %7478 }
 0xf9f   :  { %15287 = vrcp.f32 %v7479_v35 }
 0xfa0   :  { %15289 = vrcp.f32 %v7482_v48  ;;  %v20875_v48 = vld [vmem:[#allocation32_spill] sm:$0xff] }
 0xfa9   :  { %v15288_v21 = vpop.eup %15287 }
 0xfaa   :  { %v7621_v6 = vmul.f32 %v15288_v21, %v19195_v14  ;;  %v15290_v38 = vpop.eup %15289 }
 0xfab   :  { %v7622_v33 = vmul.f32 %v15290_v38, %v19189_v4 }
 0xfac   :  { %13538 = vmatprep.mubr.msk.f32.mxu0 %vm6924_vm3, %v7621_v6 }
 0xfb6   :  { %v7488_v44 = vpop.xlane.xlu1 %7487 }
 0xfba   :  { %v7485_v14 = vpop.xlane.xlu1 %7484  ;;  %v7494_v2 = vpop.xlane.xlu0 %7493 }
 0xfbb   :  { %15291 = vrcp.f32 %v7485_v14 }
 0xfbc   :  { %15293 = vrcp.f32 %v7488_v44 }
 0xfbe   :  { %v19357_v52 = vpop.f32.mrb[152].mxu1 }
 0xfbf   :  { %v19359_v31 = vpop.f32.mrb[153].mxu1 }
 0xfc2   :  { %v19361_v57 = vpop.f32.mrb[154].mxu1 }
 0xfc3   :  { %v19363_v53 = vpop.f32.mrb[155].mxu1 }
 0xfc5   :  { %v15292_v9 = vpop.eup %15291 }
 0xfc6   :  { %v19365_v5 = vpop.f32.mrb[156].mxu1  ;;  %v15294_v50 = vpop.eup %15293  ;;  %v7623_v20 = vmul.f32 %v15292_v9, %v19251_v55 }
 0xfc7   :  { %v19367_v36 = vpop.f32.mrb[157].mxu1  ;;  %v7624_v4 = vmul.f32 %v15294_v50, %v19245_v13  ;;  %v20879_v50 = vld [vmem:[#allocation40_spill] sm:$0xff] }
 0xfca   :  { %v19369_v54 = vpop.f32.mrb[158].mxu1 }
 0xfcb   :  { %v19371_v60 = vpop.f32.mrb[159].mxu1 }
 0xfda   :  { %v7491_v49 = vpop.xlane.xlu1 %7490 }
 0xfdb   :  { %15295 = vrcp.f32 %v7491_v49 }
 0xfdc   :  { %15297 = vrcp.f32 %v7494_v2 }
 0xfde   :  { %v7500_v51 = vpop.xlane.xlu1 %7499 }
 0xfe2   :  { %v19373_v10 = vpop.f32.mrb[160].mxu1  ;;  %v7497_v0 = vpop.xlane.xlu1 %7496 }
 0xfe3   :  { %v19375_v19 = vpop.f32.mrb[161].mxu1  ;;  %15299 = vrcp.f32 %v7497_v0  ;;  %v20878_v0 = vld [vmem:[#allocation39_spill] sm:$0xff] }
 0xfe4   :  { %15301 = vrcp.f32 %v7500_v51 }
 0xfe5   :  { %v15296_v11 = vpop.eup %15295 }
 0xfe6   :  { %v19377_v56 = vpop.f32.mrb[162].mxu1  ;;  %v8554_v3 = vpop.permute.xlu1 %8553  ;;  %v7625_v55 = vmul.f32 %v15296_v11, %v19314_v30 }
 0xfe7   :  { %v19379_v43 = vpop.f32.mrb[163].mxu1  ;;  %13536 = vmatprep.subr.mxu0 %v8554_v3  ;;  %v15298_v22 = vpop.eup %15297 }
 0xfe8   :  { %13537 = vmatpush3.msra.mxu0 %v8554_v3  ;;  %v7626_v28 = vmul.f32 %v15298_v22, %v19261_v16  ;;  %v20882_v22 = vld [vmem:[#allocation41_spill] sm:$0xff] }
 0xfe9   :  { %13539 = vmatmul.mubr.msk.f32.vlgmr.msra.gmra.mrb[162].mxu0 %vm6924_vm3, %v7622_v33  ;;  %14183 = vmatprep.subr.bf16.mxu0 %v19191_v45 }
 0xfea   :  { %v19383_v46 = vpop.f32.mrb[164].mxu1  ;;  %13541 = vmatprep.mubr.msk.f32.mxu0 %vm6924_vm3, %v7623_v20  ;;  %14185 = vmatpush3.bf16.msra.mxu0 %v19191_v45 }
 0xfeb   :  { %v19387_v62 = vpop.f32.mrb[165].mxu1  ;;  %14187 = vmatprep.subr.bf16.mxu0 %v19198_v8 }
 0xfed   :  { %v15300_v29 = vpop.eup %15299  ;;  %13542 = vmatmul.mubr.msk.f32.gmra.mrb[164].mxu0 %vm6924_vm3, %v7624_v4 }
 0xfee   :  { %v19394_v25 = vpop.f32.mrb[166].mxu1  ;;  %13544 = vmatprep.mubr.msk.f32.mxu0 %vm6924_vm3, %v7625_v55  ;;  %v15302_v17 = vpop.eup %15301  ;;  %v7627_v45 = vmul.f32 %v15300_v29, %v19333_v32 }
 0xfef   :  { %v19397_v27 = vpop.f32.mrb[167].mxu1  ;;  %v7628_v13 = vmul.f32 %v15302_v17, %v19320_v23  ;;  %v20870_v23 = vld [vmem:[#allocation55_spill] sm:$0xff] }
 0xff1   :  { %13545 = vmatmul.mubr.msk.f32.gmra.mrb[166].mxu0 %vm6924_vm3, %v7626_v28 }
 0xff2   :  { %13547 = vmatprep.mubr.msk.f32.mxu0 %vm6924_vm3, %v7627_v45 }
 0xff5   :  { %13548 = vmatmul.mubr.msk.f32.gmra.mrb[168].mxu0 %vm6924_vm3, %v7628_v13 }
0x1012   :  { %v13512_v30 = vpop.f32.mrb[154].mxu0 }
0x1013   :  { %v8382_v58 = vpop.f32.mrb[155].mxu0 }
0x1014   :  { %13618 = vmatprep.mubr.msk.f32.mxu0 %vm1100_vm1, %v8382_v58 }
0x1015   :  { %13619 = vmatmul.mubr.msk.f32.vlgmr.msra.gmra.mrb[170].mxu0 %vm1100_vm1, %v13512_v30 }
0x1016   :  { %14189 = vmatpush3.bf16.msra.mxu0 %v19198_v8 }
0x1017   :  { %14191 = vmatprep.subr.bf16.mxu0 %v19228_v37 }
0x1022   :  { %v13604_v16 = vpop.f32.mrb[168].mxu1  ;;  %v13515_v34 = vpop.f32.mrb[156].mxu0 }
0x1023   :  { %v9758_v12 = vadd.f32 %v13604_v16, %v20870_v23  ;;  %v9178_v41 = vpop.f32.mrb[169].mxu1  ;;  %v8392_v24 = vpop.f32.mrb[157].mxu0 }
0x1024   :  { %v9757_v59 = vadd.f32 %v9178_v41, %v20871_v61  ;;  %13621 = vmatprep.mubr.msk.f32.mxu0 %vm1100_vm1, %v8392_v24 }
0x1025   :  { %v19418_v32 = vadd.f32 %v19413_v26, %v9758_v12  ;;  %13622 = vmatmul.mubr.msk.f32.gmra.mrb[172].mxu0 %vm1100_vm1, %v13515_v34 }
0x1026   :  { %v19422_v8 = vadd.f32 %v19413_v26, %v9757_v59  ;;  %v13607_v18 = vpop.f32.mrb[170].mxu1  ;;  %v13518_v40 = vpop.f32.mrb[158].mxu0 }
0x1027   :  { %20872 = vst [vmem:[#allocation10_spill] sm:$0xff] %v19418_v32  ;;  %v9188_v15 = vpop.f32.mrb[171].mxu1  ;;  %v9795_v42 = vsel %vm346_vm0, %v19418_v32, 0.0  ;;  %v9760_v39 = vadd.f32 %v13607_v18, %v20874_v63  ;;  %v8402_v1 = vpop.f32.mrb[159].mxu0 }
0x1028   :  { %20873 = vst [vmem:[#allocation11_spill] sm:$0xff] %v19422_v8  ;;  %v9759_v35 = vadd.f32 %v9188_v15, %v20875_v48  ;;  %9796 = vadd.xlane.f32.xlu0 %v9795_v42  ;;  %v9792_v21 = vsel %vm346_vm0, %v19422_v8, 0.0  ;;  %13624 = vmatprep.mubr.msk.f32.mxu0 %vm1100_vm1, %v8402_v1 }
0x1029   :  { %9793 = vadd.xlane.f32.xlu1 %v9792_v21  ;;  %13625 = vmatmul.mubr.msk.f32.gmra.mrb[174].mxu0 %vm1100_vm1, %v13518_v40  ;;  %v19437_v51 = vadd.f32 %v19413_v26, %v9760_v39 }
0x102a   :  { %v19433_v6 = vadd.f32 %v19413_v26, %v9759_v35  ;;  %v13610_v44 = vpop.f32.mrb[172].mxu1  ;;  %v13521_v14 = vpop.f32.mrb[160].mxu0 }
0x102b   :  { %v9198_v49 = vpop.f32.mrb[173].mxu1  ;;  %20877 = vst [vmem:[#allocation13_spill] sm:$0xff] %v19437_v51  ;;  %v8412_v2 = vpop.f32.mrb[161].mxu0  ;;  %v9762_v20 = vadd.f32 %v13610_v44, %v20879_v50  ;;  %v9801_v4 = vsel %vm346_vm0, %v19437_v51, 0.0 }
0x102c   :  { %20876 = vst [vmem:[#allocation12_spill] sm:$0xff] %v19433_v6  ;;  %v9761_v38 = vadd.f32 %v9198_v49, %v20878_v0  ;;  %v9798_v9 = vsel %vm346_vm0, %v19433_v6, 0.0  ;;  %13627 = vmatprep.mubr.msk.f32.mxu0 %vm1100_vm1, %v8412_v2 }
0x102d   :  { %9799 = vadd.xlane.f32.xlu0 %v9798_v9  ;;  %13628 = vmatmul.mubr.msk.f32.gmra.mrb[176].mxu0 %vm1100_vm1, %v13521_v14 }
0x102e   :  { %v13613_v3 = vpop.f32.mrb[174].mxu1  ;;  %13634 = vmatprep.mubr.msk.f32.mxu0 %vm1100_vm1, %v19359_v31  ;;  %v19448_v11 = vadd.f32 %v19413_v26, %v9761_v38  ;;  %v19458_v31 = vadd.f32 %v19413_v26, %v9762_v20  ;;  %v10033_v20 = vld [vmem:[%s20533_s2 + $0x18] sm:$0xff] }
0x102f   :  { %v9208_v33 = vpop.f32.mrb[175].mxu1 }
0x1030   :  { %20880 = vst [vmem:[#allocation14_spill] sm:$0xff] %v19448_v11  ;;  %20881 = vst [vmem:[#allocation15_spill] sm:$0xff] %v19458_v31  ;;  %v9763_v55 = vadd.f32 %v9208_v33, %v20882_v22  ;;  %v9804_v29 = vsel %vm346_vm0, %v19448_v11, 0.0  ;;  %v9807_v28 = vsel %vm346_vm0, %v19458_v31, 0.0  ;;  %v10279_v22 = vld [vmem:[%s20533_s2 + $0x8] sm:$0xff] }
0x1031   :  { %9802 = vadd.xlane.f32.xlu0 %v9801_v4  ;;  %13635 = vmatmul.mubr.msk.f32.vlgmr.msra.gmra.mrb[170].mxu0 %vm1100_vm1, %v19357_v52  ;;  %v20883_v52 = vld [vmem:[#allocation42_spill] sm:$0xff]  ;;  %v10035_v4 = vld [vmem:[%s20533_s2 + $0x50] sm:$0xff] }
0x1032   :  { %13637 = vmatprep.mubr.msk.f32.mxu0 %vm1100_vm1, %v19363_v53  ;;  %14193 = vmatpush3.bf16.msra.mxu0 %v19228_v37  ;;  %v9764_v53 = vadd.f32 %v13613_v3, %v20883_v52  ;;  %v19470_v37 = vadd.f32 %v19413_v26, %v9763_v55  ;;  %v10281_v55 = vld [vmem:[%s20533_s2 + $0x40] sm:$0xff] }
0x1033   :  { %14195 = vmatprep.subr.bf16.mxu0 %v19269_v47 }
0x1034   :  { %20884 = vst [vmem:[#allocation16_spill] sm:$0xff] %v19470_v37 }
0x1035   :  { %9805 = vadd.xlane.f32.xlu0 %v9804_v29  ;;  %13638 = vmatmul.mubr.msk.f32.gmra.mrb[172].mxu0 %vm1100_vm1, %v19361_v57  ;;  %v19479_v57 = vadd.f32 %v19413_v26, %v9764_v53  ;;  %v19570_v53 = vpack.c.bf16 %v10035_v4, %v10033_v20 }
0x1036   :  { %13640 = vmatprep.mubr.msk.f32.mxu0 %vm1100_vm1, %v19367_v36  ;;  %v9810_v36 = vsel %vm346_vm0, %v19470_v37, 0.0 }
0x1037   :  { %20885 = vst [vmem:[#allocation17_spill] sm:$0xff] %v19479_v57  ;;  %v9813_v17 = vsel %vm346_vm0, %v19479_v57, 0.0  ;;  %14199 = vmatprep.subr.bf16.mxu1 %v19570_v53 }
0x1039   :  { %9808 = vadd.xlane.f32.xlu0 %v9807_v28  ;;  %13641 = vmatmul.mubr.msk.f32.gmra.mrb[174].mxu0 %vm1100_vm1, %v19365_v5  ;;  %v19572_v28 = vpack.c.bf16 %v10281_v55, %v10279_v22  ;;  %v10290_v22 = vld [vmem:[%s20533_s2 + $0x150] sm:$0xff]  ;;  %v10292_v55 = vld [vmem:[%s20533_s2 + $0x188] sm:$0xff] }
0x103a   :  { %13643 = vmatprep.mubr.msk.f32.mxu0 %vm1100_vm1, %v19371_v60 }
0x103d   :  { %9811 = vadd.xlane.f32.xlu0 %v9810_v36  ;;  %13644 = vmatmul.mubr.msk.f32.gmra.mrb[176].mxu0 %vm1100_vm1, %v19369_v54  ;;  %v10032_v36 = vld [vmem:[%s20533_s2 + $0x10] sm:$0xff] }
0x103e   :  { %13650 = vmatprep.mubr.msk.f32.mxu0 %vm1100_vm1, %v19375_v19 }
0x1041   :  { %9814 = vadd.xlane.f32.xlu0 %v9813_v17  ;;  %13651 = vmatmul.mubr.msk.f32.vlgmr.msra.gmra.mrb[170].mxu0 %vm1100_vm1, %v19373_v10  ;;  %v10034_v17 = vld [vmem:[%s20533_s2 + $0x48] sm:$0xff] }
0x1042   :  { %13653 = vmatprep.mubr.msk.f32.mxu0 %vm1100_vm1, %v19379_v43  ;;  %14197 = vmatpush3.bf16.msra.mxu0 %v19269_v47 }
0x1043   :  { %14215 = vmatprep.subr.bf16.mxu0 %v19572_v28 }
0x1045   :  { %13654 = vmatmul.mubr.msk.f32.gmra.mrb[172].mxu0 %vm1100_vm1, %v19377_v56 }
0x1046   :  { %13656 = vmatprep.mubr.msk.f32.mxu0 %vm1100_vm1, %v19387_v62 }
0x1049   :  { %13657 = vmatmul.mubr.msk.f32.gmra.mrb[174].mxu0 %vm1100_vm1, %v19383_v46 }
0x104a   :  { %13659 = vmatprep.mubr.msk.f32.mxu0 %vm1100_vm1, %v19397_v27 }
0x104d   :  { %13660 = vmatmul.mubr.msk.f32.gmra.mrb[176].mxu0 %vm1100_vm1, %v19394_v25 }
0x10b5   :  { %v9797_v5 = vpop.xlane.xlu0 %9796 }
0x10b6   :  { %v9841_v54 = vmul.f32 0.015625, %v9797_v5  ;;  %v9794_v60 = vpop.xlane.xlu1 %9793  ;;  %v10278_v5 = vld [vmem:[%s20533_s2] sm:$0xff] }
0x10b7   :  { %v9840_v10 = vmul.f32 0.015625, %v9794_v60  ;;  %v10280_v60 = vld [vmem:[%s20533_s2 + $0x38] sm:$0xff] }
0x10b8   :  { %v19505_v47 = vsub.f32 %v19418_v32, %v9841_v54  ;;  %v19583_v54 = vpack.c.bf16 %v10034_v17, %v10032_v36 }
0x10b9   :  { %v19508_v19 = vsub.f32 %v19422_v8, %v9840_v10 }
0x10ba   :  { %v9800_v56 = vpop.xlane.xlu0 %9799  ;;  %v9873_v43 = vmul.f32 %v19505_v47, %v19505_v47  ;;  %14201 = vmatpush1.bf16.msra.mxu1 %v19583_v54 }
0x10bb   :  { %v9842_v46 = vmul.f32 0.015625, %v9800_v56  ;;  %v9872_v62 = vmul.f32 %v19508_v19, %v19508_v19  ;;  %v19592_v56 = vpack.c.bf16 %v10280_v60, %v10278_v5 }
0x10bc   :  { %v9891_v25 = vsel %vm346_vm0, %v9873_v43, 0.0  ;;  %v13540_v45 = vpop.f32.mrb[162].mxu0  ;;  %v10037_v43 = vld [vmem:[%s20533_s2 + $0x88] sm:$0xff] }
0x10bd   :  { %v19516_v27 = vsub.f32 %v19433_v6, %v9842_v46  ;;  %9892 = vadd.xlane.f32.xlu1 %v9891_v25  ;;  %v9888_v13 = vsel %vm346_vm0, %v9872_v62, 0.0  ;;  %v8646_v30 = vpop.f32.mrb[163].mxu0  ;;  %v10039_v46 = vld [vmem:[%s20533_s2 + $0xc0] sm:$0xff]  ;;  %v10283_v62 = vld [vmem:[%s20533_s2 + $0x78] sm:$0xff] }
0x10be   :  { %9889 = vadd.xlane.f32.xlu0 %v9888_v13  ;;  %v9803_v58 = vpop.xlane.xlu0 %9802  ;;  %13666 = vmatprep.mubr.msk.f32.mxu0 %vm1100_vm1, %v8646_v30  ;;  %v19604_v25 = vpack.c.bf16 %v10039_v46, %v10037_v43  ;;  %v10036_v13 = vld [vmem:[%s20533_s2 + $0x80] sm:$0xff]  ;;  %v10038_v30 = vld [vmem:[%s20533_s2 + $0xb8] sm:$0xff] }
0x10bf   :  { %v9843_v16 = vmul.f32 0.015625, %v9803_v58  ;;  %v9874_v34 = vmul.f32 %v19516_v27, %v19516_v27  ;;  %13667 = vmatmul.mubr.msk.f32.vlgmr.msra.gmra.mrb[170].mxu0 %vm1100_vm1, %v13540_v45  ;;  %v10285_v45 = vld [vmem:[%s20533_s2 + $0xb0] sm:$0xff] }
0x10c0   :  { %v13543_v12 = vpop.f32.mrb[164].mxu0  ;;  %14217 = vmatpush1.bf16.msra.mxu0 %v19592_v56  ;;  %14203 = vmatprep.subr.bf16.mxu1 %v19604_v25 }
0x10c1   :  { %v19524_v23 = vsub.f32 %v19437_v51, %v9843_v16  ;;  %v9894_v41 = vsel %vm346_vm0, %v9874_v34, 0.0  ;;  %v8656_v24 = vpop.f32.mrb[165].mxu0  ;;  %v19617_v16 = vpack.c.bf16 %v10285_v45, %v10283_v62  ;;  %v19619_v34 = vpack.c.bf16 %v10038_v30, %v10036_v13 }
0x10c2   :  { %9895 = vadd.xlane.f32.xlu0 %v9894_v41  ;;  %v9806_v61 = vpop.xlane.xlu0 %9805  ;;  %13669 = vmatprep.mubr.msk.f32.mxu0 %vm1100_vm1, %v8656_v24  ;;  %v10284_v41 = vld [vmem:[%s20533_s2 + $0xa8] sm:$0xff] }
0x10c3   :  { %v9844_v59 = vmul.f32 0.015625, %v9806_v61  ;;  %v9875_v18 = vmul.f32 %v19524_v23, %v19524_v23  ;;  %13670 = vmatmul.mubr.msk.f32.gmra.mrb[172].mxu0 %vm1100_vm1, %v13543_v12  ;;  %v10282_v12 = vld [vmem:[%s20533_s2 + $0x70] sm:$0xff]  ;;  %14219 = vmatprep.subr.bf16.mxu0 %v19617_v16  ;;  %v10041_v61 = vld [vmem:[%s20533_s2 + $0xf8] sm:$0xff] }
0x10c4   :  { %v13546_v15 = vpop.f32.mrb[166].mxu0  ;;  %v19628_v24 = vpack.c.bf16 %v10284_v41, %v10282_v12  ;;  %14205 = vmatpush1.bf16.msra.mxu1 %v19619_v34 }
0x10c5   :  { %v19532_v40 = vsub.f32 %v19448_v11, %v9844_v59  ;;  %v9897_v42 = vsel %vm346_vm0, %v9875_v18, 0.0  ;;  %v8666_v63 = vpop.f32.mrb[167].mxu0  ;;  %v10043_v59 = vld [vmem:[%s20533_s2 + $0x130] sm:$0xff]  ;;  %v10287_v18 = vld [vmem:[%s20533_s2 + $0xe8] sm:$0xff] }
0x10c6   :  { %9898 = vadd.xlane.f32.xlu1 %v9897_v42  ;;  %v9809_v39 = vpop.xlane.xlu0 %9808  ;;  %13672 = vmatprep.mubr.msk.f32.mxu0 %vm1100_vm1, %v8666_v63  ;;  %v10289_v42 = vld [vmem:[%s20533_s2 + $0x120] sm:$0xff]  ;;  %v10040_v63 = vld [vmem:[%s20533_s2 + $0xf0] sm:$0xff] }
0x10c7   :  { %v9845_v1 = vmul.f32 0.015625, %v9809_v39  ;;  %v9876_v48 = vmul.f32 %v19532_v40, %v19532_v40  ;;  %13673 = vmatmul.mubr.msk.f32.gmra.mrb[174].mxu0 %vm1100_vm1, %v13546_v15  ;;  %v19641_v15 = vpack.c.bf16 %v10043_v59, %v10041_v61  ;;  %v10042_v39 = vld [vmem:[%s20533_s2 + $0x128] sm:$0xff]  ;;  %v19709_v59 = vld [vmem:[%s20532_s5 + $0x7] ss:$0 sm:$0xff] }
0x10c8   :  { %v13549_v21 = vpop.f32.mrb[168].mxu0  ;;  %14221 = vmatpush1.bf16.msra.mxu0 %v19628_v24 }
0x10c9   :  { %v19540_v35 = vsub.f32 %v19458_v31, %v9845_v1  ;;  %v9900_v44 = vsel %vm346_vm0, %v9876_v48, 0.0  ;;  %v8676_v14 = vpop.f32.mrb[169].mxu0  ;;  %v19653_v1 = vpack.c.bf16 %v10289_v42, %v10287_v18  ;;  %v19655_v48 = vpack.c.bf16 %v10042_v39, %v10040_v63  ;;  %14207 = vmatprep.subr.bf16.mxu1 %v19641_v15 }
0x10ca   :  { %9901 = vadd.xlane.f32.xlu0 %v9900_v44  ;;  %v9812_v49 = vpop.xlane.xlu0 %9811  ;;  %13675 = vmatprep.mubr.msk.f32.mxu0 %vm1100_vm1, %v8676_v14  ;;  %v10288_v44 = vld [vmem:[%s20533_s2 + $0x118] sm:$0xff] }
0x10cb   :  { %v9846_v2 = vmul.f32 0.015625, %v9812_v49  ;;  %v9877_v0 = vmul.f32 %v19540_v35, %v19540_v35  ;;  %13676 = vmatmul.mubr.msk.f32.gmra.mrb[176].mxu0 %vm1100_vm1, %v13549_v21  ;;  %v10286_v21 = vld [vmem:[%s20533_s2 + $0xe0] sm:$0xff]  ;;  %14223 = vmatprep.subr.bf16.mxu0 %v19653_v1  ;;  %v10045_v49 = vld [vmem:[%s20533_s2 + $0x168] sm:$0xff] }
0x10cc   :  { %10371 = vmatprep.mubr.f32.mxu0 %v20868_v7  ;;  %v19664_v14 = vpack.c.bf16 %v10288_v44, %v10286_v21  ;;  %14209 = vmatpush1.bf16.msra.mxu1 %v19655_v48  ;;  %v19716_v21 = vld [vmem:[%s20532_s5 + $0x20] ss:$0 sm:$0xff] }
0x10cd   :  { %v19548_v38 = vsub.f32 %v19470_v37, %v9846_v2  ;;  %v9903_v9 = vsel %vm346_vm0, %v9877_v0, 0.0  ;;  %v10047_v2 = vld [vmem:[%s20533_s2 + $0x1a0] sm:$0xff]  ;;  %v10291_v0 = vld [vmem:[%s20533_s2 + $0x158] sm:$0xff] }
0x10ce   :  { %9904 = vadd.xlane.f32.xlu1 %v9903_v9  ;;  %v9815_v3 = vpop.xlane.xlu0 %9814  ;;  %v19677_v9 = vpack.c.bf16 %v10047_v2, %v10045_v49  ;;  %14225 = vmatpush1.bf16.msra.mxu0 %v19664_v14 }
0x10cf   :  { %v9847_v33 = vmul.f32 0.015625, %v9815_v3  ;;  %v9878_v50 = vmul.f32 %v19548_v38, %v19548_v38  ;;  %v10293_v3 = vld [vmem:[%s20533_s2 + $0x190] sm:$0xff] }
0x10d0   :  { %v19689_v20 = vpack.c.bf16 %v10293_v3, %v10291_v0  ;;  %14211 = vmatprep.subr.bf16.mxu1 %v19677_v9 }
0x10d1   :  { %v19567_v29 = vsub.f32 %v19479_v57, %v9847_v33  ;;  %v9906_v52 = vsel %vm346_vm0, %v9878_v50, 0.0  ;;  %v10044_v33 = vld [vmem:[%s20533_s2 + $0x160] sm:$0xff]  ;;  %v10046_v50 = vld [vmem:[%s20533_s2 + $0x198] sm:$0xff] }
0x10d2   :  { %9907 = vadd.xlane.f32.xlu0 %v9906_v52  ;;  %v19691_v4 = vpack.c.bf16 %v10046_v50, %v10044_v33  ;;  %v19700_v52 = vpack.c.bf16 %v10292_v55, %v10290_v22  ;;  %14227 = vmatprep.subr.bf16.mxu0 %v19689_v20 }
0x10d3   :  { %v9879_v10 = vmul.f32 %v19567_v29, %v19567_v29 }
0x10d4   :  { %14213 = vmatpush1.bf16.msra.mxu1 %v19691_v4  ;;  %14229 = vmatpush1.bf16.msra.mxu0 %v19700_v52 }
0x10d5   :  { %v9909_v58 = vsel %vm346_vm0, %v9879_v10, 0.0  ;;  %14263 = vmatprep.subr.bf16.mxu0 %v19570_v53 }
0x10d6   :  { %9910 = vadd.xlane.f32.xlu1 %v9909_v58 }
0x114a   :  { %v9893_v36 = vpop.xlane.xlu1 %9892 }
0x114b   :  { %v9937_v17 = vmul.f32 0.015625, %v9893_v36  ;;  %v9890_v5 = vpop.xlane.xlu0 %9889 }
0x114c   :  { %v9936_v60 = vmul.f32 0.015625, %v9890_v5 }
0x114d   :  { %v9953_v10 = vadd.f32 1e-05, %v9937_v17 }
0x114e   :  { %v9952_v43 = vadd.f32 1e-05, %v9936_v60 }
0x114f   :  { %15303 = vrsqrt.f32 %v9953_v10  ;;  %v9896_v46 = vpop.xlane.xlu0 %9895 }
0x1150   :  { %15305 = vrsqrt.f32 %v9952_v43  ;;  %v9938_v62 = vmul.f32 0.015625, %v9896_v46 }
0x1152   :  { %v9954_v45 = vadd.f32 1e-05, %v9938_v62 }
0x1153   :  { %v9899_v13 = vpop.xlane.xlu1 %9898 }
0x1154   :  { %15307 = vrsqrt.f32 %v9954_v45  ;;  %v9939_v30 = vmul.f32 0.015625, %v9899_v13 }
0x1156   :  { %v9955_v58 = vadd.f32 1e-05, %v9939_v30 }
0x1157   :  { %v9902_v12 = vpop.xlane.xlu0 %9901 }
0x1158   :  { %15309 = vrsqrt.f32 %v9955_v58  ;;  %v9940_v41 = vmul.f32 0.015625, %v9902_v12 }
0x1159   :  { %v15304_v61 = vpop.eup %15303 }
0x115a   :  { %v15306_v53 = vpop.eup %15305  ;;  %v9956_v18 = vadd.f32 1e-05, %v9940_v41  ;;  %v9985_v39 = vmul.f32 %v15304_v61, %v19505_v47  ;;  %v20886_v41 = vld [vmem:[#allocation27_spill] sm:$0xff] }
0x115b   :  { %v9984_v42 = vmul.f32 %v15306_v53, %v19508_v19  ;;  %v9905_v63 = vpop.xlane.xlu1 %9904 }
0x115c   :  { %15311 = vrsqrt.f32 %v9956_v18  ;;  %v9941_v44 = vmul.f32 0.015625, %v9905_v63  ;;  %v10001_v50 = vmul.f32 %v9985_v39, %v19709_v59  ;;  %v20887_v18 = vld [vmem:[#allocation49_spill] sm:$0xff] }
0x115d   :  { %v10000_v49 = vmul.f32 %v9984_v42, %v19709_v59 }
0x115e   :  { %v15308_v2 = vpop.eup %15307  ;;  %v9957_v0 = vadd.f32 1e-05, %v9941_v44  ;;  %v10017_v17 = vadd.f32 %v10001_v50, %v19716_v21 }
0x115f   :  { %v10016_v3 = vadd.f32 %v10000_v49, %v19716_v21  ;;  %v9908_v33 = vpop.xlane.xlu0 %9907  ;;  %v9986_v19 = vmul.f32 %v15308_v2, %v19516_v27  ;;  %v20890_v49 = vld [vmem:[#allocation33_spill] sm:$0xff] }
0x1160   :  { %15313 = vrsqrt.f32 %v9957_v0  ;;  %v9942_v47 = vmul.f32 0.015625, %v9908_v33  ;;  %v20891_v33 = vld [vmem:[#allocation44_spill] sm:$0xff] }
0x1161   :  { %11800 = vmatmul.mubr.msk.f32.vlgmr.msra.gmra.mrb[176].mxu1 %vm346_vm0, %v10016_v3  ;;  %11809 = vmatmul.mubr.msk.f32.vlgmr.msra.gmra.mrb[178].mxu0 %vm346_vm0, %v10016_v3  ;;  %v10002_v5 = vmul.f32 %v9986_v19, %v19709_v59 }
0x1162   :  { %v15310_v22 = vpop.eup %15309  ;;  %v9958_v55 = vadd.f32 1e-05, %v9942_v47  ;;  %10155 = vmatprep.mubr.f32.mxu1 %v20868_v7  ;;  %10377 = vmatprep.mubr.f32.mxu0 %v20868_v7 }
0x1163   :  { %v9911_v36 = vpop.xlane.xlu1 %9910  ;;  %v9987_v60 = vmul.f32 %v15310_v22, %v19524_v23  ;;  %14265 = vmatpush1.bf16.msra.mxu0 %v19583_v54  ;;  %v10018_v46 = vadd.f32 %v10002_v5, %v19716_v21 }
0x1164   :  { %15315 = vrsqrt.f32 %v9958_v55  ;;  %v9943_v27 = vmul.f32 0.015625, %v9911_v36  ;;  %14267 = vmatprep.subr.bf16.mxu0 %v19604_v25  ;;  %v20894_v36 = vld [vmem:[#allocation23_spill] sm:$0xff] }
0x1165   :  { %11801 = vmatmul.mubr.msk.f32.gmra.mrb[178].mxu1 %vm346_vm0, %v10017_v17  ;;  %11810 = vmatmul.mubr.msk.f32.gmra.mrb[180].mxu0 %vm346_vm0, %v10017_v17  ;;  %v10003_v23 = vmul.f32 %v9987_v60, %v19709_v59 }
0x1166   :  { %v15312_v10 = vpop.eup %15311  ;;  %v9959_v43 = vadd.f32 1e-05, %v9943_v27  ;;  %10161 = vmatprep.mubr.f32.mxu1 %v20868_v7  ;;  %10383 = vmatprep.mubr.f32.mxu0 %v20868_v7  ;;  %v20895_v27 = vld [vmem:[#allocation28_spill] sm:$0xff] }
0x1167   :  { %v9988_v54 = vmul.f32 %v15312_v10, %v19532_v40  ;;  %14269 = vmatpush1.bf16.msra.mxu0 %v19619_v34  ;;  %v10019_v62 = vadd.f32 %v10003_v23, %v19716_v21 }
0x1168   :  { %15317 = vrsqrt.f32 %v9959_v43  ;;  %14271 = vmatprep.subr.bf16.mxu0 %v19641_v15 }
0x1169   :  { %11802 = vmatmul.mubr.msk.f32.gmra.mrb[180].mxu1 %vm346_vm0, %v10018_v46  ;;  %11811 = vmatmul.mubr.msk.f32.gmra.mrb[182].mxu0 %vm346_vm0, %v10018_v46  ;;  %v10004_v45 = vmul.f32 %v9988_v54, %v19709_v59 }
0x116a   :  { %v15314_v25 = vpop.eup %15313  ;;  %10167 = vmatprep.mubr.f32.mxu1 %v20868_v7  ;;  %10389 = vmatprep.mubr.f32.mxu0 %v20868_v7 }
0x116b   :  { %v9989_v40 = vmul.f32 %v15314_v25, %v19540_v35  ;;  %14273 = vmatpush1.bf16.msra.mxu0 %v19655_v48  ;;  %v10020_v15 = vadd.f32 %v10004_v45, %v19716_v21  ;;  %v20898_v25 = vld [vmem:[#allocation22_spill] sm:$0xff] }
0x116c   :  { %14275 = vmatprep.subr.bf16.mxu0 %v19677_v9 }
0x116d   :  { %11803 = vmatmul.mubr.msk.f32.gmra.mrb[182].mxu1 %vm346_vm0, %v10019_v62  ;;  %11812 = vmatmul.mubr.msk.f32.gmra.mrb[184].mxu0 %vm346_vm0, %v10019_v62  ;;  %v10005_v13 = vmul.f32 %v9989_v40, %v19709_v59 }
0x116e   :  { %v15316_v34 = vpop.eup %15315  ;;  %10173 = vmatprep.mubr.f32.mxu1 %v20868_v7  ;;  %10395 = vmatprep.mubr.f32.mxu0 %v20868_v7 }
0x116f   :  { %v9990_v30 = vmul.f32 %v15316_v34, %v19548_v38  ;;  %14277 = vmatpush1.bf16.msra.mxu0 %v19691_v4  ;;  %v10021_v48 = vadd.f32 %v10005_v13, %v19716_v21  ;;  %v20899_v34 = vld [vmem:[#allocation48_spill] sm:$0xff] }
0x1171   :  { %11804 = vmatmul.mubr.msk.f32.gmra.mrb[184].mxu1 %vm346_vm0, %v10020_v15  ;;  %11813 = vmatmul.mubr.msk.f32.gmra.mrb[186].mxu0 %vm346_vm0, %v10020_v15  ;;  %v10006_v9 = vmul.f32 %v9990_v30, %v19709_v59 }
0x1172   :  { %v15318_v35 = vpop.eup %15317  ;;  %10179 = vmatprep.mubr.f32.mxu1 %v20868_v7  ;;  %10401 = vmatprep.mubr.f32.mxu0 %v20868_v7 }
0x1173   :  { %v9991_v58 = vmul.f32 %v15318_v35, %v19567_v29  ;;  %v10022_v38 = vadd.f32 %v10006_v9, %v19716_v21 }
0x1175   :  { %11805 = vmatmul.mubr.msk.f32.gmra.mrb[186].mxu1 %vm346_vm0, %v10021_v48  ;;  %11814 = vmatmul.mubr.msk.f32.gmra.mrb[188].mxu0 %vm346_vm0, %v10021_v48  ;;  %v10007_v4 = vmul.f32 %v9991_v58, %v19709_v59  ;;  %v10452_v58 = vld [vmem:[%s20534_s3 + $0x140] sm:$0xff] }
0x1176   :  { %10185 = vmatprep.mubr.f32.mxu1 %v20868_v7  ;;  %10407 = vmatprep.mubr.f32.mxu0 %v20868_v7 }
0x1177   :  { %v10023_v29 = vadd.f32 %v10007_v4, %v19716_v21 }
0x1179   :  { %11806 = vmatmul.mubr.msk.f32.gmra.mrb[188].mxu1 %vm346_vm0, %v10022_v38  ;;  %11815 = vmatmul.mubr.msk.f32.gmra.mrb[190].mxu0 %vm346_vm0, %v10022_v38  ;;  %v10453_v38 = vld [vmem:[%s20534_s3 + $0x148] sm:$0xff] }
0x117a   :  { %10191 = vmatprep.mubr.f32.mxu1 %v20868_v7  ;;  %10413 = vmatprep.mubr.f32.mxu0 %v20868_v7  ;;  %v14230_v4 = vpack.c.bf16 %v10453_v38, %v10452_v58  ;;  %v10465_v58 = vld [vmem:[%s20534_s3 + $0x1a8] sm:$0xff] }
0x117c   :  { %14231 = vmatprep.subr.bf16.mxu1 %v14230_v4  ;;  %14295 = vmatprep.subr.bf16.mxu0 %v14230_v4  ;;  %v10448_v4 = vld [vmem:[%s20534_s3 + $0x120] sm:$0xff] }
0x117d   :  { %11807 = vmatmul.mubr.msk.f32.gmra.mrb[190].mxu1 %vm346_vm0, %v10023_v29  ;;  %11816 = vmatmul.mubr.msk.f32.gmra.mrb[192].mxu0 %vm346_vm0, %v10023_v29  ;;  %v10437_v29 = vld [vmem:[%s20534_s3 + $0xc8] sm:$0xff] }
0x117e   :  { %10661 = vmatprep.mubr.f32.mxu0 %v20868_v7 }
0x1192   :  { %v13668_v12 = vpop.f32.mrb[170].mxu0 }
0x1193   :  { %v9766_v61 = vadd.f32 %v13668_v12, %v20886_v41  ;;  %v9710_v53 = vpop.f32.mrb[171].mxu0  ;;  %v10454_v41 = vld [vmem:[%s20534_s3 + $0x150] sm:$0xff] }
0x1194   :  { %v9765_v42 = vadd.f32 %v9710_v53, %v20887_v18  ;;  %v10438_v18 = vld [vmem:[%s20534_s3 + $0xd0] sm:$0xff] }
0x1195   :  { %v19781_v63 = vadd.f32 %v19413_v26, %v9766_v61  ;;  %v10455_v61 = vld [vmem:[%s20534_s3 + $0x158] sm:$0xff] }
0x1196   :  { %v19784_v39 = vadd.f32 %v19413_v26, %v9765_v42  ;;  %v13671_v44 = vpop.f32.mrb[172].mxu0  ;;  %v19847_v53 = vpack.c.bf16 %v10455_v61, %v10454_v41  ;;  %v10439_v42 = vld [vmem:[%s20534_s3 + $0xd8] sm:$0xff]  ;;  %v10466_v41 = vld [vmem:[%s20534_s3 + $0x1b0] sm:$0xff] }
0x1197   :  { %20888 = vst [vmem:[#allocation47_spill] sm:$0xff] %v19781_v63  ;;  %v9768_v2 = vadd.f32 %v13671_v44, %v20890_v49  ;;  %v9720_v0 = vpop.f32.mrb[173].mxu0  ;;  %v9819_v3 = vsel %vm346_vm0, %v19781_v63, 0.0  ;;  %v19855_v44 = vpack.c.bf16 %v10439_v42, %v10438_v18  ;;  %v10456_v49 = vld [vmem:[%s20534_s3 + $0x160] sm:$0xff]  ;;  %v10467_v61 = vld [vmem:[%s20534_s3 + $0x1b8] sm:$0xff]  ;;  %v10450_v42 = vld [vmem:[%s20534_s3 + $0x130] sm:$0xff] }
0x1198   :  { %20889 = vst [vmem:[#allocation45_spill] sm:$0xff] %v19784_v39  ;;  %v9767_v50 = vadd.f32 %v9720_v0, %v20891_v33  ;;  %9820 = vadd.xlane.f32.xlu1 %v9819_v3  ;;  %v9816_v19 = vsel %vm346_vm0, %v19784_v39, 0.0  ;;  %v10440_v3 = vld [vmem:[%s20534_s3 + $0xe0] sm:$0xff]  ;;  %v10441_v33 = vld [vmem:[%s20534_s3 + $0xe8] sm:$0xff]  ;;  %v19955_v18 = vpack.c.bf16 %v10467_v61, %v10466_v41 }
0x1199   :  { %v19793_v47 = vadd.f32 %v19413_v26, %v9768_v2  ;;  %9817 = vadd.xlane.f32.xlu0 %v9816_v19  ;;  %v10457_v2 = vld [vmem:[%s20534_s3 + $0x168] sm:$0xff]  ;;  %v10458_v19 = vld [vmem:[%s20534_s3 + $0x170] sm:$0xff] }
0x119a   :  { %v19796_v22 = vadd.f32 %v19413_v26, %v9767_v50  ;;  %v13674_v55 = vpop.f32.mrb[174].mxu0  ;;  %v19865_v0 = vpack.c.bf16 %v10457_v2, %v10456_v49  ;;  %v19874_v50 = vpack.c.bf16 %v10441_v33, %v10440_v3  ;;  %20909 = vst [vmem:[#allocation43_spill] sm:$0xff] %v19955_v18  ;;  %v10451_v49 = vld [vmem:[%s20534_s3 + $0x138] sm:$0xff]  ;;  %v10051_v3 = vlaneseq }
0x119b   :  { %20892 = vst [vmem:[#allocation50_spill] sm:$0xff] %v19793_v47  ;;  %v9770_v17 = vadd.f32 %v13674_v55, %v20894_v36  ;;  %v9730_v5 = vpop.f32.mrb[175].mxu0  ;;  %v9825_v60 = vsel %vm346_vm0, %v19793_v47, 0.0  ;;  %v10459_v55 = vld [vmem:[%s20534_s3 + $0x178] sm:$0xff]  ;;  %v19963_v2 = vpack.c.bf16 %v10451_v49, %v10450_v42 }
0x119c   :  { %20893 = vst [vmem:[#allocation46_spill] sm:$0xff] %v19796_v22  ;;  %v9769_v10 = vadd.f32 %v9730_v5, %v20895_v27  ;;  %9826 = vadd.xlane.f32.xlu1 %v9825_v60  ;;  %v9822_v43 = vsel %vm346_vm0, %v19796_v22, 0.0  ;;  %v19883_v36 = vpack.c.bf16 %v10459_v55, %v10458_v19  ;;  %v10443_v5 = vld [vmem:[%s20534_s3 + $0xf8] sm:$0xff]  ;;  %v10460_v27 = vld [vmem:[%s20534_s3 + $0x180] sm:$0xff] }
0x119d   :  { %v19805_v46 = vadd.f32 %v19413_v26, %v9770_v17  ;;  %9823 = vadd.xlane.f32.xlu0 %v9822_v43  ;;  %v10442_v17 = vld [vmem:[%s20534_s3 + $0xf0] sm:$0xff]  ;;  %20910 = vst [vmem:[#allocation26_spill] sm:$0xff] %v19963_v2 }
0x119e   :  { %v19808_v23 = vadd.f32 %v19413_v26, %v9769_v10  ;;  %v13677_v54 = vpop.f32.mrb[176].mxu0  ;;  %v19891_v60 = vpack.c.bf16 %v10443_v5, %v10442_v17  ;;  %v10461_v10 = vld [vmem:[%s20534_s3 + $0x188] sm:$0xff]  ;;  %v11799_v61 = vld [vmem:[%s20532_s5 + $0x35] ss:$8 sm:$0x3] }
0x119f   :  { %20896 = vst [vmem:[#allocation25_spill] sm:$0xff] %v19805_v46  ;;  %v9772_v62 = vadd.f32 %v13677_v54, %v20898_v25  ;;  %v9740_v45 = vpop.f32.mrb[177].mxu0  ;;  %v9831_v40 = vsel %vm346_vm0, %v19805_v46, 0.0  ;;  %v19901_v43 = vpack.c.bf16 %v10461_v10, %v10460_v27  ;;  %v10444_v54 = vld [vmem:[%s20534_s3 + $0x100] sm:$0xff]  ;;  %v10445_v25 = vld [vmem:[%s20534_s3 + $0x108] sm:$0xff]  ;;  %v19971_v27 = vshrl.u32 %v10051_v3, 7 }
0x11a0   :  { %20897 = vst [vmem:[#allocation21_spill] sm:$0xff] %v19808_v23  ;;  %v9771_v15 = vadd.f32 %v9740_v45, %v20899_v34  ;;  %9832 = vadd.xlane.f32.xlu1 %v9831_v40  ;;  %v9828_v13 = vsel %vm346_vm0, %v19808_v23, 0.0  ;;  %20902 = vst [vmem:[#allocation24_spill] sm:$0xff] %v19891_v60  ;;  %v10462_v45 = vld [vmem:[%s20534_s3 + $0x190] sm:$0xff]  ;;  %v10463_v40 = vld [vmem:[%s20534_s3 + $0x198] sm:$0xff] }
0x11a1   :  { %v19817_v30 = vadd.f32 %v19413_v26, %v9772_v62  ;;  %9829 = vadd.xlane.f32.xlu0 %v9828_v13  ;;  %20903 = vst [vmem:[#allocation52_spill] sm:$0xff] %v19901_v43  ;;  %v19909_v62 = vpack.c.bf16 %v10445_v25, %v10444_v54  ;;  %v19919_v34 = vpack.c.bf16 %v10463_v40, %v10462_v45  ;;  %v10447_v13 = vld [vmem:[%s20534_s3 + $0x118] sm:$0xff]  ;;  %v20636_v42 = vsub.s32 1, %v19971_v27 }
0x11a2   :  { %v19820_v35 = vadd.f32 %v19413_v26, %v9771_v15  ;;  %v10436_v26 = vld [vmem:[%s20534_s3 + $0xc0] sm:$0xff]  ;;  %v10446_v15 = vld [vmem:[%s20534_s3 + $0x110] sm:$0xff]  ;;  %v20913_v51 = vsub.s32 1, %v19971_v27 }
0x11a3   :  { %20900 = vst [vmem:[#allocation20_spill] sm:$0xff] %v19817_v30  ;;  %v9837_v48 = vsel %vm346_vm0, %v19817_v30, 0.0  ;;  %v19838_v12 = vpack.c.bf16 %v10437_v29, %v10436_v26  ;;  %20904 = vst [vmem:[#allocation29_spill] sm:$0xff] %v19909_v62  ;;  %v10449_v26 = vld [vmem:[%s20534_s3 + $0x128] sm:$0xff] }
0x11a4   :  { %20901 = vst [vmem:[#allocation34_spill] sm:$0xff] %v19820_v35  ;;  %9838 = vadd.xlane.f32.xlu1 %v9837_v48  ;;  %v9834_v9 = vsel %vm346_vm0, %v19820_v35, 0.0  ;;  %20905 = vst [vmem:[#allocation53_spill] sm:$0xff] %v19919_v34  ;;  %v19927_v48 = vpack.c.bf16 %v10447_v13, %v10446_v15  ;;  %v19945_v29 = vpack.c.bf16 %v10449_v26, %v10448_v4 }
0x11a5   :  { %9835 = vadd.xlane.f32.xlu0 %v9834_v9  ;;  %14233 = vmatpush3.bf16.msra.mxu1 %v19838_v12  ;;  %v10464_v9 = vld [vmem:[%s20534_s3 + $0x1a0] sm:$0xff] }
0x11a6   :  { %14235 = vmatprep.subr.bf16.mxu1 %v19847_v53  ;;  %20906 = vst [vmem:[#allocation51_spill] sm:$0xff] %v19927_v48  ;;  %v19937_v38 = vpack.c.bf16 %v10465_v58, %v10464_v9  ;;  %20908 = vst [vmem:[#allocation37_spill] sm:$0xff] %v19945_v29  ;;  %v20637_v58 = vsub.s32 0, %v19971_v27 }
0x11a8   :  { %20907 = vst [vmem:[#allocation54_spill] sm:$0xff] %v19937_v38 }
0x11a9   :  { %14237 = vmatpush3.bf16.msra.mxu1 %v19855_v44 }
0x11aa   :  { %14239 = vmatprep.subr.bf16.mxu1 %v19865_v0 }
0x11ad   :  { %14241 = vmatpush3.bf16.msra.mxu1 %v19874_v50 }
0x11ae   :  { %14243 = vmatprep.subr.bf16.mxu1 %v19883_v36 }
0x11b1   :  { %14245 = vmatpush3.bf16.msra.mxu1 %v19891_v60 }
0x11b2   :  { %14247 = vmatprep.subr.bf16.mxu1 %v19901_v43 }
0x11b5   :  { %14249 = vmatpush3.bf16.msra.mxu1 %v19909_v62 }
0x11b6   :  { %14251 = vmatprep.subr.bf16.mxu1 %v19919_v34 }
0x11b9   :  { %14253 = vmatpush3.bf16.msra.mxu1 %v19927_v48 }
0x11ba   :  { %14255 = vmatprep.subr.bf16.mxu1 %v19937_v38 }
0x11bd   :  { %14257 = vmatpush3.bf16.msra.mxu1 %v19945_v29 }
0x11be   :  { %14259 = vmatprep.subr.bf16.mxu1 %v19955_v18 }
0x11c1   :  { %14261 = vmatpush3.bf16.msra.mxu1 %v19963_v2 }
0x11c2   :  { %14279 = vmatprep.subr.bf16.mxu1 %v19572_v28 }
0x1225   :  { %v9821_v33 = vpop.xlane.xlu1 %9820 }
0x1226   :  { %v9849_v19 = vmul.f32 0.015625, %v9821_v33  ;;  %v9818_v55 = vpop.xlane.xlu0 %9817 }
0x1227   :  { %v9848_v17 = vmul.f32 0.015625, %v9818_v55 }
0x1228   :  { %v19969_v5 = vsub.f32 %v19781_v63, %v9849_v19 }
0x1229   :  { %v19974_v10 = vsub.f32 %v19784_v39, %v9848_v17  ;;  %v9827_v54 = vpop.xlane.xlu1 %9826 }
0x122a   :  { %v9851_v25 = vmul.f32 0.015625, %v9827_v54  ;;  %v9824_v45 = vpop.xlane.xlu0 %9823  ;;  %v9881_v40 = vmul.f32 %v19969_v5, %v19969_v5 }
0x122b   :  { %v9850_v28 = vmul.f32 0.015625, %v9824_v45  ;;  %v9880_v15 = vmul.f32 %v19974_v10, %v19974_v10 }
0x122c   :  { %v19981_v13 = vsub.f32 %v19793_v47, %v9851_v25  ;;  %v9915_v9 = vsel %vm346_vm0, %v9881_v40, 0.0  ;;  %v20003_v25 = vrot.slane %v11799_v61, %v20637_v58 }
0x122d   :  { %v19986_v4 = vsub.f32 %v19796_v22, %v9850_v28  ;;  %9916 = vadd.xlane.f32.xlu1 %v9915_v9  ;;  %v9833_v26 = vpop.xlane.xlu1 %9832  ;;  %v9912_v41 = vsel %vm346_vm0, %v9880_v15, 0.0  ;;  %v20011_v15 = vrot.slane %v11799_v61, %v20636_v42 }
0x122e   :  { %v9853_v49 = vmul.f32 0.015625, %v9833_v26  ;;  %9913 = vadd.xlane.f32.xlu0 %v9912_v41  ;;  %v9830_v3 = vpop.xlane.xlu0 %9829  ;;  %v9883_v33 = vmul.f32 %v19981_v13, %v19981_v13 }
0x122f   :  { %v9852_v19 = vmul.f32 0.015625, %v9830_v3  ;;  %v9882_v55 = vmul.f32 %v19986_v4, %v19986_v4 }
0x1230   :  { %v19998_v17 = vsub.f32 %v19805_v46, %v9853_v49  ;;  %v9921_v54 = vsel %vm346_vm0, %v9883_v33, 0.0 }
0x1231   :  { %v20006_v45 = vsub.f32 %v19808_v23, %v9852_v19  ;;  %9922 = vadd.xlane.f32.xlu1 %v9921_v54  ;;  %v9839_v40 = vpop.xlane.xlu1 %9838  ;;  %v9918_v28 = vsel %vm346_vm0, %v9882_v55, 0.0 }
0x1232   :  { %v9855_v9 = vmul.f32 0.015625, %v9839_v40  ;;  %9919 = vadd.xlane.f32.xlu0 %v9918_v28  ;;  %v9836_v26 = vpop.xlane.xlu0 %9835  ;;  %v9885_v41 = vmul.f32 %v19998_v17, %v19998_v17 }
0x1233   :  { %v9854_v49 = vmul.f32 0.015625, %v9836_v26  ;;  %v9884_v19 = vmul.f32 %v20006_v45, %v20006_v45 }
0x1234   :  { %v10151_v3 = vpop.f32.mrb[176].mxu1  ;;  %v20015_v33 = vpop.f32.mrb[178].mxu0  ;;  %v20020_v54 = vsub.f32 %v19817_v30, %v9855_v9  ;;  %v9927_v40 = vsel %vm346_vm0, %v9885_v41, 0.0 }
0x1235   :  { %v10152_v55 = vadd.f32 %v10151_v3, %v20003_v25  ;;  %v10153_v61 = vpop.f32.mrb[177].mxu1  ;;  %v20023_v42 = vpop.f32.mrb[179].mxu0  ;;  %v20027_v28 = vsub.f32 %v19820_v35, %v9854_v49  ;;  %9928 = vadd.xlane.f32.xlu1 %v9927_v40  ;;  %v9924_v58 = vsel %vm346_vm0, %v9884_v19, 0.0 }
0x1236   :  { %20911 = vst [vmem:[#allocation18_spill] sm:$0xff] %v20020_v54  ;;  %v10154_v26 = vadd.f32 %v10153_v61, %v20011_v15  ;;  %9925 = vadd.xlane.f32.xlu0 %v9924_v58  ;;  %v9887_v9 = vmul.f32 %v20020_v54, %v20020_v54 }
0x1237   :  { %v10214_v46 = vmul.f32 0.70710677, %v10152_v55  ;;  %v9886_v41 = vmul.f32 %v20027_v28, %v20027_v28  ;;  %v10198_v32 = vmul.f32 0.5, %v10152_v55 }
0x1238   :  { %v10215_v30 = vmul.f32 0.70710677, %v10154_v26  ;;  %v10157_v3 = vpop.f32.mrb[178].mxu1  ;;  %v20033_v23 = vpop.f32.mrb[180].mxu0  ;;  %v9933_v19 = vsel %vm346_vm0, %v9887_v9, 0.0 }
0x1239   :  { %15319 = verf.f32 %v10214_v46  ;;  %v10158_v49 = vadd.f32 %v10157_v3, %v20003_v25  ;;  %v10159_v35 = vpop.f32.mrb[179].mxu1  ;;  %v20038_v61 = vpop.f32.mrb[181].mxu0  ;;  %9934 = vadd.xlane.f32.xlu1 %v9933_v19  ;;  %v9930_v40 = vsel %vm346_vm0, %v9886_v41, 0.0 }
0x123a   :  { %15321 = verf.f32 %v10215_v30  ;;  %v10160_v58 = vadd.f32 %v10159_v35, %v20011_v15  ;;  %9931 = vadd.xlane.f32.xlu0 %v9930_v40  ;;  %v11808_v35 = vld [vmem:[%s20532_s5 + $0x25] ss:$8 sm:$0x3] }
0x123b   :  { %v10216_v47 = vmul.f32 0.70710677, %v10158_v49  ;;  %v20068_v6 = vrot.slane %v11808_v35, %v20913_v51 }
0x123c   :  { %v10217_v22 = vmul.f32 0.70710677, %v10160_v58  ;;  %v10163_v63 = vpop.f32.mrb[180].mxu1  ;;  %v20043_v39 = vpop.f32.mrb[182].mxu0  ;;  %v10201_v54 = vmul.f32 0.5, %v10160_v58 }
0x123d   :  { %15323 = verf.f32 %v10216_v47  ;;  %v10164_v46 = vadd.f32 %v10163_v63, %v20003_v25  ;;  %v10165_v3 = vpop.f32.mrb[181].mxu1  ;;  %v20046_v57 = vpop.f32.mrb[183].mxu0 }
0x123e   :  { %15325 = verf.f32 %v10217_v22  ;;  %v10166_v30 = vadd.f32 %v10165_v3, %v20011_v15  ;;  %v20912_v22 = vsub.s32 0, %v19971_v27 }
0x123f   :  { %v10218_v9 = vmul.f32 0.70710677, %v10164_v46 }
0x1240   :  { %v10219_v41 = vmul.f32 0.70710677, %v10166_v30  ;;  %v10169_v19 = vpop.f32.mrb[182].mxu1  ;;  %v20052_v40 = vpop.f32.mrb[184].mxu0  ;;  %v20061_v31 = vrot.slane %v11808_v35, %v20912_v22  ;;  %v10199_v22 = vmul.f32 0.5, %v10154_v26  ;;  %v10376_v26 = vadd.f32 %v20023_v42, %v20068_v6 }
0x1241   :  { %15327 = verf.f32 %v10218_v9  ;;  %v20055_v47 = vadd.f32 %v10169_v19, %v20003_v25  ;;  %v10171_v63 = vpop.f32.mrb[183].mxu1  ;;  %v20057_v37 = vpop.f32.mrb[185].mxu0 }
0x1242   :  { %15329 = verf.f32 %v10219_v41  ;;  %v20064_v3 = vadd.f32 %v10171_v63, %v20011_v15  ;;  %v10374_v35 = vadd.f32 %v20015_v33, %v20061_v31 }
0x1243   :  { %v15320_v11 = vpop.eup %15319  ;;  %v10220_v9 = vmul.f32 0.70710677, %v20055_v47 }
0x1244   :  { %v15322_v19 = vpop.eup %15321  ;;  %v10246_v8 = vadd.f32 1.0, %v15320_v11  ;;  %v10221_v2 = vmul.f32 0.70710677, %v20064_v3  ;;  %v10175_v18 = vpop.f32.mrb[184].mxu1 }
0x1245   :  { %v20072_v29 = vpop.f32.mrb[186].mxu0  ;;  %v10247_v41 = vadd.f32 1.0, %v15322_v19  ;;  %15331 = verf.f32 %v10220_v9  ;;  %v20075_v63 = vadd.f32 %v10175_v18, %v20003_v25  ;;  %v10177_v38 = vpop.f32.mrb[185].mxu1  ;;  %v10200_v9 = vmul.f32 0.5, %v10158_v49 }
0x1246   :  { %v20077_v27 = vpop.f32.mrb[187].mxu0  ;;  %v10262_v51 = vmul.f32 %v10246_v8, %v10198_v32  ;;  %15333 = verf.f32 %v10221_v2  ;;  %v20082_v11 = vadd.f32 %v10177_v38, %v20011_v15 }
0x1247   :  { %v15324_v55 = vpop.eup %15323  ;;  %v10263_v48 = vmul.f32 %v10247_v41, %v10199_v22  ;;  %v10222_v18 = vmul.f32 0.70710677, %v20075_v63 }
0x1248   :  { %v15326_v19 = vpop.eup %15325  ;;  %v10420_v34 = vmul.f32 %v10374_v35, %v10262_v51  ;;  %v10248_v62 = vadd.f32 1.0, %v15324_v55  ;;  %v10223_v32 = vmul.f32 0.70710677, %v20082_v11  ;;  %v10181_v8 = vpop.f32.mrb[186].mxu1  ;;  %v10380_v51 = vadd.f32 %v20033_v23, %v20061_v31 }
0x1249   :  { %v20088_v33 = vpop.f32.mrb[188].mxu0  ;;  %v10421_v2 = vmul.f32 %v10376_v26, %v10263_v48  ;;  %v10249_v38 = vadd.f32 1.0, %v15326_v19  ;;  %15335 = verf.f32 %v10222_v18  ;;  %v20091_v22 = vadd.f32 %v10181_v8, %v20003_v25  ;;  %v10183_v41 = vpop.f32.mrb[187].mxu1 }
0x124a   :  { %v20093_v42 = vpop.f32.mrb[189].mxu0  ;;  %v10264_v49 = vmul.f32 %v10248_v62, %v10200_v9  ;;  %15337 = verf.f32 %v10223_v32  ;;  %v20098_v58 = vadd.f32 %v10183_v41, %v20011_v15  ;;  %v10382_v48 = vadd.f32 %v20038_v61, %v20068_v6 }
0x124b   :  { %v15328_v35 = vpop.eup %15327  ;;  %v10265_v55 = vmul.f32 %v10249_v38, %v10201_v54  ;;  %v10202_v26 = vmul.f32 0.5, %v10164_v46  ;;  %v10224_v18 = vmul.f32 0.70710677, %v20091_v22  ;;  %10532 = vmatprep.mubr.f32.mxu1 %v10421_v2  ;;  %v10203_v62 = vmul.f32 0.5, %v10166_v30 }
0x124c   :  { %v15330_v19 = vpop.eup %15329  ;;  %v10422_v8 = vmul.f32 %v10380_v51, %v10264_v49  ;;  %v10250_v43 = vadd.f32 1.0, %v15328_v35  ;;  %v10225_v9 = vmul.f32 0.70710677, %v20098_v58  ;;  %v10187_v23 = vpop.f32.mrb[188].mxu1  ;;  %10533 = vmatmul.mubr.f32.vlgmr.msra.gmra.mrb[192].mxu1 %v10420_v34  ;;  %v10386_v30 = vadd.f32 %v20043_v39, %v20061_v31 }
0x124d   :  { %v20104_v32 = vpop.f32.mrb[190].mxu0  ;;  %v10423_v41 = vmul.f32 %v10382_v48, %v10265_v55  ;;  %v10251_v60 = vadd.f32 1.0, %v15330_v19  ;;  %15339 = verf.f32 %v10224_v18  ;;  %v20107_v54 = vadd.f32 %v10187_v23, %v20003_v25  ;;  %v10189_v61 = vpop.f32.mrb[189].mxu1  ;;  %14281 = vmatpush1.bf16.msra.mxu1 %v19592_v56 }
0x124e   :  { %v20109_v46 = vpop.f32.mrb[191].mxu0  ;;  %v10266_v2 = vmul.f32 %v10250_v43, %v10202_v26  ;;  %15341 = verf.f32 %v10225_v9  ;;  %v20115_v38 = vadd.f32 %v10189_v61, %v20011_v15  ;;  %14283 = vmatprep.subr.bf16.mxu1 %v19617_v16  ;;  %v10388_v51 = vadd.f32 %v20046_v57, %v20068_v6 }
0x124f   :  { %v15332_v34 = vpop.eup %15331  ;;  %v10267_v49 = vmul.f32 %v10251_v60, %v10203_v62  ;;  %v10204_v35 = vmul.f32 0.5, %v20055_v47  ;;  %v10226_v55 = vmul.f32 0.70710677, %v20107_v54  ;;  %10537 = vmatprep.mubr.f32.mxu1 %v10423_v41  ;;  %v10205_v39 = vmul.f32 0.5, %v20064_v3 }
0x1250   :  { %v15334_v56 = vpop.eup %15333  ;;  %v10424_v43 = vmul.f32 %v10386_v30, %v10266_v2  ;;  %v10252_v48 = vadd.f32 1.0, %v15332_v34  ;;  %v10227_v26 = vmul.f32 0.70710677, %v20115_v38  ;;  %v10193_v18 = vpop.f32.mrb[190].mxu1  ;;  %10538 = vmatmul.mubr.f32.gmra.mrb[194].mxu1 %v10422_v8  ;;  %v10392_v3 = vadd.f32 %v20052_v40, %v20061_v31 }
0x1251   :  { %v20124_v19 = vpop.f32.mrb[192].mxu0  ;;  %v10425_v16 = vmul.f32 %v10388_v51, %v10267_v49  ;;  %v10253_v60 = vadd.f32 1.0, %v15334_v56  ;;  %15343 = verf.f32 %v10226_v55  ;;  %v20127_v57 = vadd.f32 %v10193_v18, %v20003_v25  ;;  %v10195_v47 = vpop.f32.mrb[191].mxu1  ;;  %14285 = vmatpush1.bf16.msra.mxu1 %v19628_v24 }
0x1252   :  { %v20129_v62 = vpop.f32.mrb[193].mxu0  ;;  %v10268_v9 = vmul.f32 %v10252_v48, %v10204_v35  ;;  %15345 = verf.f32 %v10227_v26  ;;  %v10196_v23 = vadd.f32 %v10195_v47, %v20011_v15  ;;  %14287 = vmatprep.subr.bf16.mxu1 %v19653_v1  ;;  %v10394_v61 = vadd.f32 %v20057_v37, %v20068_v6 }
0x1253   :  { %v15336_v8 = vpop.eup %15335  ;;  %v10269_v41 = vmul.f32 %v10253_v60, %v10205_v39  ;;  %v10228_v2 = vmul.f32 0.70710677, %v20127_v57  ;;  %10542 = vmatprep.mubr.f32.mxu1 %v10425_v16  ;;  %v10206_v24 = vmul.f32 0.5, %v20075_v63  ;;  %v10207_v35 = vmul.f32 0.5, %v20082_v11 }
0x1254   :  { %v15338_v30 = vpop.eup %15337  ;;  %v10426_v34 = vmul.f32 %v10392_v3, %v10268_v9  ;;  %v10254_v49 = vadd.f32 1.0, %v15336_v8  ;;  %v10229_v51 = vmul.f32 0.70710677, %v10196_v23  ;;  %10543 = vmatmul.mubr.f32.gmra.mrb[196].mxu1 %v10424_v43  ;;  %v10398_v37 = vadd.f32 %v20072_v29, %v20061_v31 }
0x1255   :  { %v10427_v40 = vmul.f32 %v10394_v61, %v10269_v41  ;;  %v10255_v55 = vadd.f32 1.0, %v15338_v30  ;;  %15347 = verf.f32 %v10228_v2  ;;  %14289 = vmatpush1.bf16.msra.mxu1 %v19664_v14  ;;  %v10400_v63 = vadd.f32 %v20077_v27, %v20068_v6 }
0x1256   :  { %v10270_v1 = vmul.f32 %v10254_v49, %v10206_v24  ;;  %15349 = verf.f32 %v10229_v51  ;;  %14291 = vmatprep.subr.bf16.mxu1 %v19689_v20  ;;  %v10208_v11 = vmul.f32 0.5, %v20091_v22  ;;  %v10209_v18 = vmul.f32 0.5, %v20098_v58 }
0x1257   :  { %v15340_v56 = vpop.eup %15339  ;;  %v10271_v48 = vmul.f32 %v10255_v55, %v10207_v35  ;;  %10547 = vmatprep.mubr.f32.mxu1 %v10427_v40  ;;  %v10404_v20 = vadd.f32 %v20088_v33, %v20061_v31  ;;  %v10406_v27 = vadd.f32 %v20093_v42, %v20068_v6  ;;  %v10210_v3 = vmul.f32 0.5, %v20107_v54 }
0x1258   :  { %v15342_v43 = vpop.eup %15341  ;;  %v10428_v39 = vmul.f32 %v10398_v37, %v10270_v1  ;;  %v10256_v26 = vadd.f32 1.0, %v15340_v56  ;;  %10548 = vmatmul.mubr.f32.gmra.mrb[198].mxu1 %v10426_v34  ;;  %v10211_v41 = vmul.f32 0.5, %v20115_v38  ;;  %v10410_v33 = vadd.f32 %v20104_v32, %v20061_v31 }
0x1259   :  { %v10429_v14 = vmul.f32 %v10400_v63, %v10271_v48  ;;  %v10257_v16 = vadd.f32 1.0, %v15342_v43  ;;  %14293 = vmatpush1.bf16.msra.mxu1 %v19700_v52  ;;  %v10412_v42 = vadd.f32 %v20109_v46, %v20068_v6  ;;  %v10212_v54 = vmul.f32 0.5, %v20127_v57  ;;  %v11057_v57 = vld [vmem:[%s20533_s2 + $0x20] sm:$0xff] }
0x125a   :  { %v10272_v29 = vmul.f32 %v10256_v26, %v10208_v11  ;;  %v10213_v40 = vmul.f32 0.5, %v10196_v23  ;;  %v10416_v55 = vadd.f32 %v20124_v19, %v20061_v31  ;;  %v10418_v1 = vadd.f32 %v20129_v62, %v20068_v6  ;;  %v11058_v19 = vld [vmem:[%s20533_s2 + $0x58] sm:$0xff] }
0x125b   :  { %v15344_v60 = vpop.eup %15343  ;;  %v10273_v47 = vmul.f32 %v10257_v16, %v10209_v18  ;;  %10552 = vmatprep.mubr.f32.mxu1 %v10429_v14  ;;  %v14326_v23 = vpack.c.bf16 %v11058_v19, %v11057_v57 }
0x125c   :  { %v15346_v9 = vpop.eup %15345  ;;  %v10430_v22 = vmul.f32 %v10404_v20, %v10272_v29  ;;  %v10258_v8 = vadd.f32 1.0, %v15344_v60  ;;  %10553 = vmatmul.mubr.f32.gmra.mrb[200].mxu1 %v10428_v39 }
0x125d   :  { %v10431_v58 = vmul.f32 %v10406_v27, %v10273_v47  ;;  %v10259_v52 = vadd.f32 1.0, %v15346_v9  ;;  %14327 = vmatprep.subr.bf16.mxu1 %v14326_v23 }
0x125e   :  { %v10274_v61 = vmul.f32 %v10258_v8, %v10210_v3 }
0x125f   :  { %v15348_v2 = vpop.eup %15347  ;;  %v10275_v30 = vmul.f32 %v10259_v52, %v10211_v41  ;;  %10557 = vmatprep.mubr.f32.mxu1 %v10431_v58 }
0x1260   :  { %v15350_v34 = vpop.eup %15349  ;;  %v10432_v24 = vmul.f32 %v10410_v33, %v10274_v61  ;;  %v10260_v49 = vadd.f32 1.0, %v15348_v2  ;;  %10558 = vmatmul.mubr.f32.gmra.mrb[202].mxu1 %v10430_v22 }
0x1261   :  { %v10433_v51 = vmul.f32 %v10412_v42, %v10275_v30  ;;  %v10261_v38 = vadd.f32 1.0, %v15350_v34  ;;  %v11059_v30 = vld [vmem:[%s20533_s2 + $0x90] sm:$0xff]  ;;  %v11060_v42 = vld [vmem:[%s20533_s2 + $0xc8] sm:$0xff] }
0x1262   :  { %v10276_v35 = vmul.f32 %v10260_v49, %v10212_v54 }
0x1263   :  { %v10277_v32 = vmul.f32 %v10261_v38, %v10213_v40  ;;  %10562 = vmatprep.mubr.f32.mxu1 %v10433_v51  ;;  %v14330_v40 = vpack.c.bf16 %v11060_v42, %v11059_v30  ;;  %v11061_v38 = vld [vmem:[%s20533_s2 + $0x100] sm:$0xff] }
0x1264   :  { %v10434_v46 = vmul.f32 %v10416_v55, %v10276_v35  ;;  %10563 = vmatmul.mubr.f32.gmra.mrb[204].mxu1 %v10432_v24  ;;  %v11062_v35 = vld [vmem:[%s20533_s2 + $0x138] sm:$0xff]  ;;  %v20925_v42 = vld [vmem:[#allocation10_spill] sm:$0xff] }
0x1265   :  { %v10435_v37 = vmul.f32 %v10418_v1, %v10277_v32 }
0x1267   :  { %10567 = vmatprep.mubr.f32.mxu1 %v10435_v37  ;;  %v14334_v37 = vpack.c.bf16 %v11062_v35, %v11061_v38 }
0x1268   :  { %10568 = vmatmul.mubr.f32.gmra.mrb[206].mxu1 %v10434_v46 }
0x1269   :  { %10854 = vmatprep.mubr.f32.mxu1 %v20868_v7 }
0x12ba   :  { %v9917_v56 = vpop.xlane.xlu1 %9916 }
0x12bb   :  { %v9945_v62 = vmul.f32 0.015625, %v9917_v56  ;;  %v9914_v48 = vpop.xlane.xlu0 %9913 }
0x12bc   :  { %v9944_v63 = vmul.f32 0.015625, %v9914_v48 }
0x12bd   :  { %v9961_v43 = vadd.f32 1e-05, %v9945_v62 }
0x12be   :  { %v9960_v39 = vadd.f32 1e-05, %v9944_v63  ;;  %v9923_v11 = vpop.xlane.xlu1 %9922 }
0x12bf   :  { %15351 = vrsqrt.f32 %v9961_v43  ;;  %v9947_v26 = vmul.f32 0.015625, %v9923_v11  ;;  %v9920_v14 = vpop.xlane.xlu0 %9919 }
0x12c0   :  { %15353 = vrsqrt.f32 %v9960_v39  ;;  %v9946_v18 = vmul.f32 0.015625, %v9920_v14  ;;  %v20915_v39 = vld [vmem:[#allocation52_spill] sm:$0xff] }
0x12c1   :  { %v9963_v16 = vadd.f32 1e-05, %v9947_v26  ;;  %v20916_v26 = vld [vmem:[#allocation18_spill] sm:$0xff] }
0x12c2   :  { %v9962_v29 = vadd.f32 1e-05, %v9946_v18  ;;  %v9929_v20 = vpop.xlane.xlu1 %9928  ;;  %v20917_v18 = vld [vmem:[#allocation29_spill] sm:$0xff] }
0x12c3   :  { %v9926_v60 = vpop.xlane.xlu0 %9925  ;;  %v9949_v27 = vmul.f32 0.015625, %v9929_v20  ;;  %v20919_v20 = vld [vmem:[#allocation51_spill] sm:$0xff] }
0x12c4   :  { %15355 = vrsqrt.f32 %v9962_v29  ;;  %v9948_v47 = vmul.f32 0.015625, %v9926_v60  ;;  %v20920_v60 = vld [vmem:[#allocation54_spill] sm:$0xff] }
0x12c5   :  { %15357 = vrsqrt.f32 %v9963_v16  ;;  %v9965_v58 = vadd.f32 1e-05, %v9949_v27  ;;  %v20921_v27 = vld [vmem:[#allocation37_spill] sm:$0xff] }
0x12c6   :  { %v9964_v9 = vadd.f32 1e-05, %v9948_v47  ;;  %v9935_v61 = vpop.xlane.xlu1 %9934 }
0x12c7   :  { %v9932_v22 = vpop.xlane.xlu0 %9931  ;;  %v9951_v24 = vmul.f32 0.015625, %v9935_v61 }
0x12c8   :  { %15359 = vrsqrt.f32 %v9964_v9  ;;  %v9950_v41 = vmul.f32 0.015625, %v9932_v22  ;;  %v20922_v9 = vld [vmem:[#allocation43_spill] sm:$0xff]  ;;  %v20923_v22 = vld [vmem:[#allocation26_spill] sm:$0xff] }
0x12c9   :  { %v15352_v3 = vpop.eup %15351  ;;  %15361 = vrsqrt.f32 %v9965_v58  ;;  %v9967_v55 = vadd.f32 1e-05, %v9951_v24 }
0x12ca   :  { %v15354_v8 = vpop.eup %15353  ;;  %v9993_v33 = vmul.f32 %v15352_v3, %v19969_v5  ;;  %v9966_v54 = vadd.f32 1e-05, %v9950_v41  ;;  %v20257_v41 = vld [vmem:[%s20532_s5 + $0x21] ss:$0 sm:$0xff] }
0x12cb   :  { %v9992_v52 = vmul.f32 %v15354_v8, %v19974_v10 }
0x12cc   :  { %v10009_v10 = vmul.f32 %v9993_v33, %v19709_v59  ;;  %15363 = vrsqrt.f32 %v9966_v54 }
0x12cd   :  { %v10008_v2 = vmul.f32 %v9992_v52, %v19709_v59  ;;  %15365 = vrsqrt.f32 %v9967_v55 }
0x12ce   :  { %v15356_v34 = vpop.eup %15355 }
0x12cf   :  { %v10024_v49 = vadd.f32 %v10008_v2, %v19716_v21  ;;  %v9994_v5 = vmul.f32 %v15356_v34, %v19986_v4  ;;  %v15358_v51 = vpop.eup %15357  ;;  %v10025_v4 = vadd.f32 %v10009_v10, %v19716_v21  ;;  %v11063_v21 = vld [vmem:[%s20533_s2 + $0x170] sm:$0xff] }
0x12d0   :  { %v9995_v1 = vmul.f32 %v15358_v51, %v19981_v13  ;;  %v15400_v13 = vld [vmem:[%s20532_s5 + $0x7] ss:$0 sm:$0xff] }
0x12d1   :  { %11817 = vmatmul.mubr.msk.f32.vlgmr.msra.gmra.mrb[194].mxu0 %vm346_vm0, %v10024_v49  ;;  %11825 = vmatmul.mubr.msk.f32.vlgmr.msra.gmra.mrb[208].mxu1 %vm346_vm0, %v10024_v49  ;;  %v10010_v32 = vmul.f32 %v9994_v5, %v19709_v59  ;;  %v11064_v59 = vld [vmem:[%s20533_s2 + $0x1a8] sm:$0xff]  ;;  %v20926_v5 = vld [vmem:[#allocation12_spill] sm:$0xff] }
0x12d2   :  { %10667 = vmatprep.mubr.f32.mxu0 %v20868_v7  ;;  %10860 = vmatprep.mubr.f32.mxu1 %v20868_v7  ;;  %v15360_v46 = vpop.eup %15359  ;;  %v10011_v57 = vmul.f32 %v15400_v13, %v9995_v1  ;;  %v14338_v56 = vpack.c.bf16 %v11064_v59, %v11063_v21  ;;  %v20928_v59 = vld [vmem:[#allocation14_spill] sm:$0xff] }
0x12d3   :  { %14329 = vmatpush3.bf16.msra.mxu1 %v14326_v23  ;;  %14297 = vmatpush3.bf16.msra.mxu0 %v19838_v12  ;;  %v15399_v12 = vld [vmem:[%s20532_s5 + $0x20] ss:$0 sm:$0xff]  ;;  %v9996_v19 = vmul.f32 %v15360_v46, %v20006_v45  ;;  %v15362_v23 = vpop.eup %15361 }
0x12d4   :  { %14331 = vmatprep.subr.bf16.mxu1 %v14330_v40  ;;  %14299 = vmatprep.subr.bf16.mxu0 %v19847_v53  ;;  %v10026_v53 = vadd.f32 %v15399_v12, %v10010_v32  ;;  %v10027_v62 = vadd.f32 %v15399_v12, %v10011_v57  ;;  %v9997_v45 = vmul.f32 %v15362_v23, %v19998_v17  ;;  %v20914_v17 = vld [vmem:[#allocation24_spill] sm:$0xff]  ;;  %v20929_v23 = vld [vmem:[#allocation15_spill] sm:$0xff] }
0x12d5   :  { %11818 = vmatmul.mubr.msk.f32.gmra.mrb[196].mxu0 %vm346_vm0, %v10025_v4  ;;  %11826 = vmatmul.mubr.msk.f32.gmra.mrb[210].mxu1 %vm346_vm0, %v10025_v4  ;;  %v10012_v48 = vmul.f32 %v15400_v13, %v9996_v19  ;;  %v20927_v4 = vld [vmem:[#allocation13_spill] sm:$0xff] }
0x12d6   :  { %10673 = vmatprep.mubr.f32.mxu0 %v20868_v7  ;;  %10866 = vmatprep.mubr.f32.mxu1 %v20868_v7  ;;  %v10013_v63 = vmul.f32 %v15400_v13, %v9997_v45 }
0x12d7   :  { %14333 = vmatpush3.bf16.msra.mxu1 %v14330_v40  ;;  %14301 = vmatpush3.bf16.msra.mxu0 %v19855_v44  ;;  %v15364_v44 = vpop.eup %15363 }
0x12d8   :  { %14335 = vmatprep.subr.bf16.mxu1 %v14334_v37  ;;  %14303 = vmatprep.subr.bf16.mxu0 %v19865_v0  ;;  %v10028_v0 = vadd.f32 %v15399_v12, %v10012_v48  ;;  %v9998_v43 = vmul.f32 %v15364_v44, %v20027_v28  ;;  %v20918_v28 = vld [vmem:[#allocation53_spill] sm:$0xff] }
0x12d9   :  { %11819 = vmatmul.mubr.msk.f32.gmra.mrb[198].mxu0 %vm346_vm0, %v10026_v53  ;;  %11827 = vmatmul.mubr.msk.f32.gmra.mrb[212].mxu1 %vm346_vm0, %v10026_v53 }
0x12da   :  { %10679 = vmatprep.mubr.f32.mxu0 %v20868_v7  ;;  %10872 = vmatprep.mubr.f32.mxu1 %v20868_v7  ;;  %v10014_v11 = vmul.f32 %v15400_v13, %v9998_v43 }
0x12db   :  { %14337 = vmatpush3.bf16.msra.mxu1 %v14334_v37  ;;  %14305 = vmatpush3.bf16.msra.mxu0 %v19874_v50  ;;  %v15366_v50 = vpop.eup %15365 }
0x12dc   :  { %14339 = vmatprep.subr.bf16.mxu1 %v14338_v56  ;;  %14307 = vmatprep.subr.bf16.mxu0 %v19883_v36  ;;  %v10029_v36 = vadd.f32 %v15399_v12, %v10013_v63  ;;  %v9999_v14 = vmul.f32 %v15366_v50, %v20916_v26  ;;  %v10030_v16 = vadd.f32 %v15399_v12, %v10014_v11 }
0x12dd   :  { %11820 = vmatmul.mubr.msk.f32.gmra.mrb[200].mxu0 %vm346_vm0, %v10027_v62  ;;  %11828 = vmatmul.mubr.msk.f32.gmra.mrb[214].mxu1 %vm346_vm0, %v10027_v62 }
0x12de   :  { %10685 = vmatprep.mubr.f32.mxu0 %v20868_v7  ;;  %10878 = vmatprep.mubr.f32.mxu1 %v20868_v7  ;;  %v10015_v29 = vmul.f32 %v15400_v13, %v9999_v14 }
0x12df   :  { %14341 = vmatpush3.bf16.msra.mxu1 %v14338_v56  ;;  %14309 = vmatpush3.bf16.msra.mxu0 %v20914_v17 }
0x12e0   :  { %14311 = vmatprep.subr.bf16.mxu0 %v20915_v39  ;;  %v10031_v47 = vadd.f32 %v15399_v12, %v10015_v29 }
0x12e1   :  { %11821 = vmatmul.mubr.msk.f32.gmra.mrb[202].mxu0 %vm346_vm0, %v10028_v0  ;;  %11829 = vmatmul.mubr.msk.f32.gmra.mrb[216].mxu1 %vm346_vm0, %v10028_v0  ;;  %v20930_v0 = vld [vmem:[#allocation16_spill] sm:$0xff] }
0x12e2   :  { %10691 = vmatprep.mubr.f32.mxu0 %v20868_v7  ;;  %10884 = vmatprep.mubr.f32.mxu1 %v20868_v7 }
0x12e3   :  { %14313 = vmatpush3.bf16.msra.mxu0 %v20917_v18 }
0x12e4   :  { %14315 = vmatprep.subr.bf16.mxu0 %v20918_v28 }
0x12e5   :  { %11822 = vmatmul.mubr.msk.f32.gmra.mrb[204].mxu0 %vm346_vm0, %v10029_v36  ;;  %11830 = vmatmul.mubr.msk.f32.gmra.mrb[218].mxu1 %vm346_vm0, %v10029_v36  ;;  %v20931_v36 = vld [vmem:[#allocation17_spill] sm:$0xff] }
0x12e6   :  { %10697 = vmatprep.mubr.f32.mxu0 %v20868_v7  ;;  %10890 = vmatprep.mubr.f32.mxu1 %v20868_v7 }
0x12e7   :  { %14317 = vmatpush3.bf16.msra.mxu0 %v20919_v20 }
0x12e8   :  { %14319 = vmatprep.subr.bf16.mxu0 %v20920_v60 }
0x12e9   :  { %11823 = vmatmul.mubr.msk.f32.gmra.mrb[206].mxu0 %vm346_vm0, %v10030_v16  ;;  %11831 = vmatmul.mubr.msk.f32.gmra.mrb[220].mxu1 %vm346_vm0, %v10030_v16 }
0x12ea   :  { %10703 = vmatprep.mubr.f32.mxu0 %v20868_v7  ;;  %10896 = vmatprep.mubr.f32.mxu1 %v20868_v7  ;;  %v20924_v7 = vld [vmem:[#allocation11_spill] sm:$0xff] }
0x12eb   :  { %14321 = vmatpush3.bf16.msra.mxu0 %v20921_v27 }
0x12ec   :  { %14323 = vmatprep.subr.bf16.mxu0 %v20922_v9 }
0x12ed   :  { %11824 = vmatmul.mubr.msk.f32.gmra.mrb[208].mxu0 %vm346_vm0, %v10031_v47  ;;  %11832 = vmatmul.mubr.msk.f32.gmra.mrb[222].mxu1 %vm346_vm0, %v10031_v47 }
0x12ef   :  { %14325 = vmatpush3.bf16.msra.mxu0 %v20923_v22 }
0x131f   :  { %v12515_v3 = vpop.f32.mrb[192].mxu1 }
0x1320   :  { %v12516_v8 = vpop.f32.mrb[193].mxu1 }
0x1321   :  { %v12517_v58 = vadd.f32 %v12516_v8, %v12515_v3 }
0x1323   :  { %v11024_v52 = vadd.f32 %v12517_v58, %v20924_v7  ;;  %v12518_v61 = vpop.f32.mrb[194].mxu1 }
0x1324   :  { %v12519_v33 = vpop.f32.mrb[195].mxu1 }
0x1325   :  { %v11041_v2 = vadd.f32 %v20257_v41, %v11024_v52  ;;  %v12520_v30 = vadd.f32 %v12519_v33, %v12518_v61 }
0x1327   :  { %v11025_v34 = vadd.f32 %v12520_v30, %v20925_v42  ;;  %v12521_v24 = vpop.f32.mrb[196].mxu1  ;;  %13694 = vmatprep.mubr.msk.f32.mxu1 %vm346_vm0, %v11041_v2 }
0x1328   :  { %v12522_v54 = vpop.f32.mrb[197].mxu1 }
0x1329   :  { %v11042_v49 = vadd.f32 %v20257_v41, %v11025_v34  ;;  %v12523_v10 = vadd.f32 %v12522_v54, %v12521_v24 }
0x132b   :  { %v11026_v51 = vadd.f32 %v12523_v10, %v20926_v5  ;;  %v12524_v40 = vpop.f32.mrb[198].mxu1  ;;  %13695 = vmatmul.mubr.msk.f32.vlgmr.msra.gmra.mrb[224].mxu1 %vm346_vm0, %v11042_v49 }
0x132c   :  { %v12525_v38 = vpop.f32.mrb[199].mxu1 }
0x132d   :  { %v11043_v35 = vadd.f32 %v20257_v41, %v11026_v51  ;;  %v12526_v55 = vadd.f32 %v12525_v38, %v12524_v40 }
0x132f   :  { %v11027_v32 = vadd.f32 %v12526_v55, %v20927_v4  ;;  %v12527_v1 = vpop.f32.mrb[200].mxu1  ;;  %13697 = vmatprep.mubr.msk.f32.mxu1 %vm346_vm0, %v11043_v35 }
0x1330   :  { %v12528_v46 = vpop.f32.mrb[201].mxu1 }
0x1331   :  { %v11044_v37 = vadd.f32 %v20257_v41, %v11027_v32  ;;  %v12529_v21 = vadd.f32 %v12528_v46, %v12527_v1 }
0x1333   :  { %v11028_v12 = vadd.f32 %v12529_v21, %v20928_v59  ;;  %v12530_v53 = vpop.f32.mrb[202].mxu1  ;;  %13698 = vmatmul.mubr.msk.f32.gmra.mrb[226].mxu1 %vm346_vm0, %v11044_v37 }
0x1334   :  { %v12531_v13 = vpop.f32.mrb[203].mxu1 }
0x1335   :  { %v11045_v57 = vadd.f32 %v20257_v41, %v11028_v12  ;;  %v12532_v19 = vadd.f32 %v12531_v13, %v12530_v53 }
0x1337   :  { %v11029_v56 = vadd.f32 %v12532_v19, %v20929_v23  ;;  %v12533_v62 = vpop.f32.mrb[204].mxu1  ;;  %13700 = vmatprep.mubr.msk.f32.mxu1 %vm346_vm0, %v11045_v57 }
0x1338   :  { %v12534_v48 = vpop.f32.mrb[205].mxu1 }
0x1339   :  { %v11046_v45 = vadd.f32 %v20257_v41, %v11029_v56  ;;  %v12535_v44 = vadd.f32 %v12534_v48, %v12533_v62 }
0x133b   :  { %v11030_v63 = vadd.f32 %v12535_v44, %v20930_v0  ;;  %v12536_v43 = vpop.f32.mrb[206].mxu1  ;;  %13701 = vmatmul.mubr.msk.f32.gmra.mrb[228].mxu1 %vm346_vm0, %v11046_v45 }
0x133c   :  { %v12537_v17 = vpop.f32.mrb[207].mxu1 }
0x133d   :  { %v11047_v50 = vadd.f32 %v20257_v41, %v11030_v63  ;;  %v12538_v39 = vadd.f32 %v12537_v17, %v12536_v43 }
0x133f   :  { %v11031_v11 = vadd.f32 %v12538_v39, %v20931_v36  ;;  %13703 = vmatprep.mubr.msk.f32.mxu1 %vm346_vm0, %v11047_v50 }
0x1341   :  { %v11048_v26 = vadd.f32 %v20257_v41, %v11031_v11 }
0x1343   :  { %13704 = vmatmul.mubr.msk.f32.gmra.mrb[230].mxu1 %vm346_vm0, %v11048_v26 }
0x13a4   :  { %v10663_v14 = vpop.f32.mrb[194].mxu0  ;;  %v10856_v18 = vpop.f32.mrb[208].mxu1 }
0x13a5   :  { %v10664_v28 = vadd.f32 %v10663_v14, %v20003_v25  ;;  %v10665_v16 = vpop.f32.mrb[195].mxu0  ;;  %v10858_v29 = vpop.f32.mrb[209].mxu1  ;;  %v10857_v23 = vadd.f32 %v10856_v18, %v20061_v31 }
0x13a6   :  { %v10666_v20 = vadd.f32 %v10665_v16, %v20011_v15  ;;  %v10859_v45 = vadd.f32 %v10858_v29, %v20068_v6 }
0x13a7   :  { %v10726_v60 = vmul.f32 0.70710677, %v10664_v28  ;;  %v10710_v32 = vmul.f32 0.5, %v10664_v28 }
0x13a8   :  { %v10727_v47 = vmul.f32 0.70710677, %v10666_v20  ;;  %v10669_v27 = vpop.f32.mrb[196].mxu0  ;;  %v20285_v9 = vpop.f32.mrb[210].mxu1  ;;  %v10711_v59 = vmul.f32 0.5, %v10666_v20 }
0x13a9   :  { %15367 = verf.f32 %v10726_v60  ;;  %v10670_v22 = vadd.f32 %v10669_v27, %v20003_v25  ;;  %v10671_v3 = vpop.f32.mrb[197].mxu0  ;;  %v20288_v8 = vpop.f32.mrb[211].mxu1  ;;  %v10863_v20 = vadd.f32 %v20285_v9, %v20061_v31 }
0x13aa   :  { %15369 = verf.f32 %v10727_v47  ;;  %v10672_v58 = vadd.f32 %v10671_v3, %v20011_v15 }
0x13ab   :  { %v10728_v7 = vmul.f32 0.70710677, %v10670_v22  ;;  %v10712_v44 = vmul.f32 0.5, %v10670_v22  ;;  %v10865_v22 = vadd.f32 %v20288_v8, %v20068_v6 }
0x13ac   :  { %v10729_v52 = vmul.f32 0.70710677, %v10672_v58  ;;  %v10675_v61 = vpop.f32.mrb[198].mxu0  ;;  %v20291_v33 = vpop.f32.mrb[212].mxu1  ;;  %v10713_v50 = vmul.f32 0.5, %v10672_v58 }
0x13ad   :  { %15371 = verf.f32 %v10728_v7  ;;  %v10676_v2 = vadd.f32 %v10675_v61, %v20003_v25  ;;  %v10677_v30 = vpop.f32.mrb[199].mxu0  ;;  %v20294_v42 = vpop.f32.mrb[213].mxu1 }
0x13ae   :  { %15373 = verf.f32 %v10729_v52  ;;  %v10678_v34 = vadd.f32 %v10677_v30, %v20011_v15 }
0x13af   :  { %v10730_v24 = vmul.f32 0.70710677, %v10676_v2  ;;  %v10714_v3 = vmul.f32 0.5, %v10676_v2 }
0x13b0   :  { %v10731_v54 = vmul.f32 0.70710677, %v10678_v34  ;;  %v10681_v49 = vpop.f32.mrb[200].mxu0  ;;  %v20297_v10 = vpop.f32.mrb[214].mxu1  ;;  %v10715_v30 = vmul.f32 0.5, %v10678_v34 }
0x13b1   :  { %15375 = verf.f32 %v10730_v24  ;;  %v20300_v5 = vadd.f32 %v10681_v49, %v20003_v25  ;;  %v10683_v51 = vpop.f32.mrb[201].mxu0  ;;  %v20302_v40 = vpop.f32.mrb[215].mxu1 }
0x13b2   :  { %15377 = verf.f32 %v10731_v54  ;;  %v20305_v38 = vadd.f32 %v10683_v51, %v20011_v15 }
0x13b3   :  { %v15368_v35 = vpop.eup %15367  ;;  %v10732_v55 = vmul.f32 0.70710677, %v20300_v5 }
0x13b4   :  { %v15370_v4 = vpop.eup %15369  ;;  %v10758_v1 = vadd.f32 1.0, %v15368_v35  ;;  %v10733_v46 = vmul.f32 0.70710677, %v20305_v38  ;;  %v10687_v37 = vpop.f32.mrb[202].mxu0 }
0x13b5   :  { %v20309_v21 = vpop.f32.mrb[216].mxu1  ;;  %v10759_v12 = vadd.f32 1.0, %v15370_v4  ;;  %15379 = verf.f32 %v10732_v55  ;;  %v20312_v53 = vadd.f32 %v10687_v37, %v20003_v25  ;;  %v10689_v13 = vpop.f32.mrb[203].mxu0  ;;  %v10869_v4 = vadd.f32 %v20291_v33, %v20061_v31 }
0x13b6   :  { %v20314_v57 = vpop.f32.mrb[217].mxu1  ;;  %v10774_v19 = vmul.f32 %v10758_v1, %v10710_v32  ;;  %15381 = verf.f32 %v10733_v46  ;;  %v20318_v56 = vadd.f32 %v10689_v13, %v20011_v15  ;;  %v10871_v46 = vadd.f32 %v20294_v42, %v20068_v6 }
0x13b7   :  { %v15372_v62 = vpop.eup %15371  ;;  %v10775_v48 = vmul.f32 %v10759_v12, %v10711_v59  ;;  %v10734_v0 = vmul.f32 0.70710677, %v20312_v53  ;;  %v10716_v37 = vmul.f32 0.5, %v20300_v5 }
0x13b8   :  { %v15374_v63 = vpop.eup %15373  ;;  %v10903_v43 = vmul.f32 %v10857_v23, %v10774_v19  ;;  %v10760_v17 = vadd.f32 1.0, %v15372_v62  ;;  %v10735_v39 = vmul.f32 0.70710677, %v20318_v56  ;;  %v10693_v36 = vpop.f32.mrb[204].mxu0  ;;  %v10717_v23 = vmul.f32 0.5, %v20305_v38 }
0x13b9   :  { %v20323_v11 = vpop.f32.mrb[218].mxu1  ;;  %v10904_v26 = vmul.f32 %v10859_v45, %v10775_v48  ;;  %v10761_v14 = vadd.f32 1.0, %v15374_v63  ;;  %15383 = verf.f32 %v10734_v0  ;;  %v20326_v18 = vadd.f32 %v10693_v36, %v20003_v25  ;;  %v10695_v28 = vpop.f32.mrb[205].mxu0 }
0x13ba   :  { %v20328_v16 = vpop.f32.mrb[219].mxu1  ;;  %v10776_v29 = vmul.f32 %v10760_v17, %v10712_v44  ;;  %15385 = verf.f32 %v10735_v39  ;;  %v20333_v60 = vadd.f32 %v10695_v28, %v20011_v15  ;;  %v10877_v39 = vadd.f32 %v20302_v40, %v20068_v6 }
0x13bb   :  { %v15376_v47 = vpop.eup %15375  ;;  %v10777_v27 = vmul.f32 %v10761_v14, %v10713_v50  ;;  %v10736_v58 = vmul.f32 0.70710677, %v20326_v18  ;;  %10983 = vmatprep.mubr.f32.mxu0 %v10904_v26 }
0x13bc   :  { %v15378_v7 = vpop.eup %15377  ;;  %v10905_v52 = vmul.f32 %v10863_v20, %v10776_v29  ;;  %v10762_v61 = vadd.f32 1.0, %v15376_v47  ;;  %v10737_v24 = vmul.f32 0.70710677, %v20333_v60  ;;  %v10699_v9 = vpop.f32.mrb[206].mxu0  ;;  %10984 = vmatmul.mubr.f32.vlgmr.msra.gmra.mrb[210].mxu0 %v10903_v43  ;;  %v10875_v43 = vadd.f32 %v20297_v10, %v20061_v31 }
0x13bd   :  { %v20339_v54 = vpop.f32.mrb[220].mxu1  ;;  %v10906_v49 = vmul.f32 %v10865_v22, %v10777_v27  ;;  %v10763_v51 = vadd.f32 1.0, %v15378_v7  ;;  %15387 = verf.f32 %v10736_v58  ;;  %v20342_v35 = vadd.f32 %v10699_v9, %v20003_v25  ;;  %v10701_v8 = vpop.f32.mrb[207].mxu0 }
0x13be   :  { %v20344_v2 = vpop.f32.mrb[221].mxu1  ;;  %v10778_v55 = vmul.f32 %v10762_v61, %v10714_v3  ;;  %15389 = verf.f32 %v10737_v24  ;;  %v20349_v34 = vadd.f32 %v10701_v8, %v20011_v15  ;;  %v10719_v10 = vmul.f32 0.5, %v20318_v56 }
0x13bf   :  { %v15380_v32 = vpop.eup %15379  ;;  %v10779_v1 = vmul.f32 %v10763_v51, %v10715_v30  ;;  %v10738_v59 = vmul.f32 0.70710677, %v20342_v35  ;;  %10988 = vmatprep.mubr.f32.mxu0 %v10906_v49  ;;  %v10881_v27 = vadd.f32 %v20309_v21, %v20061_v31  ;;  %v10883_v3 = vadd.f32 %v20314_v57, %v20068_v6 }
0x13c0   :  { %v15382_v12 = vpop.eup %15381  ;;  %v10907_v13 = vmul.f32 %v10869_v4, %v10778_v55  ;;  %v10764_v19 = vadd.f32 1.0, %v15380_v32  ;;  %v10739_v33 = vmul.f32 0.70710677, %v20349_v34  ;;  %v10705_v62 = vpop.f32.mrb[208].mxu0  ;;  %10989 = vmatmul.mubr.f32.gmra.mrb[212].mxu0 %v10905_v52  ;;  %v10720_v7 = vmul.f32 0.5, %v20326_v18 }
0x13c1   :  { %v20357_v48 = vpop.f32.mrb[222].mxu1  ;;  %v10908_v45 = vmul.f32 %v10871_v46, %v10779_v1  ;;  %v10765_v44 = vadd.f32 1.0, %v15382_v12  ;;  %15391 = verf.f32 %v10738_v59  ;;  %v10706_v42 = vadd.f32 %v10705_v62, %v20003_v25  ;;  %v10707_v5 = vpop.f32.mrb[209].mxu0 }
0x13c2   :  { %v20360_v0 = vpop.f32.mrb[223].mxu1  ;;  %v10780_v63 = vmul.f32 %v10764_v19, %v10716_v37  ;;  %15393 = verf.f32 %v10739_v33  ;;  %v10708_v38 = vadd.f32 %v10707_v5, %v20011_v15  ;;  %v10718_v25 = vmul.f32 0.5, %v20312_v53 }
0x13c3   :  { %v15384_v17 = vpop.eup %15383  ;;  %v10781_v50 = vmul.f32 %v10765_v44, %v10717_v23  ;;  %v10740_v36 = vmul.f32 0.70710677, %v10706_v42  ;;  %10993 = vmatprep.mubr.f32.mxu0 %v10908_v45  ;;  %v10721_v61 = vmul.f32 0.5, %v20333_v60  ;;  %v10887_v21 = vadd.f32 %v20323_v11, %v20061_v31 }
0x13c4   :  { %v15386_v26 = vpop.eup %15385  ;;  %v10909_v14 = vmul.f32 %v10875_v43, %v10780_v63  ;;  %v10766_v28 = vadd.f32 1.0, %v15384_v17  ;;  %v10741_v29 = vmul.f32 0.70710677, %v10708_v38  ;;  %10994 = vmatmul.mubr.f32.gmra.mrb[214].mxu0 %v10907_v13  ;;  %v10889_v57 = vadd.f32 %v20328_v16, %v20068_v6 }
0x13c5   :  { %v10910_v20 = vmul.f32 %v10877_v39, %v10781_v50  ;;  %v10767_v47 = vadd.f32 1.0, %v15386_v26  ;;  %15395 = verf.f32 %v10740_v36  ;;  %v10722_v18 = vmul.f32 0.5, %v20342_v35  ;;  %v11262_v50 = vld [vmem:[%s20531_s0 + $0x18] sm:$0xff]  ;;  %v11261_v26 = vld [vmem:[%s20531_s0 + $0x10] sm:$0xff] }
0x13c6   :  { %v10782_v15 = vmul.f32 %v10766_v28, %v10718_v25  ;;  %15397 = verf.f32 %v10741_v29  ;;  %v10723_v60 = vmul.f32 0.5, %v20349_v34  ;;  %v10893_v11 = vadd.f32 %v20339_v54, %v20061_v31 }
0x13c7   :  { %v15388_v40 = vpop.eup %15387  ;;  %v10783_v22 = vmul.f32 %v10767_v47, %v10719_v10  ;;  %10998 = vmatprep.mubr.f32.mxu0 %v10910_v20  ;;  %v10895_v16 = vadd.f32 %v20344_v2, %v20068_v6  ;;  %v10724_v13 = vmul.f32 0.5, %v10706_v42  ;;  %v10725_v23 = vmul.f32 0.5, %v10708_v38  ;;  %v20392_v42 = vld [vmem:[%s20532_s5 + $0x24] ss:$0 sm:$0xff]  ;;  %v11264_v20 = vld [vmem:[%s20531_s0 + $0x28] sm:$0xff] }
0x13c8   :  { %v15390_v53 = vpop.eup %15389  ;;  %v10911_v58 = vmul.f32 %v10881_v27, %v10782_v15  ;;  %v10768_v52 = vadd.f32 1.0, %v15388_v40  ;;  %10999 = vmatmul.mubr.f32.gmra.mrb[216].mxu0 %v10909_v14  ;;  %v10899_v62 = vadd.f32 %v20357_v48, %v20061_v31  ;;  %v10901_v54 = vadd.f32 %v20360_v0, %v20068_v6  ;;  %v11260_v31 = vld [vmem:[%s20531_s0 + $0x8] sm:$0xff]  ;;  %v11259_v6 = vld [vmem:[%s20531_s0] sm:$0xff] }
0x13c9   :  { %v10912_v56 = vmul.f32 %v10883_v3, %v10783_v22  ;;  %v10769_v30 = vadd.f32 1.0, %v15390_v53  ;;  %v11263_v15 = vld [vmem:[%s20531_s0 + $0x20] sm:$0xff]  ;;  %v11266_v53 = vld [vmem:[%s20531_s0 + $0x38] sm:$0xff] }
0x13ca   :  { %v10784_v24 = vmul.f32 %v10768_v52, %v10720_v7  ;;  %v11265_v52 = vld [vmem:[%s20531_s0 + $0x30] sm:$0xff] }
0x13cb   :  { %v15392_v9 = vpop.eup %15391  ;;  %v10785_v49 = vmul.f32 %v10769_v30, %v10721_v61  ;;  %11003 = vmatprep.mubr.f32.mxu0 %v10912_v56 }
0x13cc   :  { %v15394_v51 = vpop.eup %15393  ;;  %v10913_v8 = vmul.f32 %v10887_v21, %v10784_v24  ;;  %v10770_v55 = vadd.f32 1.0, %v15392_v9  ;;  %11004 = vmatmul.mubr.f32.gmra.mrb[218].mxu0 %v10911_v58 }
0x13cd   :  { %v10914_v4 = vmul.f32 %v10889_v57, %v10785_v49  ;;  %v10771_v32 = vadd.f32 1.0, %v15394_v51  ;;  %v20932_v49 = vld [vmem:[#allocation45_spill] sm:$0xff] }
0x13ce   :  { %v10786_v1 = vmul.f32 %v10770_v55, %v10722_v18 }
0x13cf   :  { %v15396_v46 = vpop.eup %15395  ;;  %v10787_v37 = vmul.f32 %v10771_v32, %v10723_v60  ;;  %11008 = vmatprep.mubr.f32.mxu0 %v10914_v4  ;;  %v20933_v4 = vld [vmem:[#allocation47_spill] sm:$0xff] }
0x13d0   :  { %v15398_v59 = vpop.eup %15397  ;;  %v10915_v12 = vmul.f32 %v10893_v11, %v10786_v1  ;;  %v10772_v35 = vadd.f32 1.0, %v15396_v46  ;;  %11009 = vmatmul.mubr.f32.gmra.mrb[220].mxu0 %v10913_v8 }
0x13d1   :  { %v10916_v19 = vmul.f32 %v10895_v16, %v10787_v37  ;;  %v10773_v33 = vadd.f32 1.0, %v15398_v59  ;;  %v20934_v37 = vld [vmem:[#allocation46_spill] sm:$0xff] }
0x13d2   :  { %v10788_v34 = vmul.f32 %v10772_v35, %v10724_v13 }
0x13d3   :  { %v10789_v45 = vmul.f32 %v10773_v33, %v10725_v23  ;;  %11013 = vmatprep.mubr.f32.mxu0 %v10916_v19  ;;  %v20935_v19 = vld [vmem:[#allocation50_spill] sm:$0xff] }
0x13d4   :  { %v10917_v44 = vmul.f32 %v10899_v62, %v10788_v34  ;;  %11014 = vmatmul.mubr.f32.gmra.mrb[222].mxu0 %v10915_v12 }
0x13d5   :  { %v10918_v2 = vmul.f32 %v10901_v54, %v10789_v45  ;;  %v20936_v54 = vld [vmem:[#allocation21_spill] sm:$0xff] }
0x13d7   :  { %11018 = vmatprep.mubr.f32.mxu0 %v10918_v2 }
0x13d8   :  { %11019 = vmatmul.mubr.f32.gmra.mrb[224].mxu0 %v10917_v44 }
0x13fe   :  { %v13696_v5 = vpop.f32.mrb[224].mxu1 }
0x13ff   :  { %v11186_v48 = vadd.f32 %v13696_v5, %v20392_v42  ;;  %v11180_v63 = vpop.f32.mrb[225].mxu1 }
0x1400   :  { %v11181_v0 = vadd.f32 %v11180_v63, %v20392_v42  ;;  %v20937_v63 = vld [vmem:[#allocation25_spill] sm:$0xff] }
0x1401   :  { %v11276_v43 = vadd.f32 %v11260_v31, %v11186_v48 }
0x1402   :  { %v11275_v38 = vadd.f32 %v11259_v6, %v11181_v0 }
0x1403   :  { %11292 = vst [vmem:[%s20536_s6 + $0x8] sm:$0xff] %v11276_v43 }
0x1404   :  { %11291 = vst [vmem:[%s20536_s6] sm:$0xff] %v11275_v38 }
0x1406   :  { %v13699_v17 = vpop.f32.mrb[226].mxu1 }
0x1407   :  { %v11196_v39 = vadd.f32 %v13699_v17, %v20392_v42  ;;  %v11190_v36 = vpop.f32.mrb[227].mxu1 }
0x1408   :  { %v11191_v14 = vadd.f32 %v11190_v36, %v20392_v42 }
0x1409   :  { %v11278_v25 = vadd.f32 %v11262_v50, %v11196_v39  ;;  %v20938_v50 = vld [vmem:[#allocation34_spill] sm:$0xff] }
0x140a   :  { %v11277_v28 = vadd.f32 %v11261_v26, %v11191_v14 }
0x140b   :  { %11294 = vst [vmem:[%s20536_s6 + $0x18] sm:$0xff] %v11278_v25 }
0x140c   :  { %11293 = vst [vmem:[%s20536_s6 + $0x10] sm:$0xff] %v11277_v28  ;;  %v20939_v28 = vld [vmem:[#allocation20_spill] sm:$0xff] }
0x140e   :  { %v13702_v29 = vpop.f32.mrb[228].mxu1 }
0x140f   :  { %v11206_v10 = vadd.f32 %v13702_v29, %v20392_v42  ;;  %v11200_v47 = vpop.f32.mrb[229].mxu1 }
0x1410   :  { %v11201_v27 = vadd.f32 %v11200_v47, %v20392_v42  ;;  %v11268_v47 = vld [vmem:[%s20531_s0 + $0x48] sm:$0xff] }
0x1411   :  { %v11280_v40 = vadd.f32 %v11264_v20, %v11206_v10 }
0x1412   :  { %v11279_v22 = vadd.f32 %v11263_v15, %v11201_v27 }
0x1413   :  { %11296 = vst [vmem:[%s20536_s6 + $0x28] sm:$0xff] %v11280_v40  ;;  %v11267_v40 = vld [vmem:[%s20531_s0 + $0x40] sm:$0xff] }
0x1414   :  { %11295 = vst [vmem:[%s20536_s6 + $0x20] sm:$0xff] %v11279_v22 }
0x1416   :  { %v13705_v3 = vpop.f32.mrb[230].mxu1 }
0x1417   :  { %v11216_v58 = vadd.f32 %v13705_v3, %v20392_v42  ;;  %v11210_v7 = vpop.f32.mrb[231].mxu1 }
0x1418   :  { %v11211_v56 = vadd.f32 %v11210_v7, %v20392_v42 }
0x1419   :  { %v11282_v61 = vadd.f32 %v11266_v53, %v11216_v58  ;;  %v11270_v58 = vld [vmem:[%s20531_s0 + $0x58] sm:$0xff] }
0x141a   :  { %v11281_v30 = vadd.f32 %v11265_v52, %v11211_v56  ;;  %v11269_v56 = vld [vmem:[%s20531_s0 + $0x50] sm:$0xff] }
0x141b   :  { %11298 = vst [vmem:[%s20536_s6 + $0x38] sm:$0xff] %v11282_v61 }
0x141c   :  { %11297 = vst [vmem:[%s20536_s6 + $0x30] sm:$0xff] %v11281_v30 }
0x148f   :  { %v12571_v24 = vpop.f32.mrb[210].mxu0 }
0x1490   :  { %v12572_v21 = vpop.f32.mrb[211].mxu0 }
0x1491   :  { %v12573_v9 = vadd.f32 %v12572_v21, %v12571_v24 }
0x1493   :  { %v11032_v57 = vadd.f32 %v12573_v9, %v20932_v49  ;;  %v12574_v51 = vpop.f32.mrb[212].mxu0  ;;  %v11272_v9 = vld [vmem:[%s20531_s0 + $0x68] sm:$0xff] }
0x1494   :  { %v12575_v8 = vpop.f32.mrb[213].mxu0 }
0x1495   :  { %v11049_v18 = vadd.f32 %v20257_v41, %v11032_v57  ;;  %v12576_v55 = vadd.f32 %v12575_v8, %v12574_v51  ;;  %v11271_v51 = vld [vmem:[%s20531_s0 + $0x60] sm:$0xff] }
0x1497   :  { %v11033_v60 = vadd.f32 %v12576_v55, %v20933_v4  ;;  %v12577_v32 = vpop.f32.mrb[214].mxu0  ;;  %13706 = vmatprep.mubr.msk.f32.mxu1 %vm346_vm0, %v11049_v18 }
0x1498   :  { %v12578_v1 = vpop.f32.mrb[215].mxu0 }
0x1499   :  { %v11050_v11 = vadd.f32 %v20257_v41, %v11033_v60  ;;  %v12579_v46 = vadd.f32 %v12578_v1, %v12577_v32  ;;  %v11274_v60 = vld [vmem:[%s20531_s0 + $0x78] sm:$0xff] }
0x149b   :  { %v11034_v16 = vadd.f32 %v12579_v46, %v20934_v37  ;;  %v12580_v59 = vpop.f32.mrb[216].mxu0  ;;  %13707 = vmatmul.mubr.msk.f32.gmra.mrb[232].mxu1 %vm346_vm0, %v11050_v11  ;;  %v11273_v11 = vld [vmem:[%s20531_s0 + $0x70] sm:$0xff] }
0x149c   :  { %v12581_v12 = vpop.f32.mrb[217].mxu0 }
0x149d   :  { %v11051_v13 = vadd.f32 %v20257_v41, %v11034_v16  ;;  %v12582_v35 = vadd.f32 %v12581_v12, %v12580_v59 }
0x149f   :  { %v11035_v23 = vadd.f32 %v12582_v35, %v20935_v19  ;;  %v12583_v33 = vpop.f32.mrb[218].mxu0  ;;  %13709 = vmatprep.mubr.msk.f32.mxu1 %vm346_vm0, %v11051_v13 }
0x14a0   :  { %v12584_v34 = vpop.f32.mrb[219].mxu0 }
0x14a1   :  { %v11052_v62 = vadd.f32 %v20257_v41, %v11035_v23  ;;  %v12585_v45 = vadd.f32 %v12584_v34, %v12583_v33 }
0x14a3   :  { %v11036_v44 = vadd.f32 %v12585_v45, %v20936_v54  ;;  %v12586_v2 = vpop.f32.mrb[220].mxu0  ;;  %13710 = vmatmul.mubr.msk.f32.gmra.mrb[234].mxu1 %vm346_vm0, %v11052_v62 }
0x14a4   :  { %v12587_v5 = vpop.f32.mrb[221].mxu0 }
0x14a5   :  { %v11053_v31 = vadd.f32 %v20257_v41, %v11036_v44  ;;  %v12588_v48 = vadd.f32 %v12587_v5, %v12586_v2 }
0x14a7   :  { %v11037_v6 = vadd.f32 %v12588_v48, %v20937_v63  ;;  %v12589_v0 = vpop.f32.mrb[222].mxu0  ;;  %13712 = vmatprep.mubr.msk.f32.mxu1 %vm346_vm0, %v11053_v31 }
0x14a8   :  { %v12590_v43 = vpop.f32.mrb[223].mxu0 }
0x14a9   :  { %v11054_v38 = vadd.f32 %v20257_v41, %v11037_v6  ;;  %v12591_v17 = vadd.f32 %v12590_v43, %v12589_v0 }
0x14ab   :  { %v11038_v39 = vadd.f32 %v12591_v17, %v20938_v50  ;;  %v12592_v36 = vpop.f32.mrb[224].mxu0  ;;  %13713 = vmatmul.mubr.msk.f32.gmra.mrb[236].mxu1 %vm346_vm0, %v11054_v38 }
0x14ac   :  { %v12593_v26 = vpop.f32.mrb[225].mxu0 }
0x14ad   :  { %v11055_v14 = vadd.f32 %v20257_v41, %v11038_v39  ;;  %v12594_v25 = vadd.f32 %v12593_v26, %v12592_v36 }
0x14af   :  { %v11039_v29 = vadd.f32 %v12594_v25, %v20939_v28  ;;  %13715 = vmatprep.mubr.msk.f32.mxu1 %vm346_vm0, %v11055_v14 }
0x14b1   :  { %v11056_v20 = vadd.f32 %v20257_v41, %v11039_v29 }
0x14b3   :  { %13716 = vmatmul.mubr.msk.f32.gmra.mrb[238].mxu1 %vm346_vm0, %v11056_v20 }
0x156e   :  { %v13708_v10 = vpop.f32.mrb[232].mxu1 }
0x156f   :  { %v11226_v15 = vadd.f32 %v13708_v10, %v20392_v42  ;;  %v11220_v27 = vpop.f32.mrb[233].mxu1 }
0x1570   :  { %v11221_v22 = vadd.f32 %v11220_v27, %v20392_v42 }
0x1571   :  { %v11284_v3 = vadd.f32 %v11268_v47, %v11226_v15 }
0x1572   :  { %v11283_v53 = vadd.f32 %v11267_v40, %v11221_v22 }
0x1573   :  { %11300 = vst [vmem:[%s20536_s6 + $0x48] sm:$0xff] %v11284_v3 }
0x1574   :  { %11299 = vst [vmem:[%s20536_s6 + $0x40] sm:$0xff] %v11283_v53 }
0x1576   :  { %v13711_v41 = vpop.f32.mrb[234].mxu1 }
0x1577   :  { %v11236_v7 = vadd.f32 %v13711_v41, %v20392_v42  ;;  %v11230_v52 = vpop.f32.mrb[235].mxu1 }
0x1578   :  { %v11231_v61 = vadd.f32 %v11230_v52, %v20392_v42 }
0x1579   :  { %v11286_v30 = vadd.f32 %v11270_v58, %v11236_v7 }
0x157a   :  { %v11285_v24 = vadd.f32 %v11269_v56, %v11231_v61 }
0x157b   :  { %11302 = vst [vmem:[%s20536_s6 + $0x58] sm:$0xff] %v11286_v30 }
0x157c   :  { %11301 = vst [vmem:[%s20536_s6 + $0x50] sm:$0xff] %v11285_v24 }
0x157e   :  { %v13714_v21 = vpop.f32.mrb[236].mxu1 }
0x157f   :  { %v11246_v49 = vadd.f32 %v13714_v21, %v20392_v42  ;;  %v11240_v57 = vpop.f32.mrb[237].mxu1 }
0x1580   :  { %v11241_v8 = vadd.f32 %v11240_v57, %v20392_v42 }
0x1581   :  { %v11288_v18 = vadd.f32 %v11272_v9, %v11246_v49 }
0x1582   :  { %v11287_v55 = vadd.f32 %v11271_v51, %v11241_v8 }
0x1583   :  { %11304 = vst [vmem:[%s20536_s6 + $0x68] sm:$0xff] %v11288_v18 }
0x1584   :  { %11303 = vst [vmem:[%s20536_s6 + $0x60] sm:$0xff] %v11287_v55 }
0x1586   :  { %v13717_v4 = vpop.f32.mrb[238].mxu1 }
0x1587   :  { %v11256_v32 = vadd.f32 %v13717_v4, %v20392_v42  ;;  %v11250_v1 = vpop.f32.mrb[239].mxu1 }
0x1588   :  { %v11251_v46 = vadd.f32 %v11250_v1, %v20392_v42 }
0x1589   :  { %v11290_v37 = vadd.f32 %v11274_v60, %v11256_v32 }
0x158a   :  { %v11289_v16 = vadd.f32 %v11273_v11, %v11251_v46 }
0x158b   :  { %11306 = vst [vmem:[%s20536_s6 + $0x78] sm:$0xff] %v11290_v37 }
0x158c   :  { %11305 = vst [vmem:[%s20536_s6 + $0x70] sm:$0xff] %v11289_v16 }

</bundles_post_ra>
